<compile_context>
chip_gen: v7x
topology: tpu7x:2x2x1
jax: 0.10.0
libtpu: 0.0.40
codegen_flags: <defaults>
</compile_context>

<pallas_src>
import math

import jax
import jax.numpy as jnp
import numpy as np
from jax import lax
from jax.experimental import pallas as pl
from jax.experimental.pallas import tpu as pltpu

# ----------------------------- hyper-parameters ------------------------------
D_EMB = 11                    # forced by x[:, 25:].view(B, 5, 11)
N_HEAD = 1                    # 11 is prime -> nn.MultiheadAttention needs 1 head
DIM_FF = 32
N_LAYERS = 2
NUM_CLASSES = 4
SEQ = 5
IN_FEATS = 25 + SEQ * D_EMB   # 80
IN_PAD = 128                  # lane-dense input block
OUT_PAD = 128                 # lane-dense output block (first 4 lanes = logits)
LN_EPS = 1e-5
SD = SEQ * D_EMB              # 55
SS = SEQ * SEQ                # 25  (query token, key token) score lanes
E_BIG = SEQ * SEQ * D_EMB     # 275 : (query, key, dim) expansion
E_PAD = 384                   # 275 padded to a 128-lane multiple
SLAB_W = 3 * E_PAD            # 1152 : width of the fused QKV weight block
ROW_ALIGN = 16                # bf16 sublane tile height


def _round_up(n, m):
    return ((n + m - 1) // m) * m


# ------------------------------ shared math ----------------------------------
def _elu(v):
    # ELU(alpha=1); clamp before exp so the untaken branch never overflows.
    return jnp.where(v > 0, v, jnp.exp(jnp.minimum(v, 0.0)) - 1.0)


def _row_ln(v, w, b):
    mu = jnp.mean(v, axis=-1, keepdims=True)
    c = v - mu
    var = jnp.mean(c * c, axis=-1, keepdims=True)
    return c * lax.rsqrt(var + LN_EPS) * w + b


# --------------------------- plain-JAX reference -----------------------------
def forward_reference(x, params):
    """Straightforward f32 JAX implementation of the PyTorch module (eval)."""
    scale = 1.0 / math.sqrt(D_EMB // N_HEAD)
    h = x[:, 25:].reshape(x.shape[0], SEQ, D_EMB)
    idx = 0
    for _ in range(N_LAYERS):
        (wq, bq, wk, bk, wv, bv, wo, bo,
         w1, b1, w2, b2, ln1w, ln1b, ln2w, ln2b) = params[idx:idx + 16]
        idx += 16
        q = h @ wq + bq
        k = h @ wk + bk
        v = h @ wv + bv
        s = jnp.einsum("bsd,btd->bst", q, k) * scale
        p = jax.nn.softmax(s, axis=-1)
        ctx = jnp.einsum("bst,btd->bsd", p, v)
        attn = ctx @ wo + bo
        y = _row_ln(h + attn, ln1w, ln1b)               # post-norm over d=11
        ff = jnp.maximum(y @ w1 + b1, 0.0) @ w2 + b2    # relu FFN, eval dropout
        h = _row_ln(y + ff, ln2w, ln2b)
    (n1w, n1b, fc1w, fc1b, n2w, n2b, fc2w, fc2b,
     n3w, n3b, fc3w, fc3b) = params[idx:idx + 12]
    flat = h.reshape(h.shape[0], SEQ * D_EMB)
    x1 = _row_ln(x[:, 25:] + flat, n1w, n1b)
    x1 = _elu(x1 @ fc1w + fc1b)
    x2 = _row_ln(jnp.concatenate([x1, x[:, 6:25]], axis=1), n2w, n2b)
    x2 = _elu(x2 @ fc2w + fc2b)
    x3 = _row_ln(jnp.concatenate([x2, x[:, 0:6]], axis=1), n3w, n3b)
    return x3 @ fc3w + fc3b


# --------------------------- host-side param packing -------------------------
class _SlabPacker:
    """Bin-packs many small arrays into one (rows, SLAB_W) slab.

    Entries are shelf-packed over 128-lane column slots: every entry starts at
    a 16-aligned sublane offset and a 128-aligned lane offset, so the kernel
    reads it back as a clean, vreg-aligned static slice of one resident ref."""

    def __init__(self, width):
        assert width % 128 == 0
        self.width = width
        self.nslots = width // 128
        self.slot_rows = [0] * self.nslots
        self.entries = {}

    def add(self, name, arr):
        arr = np.asarray(arr, np.float32)
        if arr.ndim == 1:
            arr = arr[None, :]
        r, c = arr.shape
        ns = -(-c // 128)                       # 128-lane slots needed
        assert ns <= self.nslots, (name, arr.shape)
        rp = _round_up(r, ROW_ALIGN)
        best_s, best_row = 0, None
        for s in range(self.nslots - ns + 1):   # min-max-row consecutive window
            row = max(self.slot_rows[s:s + ns])
            if best_row is None or row < best_row:
                best_s, best_row = s, row
        row_off = _round_up(best_row, ROW_ALIGN)
        for s in range(best_s, best_s + ns):
            self.slot_rows[s] = row_off + rp
        self.entries[name] = (row_off, best_s * 128, r, c, arr)

    def finish(self, dtype=jnp.bfloat16):
        rows = _round_up(max(self.slot_rows), ROW_ALIGN)
        slab = np.zeros((rows, self.width), np.float32)
        meta = {}
        for name, (ro, lo, r, c, arr) in self.entries.items():
            slab[ro:ro + r, lo:lo + c] = arr
            meta[name] = (ro, lo, r, c)
        return jnp.asarray(slab, dtype=dtype), meta


def _block_diag(w, n):
    r, c = w.shape
    out = np.zeros((n * r, n * c), np.float32)
    for s in range(n):
        out[s * r:(s + 1) * r, s * c:(s + 1) * c] = w
    return out


def _attention_constants():
    """0/1 expansion / reduction matrices for the fused attention.

    Big-index convention: e = 55*s + 11*t + d  (s = query token, t = key token,
    d = embedding dim); score index = 5*s + t.  All exact in bf16."""
    S, D = SEQ, D_EMB
    A = np.zeros((SD, E_BIG), np.float32)    # expand Q:  (11s+d) -> e
    Bm = np.zeros((SD, E_BIG), np.float32)   # expand K:  (11t+d) -> e
    Ev = np.zeros((SD, E_BIG), np.float32)   # expand V:  (11t+d) -> e
    R = np.zeros((E_BIG, SS), np.float32)    # reduce over d -> scores
    Ep = np.zeros((SS, E_BIG), np.float32)   # expand probs -> e
    Rc = np.zeros((E_BIG, SD), np.float32)   # reduce over t -> context
    for s in range(S):
        for t in range(S):
            for d in range(D):
                e = SD * s + D * t + d
                A[D * s + d, e] = 1.0
                Bm[D * t + d, e] = 1.0
                Ev[D * t + d, e] = 1.0
                R[e, S * s + t] = 1.0
                Ep[S * s + t, e] = 1.0
                Rc[e, D * s + d] = 1.0
    return A, Bm, Ev, R, Ep, Rc


def pack_params(params):
    """Fold / fuse the logical parameters into a single packed bf16 slab."""
    A, Bm, Ev, R, Ep, Rc = _attention_constants()
    scale = 1.0 / math.sqrt(D_EMB // N_HEAD)
    p = [np.asarray(a, np.float32) for a in params]
    layers = [p[16 * l:16 * (l + 1)] for l in range(N_LAYERS)]
    pk = _SlabPacker(SLAB_W)

    # 1) full-width fused QKV blocks first (they level all column slots).
    for l, (wq, bq, wk, bk, wv, bv, *_rest) in enumerate(layers):
        wqkv = np.zeros((SD, SLAB_W), np.float32)
        bqkv = np.zeros((1, SLAB_W), np.float32)
        # 1/sqrt(head_dim) folded into the Q projection (no in-kernel scale).
        wqkv[:, 0:E_BIG] = scale * (_block_diag(wq, SEQ) @ A)
        bqkv[0, 0:E_BIG] = scale * (np.tile(bq.reshape(-1), SEQ) @ A)
        wqkv[:, E_PAD:E_PAD + E_BIG] = _block_diag(wk, SEQ) @ Bm
        bqkv[0, E_PAD:E_PAD + E_BIG] = np.tile(bk.reshape(-1), SEQ) @ Bm
        wqkv[:, 2 * E_PAD:2 * E_PAD + E_BIG] = _block_diag(wv, SEQ) @ Ev
        bqkv[0, 2 * E_PAD:2 * E_PAD + E_BIG] = np.tile(bv.reshape(-1), SEQ) @ Ev
        pk.add(f"wqkv{l}", wqkv)
        pk.add(f"bqkv{l}", bqkv)

    # 2) 0/1 expand/reduce constants (exact in bf16).
    pk.add("R", R)
    pk.add("Ep", Ep)
    pk.add("Rc", Rc)

    # 3) remaining (narrow) per-layer weights, fused across tokens.
    for l, (wq, bq, wk, bk, wv, bv, wo, bo,
            w1, b1, w2, b2, ln1w, ln1b, ln2w, ln2b) in enumerate(layers):
        # TODO(synk): on v5e at large batch, fold wo into a per-layer Rc@wo_bd
        # to drop one matmul/layer once the slab DMA is fully hidden.
        pk.add(f"wo{l}", _block_diag(wo, SEQ))
        pk.add(f"bo{l}", np.tile(bo.reshape(-1), SEQ))
        pk.add(f"w1{l}", _block_diag(w1, SEQ))
        pk.add(f"b1{l}", np.tile(b1.reshape(-1), SEQ))
        pk.add(f"w2{l}", _block_diag(w2, SEQ))
        pk.add(f"b2{l}", np.tile(b2.reshape(-1), SEQ))
        pk.add(f"ln1w{l}", np.tile(ln1w.reshape(-1), SEQ))
        pk.add(f"ln1b{l}", np.tile(ln1b.reshape(-1), SEQ))
        pk.add(f"ln2w{l}", np.tile(ln2w.reshape(-1), SEQ))
        pk.add(f"ln2b{l}", np.tile(ln2b.reshape(-1), SEQ))

    # 4) MLP head; fc3 padded to a lane-dense 128-wide output block.
    (n1w, n1b, fc1w, fc1b, n2w, n2b,
     fc2w, fc2b, n3w, n3b, fc3w, fc3b) = p[16 * N_LAYERS:16 * N_LAYERS + 12]
    fc3w_pad = np.zeros((fc3w.shape[0], OUT_PAD), np.float32)
    fc3w_pad[:, :NUM_CLASSES] = fc3w
    fc3b_pad = np.zeros((1, OUT_PAD), np.float32)
    fc3b_pad[0, :NUM_CLASSES] = fc3b.reshape(-1)
    for name, arr in (("n1w", n1w), ("n1b", n1b), ("fc1w", fc1w), ("fc1b", fc1b),
                      ("n2w", n2w), ("n2b", n2b), ("fc2w", fc2w), ("fc2b", fc2b),
                      ("n3w", n3w), ("n3b", n3b),
                      ("fc3w", fc3w_pad), ("fc3b", fc3b_pad)):
        pk.add(name, arr)
    return pk.finish(jnp.bfloat16)


# ------------------------------ Pallas kernel --------------------------------
def _make_kernel(meta):
    def getp(ref, name):
        ro, lo, r, c = meta[name]
        return ref[ro:ro + r, lo:lo + c]       # static, 16x128-aligned view

    def mm(a, b):
        # bf16 operands on the MXU, f32 accumulation.
        return jnp.dot(a.astype(jnp.bfloat16), b.astype(jnp.bfloat16),
                       preferred_element_type=jnp.float32)

    def group_stat(vals, masks, reduce_fn, fill):
        """Per-lane-group reduce, broadcast back to every lane of the group."""
        out = jnp.zeros_like(vals)
        for mask in masks:
            g = reduce_fn(jnp.where(mask, vals, fill))     # (TB, 1)
            out = jnp.where(mask, g, out)
        return out

    def kernel(x_ref, w_ref, out_ref):
        x = x_ref[...]                                     # (TB, 128) f32
        x_seq = x[:, 25:IN_FEATS]                          # (TB, 55)

        # Static lane-group masks (iota comparisons; nothing DMA'd for these).
        lane25 = lax.broadcasted_iota(jnp.int32, (1, SS), 1)
        masks25 = [(lane25 >= SEQ * g) & (lane25 < SEQ * (g + 1))
                   for g in range(SEQ)]
        lane55 = lax.broadcasted_iota(jnp.int32, (1, SD), 1)
        masks55 = [(lane55 >= D_EMB * g) & (lane55 < D_EMB * (g + 1))
                   for g in range(SEQ)]

        def group_ln(y, w, b):
            # LayerNorm over each 11-wide token group of a (TB,55) tile (f32).
            mu = group_stat(y, masks55,
                            lambda v: jnp.sum(v, -1, keepdims=True) * (1.0 / D_EMB),
                            0.0)
            c = y - mu
            var = group_stat(c * c, masks55,
                             lambda v: jnp.sum(v, -1, keepdims=True) * (1.0 / D_EMB),
                             0.0)
            return c * lax.rsqrt(var + LN_EPS) * w + b

        R, Ep, Rc = getp(w_ref, "R"), getp(w_ref, "Ep"), getp(w_ref, "Rc")

        h = x_seq
        for l in range(N_LAYERS):
            # ---- fused single-head self-attention (one QKV matmul) ----
            qkv = mm(h, getp(w_ref, f"wqkv{l}")) + getp(w_ref, f"bqkv{l}")
            qb = qkv[:, 0:E_BIG]                            # (TB,275)
            kb = qkv[:, E_PAD:E_PAD + E_BIG]                # (TB,275)
            vb = qkv[:, 2 * E_PAD:2 * E_PAD + E_BIG]        # (TB,275)
            s = mm(qb * kb, R)                              # (TB,25) scores
            # NaN-safe per-query-group softmax, all f32 (denominator >= 1).
            m = group_stat(s, masks25,
                           lambda v: jnp.max(v, -1, keepdims=True), -1e30)
            pexp = jnp.exp(s - m)
            denom = group_stat(pexp, masks25,
                               lambda v: jnp.sum(v, -1, keepdims=True), 0.0)
            pn = pexp * pl.reciprocal(denom, approx=True)
            ctx = mm(mm(pn, Ep) * vb, Rc)                   # (TB,55)
            attn = mm(ctx, getp(w_ref, f"wo{l}")) + getp(w_ref, f"bo{l}")
            # ---- post-norm residual + relu FFN (eval dropout = identity) ----
            y = group_ln(h + attn, getp(w_ref, f"ln1w{l}"), getp(w_ref, f"ln1b{l}"))
            ff = jnp.maximum(mm(y, getp(w_ref, f"w1{l}")) + getp(w_ref, f"b1{l}"), 0.0)
            ff = mm(ff, getp(w_ref, f"w2{l}")) + getp(w_ref, f"b2{l}")
            h = group_ln(y + ff, getp(w_ref, f"ln2w{l}"), getp(w_ref, f"ln2b{l}"))

        # ------------------------------ MLP head ------------------------------
        x1 = _row_ln(x_seq + h, getp(w_ref, "n1w"), getp(w_ref, "n1b"))
        x1 = _elu(mm(x1, getp(w_ref, "fc1w")) + getp(w_ref, "fc1b"))
        x2 = jnp.concatenate([x1, x[:, 6:25]], axis=-1)
        x2 = _row_ln(x2, getp(w_ref, "n2w"), getp(w_ref, "n2b"))
        x2 = _elu(mm(x2, getp(w_ref, "fc2w")) + getp(w_ref, "fc2b"))
        x3 = jnp.concatenate([x2, x[:, 0:6]], axis=-1)
        x3 = _row_ln(x3, getp(w_ref, "n3w"), getp(w_ref, "n3b"))
        # fc3 weight is padded to 128 output lanes -> lane-dense store.
        out_ref[...] = (mm(x3, getp(w_ref, "fc3w"))
                        + getp(w_ref, "fc3b")).astype(out_ref.dtype)

    return kernel


def _build_call(meta, slab_shape, tb, bp, single_buffer_slab):
    slab_kwargs = {"pipeline_mode": pl.Buffered(1)} if single_buffer_slab else {}
    return pl.pallas_call(
        _make_kernel(meta),
        out_shape=jax.ShapeDtypeStruct((bp, OUT_PAD), jnp.float32),
        grid=(bp // tb,),
        in_specs=[
            pl.BlockSpec((tb, IN_PAD), lambda i: (i, 0)),
            # Resident bf16 weight slab: constant index map -> fetched once.
            pl.BlockSpec(slab_shape, lambda i: (0, 0), **slab_kwargs),
        ],
        out_specs=pl.BlockSpec((tb, OUT_PAD), lambda i: (i, 0)),
        compiler_params=pltpu.CompilerParams(
            dimension_semantics=("parallel",),
            vmem_limit_bytes=48 * 1024 * 1024),
    )


def seq_transformer(x, wslab, meta, *, batch_tile=512):
    """Whole forward pass; batch tiled on a 'parallel' grid axis."""
    b = x.shape[0]
    if b <= 8:
        tb = 8
    else:
        # >= 2 grid steps whenever possible so v7x's two TensorCores share work.
        tb = min(batch_tile, _round_up(-(-b // 2), 8))
    bp = _round_up(b, tb)
    xp = jnp.pad(x, ((0, bp - b), (0, IN_PAD - IN_FEATS)))   # lane-dense input
    try:
        out = _build_call(meta, wslab.shape, tb, bp, True)(xp, wslab)
    except Exception:
        # pl.Buffered(1) unsupported on this jax version -> default buffering.
        out = _build_call(meta, wslab.shape, tb, bp, False)(xp, wslab)
    return out[:b, :NUM_CLASSES]


# ------------------------- deterministic parameter init ----------------------
def init_params(key):
    keys = iter(jax.random.split(key, 128))

    def nrm(shape, scale=0.05):
        return scale * jax.random.normal(next(keys), shape, jnp.float32)

    def ln_pair(n):
        return 1.0 + nrm((1, n)), nrm((1, n))

    d, dff = D_EMB, DIM_FF
    params = []
    for _ in range(N_LAYERS):
        ln1w, ln1b = ln_pair(d)
        ln2w, ln2b = ln_pair(d)
        params += [
            nrm((d, d)), nrm((1, d)),        # Wq, bq
            nrm((d, d)), nrm((1, d)),        # Wk, bk
            nrm((d, d)), nrm((1, d)),        # Wv, bv
            nrm((d, d)), nrm((1, d)),        # Wo, bo (out_proj)
            nrm((d, dff)), nrm((1, dff)),    # linear1
            nrm((dff, d)), nrm((1, d)),      # linear2
            ln1w, ln1b, ln2w, ln2b,
        ]
    d55 = SEQ * D_EMB
    f1 = NUM_CLASSES * 5
    d39 = f1 + 19
    f2 = NUM_CLASSES * 3
    d18 = f2 + 6
    n1w, n1b = ln_pair(d55)
    n2w, n2b = ln_pair(d39)
    n3w, n3b = ln_pair(d18)
    params += [
        n1w, n1b, nrm((d55, f1)), nrm((1, f1)),                    # norm1, fc1
        n2w, n2b, nrm((d39, f2)), nrm((1, f2)),                    # norm2, fc2
        n3w, n3b, nrm((d18, NUM_CLASSES)), nrm((1, NUM_CLASSES)),  # norm3, fc3
    ]
    return params


# ----------------------------------- main -------------------------------------
if __name__ == "__main__":
    key = jax.random.PRNGKey(0)
    kx, kp = jax.random.split(key)

    batch = 4
    x = jax.random.normal(kx, (batch, IN_FEATS), jnp.float32)   # (4, 80)
    params = init_params(kp)
    wslab, meta = pack_params(params)

    out = jax.block_until_ready(seq_transformer(x, wslab, meta))
    ref = jax.block_until_ready(forward_reference(x, params))
    # bf16 matmul operands / bf16-stored weights vs. the f32 reference.
    np.testing.assert_allclose(np.asarray(out), np.asarray(ref),
                               rtol=3e-2, atol=3e-2)
    print("KERNEL_OK")
</pallas_src>

<mosaic_0001>
module attributes {stable_mosaic.version = 11 : i64} {
  func.func @kernel(%arg0: i32, %arg1: memref<8x128xf32, #tpu.memory_space<vmem>>, %arg2: memref<448x1152xbf16, #tpu.memory_space<vmem>>, %arg3: memref<8x128xf32, #tpu.memory_space<vmem>>) attributes {dimension_semantics = [#tpu.dimension_semantics<parallel>], iteration_bounds = array<i64: 1>, scalar_prefetch = 0 : i64, scratch_operands = 0 : i64, tpu.core_type = #tpu.core_type<tc>, window_params = [{transform_indices = @transform_0, window_bounds = array<i64: 8, 128>}, {pipeline_mode = #tpu.pipeline_mode<synchronous>, transform_indices = @transform_1, window_bounds = array<i64: 448, 1152>}, {transform_indices = @transform_2, window_bounds = array<i64: 8, 128>}]} {
    %c0 = arith.constant 0 : index
    %c0_0 = arith.constant 0 : index
    %0 = vector.load %arg1[%c0, %c0_0] : memref<8x128xf32, #tpu.memory_space<vmem>>, vector<8x128xf32>
    %1 = vector.extract_strided_slice %0 {offsets = [0, 25], sizes = [8, 55], strides = [1, 1]} : vector<8x128xf32> to vector<8x55xf32>
    %2 = tpu.iota {dimensions = array<i32: 1>} : vector<1x25xi32>
    %c0_i32 = arith.constant 0 : i32
    %3 = vector.broadcast %c0_i32 : i32 to vector<1x25xi32>
    %4 = arith.cmpi sge, %2, %3 : vector<1x25xi32>
    %c5_i32 = arith.constant 5 : i32
    %5 = vector.broadcast %c5_i32 : i32 to vector<1x25xi32>
    %6 = arith.cmpi slt, %2, %5 : vector<1x25xi32>
    %7 = arith.andi %4, %6 : vector<1x25xi1>
    %c5_i32_1 = arith.constant 5 : i32
    %8 = vector.broadcast %c5_i32_1 : i32 to vector<1x25xi32>
    %9 = arith.cmpi sge, %2, %8 : vector<1x25xi32>
    %c10_i32 = arith.constant 10 : i32
    %10 = vector.broadcast %c10_i32 : i32 to vector<1x25xi32>
    %11 = arith.cmpi slt, %2, %10 : vector<1x25xi32>
    %12 = arith.andi %9, %11 : vector<1x25xi1>
    %c10_i32_2 = arith.constant 10 : i32
    %13 = vector.broadcast %c10_i32_2 : i32 to vector<1x25xi32>
    %14 = arith.cmpi sge, %2, %13 : vector<1x25xi32>
    %c15_i32 = arith.constant 15 : i32
    %15 = vector.broadcast %c15_i32 : i32 to vector<1x25xi32>
    %16 = arith.cmpi slt, %2, %15 : vector<1x25xi32>
    %17 = arith.andi %14, %16 : vector<1x25xi1>
    %c15_i32_3 = arith.constant 15 : i32
    %18 = vector.broadcast %c15_i32_3 : i32 to vector<1x25xi32>
    %19 = arith.cmpi sge, %2, %18 : vector<1x25xi32>
    %c20_i32 = arith.constant 20 : i32
    %20 = vector.broadcast %c20_i32 : i32 to vector<1x25xi32>
    %21 = arith.cmpi slt, %2, %20 : vector<1x25xi32>
    %22 = arith.andi %19, %21 : vector<1x25xi1>
    %c20_i32_4 = arith.constant 20 : i32
    %23 = vector.broadcast %c20_i32_4 : i32 to vector<1x25xi32>
    %24 = arith.cmpi sge, %2, %23 : vector<1x25xi32>
    %c25_i32 = arith.constant 25 : i32
    %25 = vector.broadcast %c25_i32 : i32 to vector<1x25xi32>
    %26 = arith.cmpi slt, %2, %25 : vector<1x25xi32>
    %27 = arith.andi %24, %26 : vector<1x25xi1>
    %28 = tpu.iota {dimensions = array<i32: 1>} : vector<1x55xi32>
    %c0_i32_5 = arith.constant 0 : i32
    %29 = vector.broadcast %c0_i32_5 : i32 to vector<1x55xi32>
    %30 = arith.cmpi sge, %28, %29 : vector<1x55xi32>
    %c11_i32 = arith.constant 11 : i32
    %31 = vector.broadcast %c11_i32 : i32 to vector<1x55xi32>
    %32 = arith.cmpi slt, %28, %31 : vector<1x55xi32>
    %33 = arith.andi %30, %32 : vector<1x55xi1>
    %c11_i32_6 = arith.constant 11 : i32
    %34 = vector.broadcast %c11_i32_6 : i32 to vector<1x55xi32>
    %35 = arith.cmpi sge, %28, %34 : vector<1x55xi32>
    %c22_i32 = arith.constant 22 : i32
    %36 = vector.broadcast %c22_i32 : i32 to vector<1x55xi32>
    %37 = arith.cmpi slt, %28, %36 : vector<1x55xi32>
    %38 = arith.andi %35, %37 : vector<1x55xi1>
    %c22_i32_7 = arith.constant 22 : i32
    %39 = vector.broadcast %c22_i32_7 : i32 to vector<1x55xi32>
    %40 = arith.cmpi sge, %28, %39 : vector<1x55xi32>
    %c33_i32 = arith.constant 33 : i32
    %41 = vector.broadcast %c33_i32 : i32 to vector<1x55xi32>
    %42 = arith.cmpi slt, %28, %41 : vector<1x55xi32>
    %43 = arith.andi %40, %42 : vector<1x55xi1>
    %c33_i32_8 = arith.constant 33 : i32
    %44 = vector.broadcast %c33_i32_8 : i32 to vector<1x55xi32>
    %45 = arith.cmpi sge, %28, %44 : vector<1x55xi32>
    %c44_i32 = arith.constant 44 : i32
    %46 = vector.broadcast %c44_i32 : i32 to vector<1x55xi32>
    %47 = arith.cmpi slt, %28, %46 : vector<1x55xi32>
    %48 = arith.andi %45, %47 : vector<1x55xi1>
    %c44_i32_9 = arith.constant 44 : i32
    %49 = vector.broadcast %c44_i32_9 : i32 to vector<1x55xi32>
    %50 = arith.cmpi sge, %28, %49 : vector<1x55xi32>
    %c55_i32 = arith.constant 55 : i32
    %51 = vector.broadcast %c55_i32 : i32 to vector<1x55xi32>
    %52 = arith.cmpi slt, %28, %51 : vector<1x55xi32>
    %53 = arith.andi %50, %52 : vector<1x55xi1>
    %c160 = arith.constant 160 : index
    %c0_10 = arith.constant 0 : index
    %54 = vector.load %arg2[%c160, %c0_10] : memref<448x1152xbf16, #tpu.memory_space<vmem>>, vector<275x25xbf16>
    %c160_11 = arith.constant 160 : index
    %c128 = arith.constant 128 : index
    %55 = vector.load %arg2[%c160_11, %c128] : memref<448x1152xbf16, #tpu.memory_space<vmem>>, vector<25x275xbf16>
    %c160_12 = arith.constant 160 : index
    %c512 = arith.constant 512 : index
    %56 = vector.load %arg2[%c160_12, %c512] : memref<448x1152xbf16, #tpu.memory_space<vmem>>, vector<275x55xbf16>
    %c0_13 = arith.constant 0 : index
    %c0_14 = arith.constant 0 : index
    %57 = vector.load %arg2[%c0_13, %c0_14] : memref<448x1152xbf16, #tpu.memory_space<vmem>>, vector<55x1152xbf16>
    %58 = arith.truncf %1 : vector<8x55xf32> to vector<8x55xbf16>
    %cst = arith.constant dense<0.000000e+00> : vector<8x1152xf32>
    %59 = tpu.matmul %58, %57, %cst {dimension_numbers = #tpu.dot_dimension_numbers<[1], [0], [0], [1], [0, 0, 1, 1], [], []>} : vector<8x55xbf16>, vector<55x1152xbf16>, vector<8x1152xf32> -> vector<8x1152xf32>
    %c64 = arith.constant 64 : index
    %c0_15 = arith.constant 0 : index
    %60 = vector.load %arg2[%c64, %c0_15] : memref<448x1152xbf16, #tpu.memory_space<vmem>>, vector<1x1152xbf16>
    %61 = arith.extf %60 : vector<1x1152xbf16> to vector<1x1152xf32>
    %62 = vector.broadcast %61 : vector<1x1152xf32> to vector<8x1152xf32>
    %63 = arith.addf %59, %62 : vector<8x1152xf32>
    %64 = vector.extract_strided_slice %63 {offsets = [0, 0], sizes = [8, 275], strides = [1, 1]} : vector<8x1152xf32> to vector<8x275xf32>
    %65 = vector.extract_strided_slice %63 {offsets = [0, 384], sizes = [8, 275], strides = [1, 1]} : vector<8x1152xf32> to vector<8x275xf32>
    %66 = vector.extract_strided_slice %63 {offsets = [0, 768], sizes = [8, 275], strides = [1, 1]} : vector<8x1152xf32> to vector<8x275xf32>
    %67 = arith.mulf %64, %65 : vector<8x275xf32>
    %68 = arith.truncf %67 : vector<8x275xf32> to vector<8x275xbf16>
    %cst_16 = arith.constant dense<0.000000e+00> : vector<8x25xf32>
    %69 = tpu.matmul %68, %54, %cst_16 {dimension_numbers = #tpu.dot_dimension_numbers<[1], [0], [0], [1], [0, 0, 1, 1], [], []>} : vector<8x275xbf16>, vector<275x25xbf16>, vector<8x25xf32> -> vector<8x25xf32>
    %cst_17 = arith.constant 0.000000e+00 : f32
    %70 = vector.broadcast %cst_17 : f32 to vector<8x25xf32>
    %cst_18 = arith.constant -1.000000e+30 : f32
    %71 = vector.shape_cast %7 : vector<1x25xi1> to vector<1x25xi1>
    %72 = vector.broadcast %71 : vector<1x25xi1> to vector<8x25xi1>
    %73 = vector.broadcast %cst_18 : f32 to vector<8x25xf32>
    %74 = arith.select %72, %69, %73 : vector<8x25xi1>, vector<8x25xf32>
    %cst_19 = arith.constant dense<0xFF800000> : vector<8xf32>
    %75 = vector.multi_reduction <maximumf>, %74, %cst_19 [1] : vector<8x25xf32> to vector<8xf32>
    %76 = vector.shape_cast %75 : vector<8xf32> to vector<8x1xf32>
    %77 = vector.shape_cast %7 : vector<1x25xi1> to vector<1x25xi1>
    %78 = vector.broadcast %77 : vector<1x25xi1> to vector<8x25xi1>
    %79 = vector.shape_cast %76 : vector<8x1xf32> to vector<8x1xf32>
    %80 = vector.broadcast %79 : vector<8x1xf32> to vector<8x25xf32>
    %81 = arith.select %78, %80, %70 : vector<8x25xi1>, vector<8x25xf32>
    %cst_20 = arith.constant -1.000000e+30 : f32
    %82 = vector.shape_cast %12 : vector<1x25xi1> to vector<1x25xi1>
    %83 = vector.broadcast %82 : vector<1x25xi1> to vector<8x25xi1>
    %84 = vector.broadcast %cst_20 : f32 to vector<8x25xf32>
    %85 = arith.select %83, %69, %84 : vector<8x25xi1>, vector<8x25xf32>
    %cst_21 = arith.constant dense<0xFF800000> : vector<8xf32>
    %86 = vector.multi_reduction <maximumf>, %85, %cst_21 [1] : vector<8x25xf32> to vector<8xf32>
    %87 = vector.shape_cast %86 : vector<8xf32> to vector<8x1xf32>
    %88 = vector.shape_cast %12 : vector<1x25xi1> to vector<1x25xi1>
    %89 = vector.broadcast %88 : vector<1x25xi1> to vector<8x25xi1>
    %90 = vector.shape_cast %87 : vector<8x1xf32> to vector<8x1xf32>
    %91 = vector.broadcast %90 : vector<8x1xf32> to vector<8x25xf32>
    %92 = arith.select %89, %91, %81 : vector<8x25xi1>, vector<8x25xf32>
    %cst_22 = arith.constant -1.000000e+30 : f32
    %93 = vector.shape_cast %17 : vector<1x25xi1> to vector<1x25xi1>
    %94 = vector.broadcast %93 : vector<1x25xi1> to vector<8x25xi1>
    %95 = vector.broadcast %cst_22 : f32 to vector<8x25xf32>
    %96 = arith.select %94, %69, %95 : vector<8x25xi1>, vector<8x25xf32>
    %cst_23 = arith.constant dense<0xFF800000> : vector<8xf32>
    %97 = vector.multi_reduction <maximumf>, %96, %cst_23 [1] : vector<8x25xf32> to vector<8xf32>
    %98 = vector.shape_cast %97 : vector<8xf32> to vector<8x1xf32>
    %99 = vector.shape_cast %17 : vector<1x25xi1> to vector<1x25xi1>
    %100 = vector.broadcast %99 : vector<1x25xi1> to vector<8x25xi1>
    %101 = vector.shape_cast %98 : vector<8x1xf32> to vector<8x1xf32>
    %102 = vector.broadcast %101 : vector<8x1xf32> to vector<8x25xf32>
    %103 = arith.select %100, %102, %92 : vector<8x25xi1>, vector<8x25xf32>
    %cst_24 = arith.constant -1.000000e+30 : f32
    %104 = vector.shape_cast %22 : vector<1x25xi1> to vector<1x25xi1>
    %105 = vector.broadcast %104 : vector<1x25xi1> to vector<8x25xi1>
    %106 = vector.broadcast %cst_24 : f32 to vector<8x25xf32>
    %107 = arith.select %105, %69, %106 : vector<8x25xi1>, vector<8x25xf32>
    %cst_25 = arith.constant dense<0xFF800000> : vector<8xf32>
    %108 = vector.multi_reduction <maximumf>, %107, %cst_25 [1] : vector<8x25xf32> to vector<8xf32>
    %109 = vector.shape_cast %108 : vector<8xf32> to vector<8x1xf32>
    %110 = vector.shape_cast %22 : vector<1x25xi1> to vector<1x25xi1>
    %111 = vector.broadcast %110 : vector<1x25xi1> to vector<8x25xi1>
    %112 = vector.shape_cast %109 : vector<8x1xf32> to vector<8x1xf32>
    %113 = vector.broadcast %112 : vector<8x1xf32> to vector<8x25xf32>
    %114 = arith.select %111, %113, %103 : vector<8x25xi1>, vector<8x25xf32>
    %cst_26 = arith.constant -1.000000e+30 : f32
    %115 = vector.shape_cast %27 : vector<1x25xi1> to vector<1x25xi1>
    %116 = vector.broadcast %115 : vector<1x25xi1> to vector<8x25xi1>
    %117 = vector.broadcast %cst_26 : f32 to vector<8x25xf32>
    %118 = arith.select %116, %69, %117 : vector<8x25xi1>, vector<8x25xf32>
    %cst_27 = arith.constant dense<0xFF800000> : vector<8xf32>
    %119 = vector.multi_reduction <maximumf>, %118, %cst_27 [1] : vector<8x25xf32> to vector<8xf32>
    %120 = vector.shape_cast %119 : vector<8xf32> to vector<8x1xf32>
    %121 = vector.shape_cast %27 : vector<1x25xi1> to vector<1x25xi1>
    %122 = vector.broadcast %121 : vector<1x25xi1> to vector<8x25xi1>
    %123 = vector.shape_cast %120 : vector<8x1xf32> to vector<8x1xf32>
    %124 = vector.broadcast %123 : vector<8x1xf32> to vector<8x25xf32>
    %125 = arith.select %122, %124, %114 : vector<8x25xi1>, vector<8x25xf32>
    %126 = arith.subf %69, %125 : vector<8x25xf32>
    %127 = math.exp %126 : vector<8x25xf32>
    %cst_28 = arith.constant 0.000000e+00 : f32
    %128 = vector.broadcast %cst_28 : f32 to vector<8x25xf32>
    %cst_29 = arith.constant 0.000000e+00 : f32
    %129 = vector.shape_cast %7 : vector<1x25xi1> to vector<1x25xi1>
    %130 = vector.broadcast %129 : vector<1x25xi1> to vector<8x25xi1>
    %131 = vector.broadcast %cst_29 : f32 to vector<8x25xf32>
    %132 = arith.select %130, %127, %131 : vector<8x25xi1>, vector<8x25xf32>
    %cst_30 = arith.constant dense<0.000000e+00> : vector<8xf32>
    %133 = vector.multi_reduction <add>, %132, %cst_30 [1] : vector<8x25xf32> to vector<8xf32>
    %134 = vector.shape_cast %133 : vector<8xf32> to vector<8x1xf32>
    %135 = vector.shape_cast %7 : vector<1x25xi1> to vector<1x25xi1>
    %136 = vector.broadcast %135 : vector<1x25xi1> to vector<8x25xi1>
    %137 = vector.shape_cast %134 : vector<8x1xf32> to vector<8x1xf32>
    %138 = vector.broadcast %137 : vector<8x1xf32> to vector<8x25xf32>
    %139 = arith.select %136, %138, %128 : vector<8x25xi1>, vector<8x25xf32>
    %cst_31 = arith.constant 0.000000e+00 : f32
    %140 = vector.shape_cast %12 : vector<1x25xi1> to vector<1x25xi1>
    %141 = vector.broadcast %140 : vector<1x25xi1> to vector<8x25xi1>
    %142 = vector.broadcast %cst_31 : f32 to vector<8x25xf32>
    %143 = arith.select %141, %127, %142 : vector<8x25xi1>, vector<8x25xf32>
    %cst_32 = arith.constant dense<0.000000e+00> : vector<8xf32>
    %144 = vector.multi_reduction <add>, %143, %cst_32 [1] : vector<8x25xf32> to vector<8xf32>
    %145 = vector.shape_cast %144 : vector<8xf32> to vector<8x1xf32>
    %146 = vector.shape_cast %12 : vector<1x25xi1> to vector<1x25xi1>
    %147 = vector.broadcast %146 : vector<1x25xi1> to vector<8x25xi1>
    %148 = vector.shape_cast %145 : vector<8x1xf32> to vector<8x1xf32>
    %149 = vector.broadcast %148 : vector<8x1xf32> to vector<8x25xf32>
    %150 = arith.select %147, %149, %139 : vector<8x25xi1>, vector<8x25xf32>
    %cst_33 = arith.constant 0.000000e+00 : f32
    %151 = vector.shape_cast %17 : vector<1x25xi1> to vector<1x25xi1>
    %152 = vector.broadcast %151 : vector<1x25xi1> to vector<8x25xi1>
    %153 = vector.broadcast %cst_33 : f32 to vector<8x25xf32>
    %154 = arith.select %152, %127, %153 : vector<8x25xi1>, vector<8x25xf32>
    %cst_34 = arith.constant dense<0.000000e+00> : vector<8xf32>
    %155 = vector.multi_reduction <add>, %154, %cst_34 [1] : vector<8x25xf32> to vector<8xf32>
    %156 = vector.shape_cast %155 : vector<8xf32> to vector<8x1xf32>
    %157 = vector.shape_cast %17 : vector<1x25xi1> to vector<1x25xi1>
    %158 = vector.broadcast %157 : vector<1x25xi1> to vector<8x25xi1>
    %159 = vector.shape_cast %156 : vector<8x1xf32> to vector<8x1xf32>
    %160 = vector.broadcast %159 : vector<8x1xf32> to vector<8x25xf32>
    %161 = arith.select %158, %160, %150 : vector<8x25xi1>, vector<8x25xf32>
    %cst_35 = arith.constant 0.000000e+00 : f32
    %162 = vector.shape_cast %22 : vector<1x25xi1> to vector<1x25xi1>
    %163 = vector.broadcast %162 : vector<1x25xi1> to vector<8x25xi1>
    %164 = vector.broadcast %cst_35 : f32 to vector<8x25xf32>
    %165 = arith.select %163, %127, %164 : vector<8x25xi1>, vector<8x25xf32>
    %cst_36 = arith.constant dense<0.000000e+00> : vector<8xf32>
    %166 = vector.multi_reduction <add>, %165, %cst_36 [1] : vector<8x25xf32> to vector<8xf32>
    %167 = vector.shape_cast %166 : vector<8xf32> to vector<8x1xf32>
    %168 = vector.shape_cast %22 : vector<1x25xi1> to vector<1x25xi1>
    %169 = vector.broadcast %168 : vector<1x25xi1> to vector<8x25xi1>
    %170 = vector.shape_cast %167 : vector<8x1xf32> to vector<8x1xf32>
    %171 = vector.broadcast %170 : vector<8x1xf32> to vector<8x25xf32>
    %172 = arith.select %169, %171, %161 : vector<8x25xi1>, vector<8x25xf32>
    %cst_37 = arith.constant 0.000000e+00 : f32
    %173 = vector.shape_cast %27 : vector<1x25xi1> to vector<1x25xi1>
    %174 = vector.broadcast %173 : vector<1x25xi1> to vector<8x25xi1>
    %175 = vector.broadcast %cst_37 : f32 to vector<8x25xf32>
    %176 = arith.select %174, %127, %175 : vector<8x25xi1>, vector<8x25xf32>
    %cst_38 = arith.constant dense<0.000000e+00> : vector<8xf32>
    %177 = vector.multi_reduction <add>, %176, %cst_38 [1] : vector<8x25xf32> to vector<8xf32>
    %178 = vector.shape_cast %177 : vector<8xf32> to vector<8x1xf32>
    %179 = vector.shape_cast %27 : vector<1x25xi1> to vector<1x25xi1>
    %180 = vector.broadcast %179 : vector<1x25xi1> to vector<8x25xi1>
    %181 = vector.shape_cast %178 : vector<8x1xf32> to vector<8x1xf32>
    %182 = vector.broadcast %181 : vector<8x1xf32> to vector<8x25xf32>
    %183 = arith.select %180, %182, %172 : vector<8x25xi1>, vector<8x25xf32>
    %184 = tpu.reciprocal %183 {approx = true} : vector<8x25xf32> -> vector<8x25xf32>
    %185 = arith.mulf %127, %184 : vector<8x25xf32>
    %186 = arith.truncf %185 : vector<8x25xf32> to vector<8x25xbf16>
    %cst_39 = arith.constant dense<0.000000e+00> : vector<8x275xf32>
    %187 = tpu.matmul %186, %55, %cst_39 {dimension_numbers = #tpu.dot_dimension_numbers<[1], [0], [0], [1], [0, 0, 1, 1], [], []>} : vector<8x25xbf16>, vector<25x275xbf16>, vector<8x275xf32> -> vector<8x275xf32>
    %188 = arith.mulf %187, %66 : vector<8x275xf32>
    %189 = arith.truncf %188 : vector<8x275xf32> to vector<8x275xbf16>
    %cst_40 = arith.constant dense<0.000000e+00> : vector<8x55xf32>
    %190 = tpu.matmul %189, %56, %cst_40 {dimension_numbers = #tpu.dot_dimension_numbers<[1], [0], [0], [1], [0, 0, 1, 1], [], []>} : vector<8x275xbf16>, vector<275x55xbf16>, vector<8x55xf32> -> vector<8x55xf32>
    %c160_41 = arith.constant 160 : index
    %c640 = arith.constant 640 : index
    %191 = vector.load %arg2[%c160_41, %c640] : memref<448x1152xbf16, #tpu.memory_space<vmem>>, vector<55x55xbf16>
    %192 = arith.truncf %190 : vector<8x55xf32> to vector<8x55xbf16>
    %cst_42 = arith.constant dense<0.000000e+00> : vector<8x55xf32>
    %193 = tpu.matmul %192, %191, %cst_42 {dimension_numbers = #tpu.dot_dimension_numbers<[1], [0], [0], [1], [0, 0, 1, 1], [], []>} : vector<8x55xbf16>, vector<55x55xbf16>, vector<8x55xf32> -> vector<8x55xf32>
    %c160_43 = arith.constant 160 : index
    %c768 = arith.constant 768 : index
    %194 = vector.load %arg2[%c160_43, %c768] : memref<448x1152xbf16, #tpu.memory_space<vmem>>, vector<1x55xbf16>
    %195 = arith.extf %194 : vector<1x55xbf16> to vector<1x55xf32>
    %196 = vector.broadcast %195 : vector<1x55xf32> to vector<8x55xf32>
    %197 = arith.addf %193, %196 : vector<8x55xf32>
    %198 = arith.addf %1, %197 : vector<8x55xf32>
    %c208 = arith.constant 208 : index
    %c128_44 = arith.constant 128 : index
    %199 = vector.load %arg2[%c208, %c128_44] : memref<448x1152xbf16, #tpu.memory_space<vmem>>, vector<1x55xbf16>
    %c208_45 = arith.constant 208 : index
    %c256 = arith.constant 256 : index
    %200 = vector.load %arg2[%c208_45, %c256] : memref<448x1152xbf16, #tpu.memory_space<vmem>>, vector<1x55xbf16>
    %cst_46 = arith.constant 0.000000e+00 : f32
    %201 = vector.broadcast %cst_46 : f32 to vector<8x55xf32>
    %cst_47 = arith.constant 0.000000e+00 : f32
    %202 = vector.shape_cast %33 : vector<1x55xi1> to vector<1x55xi1>
    %203 = vector.broadcast %202 : vector<1x55xi1> to vector<8x55xi1>
    %204 = vector.broadcast %cst_47 : f32 to vector<8x55xf32>
    %205 = arith.select %203, %198, %204 : vector<8x55xi1>, vector<8x55xf32>
    %cst_48 = arith.constant dense<0.000000e+00> : vector<8xf32>
    %206 = vector.multi_reduction <add>, %205, %cst_48 [1] : vector<8x55xf32> to vector<8xf32>
    %207 = vector.shape_cast %206 : vector<8xf32> to vector<8x1xf32>
    %cst_49 = arith.constant 0.0909090936 : f32
    %208 = vector.broadcast %cst_49 : f32 to vector<8x1xf32>
    %209 = arith.mulf %207, %208 : vector<8x1xf32>
    %210 = vector.shape_cast %33 : vector<1x55xi1> to vector<1x55xi1>
    %211 = vector.broadcast %210 : vector<1x55xi1> to vector<8x55xi1>
    %212 = vector.shape_cast %209 : vector<8x1xf32> to vector<8x1xf32>
    %213 = vector.broadcast %212 : vector<8x1xf32> to vector<8x55xf32>
    %214 = arith.select %211, %213, %201 : vector<8x55xi1>, vector<8x55xf32>
    %cst_50 = arith.constant 0.000000e+00 : f32
    %215 = vector.shape_cast %38 : vector<1x55xi1> to vector<1x55xi1>
    %216 = vector.broadcast %215 : vector<1x55xi1> to vector<8x55xi1>
    %217 = vector.broadcast %cst_50 : f32 to vector<8x55xf32>
    %218 = arith.select %216, %198, %217 : vector<8x55xi1>, vector<8x55xf32>
    %cst_51 = arith.constant dense<0.000000e+00> : vector<8xf32>
    %219 = vector.multi_reduction <add>, %218, %cst_51 [1] : vector<8x55xf32> to vector<8xf32>
    %220 = vector.shape_cast %219 : vector<8xf32> to vector<8x1xf32>
    %cst_52 = arith.constant 0.0909090936 : f32
    %221 = vector.broadcast %cst_52 : f32 to vector<8x1xf32>
    %222 = arith.mulf %220, %221 : vector<8x1xf32>
    %223 = vector.shape_cast %38 : vector<1x55xi1> to vector<1x55xi1>
    %224 = vector.broadcast %223 : vector<1x55xi1> to vector<8x55xi1>
    %225 = vector.shape_cast %222 : vector<8x1xf32> to vector<8x1xf32>
    %226 = vector.broadcast %225 : vector<8x1xf32> to vector<8x55xf32>
    %227 = arith.select %224, %226, %214 : vector<8x55xi1>, vector<8x55xf32>
    %cst_53 = arith.constant 0.000000e+00 : f32
    %228 = vector.shape_cast %43 : vector<1x55xi1> to vector<1x55xi1>
    %229 = vector.broadcast %228 : vector<1x55xi1> to vector<8x55xi1>
    %230 = vector.broadcast %cst_53 : f32 to vector<8x55xf32>
    %231 = arith.select %229, %198, %230 : vector<8x55xi1>, vector<8x55xf32>
    %cst_54 = arith.constant dense<0.000000e+00> : vector<8xf32>
    %232 = vector.multi_reduction <add>, %231, %cst_54 [1] : vector<8x55xf32> to vector<8xf32>
    %233 = vector.shape_cast %232 : vector<8xf32> to vector<8x1xf32>
    %cst_55 = arith.constant 0.0909090936 : f32
    %234 = vector.broadcast %cst_55 : f32 to vector<8x1xf32>
    %235 = arith.mulf %233, %234 : vector<8x1xf32>
    %236 = vector.shape_cast %43 : vector<1x55xi1> to vector<1x55xi1>
    %237 = vector.broadcast %236 : vector<1x55xi1> to vector<8x55xi1>
    %238 = vector.shape_cast %235 : vector<8x1xf32> to vector<8x1xf32>
    %239 = vector.broadcast %238 : vector<8x1xf32> to vector<8x55xf32>
    %240 = arith.select %237, %239, %227 : vector<8x55xi1>, vector<8x55xf32>
    %cst_56 = arith.constant 0.000000e+00 : f32
    %241 = vector.shape_cast %48 : vector<1x55xi1> to vector<1x55xi1>
    %242 = vector.broadcast %241 : vector<1x55xi1> to vector<8x55xi1>
    %243 = vector.broadcast %cst_56 : f32 to vector<8x55xf32>
    %244 = arith.select %242, %198, %243 : vector<8x55xi1>, vector<8x55xf32>
    %cst_57 = arith.constant dense<0.000000e+00> : vector<8xf32>
    %245 = vector.multi_reduction <add>, %244, %cst_57 [1] : vector<8x55xf32> to vector<8xf32>
    %246 = vector.shape_cast %245 : vector<8xf32> to vector<8x1xf32>
    %cst_58 = arith.constant 0.0909090936 : f32
    %247 = vector.broadcast %cst_58 : f32 to vector<8x1xf32>
    %248 = arith.mulf %246, %247 : vector<8x1xf32>
    %249 = vector.shape_cast %48 : vector<1x55xi1> to vector<1x55xi1>
    %250 = vector.broadcast %249 : vector<1x55xi1> to vector<8x55xi1>
    %251 = vector.shape_cast %248 : vector<8x1xf32> to vector<8x1xf32>
    %252 = vector.broadcast %251 : vector<8x1xf32> to vector<8x55xf32>
    %253 = arith.select %250, %252, %240 : vector<8x55xi1>, vector<8x55xf32>
    %cst_59 = arith.constant 0.000000e+00 : f32
    %254 = vector.shape_cast %53 : vector<1x55xi1> to vector<1x55xi1>
    %255 = vector.broadcast %254 : vector<1x55xi1> to vector<8x55xi1>
    %256 = vector.broadcast %cst_59 : f32 to vector<8x55xf32>
    %257 = arith.select %255, %198, %256 : vector<8x55xi1>, vector<8x55xf32>
    %cst_60 = arith.constant dense<0.000000e+00> : vector<8xf32>
    %258 = vector.multi_reduction <add>, %257, %cst_60 [1] : vector<8x55xf32> to vector<8xf32>
    %259 = vector.shape_cast %258 : vector<8xf32> to vector<8x1xf32>
    %cst_61 = arith.constant 0.0909090936 : f32
    %260 = vector.broadcast %cst_61 : f32 to vector<8x1xf32>
    %261 = arith.mulf %259, %260 : vector<8x1xf32>
    %262 = vector.shape_cast %53 : vector<1x55xi1> to vector<1x55xi1>
    %263 = vector.broadcast %262 : vector<1x55xi1> to vector<8x55xi1>
    %264 = vector.shape_cast %261 : vector<8x1xf32> to vector<8x1xf32>
    %265 = vector.broadcast %264 : vector<8x1xf32> to vector<8x55xf32>
    %266 = arith.select %263, %265, %253 : vector<8x55xi1>, vector<8x55xf32>
    %267 = arith.subf %198, %266 : vector<8x55xf32>
    %268 = arith.mulf %267, %267 : vector<8x55xf32>
    %cst_62 = arith.constant 0.000000e+00 : f32
    %269 = vector.broadcast %cst_62 : f32 to vector<8x55xf32>
    %cst_63 = arith.constant 0.000000e+00 : f32
    %270 = vector.shape_cast %33 : vector<1x55xi1> to vector<1x55xi1>
    %271 = vector.broadcast %270 : vector<1x55xi1> to vector<8x55xi1>
    %272 = vector.broadcast %cst_63 : f32 to vector<8x55xf32>
    %273 = arith.select %271, %268, %272 : vector<8x55xi1>, vector<8x55xf32>
    %cst_64 = arith.constant dense<0.000000e+00> : vector<8xf32>
    %274 = vector.multi_reduction <add>, %273, %cst_64 [1] : vector<8x55xf32> to vector<8xf32>
    %275 = vector.shape_cast %274 : vector<8xf32> to vector<8x1xf32>
    %cst_65 = arith.constant 0.0909090936 : f32
    %276 = vector.broadcast %cst_65 : f32 to vector<8x1xf32>
    %277 = arith.mulf %275, %276 : vector<8x1xf32>
    %278 = vector.shape_cast %33 : vector<1x55xi1> to vector<1x55xi1>
    %279 = vector.broadcast %278 : vector<1x55xi1> to vector<8x55xi1>
    %280 = vector.shape_cast %277 : vector<8x1xf32> to vector<8x1xf32>
    %281 = vector.broadcast %280 : vector<8x1xf32> to vector<8x55xf32>
    %282 = arith.select %279, %281, %269 : vector<8x55xi1>, vector<8x55xf32>
    %cst_66 = arith.constant 0.000000e+00 : f32
    %283 = vector.shape_cast %38 : vector<1x55xi1> to vector<1x55xi1>
    %284 = vector.broadcast %283 : vector<1x55xi1> to vector<8x55xi1>
    %285 = vector.broadcast %cst_66 : f32 to vector<8x55xf32>
    %286 = arith.select %284, %268, %285 : vector<8x55xi1>, vector<8x55xf32>
    %cst_67 = arith.constant dense<0.000000e+00> : vector<8xf32>
    %287 = vector.multi_reduction <add>, %286, %cst_67 [1] : vector<8x55xf32> to vector<8xf32>
    %288 = vector.shape_cast %287 : vector<8xf32> to vector<8x1xf32>
    %cst_68 = arith.constant 0.0909090936 : f32
    %289 = vector.broadcast %cst_68 : f32 to vector<8x1xf32>
    %290 = arith.mulf %288, %289 : vector<8x1xf32>
    %291 = vector.shape_cast %38 : vector<1x55xi1> to vector<1x55xi1>
    %292 = vector.broadcast %291 : vector<1x55xi1> to vector<8x55xi1>
    %293 = vector.shape_cast %290 : vector<8x1xf32> to vector<8x1xf32>
    %294 = vector.broadcast %293 : vector<8x1xf32> to vector<8x55xf32>
    %295 = arith.select %292, %294, %282 : vector<8x55xi1>, vector<8x55xf32>
    %cst_69 = arith.constant 0.000000e+00 : f32
    %296 = vector.shape_cast %43 : vector<1x55xi1> to vector<1x55xi1>
    %297 = vector.broadcast %296 : vector<1x55xi1> to vector<8x55xi1>
    %298 = vector.broadcast %cst_69 : f32 to vector<8x55xf32>
    %299 = arith.select %297, %268, %298 : vector<8x55xi1>, vector<8x55xf32>
    %cst_70 = arith.constant dense<0.000000e+00> : vector<8xf32>
    %300 = vector.multi_reduction <add>, %299, %cst_70 [1] : vector<8x55xf32> to vector<8xf32>
    %301 = vector.shape_cast %300 : vector<8xf32> to vector<8x1xf32>
    %cst_71 = arith.constant 0.0909090936 : f32
    %302 = vector.broadcast %cst_71 : f32 to vector<8x1xf32>
    %303 = arith.mulf %301, %302 : vector<8x1xf32>
    %304 = vector.shape_cast %43 : vector<1x55xi1> to vector<1x55xi1>
    %305 = vector.broadcast %304 : vector<1x55xi1> to vector<8x55xi1>
    %306 = vector.shape_cast %303 : vector<8x1xf32> to vector<8x1xf32>
    %307 = vector.broadcast %306 : vector<8x1xf32> to vector<8x55xf32>
    %308 = arith.select %305, %307, %295 : vector<8x55xi1>, vector<8x55xf32>
    %cst_72 = arith.constant 0.000000e+00 : f32
    %309 = vector.shape_cast %48 : vector<1x55xi1> to vector<1x55xi1>
    %310 = vector.broadcast %309 : vector<1x55xi1> to vector<8x55xi1>
    %311 = vector.broadcast %cst_72 : f32 to vector<8x55xf32>
    %312 = arith.select %310, %268, %311 : vector<8x55xi1>, vector<8x55xf32>
    %cst_73 = arith.constant dense<0.000000e+00> : vector<8xf32>
    %313 = vector.multi_reduction <add>, %312, %cst_73 [1] : vector<8x55xf32> to vector<8xf32>
    %314 = vector.shape_cast %313 : vector<8xf32> to vector<8x1xf32>
    %cst_74 = arith.constant 0.0909090936 : f32
    %315 = vector.broadcast %cst_74 : f32 to vector<8x1xf32>
    %316 = arith.mulf %314, %315 : vector<8x1xf32>
    %317 = vector.shape_cast %48 : vector<1x55xi1> to vector<1x55xi1>
    %318 = vector.broadcast %317 : vector<1x55xi1> to vector<8x55xi1>
    %319 = vector.shape_cast %316 : vector<8x1xf32> to vector<8x1xf32>
    %320 = vector.broadcast %319 : vector<8x1xf32> to vector<8x55xf32>
    %321 = arith.select %318, %320, %308 : vector<8x55xi1>, vector<8x55xf32>
    %cst_75 = arith.constant 0.000000e+00 : f32
    %322 = vector.shape_cast %53 : vector<1x55xi1> to vector<1x55xi1>
    %323 = vector.broadcast %322 : vector<1x55xi1> to vector<8x55xi1>
    %324 = vector.broadcast %cst_75 : f32 to vector<8x55xf32>
    %325 = arith.select %323, %268, %324 : vector<8x55xi1>, vector<8x55xf32>
    %cst_76 = arith.constant dense<0.000000e+00> : vector<8xf32>
    %326 = vector.multi_reduction <add>, %325, %cst_76 [1] : vector<8x55xf32> to vector<8xf32>
    %327 = vector.shape_cast %326 : vector<8xf32> to vector<8x1xf32>
    %cst_77 = arith.constant 0.0909090936 : f32
    %328 = vector.broadcast %cst_77 : f32 to vector<8x1xf32>
    %329 = arith.mulf %327, %328 : vector<8x1xf32>
    %330 = vector.shape_cast %53 : vector<1x55xi1> to vector<1x55xi1>
    %331 = vector.broadcast %330 : vector<1x55xi1> to vector<8x55xi1>
    %332 = vector.shape_cast %329 : vector<8x1xf32> to vector<8x1xf32>
    %333 = vector.broadcast %332 : vector<8x1xf32> to vector<8x55xf32>
    %334 = arith.select %331, %333, %321 : vector<8x55xi1>, vector<8x55xf32>
    %cst_78 = arith.constant 9.99999974E-6 : f32
    %335 = vector.broadcast %cst_78 : f32 to vector<8x55xf32>
    %336 = arith.addf %334, %335 : vector<8x55xf32>
    %337 = math.rsqrt %336 : vector<8x55xf32>
    %338 = arith.mulf %267, %337 : vector<8x55xf32>
    %339 = arith.extf %199 : vector<1x55xbf16> to vector<1x55xf32>
    %340 = vector.broadcast %339 : vector<1x55xf32> to vector<8x55xf32>
    %341 = arith.mulf %338, %340 : vector<8x55xf32>
    %342 = arith.extf %200 : vector<1x55xbf16> to vector<1x55xf32>
    %343 = vector.broadcast %342 : vector<1x55xf32> to vector<8x55xf32>
    %344 = arith.addf %341, %343 : vector<8x55xf32>
    %c160_79 = arith.constant 160 : index
    %c896 = arith.constant 896 : index
    %345 = vector.load %arg2[%c160_79, %c896] : memref<448x1152xbf16, #tpu.memory_space<vmem>>, vector<55x160xbf16>
    %346 = arith.truncf %344 : vector<8x55xf32> to vector<8x55xbf16>
    %cst_80 = arith.constant dense<0.000000e+00> : vector<8x160xf32>
    %347 = tpu.matmul %346, %345, %cst_80 {dimension_numbers = #tpu.dot_dimension_numbers<[1], [0], [0], [1], [0, 0, 1, 1], [], []>} : vector<8x55xbf16>, vector<55x160xbf16>, vector<8x160xf32> -> vector<8x160xf32>
    %c192 = arith.constant 192 : index
    %c128_81 = arith.constant 128 : index
    %348 = vector.load %arg2[%c192, %c128_81] : memref<448x1152xbf16, #tpu.memory_space<vmem>>, vector<1x160xbf16>
    %349 = arith.extf %348 : vector<1x160xbf16> to vector<1x160xf32>
    %350 = vector.broadcast %349 : vector<1x160xf32> to vector<8x160xf32>
    %351 = arith.addf %347, %350 : vector<8x160xf32>
    %cst_82 = arith.constant 0.000000e+00 : f32
    %352 = vector.broadcast %cst_82 : f32 to vector<8x160xf32>
    %353 = arith.maximumf %351, %352 : vector<8x160xf32>
    %c176 = arith.constant 176 : index
    %c768_83 = arith.constant 768 : index
    %354 = vector.load %arg2[%c176, %c768_83] : memref<448x1152xbf16, #tpu.memory_space<vmem>>, vector<160x55xbf16>
    %355 = arith.truncf %353 : vector<8x160xf32> to vector<8x160xbf16>
    %cst_84 = arith.constant dense<0.000000e+00> : vector<8x55xf32>
    %356 = tpu.matmul %355, %354, %cst_84 {dimension_numbers = #tpu.dot_dimension_numbers<[1], [0], [0], [1], [0, 0, 1, 1], [], []>} : vector<8x160xbf16>, vector<160x55xbf16>, vector<8x55xf32> -> vector<8x55xf32>
    %c192_85 = arith.constant 192 : index
    %c384 = arith.constant 384 : index
    %357 = vector.load %arg2[%c192_85, %c384] : memref<448x1152xbf16, #tpu.memory_space<vmem>>, vector<1x55xbf16>
    %358 = arith.extf %357 : vector<1x55xbf16> to vector<1x55xf32>
    %359 = vector.broadcast %358 : vector<1x55xf32> to vector<8x55xf32>
    %360 = arith.addf %356, %359 : vector<8x55xf32>
    %361 = arith.addf %344, %360 : vector<8x55xf32>
    %c208_86 = arith.constant 208 : index
    %c384_87 = arith.constant 384 : index
    %362 = vector.load %arg2[%c208_86, %c384_87] : memref<448x1152xbf16, #tpu.memory_space<vmem>>, vector<1x55xbf16>
    %c224 = arith.constant 224 : index
    %c128_88 = arith.constant 128 : index
    %363 = vector.load %arg2[%c224, %c128_88] : memref<448x1152xbf16, #tpu.memory_space<vmem>>, vector<1x55xbf16>
    %cst_89 = arith.constant 0.000000e+00 : f32
    %364 = vector.broadcast %cst_89 : f32 to vector<8x55xf32>
    %cst_90 = arith.constant 0.000000e+00 : f32
    %365 = vector.shape_cast %33 : vector<1x55xi1> to vector<1x55xi1>
    %366 = vector.broadcast %365 : vector<1x55xi1> to vector<8x55xi1>
    %367 = vector.broadcast %cst_90 : f32 to vector<8x55xf32>
    %368 = arith.select %366, %361, %367 : vector<8x55xi1>, vector<8x55xf32>
    %cst_91 = arith.constant dense<0.000000e+00> : vector<8xf32>
    %369 = vector.multi_reduction <add>, %368, %cst_91 [1] : vector<8x55xf32> to vector<8xf32>
    %370 = vector.shape_cast %369 : vector<8xf32> to vector<8x1xf32>
    %cst_92 = arith.constant 0.0909090936 : f32
    %371 = vector.broadcast %cst_92 : f32 to vector<8x1xf32>
    %372 = arith.mulf %370, %371 : vector<8x1xf32>
    %373 = vector.shape_cast %33 : vector<1x55xi1> to vector<1x55xi1>
    %374 = vector.broadcast %373 : vector<1x55xi1> to vector<8x55xi1>
    %375 = vector.shape_cast %372 : vector<8x1xf32> to vector<8x1xf32>
    %376 = vector.broadcast %375 : vector<8x1xf32> to vector<8x55xf32>
    %377 = arith.select %374, %376, %364 : vector<8x55xi1>, vector<8x55xf32>
    %cst_93 = arith.constant 0.000000e+00 : f32
    %378 = vector.shape_cast %38 : vector<1x55xi1> to vector<1x55xi1>
    %379 = vector.broadcast %378 : vector<1x55xi1> to vector<8x55xi1>
    %380 = vector.broadcast %cst_93 : f32 to vector<8x55xf32>
    %381 = arith.select %379, %361, %380 : vector<8x55xi1>, vector<8x55xf32>
    %cst_94 = arith.constant dense<0.000000e+00> : vector<8xf32>
    %382 = vector.multi_reduction <add>, %381, %cst_94 [1] : vector<8x55xf32> to vector<8xf32>
    %383 = vector.shape_cast %382 : vector<8xf32> to vector<8x1xf32>
    %cst_95 = arith.constant 0.0909090936 : f32
    %384 = vector.broadcast %cst_95 : f32 to vector<8x1xf32>
    %385 = arith.mulf %383, %384 : vector<8x1xf32>
    %386 = vector.shape_cast %38 : vector<1x55xi1> to vector<1x55xi1>
    %387 = vector.broadcast %386 : vector<1x55xi1> to vector<8x55xi1>
    %388 = vector.shape_cast %385 : vector<8x1xf32> to vector<8x1xf32>
    %389 = vector.broadcast %388 : vector<8x1xf32> to vector<8x55xf32>
    %390 = arith.select %387, %389, %377 : vector<8x55xi1>, vector<8x55xf32>
    %cst_96 = arith.constant 0.000000e+00 : f32
    %391 = vector.shape_cast %43 : vector<1x55xi1> to vector<1x55xi1>
    %392 = vector.broadcast %391 : vector<1x55xi1> to vector<8x55xi1>
    %393 = vector.broadcast %cst_96 : f32 to vector<8x55xf32>
    %394 = arith.select %392, %361, %393 : vector<8x55xi1>, vector<8x55xf32>
    %cst_97 = arith.constant dense<0.000000e+00> : vector<8xf32>
    %395 = vector.multi_reduction <add>, %394, %cst_97 [1] : vector<8x55xf32> to vector<8xf32>
    %396 = vector.shape_cast %395 : vector<8xf32> to vector<8x1xf32>
    %cst_98 = arith.constant 0.0909090936 : f32
    %397 = vector.broadcast %cst_98 : f32 to vector<8x1xf32>
    %398 = arith.mulf %396, %397 : vector<8x1xf32>
    %399 = vector.shape_cast %43 : vector<1x55xi1> to vector<1x55xi1>
    %400 = vector.broadcast %399 : vector<1x55xi1> to vector<8x55xi1>
    %401 = vector.shape_cast %398 : vector<8x1xf32> to vector<8x1xf32>
    %402 = vector.broadcast %401 : vector<8x1xf32> to vector<8x55xf32>
    %403 = arith.select %400, %402, %390 : vector<8x55xi1>, vector<8x55xf32>
    %cst_99 = arith.constant 0.000000e+00 : f32
    %404 = vector.shape_cast %48 : vector<1x55xi1> to vector<1x55xi1>
    %405 = vector.broadcast %404 : vector<1x55xi1> to vector<8x55xi1>
    %406 = vector.broadcast %cst_99 : f32 to vector<8x55xf32>
    %407 = arith.select %405, %361, %406 : vector<8x55xi1>, vector<8x55xf32>
    %cst_100 = arith.constant dense<0.000000e+00> : vector<8xf32>
    %408 = vector.multi_reduction <add>, %407, %cst_100 [1] : vector<8x55xf32> to vector<8xf32>
    %409 = vector.shape_cast %408 : vector<8xf32> to vector<8x1xf32>
    %cst_101 = arith.constant 0.0909090936 : f32
    %410 = vector.broadcast %cst_101 : f32 to vector<8x1xf32>
    %411 = arith.mulf %409, %410 : vector<8x1xf32>
    %412 = vector.shape_cast %48 : vector<1x55xi1> to vector<1x55xi1>
    %413 = vector.broadcast %412 : vector<1x55xi1> to vector<8x55xi1>
    %414 = vector.shape_cast %411 : vector<8x1xf32> to vector<8x1xf32>
    %415 = vector.broadcast %414 : vector<8x1xf32> to vector<8x55xf32>
    %416 = arith.select %413, %415, %403 : vector<8x55xi1>, vector<8x55xf32>
    %cst_102 = arith.constant 0.000000e+00 : f32
    %417 = vector.shape_cast %53 : vector<1x55xi1> to vector<1x55xi1>
    %418 = vector.broadcast %417 : vector<1x55xi1> to vector<8x55xi1>
    %419 = vector.broadcast %cst_102 : f32 to vector<8x55xf32>
    %420 = arith.select %418, %361, %419 : vector<8x55xi1>, vector<8x55xf32>
    %cst_103 = arith.constant dense<0.000000e+00> : vector<8xf32>
    %421 = vector.multi_reduction <add>, %420, %cst_103 [1] : vector<8x55xf32> to vector<8xf32>
    %422 = vector.shape_cast %421 : vector<8xf32> to vector<8x1xf32>
    %cst_104 = arith.constant 0.0909090936 : f32
    %423 = vector.broadcast %cst_104 : f32 to vector<8x1xf32>
    %424 = arith.mulf %422, %423 : vector<8x1xf32>
    %425 = vector.shape_cast %53 : vector<1x55xi1> to vector<1x55xi1>
    %426 = vector.broadcast %425 : vector<1x55xi1> to vector<8x55xi1>
    %427 = vector.shape_cast %424 : vector<8x1xf32> to vector<8x1xf32>
    %428 = vector.broadcast %427 : vector<8x1xf32> to vector<8x55xf32>
    %429 = arith.select %426, %428, %416 : vector<8x55xi1>, vector<8x55xf32>
    %430 = arith.subf %361, %429 : vector<8x55xf32>
    %431 = arith.mulf %430, %430 : vector<8x55xf32>
    %cst_105 = arith.constant 0.000000e+00 : f32
    %432 = vector.broadcast %cst_105 : f32 to vector<8x55xf32>
    %cst_106 = arith.constant 0.000000e+00 : f32
    %433 = vector.shape_cast %33 : vector<1x55xi1> to vector<1x55xi1>
    %434 = vector.broadcast %433 : vector<1x55xi1> to vector<8x55xi1>
    %435 = vector.broadcast %cst_106 : f32 to vector<8x55xf32>
    %436 = arith.select %434, %431, %435 : vector<8x55xi1>, vector<8x55xf32>
    %cst_107 = arith.constant dense<0.000000e+00> : vector<8xf32>
    %437 = vector.multi_reduction <add>, %436, %cst_107 [1] : vector<8x55xf32> to vector<8xf32>
    %438 = vector.shape_cast %437 : vector<8xf32> to vector<8x1xf32>
    %cst_108 = arith.constant 0.0909090936 : f32
    %439 = vector.broadcast %cst_108 : f32 to vector<8x1xf32>
    %440 = arith.mulf %438, %439 : vector<8x1xf32>
    %441 = vector.shape_cast %33 : vector<1x55xi1> to vector<1x55xi1>
    %442 = vector.broadcast %441 : vector<1x55xi1> to vector<8x55xi1>
    %443 = vector.shape_cast %440 : vector<8x1xf32> to vector<8x1xf32>
    %444 = vector.broadcast %443 : vector<8x1xf32> to vector<8x55xf32>
    %445 = arith.select %442, %444, %432 : vector<8x55xi1>, vector<8x55xf32>
    %cst_109 = arith.constant 0.000000e+00 : f32
    %446 = vector.shape_cast %38 : vector<1x55xi1> to vector<1x55xi1>
    %447 = vector.broadcast %446 : vector<1x55xi1> to vector<8x55xi1>
    %448 = vector.broadcast %cst_109 : f32 to vector<8x55xf32>
    %449 = arith.select %447, %431, %448 : vector<8x55xi1>, vector<8x55xf32>
    %cst_110 = arith.constant dense<0.000000e+00> : vector<8xf32>
    %450 = vector.multi_reduction <add>, %449, %cst_110 [1] : vector<8x55xf32> to vector<8xf32>
    %451 = vector.shape_cast %450 : vector<8xf32> to vector<8x1xf32>
    %cst_111 = arith.constant 0.0909090936 : f32
    %452 = vector.broadcast %cst_111 : f32 to vector<8x1xf32>
    %453 = arith.mulf %451, %452 : vector<8x1xf32>
    %454 = vector.shape_cast %38 : vector<1x55xi1> to vector<1x55xi1>
    %455 = vector.broadcast %454 : vector<1x55xi1> to vector<8x55xi1>
    %456 = vector.shape_cast %453 : vector<8x1xf32> to vector<8x1xf32>
    %457 = vector.broadcast %456 : vector<8x1xf32> to vector<8x55xf32>
    %458 = arith.select %455, %457, %445 : vector<8x55xi1>, vector<8x55xf32>
    %cst_112 = arith.constant 0.000000e+00 : f32
    %459 = vector.shape_cast %43 : vector<1x55xi1> to vector<1x55xi1>
    %460 = vector.broadcast %459 : vector<1x55xi1> to vector<8x55xi1>
    %461 = vector.broadcast %cst_112 : f32 to vector<8x55xf32>
    %462 = arith.select %460, %431, %461 : vector<8x55xi1>, vector<8x55xf32>
    %cst_113 = arith.constant dense<0.000000e+00> : vector<8xf32>
    %463 = vector.multi_reduction <add>, %462, %cst_113 [1] : vector<8x55xf32> to vector<8xf32>
    %464 = vector.shape_cast %463 : vector<8xf32> to vector<8x1xf32>
    %cst_114 = arith.constant 0.0909090936 : f32
    %465 = vector.broadcast %cst_114 : f32 to vector<8x1xf32>
    %466 = arith.mulf %464, %465 : vector<8x1xf32>
    %467 = vector.shape_cast %43 : vector<1x55xi1> to vector<1x55xi1>
    %468 = vector.broadcast %467 : vector<1x55xi1> to vector<8x55xi1>
    %469 = vector.shape_cast %466 : vector<8x1xf32> to vector<8x1xf32>
    %470 = vector.broadcast %469 : vector<8x1xf32> to vector<8x55xf32>
    %471 = arith.select %468, %470, %458 : vector<8x55xi1>, vector<8x55xf32>
    %cst_115 = arith.constant 0.000000e+00 : f32
    %472 = vector.shape_cast %48 : vector<1x55xi1> to vector<1x55xi1>
    %473 = vector.broadcast %472 : vector<1x55xi1> to vector<8x55xi1>
    %474 = vector.broadcast %cst_115 : f32 to vector<8x55xf32>
    %475 = arith.select %473, %431, %474 : vector<8x55xi1>, vector<8x55xf32>
    %cst_116 = arith.constant dense<0.000000e+00> : vector<8xf32>
    %476 = vector.multi_reduction <add>, %475, %cst_116 [1] : vector<8x55xf32> to vector<8xf32>
    %477 = vector.shape_cast %476 : vector<8xf32> to vector<8x1xf32>
    %cst_117 = arith.constant 0.0909090936 : f32
    %478 = vector.broadcast %cst_117 : f32 to vector<8x1xf32>
    %479 = arith.mulf %477, %478 : vector<8x1xf32>
    %480 = vector.shape_cast %48 : vector<1x55xi1> to vector<1x55xi1>
    %481 = vector.broadcast %480 : vector<1x55xi1> to vector<8x55xi1>
    %482 = vector.shape_cast %479 : vector<8x1xf32> to vector<8x1xf32>
    %483 = vector.broadcast %482 : vector<8x1xf32> to vector<8x55xf32>
    %484 = arith.select %481, %483, %471 : vector<8x55xi1>, vector<8x55xf32>
    %cst_118 = arith.constant 0.000000e+00 : f32
    %485 = vector.shape_cast %53 : vector<1x55xi1> to vector<1x55xi1>
    %486 = vector.broadcast %485 : vector<1x55xi1> to vector<8x55xi1>
    %487 = vector.broadcast %cst_118 : f32 to vector<8x55xf32>
    %488 = arith.select %486, %431, %487 : vector<8x55xi1>, vector<8x55xf32>
    %cst_119 = arith.constant dense<0.000000e+00> : vector<8xf32>
    %489 = vector.multi_reduction <add>, %488, %cst_119 [1] : vector<8x55xf32> to vector<8xf32>
    %490 = vector.shape_cast %489 : vector<8xf32> to vector<8x1xf32>
    %cst_120 = arith.constant 0.0909090936 : f32
    %491 = vector.broadcast %cst_120 : f32 to vector<8x1xf32>
    %492 = arith.mulf %490, %491 : vector<8x1xf32>
    %493 = vector.shape_cast %53 : vector<1x55xi1> to vector<1x55xi1>
    %494 = vector.broadcast %493 : vector<1x55xi1> to vector<8x55xi1>
    %495 = vector.shape_cast %492 : vector<8x1xf32> to vector<8x1xf32>
    %496 = vector.broadcast %495 : vector<8x1xf32> to vector<8x55xf32>
    %497 = arith.select %494, %496, %484 : vector<8x55xi1>, vector<8x55xf32>
    %cst_121 = arith.constant 9.99999974E-6 : f32
    %498 = vector.broadcast %cst_121 : f32 to vector<8x55xf32>
    %499 = arith.addf %497, %498 : vector<8x55xf32>
    %500 = math.rsqrt %499 : vector<8x55xf32>
    %501 = arith.mulf %430, %500 : vector<8x55xf32>
    %502 = arith.extf %362 : vector<1x55xbf16> to vector<1x55xf32>
    %503 = vector.broadcast %502 : vector<1x55xf32> to vector<8x55xf32>
    %504 = arith.mulf %501, %503 : vector<8x55xf32>
    %505 = arith.extf %363 : vector<1x55xbf16> to vector<1x55xf32>
    %506 = vector.broadcast %505 : vector<1x55xf32> to vector<8x55xf32>
    %507 = arith.addf %504, %506 : vector<8x55xf32>
    %c80 = arith.constant 80 : index
    %c0_122 = arith.constant 0 : index
    %508 = vector.load %arg2[%c80, %c0_122] : memref<448x1152xbf16, #tpu.memory_space<vmem>>, vector<55x1152xbf16>
    %509 = arith.truncf %507 : vector<8x55xf32> to vector<8x55xbf16>
    %cst_123 = arith.constant dense<0.000000e+00> : vector<8x1152xf32>
    %510 = tpu.matmul %509, %508, %cst_123 {dimension_numbers = #tpu.dot_dimension_numbers<[1], [0], [0], [1], [0, 0, 1, 1], [], []>} : vector<8x55xbf16>, vector<55x1152xbf16>, vector<8x1152xf32> -> vector<8x1152xf32>
    %c144 = arith.constant 144 : index
    %c0_124 = arith.constant 0 : index
    %511 = vector.load %arg2[%c144, %c0_124] : memref<448x1152xbf16, #tpu.memory_space<vmem>>, vector<1x1152xbf16>
    %512 = arith.extf %511 : vector<1x1152xbf16> to vector<1x1152xf32>
    %513 = vector.broadcast %512 : vector<1x1152xf32> to vector<8x1152xf32>
    %514 = arith.addf %510, %513 : vector<8x1152xf32>
    %515 = vector.extract_strided_slice %514 {offsets = [0, 0], sizes = [8, 275], strides = [1, 1]} : vector<8x1152xf32> to vector<8x275xf32>
    %516 = vector.extract_strided_slice %514 {offsets = [0, 384], sizes = [8, 275], strides = [1, 1]} : vector<8x1152xf32> to vector<8x275xf32>
    %517 = vector.extract_strided_slice %514 {offsets = [0, 768], sizes = [8, 275], strides = [1, 1]} : vector<8x1152xf32> to vector<8x275xf32>
    %518 = arith.mulf %515, %516 : vector<8x275xf32>
    %519 = arith.truncf %518 : vector<8x275xf32> to vector<8x275xbf16>
    %cst_125 = arith.constant dense<0.000000e+00> : vector<8x25xf32>
    %520 = tpu.matmul %519, %54, %cst_125 {dimension_numbers = #tpu.dot_dimension_numbers<[1], [0], [0], [1], [0, 0, 1, 1], [], []>} : vector<8x275xbf16>, vector<275x25xbf16>, vector<8x25xf32> -> vector<8x25xf32>
    %cst_126 = arith.constant 0.000000e+00 : f32
    %521 = vector.broadcast %cst_126 : f32 to vector<8x25xf32>
    %cst_127 = arith.constant -1.000000e+30 : f32
    %522 = vector.shape_cast %7 : vector<1x25xi1> to vector<1x25xi1>
    %523 = vector.broadcast %522 : vector<1x25xi1> to vector<8x25xi1>
    %524 = vector.broadcast %cst_127 : f32 to vector<8x25xf32>
    %525 = arith.select %523, %520, %524 : vector<8x25xi1>, vector<8x25xf32>
    %cst_128 = arith.constant dense<0xFF800000> : vector<8xf32>
    %526 = vector.multi_reduction <maximumf>, %525, %cst_128 [1] : vector<8x25xf32> to vector<8xf32>
    %527 = vector.shape_cast %526 : vector<8xf32> to vector<8x1xf32>
    %528 = vector.shape_cast %7 : vector<1x25xi1> to vector<1x25xi1>
    %529 = vector.broadcast %528 : vector<1x25xi1> to vector<8x25xi1>
    %530 = vector.shape_cast %527 : vector<8x1xf32> to vector<8x1xf32>
    %531 = vector.broadcast %530 : vector<8x1xf32> to vector<8x25xf32>
    %532 = arith.select %529, %531, %521 : vector<8x25xi1>, vector<8x25xf32>
    %cst_129 = arith.constant -1.000000e+30 : f32
    %533 = vector.shape_cast %12 : vector<1x25xi1> to vector<1x25xi1>
    %534 = vector.broadcast %533 : vector<1x25xi1> to vector<8x25xi1>
    %535 = vector.broadcast %cst_129 : f32 to vector<8x25xf32>
    %536 = arith.select %534, %520, %535 : vector<8x25xi1>, vector<8x25xf32>
    %cst_130 = arith.constant dense<0xFF800000> : vector<8xf32>
    %537 = vector.multi_reduction <maximumf>, %536, %cst_130 [1] : vector<8x25xf32> to vector<8xf32>
    %538 = vector.shape_cast %537 : vector<8xf32> to vector<8x1xf32>
    %539 = vector.shape_cast %12 : vector<1x25xi1> to vector<1x25xi1>
    %540 = vector.broadcast %539 : vector<1x25xi1> to vector<8x25xi1>
    %541 = vector.shape_cast %538 : vector<8x1xf32> to vector<8x1xf32>
    %542 = vector.broadcast %541 : vector<8x1xf32> to vector<8x25xf32>
    %543 = arith.select %540, %542, %532 : vector<8x25xi1>, vector<8x25xf32>
    %cst_131 = arith.constant -1.000000e+30 : f32
    %544 = vector.shape_cast %17 : vector<1x25xi1> to vector<1x25xi1>
    %545 = vector.broadcast %544 : vector<1x25xi1> to vector<8x25xi1>
    %546 = vector.broadcast %cst_131 : f32 to vector<8x25xf32>
    %547 = arith.select %545, %520, %546 : vector<8x25xi1>, vector<8x25xf32>
    %cst_132 = arith.constant dense<0xFF800000> : vector<8xf32>
    %548 = vector.multi_reduction <maximumf>, %547, %cst_132 [1] : vector<8x25xf32> to vector<8xf32>
    %549 = vector.shape_cast %548 : vector<8xf32> to vector<8x1xf32>
    %550 = vector.shape_cast %17 : vector<1x25xi1> to vector<1x25xi1>
    %551 = vector.broadcast %550 : vector<1x25xi1> to vector<8x25xi1>
    %552 = vector.shape_cast %549 : vector<8x1xf32> to vector<8x1xf32>
    %553 = vector.broadcast %552 : vector<8x1xf32> to vector<8x25xf32>
    %554 = arith.select %551, %553, %543 : vector<8x25xi1>, vector<8x25xf32>
    %cst_133 = arith.constant -1.000000e+30 : f32
    %555 = vector.shape_cast %22 : vector<1x25xi1> to vector<1x25xi1>
    %556 = vector.broadcast %555 : vector<1x25xi1> to vector<8x25xi1>
    %557 = vector.broadcast %cst_133 : f32 to vector<8x25xf32>
    %558 = arith.select %556, %520, %557 : vector<8x25xi1>, vector<8x25xf32>
    %cst_134 = arith.constant dense<0xFF800000> : vector<8xf32>
    %559 = vector.multi_reduction <maximumf>, %558, %cst_134 [1] : vector<8x25xf32> to vector<8xf32>
    %560 = vector.shape_cast %559 : vector<8xf32> to vector<8x1xf32>
    %561 = vector.shape_cast %22 : vector<1x25xi1> to vector<1x25xi1>
    %562 = vector.broadcast %561 : vector<1x25xi1> to vector<8x25xi1>
    %563 = vector.shape_cast %560 : vector<8x1xf32> to vector<8x1xf32>
    %564 = vector.broadcast %563 : vector<8x1xf32> to vector<8x25xf32>
    %565 = arith.select %562, %564, %554 : vector<8x25xi1>, vector<8x25xf32>
    %cst_135 = arith.constant -1.000000e+30 : f32
    %566 = vector.shape_cast %27 : vector<1x25xi1> to vector<1x25xi1>
    %567 = vector.broadcast %566 : vector<1x25xi1> to vector<8x25xi1>
    %568 = vector.broadcast %cst_135 : f32 to vector<8x25xf32>
    %569 = arith.select %567, %520, %568 : vector<8x25xi1>, vector<8x25xf32>
    %cst_136 = arith.constant dense<0xFF800000> : vector<8xf32>
    %570 = vector.multi_reduction <maximumf>, %569, %cst_136 [1] : vector<8x25xf32> to vector<8xf32>
    %571 = vector.shape_cast %570 : vector<8xf32> to vector<8x1xf32>
    %572 = vector.shape_cast %27 : vector<1x25xi1> to vector<1x25xi1>
    %573 = vector.broadcast %572 : vector<1x25xi1> to vector<8x25xi1>
    %574 = vector.shape_cast %571 : vector<8x1xf32> to vector<8x1xf32>
    %575 = vector.broadcast %574 : vector<8x1xf32> to vector<8x25xf32>
    %576 = arith.select %573, %575, %565 : vector<8x25xi1>, vector<8x25xf32>
    %577 = arith.subf %520, %576 : vector<8x25xf32>
    %578 = math.exp %577 : vector<8x25xf32>
    %cst_137 = arith.constant 0.000000e+00 : f32
    %579 = vector.broadcast %cst_137 : f32 to vector<8x25xf32>
    %cst_138 = arith.constant 0.000000e+00 : f32
    %580 = vector.shape_cast %7 : vector<1x25xi1> to vector<1x25xi1>
    %581 = vector.broadcast %580 : vector<1x25xi1> to vector<8x25xi1>
    %582 = vector.broadcast %cst_138 : f32 to vector<8x25xf32>
    %583 = arith.select %581, %578, %582 : vector<8x25xi1>, vector<8x25xf32>
    %cst_139 = arith.constant dense<0.000000e+00> : vector<8xf32>
    %584 = vector.multi_reduction <add>, %583, %cst_139 [1] : vector<8x25xf32> to vector<8xf32>
    %585 = vector.shape_cast %584 : vector<8xf32> to vector<8x1xf32>
    %586 = vector.shape_cast %7 : vector<1x25xi1> to vector<1x25xi1>
    %587 = vector.broadcast %586 : vector<1x25xi1> to vector<8x25xi1>
    %588 = vector.shape_cast %585 : vector<8x1xf32> to vector<8x1xf32>
    %589 = vector.broadcast %588 : vector<8x1xf32> to vector<8x25xf32>
    %590 = arith.select %587, %589, %579 : vector<8x25xi1>, vector<8x25xf32>
    %cst_140 = arith.constant 0.000000e+00 : f32
    %591 = vector.shape_cast %12 : vector<1x25xi1> to vector<1x25xi1>
    %592 = vector.broadcast %591 : vector<1x25xi1> to vector<8x25xi1>
    %593 = vector.broadcast %cst_140 : f32 to vector<8x25xf32>
    %594 = arith.select %592, %578, %593 : vector<8x25xi1>, vector<8x25xf32>
    %cst_141 = arith.constant dense<0.000000e+00> : vector<8xf32>
    %595 = vector.multi_reduction <add>, %594, %cst_141 [1] : vector<8x25xf32> to vector<8xf32>
    %596 = vector.shape_cast %595 : vector<8xf32> to vector<8x1xf32>
    %597 = vector.shape_cast %12 : vector<1x25xi1> to vector<1x25xi1>
    %598 = vector.broadcast %597 : vector<1x25xi1> to vector<8x25xi1>
    %599 = vector.shape_cast %596 : vector<8x1xf32> to vector<8x1xf32>
    %600 = vector.broadcast %599 : vector<8x1xf32> to vector<8x25xf32>
    %601 = arith.select %598, %600, %590 : vector<8x25xi1>, vector<8x25xf32>
    %cst_142 = arith.constant 0.000000e+00 : f32
    %602 = vector.shape_cast %17 : vector<1x25xi1> to vector<1x25xi1>
    %603 = vector.broadcast %602 : vector<1x25xi1> to vector<8x25xi1>
    %604 = vector.broadcast %cst_142 : f32 to vector<8x25xf32>
    %605 = arith.select %603, %578, %604 : vector<8x25xi1>, vector<8x25xf32>
    %cst_143 = arith.constant dense<0.000000e+00> : vector<8xf32>
    %606 = vector.multi_reduction <add>, %605, %cst_143 [1] : vector<8x25xf32> to vector<8xf32>
    %607 = vector.shape_cast %606 : vector<8xf32> to vector<8x1xf32>
    %608 = vector.shape_cast %17 : vector<1x25xi1> to vector<1x25xi1>
    %609 = vector.broadcast %608 : vector<1x25xi1> to vector<8x25xi1>
    %610 = vector.shape_cast %607 : vector<8x1xf32> to vector<8x1xf32>
    %611 = vector.broadcast %610 : vector<8x1xf32> to vector<8x25xf32>
    %612 = arith.select %609, %611, %601 : vector<8x25xi1>, vector<8x25xf32>
    %cst_144 = arith.constant 0.000000e+00 : f32
    %613 = vector.shape_cast %22 : vector<1x25xi1> to vector<1x25xi1>
    %614 = vector.broadcast %613 : vector<1x25xi1> to vector<8x25xi1>
    %615 = vector.broadcast %cst_144 : f32 to vector<8x25xf32>
    %616 = arith.select %614, %578, %615 : vector<8x25xi1>, vector<8x25xf32>
    %cst_145 = arith.constant dense<0.000000e+00> : vector<8xf32>
    %617 = vector.multi_reduction <add>, %616, %cst_145 [1] : vector<8x25xf32> to vector<8xf32>
    %618 = vector.shape_cast %617 : vector<8xf32> to vector<8x1xf32>
    %619 = vector.shape_cast %22 : vector<1x25xi1> to vector<1x25xi1>
    %620 = vector.broadcast %619 : vector<1x25xi1> to vector<8x25xi1>
    %621 = vector.shape_cast %618 : vector<8x1xf32> to vector<8x1xf32>
    %622 = vector.broadcast %621 : vector<8x1xf32> to vector<8x25xf32>
    %623 = arith.select %620, %622, %612 : vector<8x25xi1>, vector<8x25xf32>
    %cst_146 = arith.constant 0.000000e+00 : f32
    %624 = vector.shape_cast %27 : vector<1x25xi1> to vector<1x25xi1>
    %625 = vector.broadcast %624 : vector<1x25xi1> to vector<8x25xi1>
    %626 = vector.broadcast %cst_146 : f32 to vector<8x25xf32>
    %627 = arith.select %625, %578, %626 : vector<8x25xi1>, vector<8x25xf32>
    %cst_147 = arith.constant dense<0.000000e+00> : vector<8xf32>
    %628 = vector.multi_reduction <add>, %627, %cst_147 [1] : vector<8x25xf32> to vector<8xf32>
    %629 = vector.shape_cast %628 : vector<8xf32> to vector<8x1xf32>
    %630 = vector.shape_cast %27 : vector<1x25xi1> to vector<1x25xi1>
    %631 = vector.broadcast %630 : vector<1x25xi1> to vector<8x25xi1>
    %632 = vector.shape_cast %629 : vector<8x1xf32> to vector<8x1xf32>
    %633 = vector.broadcast %632 : vector<8x1xf32> to vector<8x25xf32>
    %634 = arith.select %631, %633, %623 : vector<8x25xi1>, vector<8x25xf32>
    %635 = tpu.reciprocal %634 {approx = true} : vector<8x25xf32> -> vector<8x25xf32>
    %636 = arith.mulf %578, %635 : vector<8x25xf32>
    %637 = arith.truncf %636 : vector<8x25xf32> to vector<8x25xbf16>
    %cst_148 = arith.constant dense<0.000000e+00> : vector<8x275xf32>
    %638 = tpu.matmul %637, %55, %cst_148 {dimension_numbers = #tpu.dot_dimension_numbers<[1], [0], [0], [1], [0, 0, 1, 1], [], []>} : vector<8x25xbf16>, vector<25x275xbf16>, vector<8x275xf32> -> vector<8x275xf32>
    %639 = arith.mulf %638, %517 : vector<8x275xf32>
    %640 = arith.truncf %639 : vector<8x275xf32> to vector<8x275xbf16>
    %cst_149 = arith.constant dense<0.000000e+00> : vector<8x55xf32>
    %641 = tpu.matmul %640, %56, %cst_149 {dimension_numbers = #tpu.dot_dimension_numbers<[1], [0], [0], [1], [0, 0, 1, 1], [], []>} : vector<8x275xbf16>, vector<275x55xbf16>, vector<8x55xf32> -> vector<8x55xf32>
    %c224_150 = arith.constant 224 : index
    %c256_151 = arith.constant 256 : index
    %642 = vector.load %arg2[%c224_150, %c256_151] : memref<448x1152xbf16, #tpu.memory_space<vmem>>, vector<55x55xbf16>
    %643 = arith.truncf %641 : vector<8x55xf32> to vector<8x55xbf16>
    %cst_152 = arith.constant dense<0.000000e+00> : vector<8x55xf32>
    %644 = tpu.matmul %643, %642, %cst_152 {dimension_numbers = #tpu.dot_dimension_numbers<[1], [0], [0], [1], [0, 0, 1, 1], [], []>} : vector<8x55xbf16>, vector<55x55xbf16>, vector<8x55xf32> -> vector<8x55xf32>
    %c224_153 = arith.constant 224 : index
    %c384_154 = arith.constant 384 : index
    %645 = vector.load %arg2[%c224_153, %c384_154] : memref<448x1152xbf16, #tpu.memory_space<vmem>>, vector<1x55xbf16>
    %646 = arith.extf %645 : vector<1x55xbf16> to vector<1x55xf32>
    %647 = vector.broadcast %646 : vector<1x55xf32> to vector<8x55xf32>
    %648 = arith.addf %644, %647 : vector<8x55xf32>
    %649 = arith.addf %507, %648 : vector<8x55xf32>
    %c256_155 = arith.constant 256 : index
    %c384_156 = arith.constant 384 : index
    %650 = vector.load %arg2[%c256_155, %c384_156] : memref<448x1152xbf16, #tpu.memory_space<vmem>>, vector<1x55xbf16>
    %c272 = arith.constant 272 : index
    %c384_157 = arith.constant 384 : index
    %651 = vector.load %arg2[%c272, %c384_157] : memref<448x1152xbf16, #tpu.memory_space<vmem>>, vector<1x55xbf16>
    %cst_158 = arith.constant 0.000000e+00 : f32
    %652 = vector.broadcast %cst_158 : f32 to vector<8x55xf32>
    %cst_159 = arith.constant 0.000000e+00 : f32
    %653 = vector.shape_cast %33 : vector<1x55xi1> to vector<1x55xi1>
    %654 = vector.broadcast %653 : vector<1x55xi1> to vector<8x55xi1>
    %655 = vector.broadcast %cst_159 : f32 to vector<8x55xf32>
    %656 = arith.select %654, %649, %655 : vector<8x55xi1>, vector<8x55xf32>
    %cst_160 = arith.constant dense<0.000000e+00> : vector<8xf32>
    %657 = vector.multi_reduction <add>, %656, %cst_160 [1] : vector<8x55xf32> to vector<8xf32>
    %658 = vector.shape_cast %657 : vector<8xf32> to vector<8x1xf32>
    %cst_161 = arith.constant 0.0909090936 : f32
    %659 = vector.broadcast %cst_161 : f32 to vector<8x1xf32>
    %660 = arith.mulf %658, %659 : vector<8x1xf32>
    %661 = vector.shape_cast %33 : vector<1x55xi1> to vector<1x55xi1>
    %662 = vector.broadcast %661 : vector<1x55xi1> to vector<8x55xi1>
    %663 = vector.shape_cast %660 : vector<8x1xf32> to vector<8x1xf32>
    %664 = vector.broadcast %663 : vector<8x1xf32> to vector<8x55xf32>
    %665 = arith.select %662, %664, %652 : vector<8x55xi1>, vector<8x55xf32>
    %cst_162 = arith.constant 0.000000e+00 : f32
    %666 = vector.shape_cast %38 : vector<1x55xi1> to vector<1x55xi1>
    %667 = vector.broadcast %666 : vector<1x55xi1> to vector<8x55xi1>
    %668 = vector.broadcast %cst_162 : f32 to vector<8x55xf32>
    %669 = arith.select %667, %649, %668 : vector<8x55xi1>, vector<8x55xf32>
    %cst_163 = arith.constant dense<0.000000e+00> : vector<8xf32>
    %670 = vector.multi_reduction <add>, %669, %cst_163 [1] : vector<8x55xf32> to vector<8xf32>
    %671 = vector.shape_cast %670 : vector<8xf32> to vector<8x1xf32>
    %cst_164 = arith.constant 0.0909090936 : f32
    %672 = vector.broadcast %cst_164 : f32 to vector<8x1xf32>
    %673 = arith.mulf %671, %672 : vector<8x1xf32>
    %674 = vector.shape_cast %38 : vector<1x55xi1> to vector<1x55xi1>
    %675 = vector.broadcast %674 : vector<1x55xi1> to vector<8x55xi1>
    %676 = vector.shape_cast %673 : vector<8x1xf32> to vector<8x1xf32>
    %677 = vector.broadcast %676 : vector<8x1xf32> to vector<8x55xf32>
    %678 = arith.select %675, %677, %665 : vector<8x55xi1>, vector<8x55xf32>
    %cst_165 = arith.constant 0.000000e+00 : f32
    %679 = vector.shape_cast %43 : vector<1x55xi1> to vector<1x55xi1>
    %680 = vector.broadcast %679 : vector<1x55xi1> to vector<8x55xi1>
    %681 = vector.broadcast %cst_165 : f32 to vector<8x55xf32>
    %682 = arith.select %680, %649, %681 : vector<8x55xi1>, vector<8x55xf32>
    %cst_166 = arith.constant dense<0.000000e+00> : vector<8xf32>
    %683 = vector.multi_reduction <add>, %682, %cst_166 [1] : vector<8x55xf32> to vector<8xf32>
    %684 = vector.shape_cast %683 : vector<8xf32> to vector<8x1xf32>
    %cst_167 = arith.constant 0.0909090936 : f32
    %685 = vector.broadcast %cst_167 : f32 to vector<8x1xf32>
    %686 = arith.mulf %684, %685 : vector<8x1xf32>
    %687 = vector.shape_cast %43 : vector<1x55xi1> to vector<1x55xi1>
    %688 = vector.broadcast %687 : vector<1x55xi1> to vector<8x55xi1>
    %689 = vector.shape_cast %686 : vector<8x1xf32> to vector<8x1xf32>
    %690 = vector.broadcast %689 : vector<8x1xf32> to vector<8x55xf32>
    %691 = arith.select %688, %690, %678 : vector<8x55xi1>, vector<8x55xf32>
    %cst_168 = arith.constant 0.000000e+00 : f32
    %692 = vector.shape_cast %48 : vector<1x55xi1> to vector<1x55xi1>
    %693 = vector.broadcast %692 : vector<1x55xi1> to vector<8x55xi1>
    %694 = vector.broadcast %cst_168 : f32 to vector<8x55xf32>
    %695 = arith.select %693, %649, %694 : vector<8x55xi1>, vector<8x55xf32>
    %cst_169 = arith.constant dense<0.000000e+00> : vector<8xf32>
    %696 = vector.multi_reduction <add>, %695, %cst_169 [1] : vector<8x55xf32> to vector<8xf32>
    %697 = vector.shape_cast %696 : vector<8xf32> to vector<8x1xf32>
    %cst_170 = arith.constant 0.0909090936 : f32
    %698 = vector.broadcast %cst_170 : f32 to vector<8x1xf32>
    %699 = arith.mulf %697, %698 : vector<8x1xf32>
    %700 = vector.shape_cast %48 : vector<1x55xi1> to vector<1x55xi1>
    %701 = vector.broadcast %700 : vector<1x55xi1> to vector<8x55xi1>
    %702 = vector.shape_cast %699 : vector<8x1xf32> to vector<8x1xf32>
    %703 = vector.broadcast %702 : vector<8x1xf32> to vector<8x55xf32>
    %704 = arith.select %701, %703, %691 : vector<8x55xi1>, vector<8x55xf32>
    %cst_171 = arith.constant 0.000000e+00 : f32
    %705 = vector.shape_cast %53 : vector<1x55xi1> to vector<1x55xi1>
    %706 = vector.broadcast %705 : vector<1x55xi1> to vector<8x55xi1>
    %707 = vector.broadcast %cst_171 : f32 to vector<8x55xf32>
    %708 = arith.select %706, %649, %707 : vector<8x55xi1>, vector<8x55xf32>
    %cst_172 = arith.constant dense<0.000000e+00> : vector<8xf32>
    %709 = vector.multi_reduction <add>, %708, %cst_172 [1] : vector<8x55xf32> to vector<8xf32>
    %710 = vector.shape_cast %709 : vector<8xf32> to vector<8x1xf32>
    %cst_173 = arith.constant 0.0909090936 : f32
    %711 = vector.broadcast %cst_173 : f32 to vector<8x1xf32>
    %712 = arith.mulf %710, %711 : vector<8x1xf32>
    %713 = vector.shape_cast %53 : vector<1x55xi1> to vector<1x55xi1>
    %714 = vector.broadcast %713 : vector<1x55xi1> to vector<8x55xi1>
    %715 = vector.shape_cast %712 : vector<8x1xf32> to vector<8x1xf32>
    %716 = vector.broadcast %715 : vector<8x1xf32> to vector<8x55xf32>
    %717 = arith.select %714, %716, %704 : vector<8x55xi1>, vector<8x55xf32>
    %718 = arith.subf %649, %717 : vector<8x55xf32>
    %719 = arith.mulf %718, %718 : vector<8x55xf32>
    %cst_174 = arith.constant 0.000000e+00 : f32
    %720 = vector.broadcast %cst_174 : f32 to vector<8x55xf32>
    %cst_175 = arith.constant 0.000000e+00 : f32
    %721 = vector.shape_cast %33 : vector<1x55xi1> to vector<1x55xi1>
    %722 = vector.broadcast %721 : vector<1x55xi1> to vector<8x55xi1>
    %723 = vector.broadcast %cst_175 : f32 to vector<8x55xf32>
    %724 = arith.select %722, %719, %723 : vector<8x55xi1>, vector<8x55xf32>
    %cst_176 = arith.constant dense<0.000000e+00> : vector<8xf32>
    %725 = vector.multi_reduction <add>, %724, %cst_176 [1] : vector<8x55xf32> to vector<8xf32>
    %726 = vector.shape_cast %725 : vector<8xf32> to vector<8x1xf32>
    %cst_177 = arith.constant 0.0909090936 : f32
    %727 = vector.broadcast %cst_177 : f32 to vector<8x1xf32>
    %728 = arith.mulf %726, %727 : vector<8x1xf32>
    %729 = vector.shape_cast %33 : vector<1x55xi1> to vector<1x55xi1>
    %730 = vector.broadcast %729 : vector<1x55xi1> to vector<8x55xi1>
    %731 = vector.shape_cast %728 : vector<8x1xf32> to vector<8x1xf32>
    %732 = vector.broadcast %731 : vector<8x1xf32> to vector<8x55xf32>
    %733 = arith.select %730, %732, %720 : vector<8x55xi1>, vector<8x55xf32>
    %cst_178 = arith.constant 0.000000e+00 : f32
    %734 = vector.shape_cast %38 : vector<1x55xi1> to vector<1x55xi1>
    %735 = vector.broadcast %734 : vector<1x55xi1> to vector<8x55xi1>
    %736 = vector.broadcast %cst_178 : f32 to vector<8x55xf32>
    %737 = arith.select %735, %719, %736 : vector<8x55xi1>, vector<8x55xf32>
    %cst_179 = arith.constant dense<0.000000e+00> : vector<8xf32>
    %738 = vector.multi_reduction <add>, %737, %cst_179 [1] : vector<8x55xf32> to vector<8xf32>
    %739 = vector.shape_cast %738 : vector<8xf32> to vector<8x1xf32>
    %cst_180 = arith.constant 0.0909090936 : f32
    %740 = vector.broadcast %cst_180 : f32 to vector<8x1xf32>
    %741 = arith.mulf %739, %740 : vector<8x1xf32>
    %742 = vector.shape_cast %38 : vector<1x55xi1> to vector<1x55xi1>
    %743 = vector.broadcast %742 : vector<1x55xi1> to vector<8x55xi1>
    %744 = vector.shape_cast %741 : vector<8x1xf32> to vector<8x1xf32>
    %745 = vector.broadcast %744 : vector<8x1xf32> to vector<8x55xf32>
    %746 = arith.select %743, %745, %733 : vector<8x55xi1>, vector<8x55xf32>
    %cst_181 = arith.constant 0.000000e+00 : f32
    %747 = vector.shape_cast %43 : vector<1x55xi1> to vector<1x55xi1>
    %748 = vector.broadcast %747 : vector<1x55xi1> to vector<8x55xi1>
    %749 = vector.broadcast %cst_181 : f32 to vector<8x55xf32>
    %750 = arith.select %748, %719, %749 : vector<8x55xi1>, vector<8x55xf32>
    %cst_182 = arith.constant dense<0.000000e+00> : vector<8xf32>
    %751 = vector.multi_reduction <add>, %750, %cst_182 [1] : vector<8x55xf32> to vector<8xf32>
    %752 = vector.shape_cast %751 : vector<8xf32> to vector<8x1xf32>
    %cst_183 = arith.constant 0.0909090936 : f32
    %753 = vector.broadcast %cst_183 : f32 to vector<8x1xf32>
    %754 = arith.mulf %752, %753 : vector<8x1xf32>
    %755 = vector.shape_cast %43 : vector<1x55xi1> to vector<1x55xi1>
    %756 = vector.broadcast %755 : vector<1x55xi1> to vector<8x55xi1>
    %757 = vector.shape_cast %754 : vector<8x1xf32> to vector<8x1xf32>
    %758 = vector.broadcast %757 : vector<8x1xf32> to vector<8x55xf32>
    %759 = arith.select %756, %758, %746 : vector<8x55xi1>, vector<8x55xf32>
    %cst_184 = arith.constant 0.000000e+00 : f32
    %760 = vector.shape_cast %48 : vector<1x55xi1> to vector<1x55xi1>
    %761 = vector.broadcast %760 : vector<1x55xi1> to vector<8x55xi1>
    %762 = vector.broadcast %cst_184 : f32 to vector<8x55xf32>
    %763 = arith.select %761, %719, %762 : vector<8x55xi1>, vector<8x55xf32>
    %cst_185 = arith.constant dense<0.000000e+00> : vector<8xf32>
    %764 = vector.multi_reduction <add>, %763, %cst_185 [1] : vector<8x55xf32> to vector<8xf32>
    %765 = vector.shape_cast %764 : vector<8xf32> to vector<8x1xf32>
    %cst_186 = arith.constant 0.0909090936 : f32
    %766 = vector.broadcast %cst_186 : f32 to vector<8x1xf32>
    %767 = arith.mulf %765, %766 : vector<8x1xf32>
    %768 = vector.shape_cast %48 : vector<1x55xi1> to vector<1x55xi1>
    %769 = vector.broadcast %768 : vector<1x55xi1> to vector<8x55xi1>
    %770 = vector.shape_cast %767 : vector<8x1xf32> to vector<8x1xf32>
    %771 = vector.broadcast %770 : vector<8x1xf32> to vector<8x55xf32>
    %772 = arith.select %769, %771, %759 : vector<8x55xi1>, vector<8x55xf32>
    %cst_187 = arith.constant 0.000000e+00 : f32
    %773 = vector.shape_cast %53 : vector<1x55xi1> to vector<1x55xi1>
    %774 = vector.broadcast %773 : vector<1x55xi1> to vector<8x55xi1>
    %775 = vector.broadcast %cst_187 : f32 to vector<8x55xf32>
    %776 = arith.select %774, %719, %775 : vector<8x55xi1>, vector<8x55xf32>
    %cst_188 = arith.constant dense<0.000000e+00> : vector<8xf32>
    %777 = vector.multi_reduction <add>, %776, %cst_188 [1] : vector<8x55xf32> to vector<8xf32>
    %778 = vector.shape_cast %777 : vector<8xf32> to vector<8x1xf32>
    %cst_189 = arith.constant 0.0909090936 : f32
    %779 = vector.broadcast %cst_189 : f32 to vector<8x1xf32>
    %780 = arith.mulf %778, %779 : vector<8x1xf32>
    %781 = vector.shape_cast %53 : vector<1x55xi1> to vector<1x55xi1>
    %782 = vector.broadcast %781 : vector<1x55xi1> to vector<8x55xi1>
    %783 = vector.shape_cast %780 : vector<8x1xf32> to vector<8x1xf32>
    %784 = vector.broadcast %783 : vector<8x1xf32> to vector<8x55xf32>
    %785 = arith.select %782, %784, %772 : vector<8x55xi1>, vector<8x55xf32>
    %cst_190 = arith.constant 9.99999974E-6 : f32
    %786 = vector.broadcast %cst_190 : f32 to vector<8x55xf32>
    %787 = arith.addf %785, %786 : vector<8x55xf32>
    %788 = math.rsqrt %787 : vector<8x55xf32>
    %789 = arith.mulf %718, %788 : vector<8x55xf32>
    %790 = arith.extf %650 : vector<1x55xbf16> to vector<1x55xf32>
    %791 = vector.broadcast %790 : vector<1x55xf32> to vector<8x55xf32>
    %792 = arith.mulf %789, %791 : vector<8x55xf32>
    %793 = arith.extf %651 : vector<1x55xbf16> to vector<1x55xf32>
    %794 = vector.broadcast %793 : vector<1x55xf32> to vector<8x55xf32>
    %795 = arith.addf %792, %794 : vector<8x55xf32>
    %c224_191 = arith.constant 224 : index
    %c896_192 = arith.constant 896 : index
    %796 = vector.load %arg2[%c224_191, %c896_192] : memref<448x1152xbf16, #tpu.memory_space<vmem>>, vector<55x160xbf16>
    %797 = arith.truncf %795 : vector<8x55xf32> to vector<8x55xbf16>
    %cst_193 = arith.constant dense<0.000000e+00> : vector<8x160xf32>
    %798 = tpu.matmul %797, %796, %cst_193 {dimension_numbers = #tpu.dot_dimension_numbers<[1], [0], [0], [1], [0, 0, 1, 1], [], []>} : vector<8x55xbf16>, vector<55x160xbf16>, vector<8x160xf32> -> vector<8x160xf32>
    %c288 = arith.constant 288 : index
    %c128_194 = arith.constant 128 : index
    %799 = vector.load %arg2[%c288, %c128_194] : memref<448x1152xbf16, #tpu.memory_space<vmem>>, vector<1x160xbf16>
    %800 = arith.extf %799 : vector<1x160xbf16> to vector<1x160xf32>
    %801 = vector.broadcast %800 : vector<1x160xf32> to vector<8x160xf32>
    %802 = arith.addf %798, %801 : vector<8x160xf32>
    %cst_195 = arith.constant 0.000000e+00 : f32
    %803 = vector.broadcast %cst_195 : f32 to vector<8x160xf32>
    %804 = arith.maximumf %802, %803 : vector<8x160xf32>
    %c224_196 = arith.constant 224 : index
    %c640_197 = arith.constant 640 : index
    %805 = vector.load %arg2[%c224_196, %c640_197] : memref<448x1152xbf16, #tpu.memory_space<vmem>>, vector<160x55xbf16>
    %806 = arith.truncf %804 : vector<8x160xf32> to vector<8x160xbf16>
    %cst_198 = arith.constant dense<0.000000e+00> : vector<8x55xf32>
    %807 = tpu.matmul %806, %805, %cst_198 {dimension_numbers = #tpu.dot_dimension_numbers<[1], [0], [0], [1], [0, 0, 1, 1], [], []>} : vector<8x160xbf16>, vector<160x55xbf16>, vector<8x55xf32> -> vector<8x55xf32>
    %c240 = arith.constant 240 : index
    %c384_199 = arith.constant 384 : index
    %808 = vector.load %arg2[%c240, %c384_199] : memref<448x1152xbf16, #tpu.memory_space<vmem>>, vector<1x55xbf16>
    %809 = arith.extf %808 : vector<1x55xbf16> to vector<1x55xf32>
    %810 = vector.broadcast %809 : vector<1x55xf32> to vector<8x55xf32>
    %811 = arith.addf %807, %810 : vector<8x55xf32>
    %812 = arith.addf %795, %811 : vector<8x55xf32>
    %c288_200 = arith.constant 288 : index
    %c384_201 = arith.constant 384 : index
    %813 = vector.load %arg2[%c288_200, %c384_201] : memref<448x1152xbf16, #tpu.memory_space<vmem>>, vector<1x55xbf16>
    %c288_202 = arith.constant 288 : index
    %c896_203 = arith.constant 896 : index
    %814 = vector.load %arg2[%c288_202, %c896_203] : memref<448x1152xbf16, #tpu.memory_space<vmem>>, vector<1x55xbf16>
    %cst_204 = arith.constant 0.000000e+00 : f32
    %815 = vector.broadcast %cst_204 : f32 to vector<8x55xf32>
    %cst_205 = arith.constant 0.000000e+00 : f32
    %816 = vector.shape_cast %33 : vector<1x55xi1> to vector<1x55xi1>
    %817 = vector.broadcast %816 : vector<1x55xi1> to vector<8x55xi1>
    %818 = vector.broadcast %cst_205 : f32 to vector<8x55xf32>
    %819 = arith.select %817, %812, %818 : vector<8x55xi1>, vector<8x55xf32>
    %cst_206 = arith.constant dense<0.000000e+00> : vector<8xf32>
    %820 = vector.multi_reduction <add>, %819, %cst_206 [1] : vector<8x55xf32> to vector<8xf32>
    %821 = vector.shape_cast %820 : vector<8xf32> to vector<8x1xf32>
    %cst_207 = arith.constant 0.0909090936 : f32
    %822 = vector.broadcast %cst_207 : f32 to vector<8x1xf32>
    %823 = arith.mulf %821, %822 : vector<8x1xf32>
    %824 = vector.shape_cast %33 : vector<1x55xi1> to vector<1x55xi1>
    %825 = vector.broadcast %824 : vector<1x55xi1> to vector<8x55xi1>
    %826 = vector.shape_cast %823 : vector<8x1xf32> to vector<8x1xf32>
    %827 = vector.broadcast %826 : vector<8x1xf32> to vector<8x55xf32>
    %828 = arith.select %825, %827, %815 : vector<8x55xi1>, vector<8x55xf32>
    %cst_208 = arith.constant 0.000000e+00 : f32
    %829 = vector.shape_cast %38 : vector<1x55xi1> to vector<1x55xi1>
    %830 = vector.broadcast %829 : vector<1x55xi1> to vector<8x55xi1>
    %831 = vector.broadcast %cst_208 : f32 to vector<8x55xf32>
    %832 = arith.select %830, %812, %831 : vector<8x55xi1>, vector<8x55xf32>
    %cst_209 = arith.constant dense<0.000000e+00> : vector<8xf32>
    %833 = vector.multi_reduction <add>, %832, %cst_209 [1] : vector<8x55xf32> to vector<8xf32>
    %834 = vector.shape_cast %833 : vector<8xf32> to vector<8x1xf32>
    %cst_210 = arith.constant 0.0909090936 : f32
    %835 = vector.broadcast %cst_210 : f32 to vector<8x1xf32>
    %836 = arith.mulf %834, %835 : vector<8x1xf32>
    %837 = vector.shape_cast %38 : vector<1x55xi1> to vector<1x55xi1>
    %838 = vector.broadcast %837 : vector<1x55xi1> to vector<8x55xi1>
    %839 = vector.shape_cast %836 : vector<8x1xf32> to vector<8x1xf32>
    %840 = vector.broadcast %839 : vector<8x1xf32> to vector<8x55xf32>
    %841 = arith.select %838, %840, %828 : vector<8x55xi1>, vector<8x55xf32>
    %cst_211 = arith.constant 0.000000e+00 : f32
    %842 = vector.shape_cast %43 : vector<1x55xi1> to vector<1x55xi1>
    %843 = vector.broadcast %842 : vector<1x55xi1> to vector<8x55xi1>
    %844 = vector.broadcast %cst_211 : f32 to vector<8x55xf32>
    %845 = arith.select %843, %812, %844 : vector<8x55xi1>, vector<8x55xf32>
    %cst_212 = arith.constant dense<0.000000e+00> : vector<8xf32>
    %846 = vector.multi_reduction <add>, %845, %cst_212 [1] : vector<8x55xf32> to vector<8xf32>
    %847 = vector.shape_cast %846 : vector<8xf32> to vector<8x1xf32>
    %cst_213 = arith.constant 0.0909090936 : f32
    %848 = vector.broadcast %cst_213 : f32 to vector<8x1xf32>
    %849 = arith.mulf %847, %848 : vector<8x1xf32>
    %850 = vector.shape_cast %43 : vector<1x55xi1> to vector<1x55xi1>
    %851 = vector.broadcast %850 : vector<1x55xi1> to vector<8x55xi1>
    %852 = vector.shape_cast %849 : vector<8x1xf32> to vector<8x1xf32>
    %853 = vector.broadcast %852 : vector<8x1xf32> to vector<8x55xf32>
    %854 = arith.select %851, %853, %841 : vector<8x55xi1>, vector<8x55xf32>
    %cst_214 = arith.constant 0.000000e+00 : f32
    %855 = vector.shape_cast %48 : vector<1x55xi1> to vector<1x55xi1>
    %856 = vector.broadcast %855 : vector<1x55xi1> to vector<8x55xi1>
    %857 = vector.broadcast %cst_214 : f32 to vector<8x55xf32>
    %858 = arith.select %856, %812, %857 : vector<8x55xi1>, vector<8x55xf32>
    %cst_215 = arith.constant dense<0.000000e+00> : vector<8xf32>
    %859 = vector.multi_reduction <add>, %858, %cst_215 [1] : vector<8x55xf32> to vector<8xf32>
    %860 = vector.shape_cast %859 : vector<8xf32> to vector<8x1xf32>
    %cst_216 = arith.constant 0.0909090936 : f32
    %861 = vector.broadcast %cst_216 : f32 to vector<8x1xf32>
    %862 = arith.mulf %860, %861 : vector<8x1xf32>
    %863 = vector.shape_cast %48 : vector<1x55xi1> to vector<1x55xi1>
    %864 = vector.broadcast %863 : vector<1x55xi1> to vector<8x55xi1>
    %865 = vector.shape_cast %862 : vector<8x1xf32> to vector<8x1xf32>
    %866 = vector.broadcast %865 : vector<8x1xf32> to vector<8x55xf32>
    %867 = arith.select %864, %866, %854 : vector<8x55xi1>, vector<8x55xf32>
    %cst_217 = arith.constant 0.000000e+00 : f32
    %868 = vector.shape_cast %53 : vector<1x55xi1> to vector<1x55xi1>
    %869 = vector.broadcast %868 : vector<1x55xi1> to vector<8x55xi1>
    %870 = vector.broadcast %cst_217 : f32 to vector<8x55xf32>
    %871 = arith.select %869, %812, %870 : vector<8x55xi1>, vector<8x55xf32>
    %cst_218 = arith.constant dense<0.000000e+00> : vector<8xf32>
    %872 = vector.multi_reduction <add>, %871, %cst_218 [1] : vector<8x55xf32> to vector<8xf32>
    %873 = vector.shape_cast %872 : vector<8xf32> to vector<8x1xf32>
    %cst_219 = arith.constant 0.0909090936 : f32
    %874 = vector.broadcast %cst_219 : f32 to vector<8x1xf32>
    %875 = arith.mulf %873, %874 : vector<8x1xf32>
    %876 = vector.shape_cast %53 : vector<1x55xi1> to vector<1x55xi1>
    %877 = vector.broadcast %876 : vector<1x55xi1> to vector<8x55xi1>
    %878 = vector.shape_cast %875 : vector<8x1xf32> to vector<8x1xf32>
    %879 = vector.broadcast %878 : vector<8x1xf32> to vector<8x55xf32>
    %880 = arith.select %877, %879, %867 : vector<8x55xi1>, vector<8x55xf32>
    %881 = arith.subf %812, %880 : vector<8x55xf32>
    %882 = arith.mulf %881, %881 : vector<8x55xf32>
    %cst_220 = arith.constant 0.000000e+00 : f32
    %883 = vector.broadcast %cst_220 : f32 to vector<8x55xf32>
    %cst_221 = arith.constant 0.000000e+00 : f32
    %884 = vector.shape_cast %33 : vector<1x55xi1> to vector<1x55xi1>
    %885 = vector.broadcast %884 : vector<1x55xi1> to vector<8x55xi1>
    %886 = vector.broadcast %cst_221 : f32 to vector<8x55xf32>
    %887 = arith.select %885, %882, %886 : vector<8x55xi1>, vector<8x55xf32>
    %cst_222 = arith.constant dense<0.000000e+00> : vector<8xf32>
    %888 = vector.multi_reduction <add>, %887, %cst_222 [1] : vector<8x55xf32> to vector<8xf32>
    %889 = vector.shape_cast %888 : vector<8xf32> to vector<8x1xf32>
    %cst_223 = arith.constant 0.0909090936 : f32
    %890 = vector.broadcast %cst_223 : f32 to vector<8x1xf32>
    %891 = arith.mulf %889, %890 : vector<8x1xf32>
    %892 = vector.shape_cast %33 : vector<1x55xi1> to vector<1x55xi1>
    %893 = vector.broadcast %892 : vector<1x55xi1> to vector<8x55xi1>
    %894 = vector.shape_cast %891 : vector<8x1xf32> to vector<8x1xf32>
    %895 = vector.broadcast %894 : vector<8x1xf32> to vector<8x55xf32>
    %896 = arith.select %893, %895, %883 : vector<8x55xi1>, vector<8x55xf32>
    %cst_224 = arith.constant 0.000000e+00 : f32
    %897 = vector.shape_cast %38 : vector<1x55xi1> to vector<1x55xi1>
    %898 = vector.broadcast %897 : vector<1x55xi1> to vector<8x55xi1>
    %899 = vector.broadcast %cst_224 : f32 to vector<8x55xf32>
    %900 = arith.select %898, %882, %899 : vector<8x55xi1>, vector<8x55xf32>
    %cst_225 = arith.constant dense<0.000000e+00> : vector<8xf32>
    %901 = vector.multi_reduction <add>, %900, %cst_225 [1] : vector<8x55xf32> to vector<8xf32>
    %902 = vector.shape_cast %901 : vector<8xf32> to vector<8x1xf32>
    %cst_226 = arith.constant 0.0909090936 : f32
    %903 = vector.broadcast %cst_226 : f32 to vector<8x1xf32>
    %904 = arith.mulf %902, %903 : vector<8x1xf32>
    %905 = vector.shape_cast %38 : vector<1x55xi1> to vector<1x55xi1>
    %906 = vector.broadcast %905 : vector<1x55xi1> to vector<8x55xi1>
    %907 = vector.shape_cast %904 : vector<8x1xf32> to vector<8x1xf32>
    %908 = vector.broadcast %907 : vector<8x1xf32> to vector<8x55xf32>
    %909 = arith.select %906, %908, %896 : vector<8x55xi1>, vector<8x55xf32>
    %cst_227 = arith.constant 0.000000e+00 : f32
    %910 = vector.shape_cast %43 : vector<1x55xi1> to vector<1x55xi1>
    %911 = vector.broadcast %910 : vector<1x55xi1> to vector<8x55xi1>
    %912 = vector.broadcast %cst_227 : f32 to vector<8x55xf32>
    %913 = arith.select %911, %882, %912 : vector<8x55xi1>, vector<8x55xf32>
    %cst_228 = arith.constant dense<0.000000e+00> : vector<8xf32>
    %914 = vector.multi_reduction <add>, %913, %cst_228 [1] : vector<8x55xf32> to vector<8xf32>
    %915 = vector.shape_cast %914 : vector<8xf32> to vector<8x1xf32>
    %cst_229 = arith.constant 0.0909090936 : f32
    %916 = vector.broadcast %cst_229 : f32 to vector<8x1xf32>
    %917 = arith.mulf %915, %916 : vector<8x1xf32>
    %918 = vector.shape_cast %43 : vector<1x55xi1> to vector<1x55xi1>
    %919 = vector.broadcast %918 : vector<1x55xi1> to vector<8x55xi1>
    %920 = vector.shape_cast %917 : vector<8x1xf32> to vector<8x1xf32>
    %921 = vector.broadcast %920 : vector<8x1xf32> to vector<8x55xf32>
    %922 = arith.select %919, %921, %909 : vector<8x55xi1>, vector<8x55xf32>
    %cst_230 = arith.constant 0.000000e+00 : f32
    %923 = vector.shape_cast %48 : vector<1x55xi1> to vector<1x55xi1>
    %924 = vector.broadcast %923 : vector<1x55xi1> to vector<8x55xi1>
    %925 = vector.broadcast %cst_230 : f32 to vector<8x55xf32>
    %926 = arith.select %924, %882, %925 : vector<8x55xi1>, vector<8x55xf32>
    %cst_231 = arith.constant dense<0.000000e+00> : vector<8xf32>
    %927 = vector.multi_reduction <add>, %926, %cst_231 [1] : vector<8x55xf32> to vector<8xf32>
    %928 = vector.shape_cast %927 : vector<8xf32> to vector<8x1xf32>
    %cst_232 = arith.constant 0.0909090936 : f32
    %929 = vector.broadcast %cst_232 : f32 to vector<8x1xf32>
    %930 = arith.mulf %928, %929 : vector<8x1xf32>
    %931 = vector.shape_cast %48 : vector<1x55xi1> to vector<1x55xi1>
    %932 = vector.broadcast %931 : vector<1x55xi1> to vector<8x55xi1>
    %933 = vector.shape_cast %930 : vector<8x1xf32> to vector<8x1xf32>
    %934 = vector.broadcast %933 : vector<8x1xf32> to vector<8x55xf32>
    %935 = arith.select %932, %934, %922 : vector<8x55xi1>, vector<8x55xf32>
    %cst_233 = arith.constant 0.000000e+00 : f32
    %936 = vector.shape_cast %53 : vector<1x55xi1> to vector<1x55xi1>
    %937 = vector.broadcast %936 : vector<1x55xi1> to vector<8x55xi1>
    %938 = vector.broadcast %cst_233 : f32 to vector<8x55xf32>
    %939 = arith.select %937, %882, %938 : vector<8x55xi1>, vector<8x55xf32>
    %cst_234 = arith.constant dense<0.000000e+00> : vector<8xf32>
    %940 = vector.multi_reduction <add>, %939, %cst_234 [1] : vector<8x55xf32> to vector<8xf32>
    %941 = vector.shape_cast %940 : vector<8xf32> to vector<8x1xf32>
    %cst_235 = arith.constant 0.0909090936 : f32
    %942 = vector.broadcast %cst_235 : f32 to vector<8x1xf32>
    %943 = arith.mulf %941, %942 : vector<8x1xf32>
    %944 = vector.shape_cast %53 : vector<1x55xi1> to vector<1x55xi1>
    %945 = vector.broadcast %944 : vector<1x55xi1> to vector<8x55xi1>
    %946 = vector.shape_cast %943 : vector<8x1xf32> to vector<8x1xf32>
    %947 = vector.broadcast %946 : vector<8x1xf32> to vector<8x55xf32>
    %948 = arith.select %945, %947, %935 : vector<8x55xi1>, vector<8x55xf32>
    %cst_236 = arith.constant 9.99999974E-6 : f32
    %949 = vector.broadcast %cst_236 : f32 to vector<8x55xf32>
    %950 = arith.addf %948, %949 : vector<8x55xf32>
    %951 = math.rsqrt %950 : vector<8x55xf32>
    %952 = arith.mulf %881, %951 : vector<8x55xf32>
    %953 = arith.extf %813 : vector<1x55xbf16> to vector<1x55xf32>
    %954 = vector.broadcast %953 : vector<1x55xf32> to vector<8x55xf32>
    %955 = arith.mulf %952, %954 : vector<8x55xf32>
    %956 = arith.extf %814 : vector<1x55xbf16> to vector<1x55xf32>
    %957 = vector.broadcast %956 : vector<1x55xf32> to vector<8x55xf32>
    %958 = arith.addf %955, %957 : vector<8x55xf32>
    %959 = arith.addf %1, %958 : vector<8x55xf32>
    %c288_237 = arith.constant 288 : index
    %c1024 = arith.constant 1024 : index
    %960 = vector.load %arg2[%c288_237, %c1024] : memref<448x1152xbf16, #tpu.memory_space<vmem>>, vector<1x55xbf16>
    %c304 = arith.constant 304 : index
    %c128_238 = arith.constant 128 : index
    %961 = vector.load %arg2[%c304, %c128_238] : memref<448x1152xbf16, #tpu.memory_space<vmem>>, vector<1x55xbf16>
    %cst_239 = arith.constant dense<0.000000e+00> : vector<8xf32>
    %962 = vector.multi_reduction <add>, %959, %cst_239 [1] : vector<8x55xf32> to vector<8xf32>
    %963 = vector.shape_cast %962 : vector<8xf32> to vector<8x1xf32>
    %cst_240 = arith.constant 5.500000e+01 : f32
    %964 = vector.broadcast %cst_240 : f32 to vector<8x1xf32>
    %965 = arith.divf %963, %964 : vector<8x1xf32>
    %966 = vector.broadcast %965 : vector<8x1xf32> to vector<8x55xf32>
    %967 = arith.subf %959, %966 : vector<8x55xf32>
    %968 = arith.mulf %967, %967 : vector<8x55xf32>
    %cst_241 = arith.constant dense<0.000000e+00> : vector<8xf32>
    %969 = vector.multi_reduction <add>, %968, %cst_241 [1] : vector<8x55xf32> to vector<8xf32>
    %970 = vector.shape_cast %969 : vector<8xf32> to vector<8x1xf32>
    %cst_242 = arith.constant 5.500000e+01 : f32
    %971 = vector.broadcast %cst_242 : f32 to vector<8x1xf32>
    %972 = arith.divf %970, %971 : vector<8x1xf32>
    %cst_243 = arith.constant 9.99999974E-6 : f32
    %973 = vector.broadcast %cst_243 : f32 to vector<8x1xf32>
    %974 = arith.addf %972, %973 : vector<8x1xf32>
    %975 = math.rsqrt %974 : vector<8x1xf32>
    %976 = vector.broadcast %975 : vector<8x1xf32> to vector<8x55xf32>
    %977 = arith.mulf %967, %976 : vector<8x55xf32>
    %978 = arith.extf %960 : vector<1x55xbf16> to vector<1x55xf32>
    %979 = vector.broadcast %978 : vector<1x55xf32> to vector<8x55xf32>
    %980 = arith.mulf %977, %979 : vector<8x55xf32>
    %981 = arith.extf %961 : vector<1x55xbf16> to vector<1x55xf32>
    %982 = vector.broadcast %981 : vector<1x55xf32> to vector<8x55xf32>
    %983 = arith.addf %980, %982 : vector<8x55xf32>
    %c304_244 = arith.constant 304 : index
    %c256_245 = arith.constant 256 : index
    %984 = vector.load %arg2[%c304_244, %c256_245] : memref<448x1152xbf16, #tpu.memory_space<vmem>>, vector<55x20xbf16>
    %985 = arith.truncf %983 : vector<8x55xf32> to vector<8x55xbf16>
    %cst_246 = arith.constant dense<0.000000e+00> : vector<8x20xf32>
    %986 = tpu.matmul %985, %984, %cst_246 {dimension_numbers = #tpu.dot_dimension_numbers<[1], [0], [0], [1], [0, 0, 1, 1], [], []>} : vector<8x55xbf16>, vector<55x20xbf16>, vector<8x20xf32> -> vector<8x20xf32>
    %c304_247 = arith.constant 304 : index
    %c384_248 = arith.constant 384 : index
    %987 = vector.load %arg2[%c304_247, %c384_248] : memref<448x1152xbf16, #tpu.memory_space<vmem>>, vector<1x20xbf16>
    %988 = arith.extf %987 : vector<1x20xbf16> to vector<1x20xf32>
    %989 = vector.broadcast %988 : vector<1x20xf32> to vector<8x20xf32>
    %990 = arith.addf %986, %989 : vector<8x20xf32>
    %cst_249 = arith.constant 0.000000e+00 : f32
    %991 = vector.broadcast %cst_249 : f32 to vector<8x20xf32>
    %992 = arith.cmpf ogt, %990, %991 : vector<8x20xf32>
    %cst_250 = arith.constant 0.000000e+00 : f32
    %993 = vector.broadcast %cst_250 : f32 to vector<8x20xf32>
    %994 = arith.minimumf %990, %993 : vector<8x20xf32>
    %995 = math.exp %994 : vector<8x20xf32>
    %cst_251 = arith.constant 1.000000e+00 : f32
    %996 = vector.broadcast %cst_251 : f32 to vector<8x20xf32>
    %997 = arith.subf %995, %996 : vector<8x20xf32>
    %998 = arith.select %992, %990, %997 : vector<8x20xi1>, vector<8x20xf32>
    %999 = vector.extract_strided_slice %0 {offsets = [0, 6], sizes = [8, 19], strides = [1, 1]} : vector<8x128xf32> to vector<8x19xf32>
    %1000 = tpu.concatenate %998, %999 in 1 : vector<8x20xf32>, vector<8x19xf32> -> vector<8x39xf32>
    %c304_252 = arith.constant 304 : index
    %c896_253 = arith.constant 896 : index
    %1001 = vector.load %arg2[%c304_252, %c896_253] : memref<448x1152xbf16, #tpu.memory_space<vmem>>, vector<1x39xbf16>
    %c304_254 = arith.constant 304 : index
    %c1024_255 = arith.constant 1024 : index
    %1002 = vector.load %arg2[%c304_254, %c1024_255] : memref<448x1152xbf16, #tpu.memory_space<vmem>>, vector<1x39xbf16>
    %cst_256 = arith.constant dense<0.000000e+00> : vector<8xf32>
    %1003 = vector.multi_reduction <add>, %1000, %cst_256 [1] : vector<8x39xf32> to vector<8xf32>
    %1004 = vector.shape_cast %1003 : vector<8xf32> to vector<8x1xf32>
    %cst_257 = arith.constant 3.900000e+01 : f32
    %1005 = vector.broadcast %cst_257 : f32 to vector<8x1xf32>
    %1006 = arith.divf %1004, %1005 : vector<8x1xf32>
    %1007 = vector.broadcast %1006 : vector<8x1xf32> to vector<8x39xf32>
    %1008 = arith.subf %1000, %1007 : vector<8x39xf32>
    %1009 = arith.mulf %1008, %1008 : vector<8x39xf32>
    %cst_258 = arith.constant dense<0.000000e+00> : vector<8xf32>
    %1010 = vector.multi_reduction <add>, %1009, %cst_258 [1] : vector<8x39xf32> to vector<8xf32>
    %1011 = vector.shape_cast %1010 : vector<8xf32> to vector<8x1xf32>
    %cst_259 = arith.constant 3.900000e+01 : f32
    %1012 = vector.broadcast %cst_259 : f32 to vector<8x1xf32>
    %1013 = arith.divf %1011, %1012 : vector<8x1xf32>
    %cst_260 = arith.constant 9.99999974E-6 : f32
    %1014 = vector.broadcast %cst_260 : f32 to vector<8x1xf32>
    %1015 = arith.addf %1013, %1014 : vector<8x1xf32>
    %1016 = math.rsqrt %1015 : vector<8x1xf32>
    %1017 = vector.broadcast %1016 : vector<8x1xf32> to vector<8x39xf32>
    %1018 = arith.mulf %1008, %1017 : vector<8x39xf32>
    %1019 = arith.extf %1001 : vector<1x39xbf16> to vector<1x39xf32>
    %1020 = vector.broadcast %1019 : vector<1x39xf32> to vector<8x39xf32>
    %1021 = arith.mulf %1018, %1020 : vector<8x39xf32>
    %1022 = arith.extf %1002 : vector<1x39xbf16> to vector<1x39xf32>
    %1023 = vector.broadcast %1022 : vector<1x39xf32> to vector<8x39xf32>
    %1024 = arith.addf %1021, %1023 : vector<8x39xf32>
    %c320 = arith.constant 320 : index
    %c128_261 = arith.constant 128 : index
    %1025 = vector.load %arg2[%c320, %c128_261] : memref<448x1152xbf16, #tpu.memory_space<vmem>>, vector<39x12xbf16>
    %1026 = arith.truncf %1024 : vector<8x39xf32> to vector<8x39xbf16>
    %cst_262 = arith.constant dense<0.000000e+00> : vector<8x12xf32>
    %1027 = tpu.matmul %1026, %1025, %cst_262 {dimension_numbers = #tpu.dot_dimension_numbers<[1], [0], [0], [1], [0, 0, 1, 1], [], []>} : vector<8x39xbf16>, vector<39x12xbf16>, vector<8x12xf32> -> vector<8x12xf32>
    %c320_263 = arith.constant 320 : index
    %c384_264 = arith.constant 384 : index
    %1028 = vector.load %arg2[%c320_263, %c384_264] : memref<448x1152xbf16, #tpu.memory_space<vmem>>, vector<1x12xbf16>
    %1029 = arith.extf %1028 : vector<1x12xbf16> to vector<1x12xf32>
    %1030 = vector.broadcast %1029 : vector<1x12xf32> to vector<8x12xf32>
    %1031 = arith.addf %1027, %1030 : vector<8x12xf32>
    %cst_265 = arith.constant 0.000000e+00 : f32
    %1032 = vector.broadcast %cst_265 : f32 to vector<8x12xf32>
    %1033 = arith.cmpf ogt, %1031, %1032 : vector<8x12xf32>
    %cst_266 = arith.constant 0.000000e+00 : f32
    %1034 = vector.broadcast %cst_266 : f32 to vector<8x12xf32>
    %1035 = arith.minimumf %1031, %1034 : vector<8x12xf32>
    %1036 = math.exp %1035 : vector<8x12xf32>
    %cst_267 = arith.constant 1.000000e+00 : f32
    %1037 = vector.broadcast %cst_267 : f32 to vector<8x12xf32>
    %1038 = arith.subf %1036, %1037 : vector<8x12xf32>
    %1039 = arith.select %1033, %1031, %1038 : vector<8x12xi1>, vector<8x12xf32>
    %1040 = vector.extract_strided_slice %0 {offsets = [0, 0], sizes = [8, 6], strides = [1, 1]} : vector<8x128xf32> to vector<8x6xf32>
    %1041 = tpu.concatenate %1039, %1040 in 1 : vector<8x12xf32>, vector<8x6xf32> -> vector<8x18xf32>
    %c320_268 = arith.constant 320 : index
    %c896_269 = arith.constant 896 : index
    %1042 = vector.load %arg2[%c320_268, %c896_269] : memref<448x1152xbf16, #tpu.memory_space<vmem>>, vector<1x18xbf16>
    %c320_270 = arith.constant 320 : index
    %c1024_271 = arith.constant 1024 : index
    %1043 = vector.load %arg2[%c320_270, %c1024_271] : memref<448x1152xbf16, #tpu.memory_space<vmem>>, vector<1x18xbf16>
    %cst_272 = arith.constant dense<0.000000e+00> : vector<8xf32>
    %1044 = vector.multi_reduction <add>, %1041, %cst_272 [1] : vector<8x18xf32> to vector<8xf32>
    %1045 = vector.shape_cast %1044 : vector<8xf32> to vector<8x1xf32>
    %cst_273 = arith.constant 1.800000e+01 : f32
    %1046 = vector.broadcast %cst_273 : f32 to vector<8x1xf32>
    %1047 = arith.divf %1045, %1046 : vector<8x1xf32>
    %1048 = vector.broadcast %1047 : vector<8x1xf32> to vector<8x18xf32>
    %1049 = arith.subf %1041, %1048 : vector<8x18xf32>
    %1050 = arith.mulf %1049, %1049 : vector<8x18xf32>
    %cst_274 = arith.constant dense<0.000000e+00> : vector<8xf32>
    %1051 = vector.multi_reduction <add>, %1050, %cst_274 [1] : vector<8x18xf32> to vector<8xf32>
    %1052 = vector.shape_cast %1051 : vector<8xf32> to vector<8x1xf32>
    %cst_275 = arith.constant 1.800000e+01 : f32
    %1053 = vector.broadcast %cst_275 : f32 to vector<8x1xf32>
    %1054 = arith.divf %1052, %1053 : vector<8x1xf32>
    %cst_276 = arith.constant 9.99999974E-6 : f32
    %1055 = vector.broadcast %cst_276 : f32 to vector<8x1xf32>
    %1056 = arith.addf %1054, %1055 : vector<8x1xf32>
    %1057 = math.rsqrt %1056 : vector<8x1xf32>
    %1058 = vector.broadcast %1057 : vector<8x1xf32> to vector<8x18xf32>
    %1059 = arith.mulf %1049, %1058 : vector<8x18xf32>
    %1060 = arith.extf %1042 : vector<1x18xbf16> to vector<1x18xf32>
    %1061 = vector.broadcast %1060 : vector<1x18xf32> to vector<8x18xf32>
    %1062 = arith.mulf %1059, %1061 : vector<8x18xf32>
    %1063 = arith.extf %1043 : vector<1x18xbf16> to vector<1x18xf32>
    %1064 = vector.broadcast %1063 : vector<1x18xf32> to vector<8x18xf32>
    %1065 = arith.addf %1062, %1064 : vector<8x18xf32>
    %c336 = arith.constant 336 : index
    %c384_277 = arith.constant 384 : index
    %1066 = vector.load %arg2[%c336, %c384_277] : memref<448x1152xbf16, #tpu.memory_space<vmem>>, vector<18x128xbf16>
    %1067 = arith.truncf %1065 : vector<8x18xf32> to vector<8x18xbf16>
    %cst_278 = arith.constant dense<0.000000e+00> : vector<8x128xf32>
    %1068 = tpu.matmul %1067, %1066, %cst_278 {dimension_numbers = #tpu.dot_dimension_numbers<[1], [0], [0], [1], [0, 0, 1, 1], [], []>} : vector<8x18xbf16>, vector<18x128xbf16>, vector<8x128xf32> -> vector<8x128xf32>
    %c336_279 = arith.constant 336 : index
    %c768_280 = arith.constant 768 : index
    %1069 = vector.load %arg2[%c336_279, %c768_280] : memref<448x1152xbf16, #tpu.memory_space<vmem>>, vector<1x128xbf16>
    %1070 = arith.extf %1069 : vector<1x128xbf16> to vector<1x128xf32>
    %1071 = vector.broadcast %1070 : vector<1x128xf32> to vector<8x128xf32>
    %1072 = arith.addf %1068, %1071 : vector<8x128xf32>
    %c0_281 = arith.constant 0 : index
    %c0_282 = arith.constant 0 : index
    %1073 = vector.load %arg3[%c0_281, %c0_282] : memref<8x128xf32, #tpu.memory_space<vmem>>, vector<8x128xf32>
    tpu.vector_store %arg3[%c0_281, %c0_282], %1072 {strides = array<i32>} : memref<8x128xf32, #tpu.memory_space<vmem>>, vector<8x128xf32>,
    return
  }
  func.func @transform_0(%arg0: i32) -> (i32, i32) {
    %c0_i32 = arith.constant 0 : i32
    %c0_i32_0 = arith.constant 0 : i32
    return %arg0, %c0_i32 : i32, i32
  }
  func.func @transform_1(%arg0: i32) -> (i32, i32) {
    %c0_i32 = arith.constant 0 : i32
    %c0_i32_0 = arith.constant 0 : i32
    %c0_i32_1 = arith.constant 0 : i32
    return %c0_i32, %c0_i32_0 : i32, i32
  }
  func.func @transform_2(%arg0: i32) -> (i32, i32) {
    %c0_i32 = arith.constant 0 : i32
    %c0_i32_0 = arith.constant 0 : i32
    return %arg0, %c0_i32 : i32, i32
  }
}

module attributes {stable_mosaic.version = 11 : i64} {
  func.func @kernel(%arg0: i32, %arg1: memref<8x128xf32, #tpu.memory_space<vmem>>, %arg2: memref<448x1152xbf16, #tpu.memory_space<vmem>>, %arg3: memref<8x128xf32, #tpu.memory_space<vmem>>) attributes {dimension_semantics = [#tpu.dimension_semantics<parallel>], iteration_bounds = array<i64: 1>, scalar_prefetch = 0 : i64, scratch_operands = 0 : i64, tpu.core_type = #tpu.core_type<tc>, window_params = [{transform_indices = @transform_0, window_bounds = array<i64: 8, 128>}, {pipeline_mode = #tpu.pipeline_mode<synchronous>, transform_indices = @transform_1, window_bounds = array<i64: 448, 1152>}, {transform_indices = @transform_2, window_bounds = array<i64: 8, 128>}]} {
    %c0 = arith.constant 0 : index
    %c0_0 = arith.constant 0 : index
    %0 = vector.load %arg1[%c0, %c0_0] : memref<8x128xf32, #tpu.memory_space<vmem>>, vector<8x128xf32>
    %1 = vector.extract_strided_slice %0 {offsets = [0, 25], sizes = [8, 55], strides = [1, 1]} : vector<8x128xf32> to vector<8x55xf32>
    %2 = tpu.iota {dimensions = array<i32: 1>} : vector<1x25xi32>
    %c0_i32 = arith.constant 0 : i32
    %3 = vector.broadcast %c0_i32 : i32 to vector<1x25xi32>
    %4 = arith.cmpi sge, %2, %3 : vector<1x25xi32>
    %c5_i32 = arith.constant 5 : i32
    %5 = vector.broadcast %c5_i32 : i32 to vector<1x25xi32>
    %6 = arith.cmpi slt, %2, %5 : vector<1x25xi32>
    %7 = arith.andi %4, %6 : vector<1x25xi1>
    %c5_i32_1 = arith.constant 5 : i32
    %8 = vector.broadcast %c5_i32_1 : i32 to vector<1x25xi32>
    %9 = arith.cmpi sge, %2, %8 : vector<1x25xi32>
    %c10_i32 = arith.constant 10 : i32
    %10 = vector.broadcast %c10_i32 : i32 to vector<1x25xi32>
    %11 = arith.cmpi slt, %2, %10 : vector<1x25xi32>
    %12 = arith.andi %9, %11 : vector<1x25xi1>
    %c10_i32_2 = arith.constant 10 : i32
    %13 = vector.broadcast %c10_i32_2 : i32 to vector<1x25xi32>
    %14 = arith.cmpi sge, %2, %13 : vector<1x25xi32>
    %c15_i32 = arith.constant 15 : i32
    %15 = vector.broadcast %c15_i32 : i32 to vector<1x25xi32>
    %16 = arith.cmpi slt, %2, %15 : vector<1x25xi32>
    %17 = arith.andi %14, %16 : vector<1x25xi1>
    %c15_i32_3 = arith.constant 15 : i32
    %18 = vector.broadcast %c15_i32_3 : i32 to vector<1x25xi32>
    %19 = arith.cmpi sge, %2, %18 : vector<1x25xi32>
    %c20_i32 = arith.constant 20 : i32
    %20 = vector.broadcast %c20_i32 : i32 to vector<1x25xi32>
    %21 = arith.cmpi slt, %2, %20 : vector<1x25xi32>
    %22 = arith.andi %19, %21 : vector<1x25xi1>
    %c20_i32_4 = arith.constant 20 : i32
    %23 = vector.broadcast %c20_i32_4 : i32 to vector<1x25xi32>
    %24 = arith.cmpi sge, %2, %23 : vector<1x25xi32>
    %c25_i32 = arith.constant 25 : i32
    %25 = vector.broadcast %c25_i32 : i32 to vector<1x25xi32>
    %26 = arith.cmpi slt, %2, %25 : vector<1x25xi32>
    %27 = arith.andi %24, %26 : vector<1x25xi1>
    %28 = tpu.iota {dimensions = array<i32: 1>} : vector<1x55xi32>
    %c0_i32_5 = arith.constant 0 : i32
    %29 = vector.broadcast %c0_i32_5 : i32 to vector<1x55xi32>
    %30 = arith.cmpi sge, %28, %29 : vector<1x55xi32>
    %c11_i32 = arith.constant 11 : i32
    %31 = vector.broadcast %c11_i32 : i32 to vector<1x55xi32>
    %32 = arith.cmpi slt, %28, %31 : vector<1x55xi32>
    %33 = arith.andi %30, %32 : vector<1x55xi1>
    %c11_i32_6 = arith.constant 11 : i32
    %34 = vector.broadcast %c11_i32_6 : i32 to vector<1x55xi32>
    %35 = arith.cmpi sge, %28, %34 : vector<1x55xi32>
    %c22_i32 = arith.constant 22 : i32
    %36 = vector.broadcast %c22_i32 : i32 to vector<1x55xi32>
    %37 = arith.cmpi slt, %28, %36 : vector<1x55xi32>
    %38 = arith.andi %35, %37 : vector<1x55xi1>
    %c22_i32_7 = arith.constant 22 : i32
    %39 = vector.broadcast %c22_i32_7 : i32 to vector<1x55xi32>
    %40 = arith.cmpi sge, %28, %39 : vector<1x55xi32>
    %c33_i32 = arith.constant 33 : i32
    %41 = vector.broadcast %c33_i32 : i32 to vector<1x55xi32>
    %42 = arith.cmpi slt, %28, %41 : vector<1x55xi32>
    %43 = arith.andi %40, %42 : vector<1x55xi1>
    %c33_i32_8 = arith.constant 33 : i32
    %44 = vector.broadcast %c33_i32_8 : i32 to vector<1x55xi32>
    %45 = arith.cmpi sge, %28, %44 : vector<1x55xi32>
    %c44_i32 = arith.constant 44 : i32
    %46 = vector.broadcast %c44_i32 : i32 to vector<1x55xi32>
    %47 = arith.cmpi slt, %28, %46 : vector<1x55xi32>
    %48 = arith.andi %45, %47 : vector<1x55xi1>
    %c44_i32_9 = arith.constant 44 : i32
    %49 = vector.broadcast %c44_i32_9 : i32 to vector<1x55xi32>
    %50 = arith.cmpi sge, %28, %49 : vector<1x55xi32>
    %c55_i32 = arith.constant 55 : i32
    %51 = vector.broadcast %c55_i32 : i32 to vector<1x55xi32>
    %52 = arith.cmpi slt, %28, %51 : vector<1x55xi32>
    %53 = arith.andi %50, %52 : vector<1x55xi1>
    %c160 = arith.constant 160 : index
    %c0_10 = arith.constant 0 : index
    %54 = vector.load %arg2[%c160, %c0_10] : memref<448x1152xbf16, #tpu.memory_space<vmem>>, vector<275x25xbf16>
    %c160_11 = arith.constant 160 : index
    %c128 = arith.constant 128 : index
    %55 = vector.load %arg2[%c160_11, %c128] : memref<448x1152xbf16, #tpu.memory_space<vmem>>, vector<25x275xbf16>
    %c160_12 = arith.constant 160 : index
    %c512 = arith.constant 512 : index
    %56 = vector.load %arg2[%c160_12, %c512] : memref<448x1152xbf16, #tpu.memory_space<vmem>>, vector<275x55xbf16>
    %c0_13 = arith.constant 0 : index
    %c0_14 = arith.constant 0 : index
    %57 = vector.load %arg2[%c0_13, %c0_14] : memref<448x1152xbf16, #tpu.memory_space<vmem>>, vector<55x1152xbf16>
    %58 = arith.truncf %1 : vector<8x55xf32> to vector<8x55xbf16>
    %cst = arith.constant dense<0.000000e+00> : vector<8x1152xf32>
    %59 = tpu.matmul %58, %57, %cst {dimension_numbers = #tpu.dot_dimension_numbers<[1], [0], [0], [1], [0, 0, 1, 1], [], []>} : vector<8x55xbf16>, vector<55x1152xbf16>, vector<8x1152xf32> -> vector<8x1152xf32>
    %c64 = arith.constant 64 : index
    %c0_15 = arith.constant 0 : index
    %60 = vector.load %arg2[%c64, %c0_15] : memref<448x1152xbf16, #tpu.memory_space<vmem>>, vector<1x1152xbf16>
    %61 = arith.extf %60 : vector<1x1152xbf16> to vector<1x1152xf32>
    %62 = vector.broadcast %61 : vector<1x1152xf32> to vector<8x1152xf32>
    %63 = arith.addf %59, %62 : vector<8x1152xf32>
    %64 = vector.extract_strided_slice %63 {offsets = [0, 0], sizes = [8, 275], strides = [1, 1]} : vector<8x1152xf32> to vector<8x275xf32>
    %65 = vector.extract_strided_slice %63 {offsets = [0, 384], sizes = [8, 275], strides = [1, 1]} : vector<8x1152xf32> to vector<8x275xf32>
    %66 = vector.extract_strided_slice %63 {offsets = [0, 768], sizes = [8, 275], strides = [1, 1]} : vector<8x1152xf32> to vector<8x275xf32>
    %67 = arith.mulf %64, %65 : vector<8x275xf32>
    %68 = arith.truncf %67 : vector<8x275xf32> to vector<8x275xbf16>
    %cst_16 = arith.constant dense<0.000000e+00> : vector<8x25xf32>
    %69 = tpu.matmul %68, %54, %cst_16 {dimension_numbers = #tpu.dot_dimension_numbers<[1], [0], [0], [1], [0, 0, 1, 1], [], []>} : vector<8x275xbf16>, vector<275x25xbf16>, vector<8x25xf32> -> vector<8x25xf32>
    %cst_17 = arith.constant 0.000000e+00 : f32
    %70 = vector.broadcast %cst_17 : f32 to vector<8x25xf32>
    %cst_18 = arith.constant -1.000000e+30 : f32
    %71 = vector.shape_cast %7 : vector<1x25xi1> to vector<1x25xi1>
    %72 = vector.broadcast %71 : vector<1x25xi1> to vector<8x25xi1>
    %73 = vector.broadcast %cst_18 : f32 to vector<8x25xf32>
    %74 = arith.select %72, %69, %73 : vector<8x25xi1>, vector<8x25xf32>
    %cst_19 = arith.constant dense<0xFF800000> : vector<8xf32>
    %75 = vector.multi_reduction <maximumf>, %74, %cst_19 [1] : vector<8x25xf32> to vector<8xf32>
    %76 = vector.shape_cast %75 : vector<8xf32> to vector<8x1xf32>
    %77 = vector.shape_cast %7 : vector<1x25xi1> to vector<1x25xi1>
    %78 = vector.broadcast %77 : vector<1x25xi1> to vector<8x25xi1>
    %79 = vector.shape_cast %76 : vector<8x1xf32> to vector<8x1xf32>
    %80 = vector.broadcast %79 : vector<8x1xf32> to vector<8x25xf32>
    %81 = arith.select %78, %80, %70 : vector<8x25xi1>, vector<8x25xf32>
    %cst_20 = arith.constant -1.000000e+30 : f32
    %82 = vector.shape_cast %12 : vector<1x25xi1> to vector<1x25xi1>
    %83 = vector.broadcast %82 : vector<1x25xi1> to vector<8x25xi1>
    %84 = vector.broadcast %cst_20 : f32 to vector<8x25xf32>
    %85 = arith.select %83, %69, %84 : vector<8x25xi1>, vector<8x25xf32>
    %cst_21 = arith.constant dense<0xFF800000> : vector<8xf32>
    %86 = vector.multi_reduction <maximumf>, %85, %cst_21 [1] : vector<8x25xf32> to vector<8xf32>
    %87 = vector.shape_cast %86 : vector<8xf32> to vector<8x1xf32>
    %88 = vector.shape_cast %12 : vector<1x25xi1> to vector<1x25xi1>
    %89 = vector.broadcast %88 : vector<1x25xi1> to vector<8x25xi1>
    %90 = vector.shape_cast %87 : vector<8x1xf32> to vector<8x1xf32>
    %91 = vector.broadcast %90 : vector<8x1xf32> to vector<8x25xf32>
    %92 = arith.select %89, %91, %81 : vector<8x25xi1>, vector<8x25xf32>
    %cst_22 = arith.constant -1.000000e+30 : f32
    %93 = vector.shape_cast %17 : vector<1x25xi1> to vector<1x25xi1>
    %94 = vector.broadcast %93 : vector<1x25xi1> to vector<8x25xi1>
    %95 = vector.broadcast %cst_22 : f32 to vector<8x25xf32>
    %96 = arith.select %94, %69, %95 : vector<8x25xi1>, vector<8x25xf32>
    %cst_23 = arith.constant dense<0xFF800000> : vector<8xf32>
    %97 = vector.multi_reduction <maximumf>, %96, %cst_23 [1] : vector<8x25xf32> to vector<8xf32>
    %98 = vector.shape_cast %97 : vector<8xf32> to vector<8x1xf32>
    %99 = vector.shape_cast %17 : vector<1x25xi1> to vector<1x25xi1>
    %100 = vector.broadcast %99 : vector<1x25xi1> to vector<8x25xi1>
    %101 = vector.shape_cast %98 : vector<8x1xf32> to vector<8x1xf32>
    %102 = vector.broadcast %101 : vector<8x1xf32> to vector<8x25xf32>
    %103 = arith.select %100, %102, %92 : vector<8x25xi1>, vector<8x25xf32>
    %cst_24 = arith.constant -1.000000e+30 : f32
    %104 = vector.shape_cast %22 : vector<1x25xi1> to vector<1x25xi1>
    %105 = vector.broadcast %104 : vector<1x25xi1> to vector<8x25xi1>
    %106 = vector.broadcast %cst_24 : f32 to vector<8x25xf32>
    %107 = arith.select %105, %69, %106 : vector<8x25xi1>, vector<8x25xf32>
    %cst_25 = arith.constant dense<0xFF800000> : vector<8xf32>
    %108 = vector.multi_reduction <maximumf>, %107, %cst_25 [1] : vector<8x25xf32> to vector<8xf32>
    %109 = vector.shape_cast %108 : vector<8xf32> to vector<8x1xf32>
    %110 = vector.shape_cast %22 : vector<1x25xi1> to vector<1x25xi1>
    %111 = vector.broadcast %110 : vector<1x25xi1> to vector<8x25xi1>
    %112 = vector.shape_cast %109 : vector<8x1xf32> to vector<8x1xf32>
    %113 = vector.broadcast %112 : vector<8x1xf32> to vector<8x25xf32>
    %114 = arith.select %111, %113, %103 : vector<8x25xi1>, vector<8x25xf32>
    %cst_26 = arith.constant -1.000000e+30 : f32
    %115 = vector.shape_cast %27 : vector<1x25xi1> to vector<1x25xi1>
    %116 = vector.broadcast %115 : vector<1x25xi1> to vector<8x25xi1>
    %117 = vector.broadcast %cst_26 : f32 to vector<8x25xf32>
    %118 = arith.select %116, %69, %117 : vector<8x25xi1>, vector<8x25xf32>
    %cst_27 = arith.constant dense<0xFF800000> : vector<8xf32>
    %119 = vector.multi_reduction <maximumf>, %118, %cst_27 [1] : vector<8x25xf32> to vector<8xf32>
    %120 = vector.shape_cast %119 : vector<8xf32> to vector<8x1xf32>
    %121 = vector.shape_cast %27 : vector<1x25xi1> to vector<1x25xi1>
    %122 = vector.broadcast %121 : vector<1x25xi1> to vector<8x25xi1>
    %123 = vector.shape_cast %120 : vector<8x1xf32> to vector<8x1xf32>
    %124 = vector.broadcast %123 : vector<8x1xf32> to vector<8x25xf32>
    %125 = arith.select %122, %124, %114 : vector<8x25xi1>, vector<8x25xf32>
    %126 = arith.subf %69, %125 : vector<8x25xf32>
    %127 = math.exp %126 : vector<8x25xf32>
    %cst_28 = arith.constant 0.000000e+00 : f32
    %128 = vector.broadcast %cst_28 : f32 to vector<8x25xf32>
    %cst_29 = arith.constant 0.000000e+00 : f32
    %129 = vector.shape_cast %7 : vector<1x25xi1> to vector<1x25xi1>
    %130 = vector.broadcast %129 : vector<1x25xi1> to vector<8x25xi1>
    %131 = vector.broadcast %cst_29 : f32 to vector<8x25xf32>
    %132 = arith.select %130, %127, %131 : vector<8x25xi1>, vector<8x25xf32>
    %cst_30 = arith.constant dense<0.000000e+00> : vector<8xf32>
    %133 = vector.multi_reduction <add>, %132, %cst_30 [1] : vector<8x25xf32> to vector<8xf32>
    %134 = vector.shape_cast %133 : vector<8xf32> to vector<8x1xf32>
    %135 = vector.shape_cast %7 : vector<1x25xi1> to vector<1x25xi1>
    %136 = vector.broadcast %135 : vector<1x25xi1> to vector<8x25xi1>
    %137 = vector.shape_cast %134 : vector<8x1xf32> to vector<8x1xf32>
    %138 = vector.broadcast %137 : vector<8x1xf32> to vector<8x25xf32>
    %139 = arith.select %136, %138, %128 : vector<8x25xi1>, vector<8x25xf32>
    %cst_31 = arith.constant 0.000000e+00 : f32
    %140 = vector.shape_cast %12 : vector<1x25xi1> to vector<1x25xi1>
    %141 = vector.broadcast %140 : vector<1x25xi1> to vector<8x25xi1>
    %142 = vector.broadcast %cst_31 : f32 to vector<8x25xf32>
    %143 = arith.select %141, %127, %142 : vector<8x25xi1>, vector<8x25xf32>
    %cst_32 = arith.constant dense<0.000000e+00> : vector<8xf32>
    %144 = vector.multi_reduction <add>, %143, %cst_32 [1] : vector<8x25xf32> to vector<8xf32>
    %145 = vector.shape_cast %144 : vector<8xf32> to vector<8x1xf32>
    %146 = vector.shape_cast %12 : vector<1x25xi1> to vector<1x25xi1>
    %147 = vector.broadcast %146 : vector<1x25xi1> to vector<8x25xi1>
    %148 = vector.shape_cast %145 : vector<8x1xf32> to vector<8x1xf32>
    %149 = vector.broadcast %148 : vector<8x1xf32> to vector<8x25xf32>
    %150 = arith.select %147, %149, %139 : vector<8x25xi1>, vector<8x25xf32>
    %cst_33 = arith.constant 0.000000e+00 : f32
    %151 = vector.shape_cast %17 : vector<1x25xi1> to vector<1x25xi1>
    %152 = vector.broadcast %151 : vector<1x25xi1> to vector<8x25xi1>
    %153 = vector.broadcast %cst_33 : f32 to vector<8x25xf32>
    %154 = arith.select %152, %127, %153 : vector<8x25xi1>, vector<8x25xf32>
    %cst_34 = arith.constant dense<0.000000e+00> : vector<8xf32>
    %155 = vector.multi_reduction <add>, %154, %cst_34 [1] : vector<8x25xf32> to vector<8xf32>
    %156 = vector.shape_cast %155 : vector<8xf32> to vector<8x1xf32>
    %157 = vector.shape_cast %17 : vector<1x25xi1> to vector<1x25xi1>
    %158 = vector.broadcast %157 : vector<1x25xi1> to vector<8x25xi1>
    %159 = vector.shape_cast %156 : vector<8x1xf32> to vector<8x1xf32>
    %160 = vector.broadcast %159 : vector<8x1xf32> to vector<8x25xf32>
    %161 = arith.select %158, %160, %150 : vector<8x25xi1>, vector<8x25xf32>
    %cst_35 = arith.constant 0.000000e+00 : f32
    %162 = vector.shape_cast %22 : vector<1x25xi1> to vector<1x25xi1>
    %163 = vector.broadcast %162 : vector<1x25xi1> to vector<8x25xi1>
    %164 = vector.broadcast %cst_35 : f32 to vector<8x25xf32>
    %165 = arith.select %163, %127, %164 : vector<8x25xi1>, vector<8x25xf32>
    %cst_36 = arith.constant dense<0.000000e+00> : vector<8xf32>
    %166 = vector.multi_reduction <add>, %165, %cst_36 [1] : vector<8x25xf32> to vector<8xf32>
    %167 = vector.shape_cast %166 : vector<8xf32> to vector<8x1xf32>
    %168 = vector.shape_cast %22 : vector<1x25xi1> to vector<1x25xi1>
    %169 = vector.broadcast %168 : vector<1x25xi1> to vector<8x25xi1>
    %170 = vector.shape_cast %167 : vector<8x1xf32> to vector<8x1xf32>
    %171 = vector.broadcast %170 : vector<8x1xf32> to vector<8x25xf32>
    %172 = arith.select %169, %171, %161 : vector<8x25xi1>, vector<8x25xf32>
    %cst_37 = arith.constant 0.000000e+00 : f32
    %173 = vector.shape_cast %27 : vector<1x25xi1> to vector<1x25xi1>
    %174 = vector.broadcast %173 : vector<1x25xi1> to vector<8x25xi1>
    %175 = vector.broadcast %cst_37 : f32 to vector<8x25xf32>
    %176 = arith.select %174, %127, %175 : vector<8x25xi1>, vector<8x25xf32>
    %cst_38 = arith.constant dense<0.000000e+00> : vector<8xf32>
    %177 = vector.multi_reduction <add>, %176, %cst_38 [1] : vector<8x25xf32> to vector<8xf32>
    %178 = vector.shape_cast %177 : vector<8xf32> to vector<8x1xf32>
    %179 = vector.shape_cast %27 : vector<1x25xi1> to vector<1x25xi1>
    %180 = vector.broadcast %179 : vector<1x25xi1> to vector<8x25xi1>
    %181 = vector.shape_cast %178 : vector<8x1xf32> to vector<8x1xf32>
    %182 = vector.broadcast %181 : vector<8x1xf32> to vector<8x25xf32>
    %183 = arith.select %180, %182, %172 : vector<8x25xi1>, vector<8x25xf32>
    %184 = tpu.reciprocal %183 {approx = true} : vector<8x25xf32> -> vector<8x25xf32>
    %185 = arith.mulf %127, %184 : vector<8x25xf32>
    %186 = arith.truncf %185 : vector<8x25xf32> to vector<8x25xbf16>
    %cst_39 = arith.constant dense<0.000000e+00> : vector<8x275xf32>
    %187 = tpu.matmul %186, %55, %cst_39 {dimension_numbers = #tpu.dot_dimension_numbers<[1], [0], [0], [1], [0, 0, 1, 1], [], []>} : vector<8x25xbf16>, vector<25x275xbf16>, vector<8x275xf32> -> vector<8x275xf32>
    %188 = arith.mulf %187, %66 : vector<8x275xf32>
    %189 = arith.truncf %188 : vector<8x275xf32> to vector<8x275xbf16>
    %cst_40 = arith.constant dense<0.000000e+00> : vector<8x55xf32>
    %190 = tpu.matmul %189, %56, %cst_40 {dimension_numbers = #tpu.dot_dimension_numbers<[1], [0], [0], [1], [0, 0, 1, 1], [], []>} : vector<8x275xbf16>, vector<275x55xbf16>, vector<8x55xf32> -> vector<8x55xf32>
    %c160_41 = arith.constant 160 : index
    %c640 = arith.constant 640 : index
    %191 = vector.load %arg2[%c160_41, %c640] : memref<448x1152xbf16, #tpu.memory_space<vmem>>, vector<55x55xbf16>
    %192 = arith.truncf %190 : vector<8x55xf32> to vector<8x55xbf16>
    %cst_42 = arith.constant dense<0.000000e+00> : vector<8x55xf32>
    %193 = tpu.matmul %192, %191, %cst_42 {dimension_numbers = #tpu.dot_dimension_numbers<[1], [0], [0], [1], [0, 0, 1, 1], [], []>} : vector<8x55xbf16>, vector<55x55xbf16>, vector<8x55xf32> -> vector<8x55xf32>
    %c160_43 = arith.constant 160 : index
    %c768 = arith.constant 768 : index
    %194 = vector.load %arg2[%c160_43, %c768] : memref<448x1152xbf16, #tpu.memory_space<vmem>>, vector<1x55xbf16>
    %195 = arith.extf %194 : vector<1x55xbf16> to vector<1x55xf32>
    %196 = vector.broadcast %195 : vector<1x55xf32> to vector<8x55xf32>
    %197 = arith.addf %193, %196 : vector<8x55xf32>
    %198 = arith.addf %1, %197 : vector<8x55xf32>
    %c208 = arith.constant 208 : index
    %c128_44 = arith.constant 128 : index
    %199 = vector.load %arg2[%c208, %c128_44] : memref<448x1152xbf16, #tpu.memory_space<vmem>>, vector<1x55xbf16>
    %c208_45 = arith.constant 208 : index
    %c256 = arith.constant 256 : index
    %200 = vector.load %arg2[%c208_45, %c256] : memref<448x1152xbf16, #tpu.memory_space<vmem>>, vector<1x55xbf16>
    %cst_46 = arith.constant 0.000000e+00 : f32
    %201 = vector.broadcast %cst_46 : f32 to vector<8x55xf32>
    %cst_47 = arith.constant 0.000000e+00 : f32
    %202 = vector.shape_cast %33 : vector<1x55xi1> to vector<1x55xi1>
    %203 = vector.broadcast %202 : vector<1x55xi1> to vector<8x55xi1>
    %204 = vector.broadcast %cst_47 : f32 to vector<8x55xf32>
    %205 = arith.select %203, %198, %204 : vector<8x55xi1>, vector<8x55xf32>
    %cst_48 = arith.constant dense<0.000000e+00> : vector<8xf32>
    %206 = vector.multi_reduction <add>, %205, %cst_48 [1] : vector<8x55xf32> to vector<8xf32>
    %207 = vector.shape_cast %206 : vector<8xf32> to vector<8x1xf32>
    %cst_49 = arith.constant 0.0909090936 : f32
    %208 = vector.broadcast %cst_49 : f32 to vector<8x1xf32>
    %209 = arith.mulf %207, %208 : vector<8x1xf32>
    %210 = vector.shape_cast %33 : vector<1x55xi1> to vector<1x55xi1>
    %211 = vector.broadcast %210 : vector<1x55xi1> to vector<8x55xi1>
    %212 = vector.shape_cast %209 : vector<8x1xf32> to vector<8x1xf32>
    %213 = vector.broadcast %212 : vector<8x1xf32> to vector<8x55xf32>
    %214 = arith.select %211, %213, %201 : vector<8x55xi1>, vector<8x55xf32>
    %cst_50 = arith.constant 0.000000e+00 : f32
    %215 = vector.shape_cast %38 : vector<1x55xi1> to vector<1x55xi1>
    %216 = vector.broadcast %215 : vector<1x55xi1> to vector<8x55xi1>
    %217 = vector.broadcast %cst_50 : f32 to vector<8x55xf32>
    %218 = arith.select %216, %198, %217 : vector<8x55xi1>, vector<8x55xf32>
    %cst_51 = arith.constant dense<0.000000e+00> : vector<8xf32>
    %219 = vector.multi_reduction <add>, %218, %cst_51 [1] : vector<8x55xf32> to vector<8xf32>
    %220 = vector.shape_cast %219 : vector<8xf32> to vector<8x1xf32>
    %cst_52 = arith.constant 0.0909090936 : f32
    %221 = vector.broadcast %cst_52 : f32 to vector<8x1xf32>
    %222 = arith.mulf %220, %221 : vector<8x1xf32>
    %223 = vector.shape_cast %38 : vector<1x55xi1> to vector<1x55xi1>
    %224 = vector.broadcast %223 : vector<1x55xi1> to vector<8x55xi1>
    %225 = vector.shape_cast %222 : vector<8x1xf32> to vector<8x1xf32>
    %226 = vector.broadcast %225 : vector<8x1xf32> to vector<8x55xf32>
    %227 = arith.select %224, %226, %214 : vector<8x55xi1>, vector<8x55xf32>
    %cst_53 = arith.constant 0.000000e+00 : f32
    %228 = vector.shape_cast %43 : vector<1x55xi1> to vector<1x55xi1>
    %229 = vector.broadcast %228 : vector<1x55xi1> to vector<8x55xi1>
    %230 = vector.broadcast %cst_53 : f32 to vector<8x55xf32>
    %231 = arith.select %229, %198, %230 : vector<8x55xi1>, vector<8x55xf32>
    %cst_54 = arith.constant dense<0.000000e+00> : vector<8xf32>
    %232 = vector.multi_reduction <add>, %231, %cst_54 [1] : vector<8x55xf32> to vector<8xf32>
    %233 = vector.shape_cast %232 : vector<8xf32> to vector<8x1xf32>
    %cst_55 = arith.constant 0.0909090936 : f32
    %234 = vector.broadcast %cst_55 : f32 to vector<8x1xf32>
    %235 = arith.mulf %233, %234 : vector<8x1xf32>
    %236 = vector.shape_cast %43 : vector<1x55xi1> to vector<1x55xi1>
    %237 = vector.broadcast %236 : vector<1x55xi1> to vector<8x55xi1>
    %238 = vector.shape_cast %235 : vector<8x1xf32> to vector<8x1xf32>
    %239 = vector.broadcast %238 : vector<8x1xf32> to vector<8x55xf32>
    %240 = arith.select %237, %239, %227 : vector<8x55xi1>, vector<8x55xf32>
    %cst_56 = arith.constant 0.000000e+00 : f32
    %241 = vector.shape_cast %48 : vector<1x55xi1> to vector<1x55xi1>
    %242 = vector.broadcast %241 : vector<1x55xi1> to vector<8x55xi1>
    %243 = vector.broadcast %cst_56 : f32 to vector<8x55xf32>
    %244 = arith.select %242, %198, %243 : vector<8x55xi1>, vector<8x55xf32>
    %cst_57 = arith.constant dense<0.000000e+00> : vector<8xf32>
    %245 = vector.multi_reduction <add>, %244, %cst_57 [1] : vector<8x55xf32> to vector<8xf32>
    %246 = vector.shape_cast %245 : vector<8xf32> to vector<8x1xf32>
    %cst_58 = arith.constant 0.0909090936 : f32
    %247 = vector.broadcast %cst_58 : f32 to vector<8x1xf32>
    %248 = arith.mulf %246, %247 : vector<8x1xf32>
    %249 = vector.shape_cast %48 : vector<1x55xi1> to vector<1x55xi1>
    %250 = vector.broadcast %249 : vector<1x55xi1> to vector<8x55xi1>
    %251 = vector.shape_cast %248 : vector<8x1xf32> to vector<8x1xf32>
    %252 = vector.broadcast %251 : vector<8x1xf32> to vector<8x55xf32>
    %253 = arith.select %250, %252, %240 : vector<8x55xi1>, vector<8x55xf32>
    %cst_59 = arith.constant 0.000000e+00 : f32
    %254 = vector.shape_cast %53 : vector<1x55xi1> to vector<1x55xi1>
    %255 = vector.broadcast %254 : vector<1x55xi1> to vector<8x55xi1>
    %256 = vector.broadcast %cst_59 : f32 to vector<8x55xf32>
    %257 = arith.select %255, %198, %256 : vector<8x55xi1>, vector<8x55xf32>
    %cst_60 = arith.constant dense<0.000000e+00> : vector<8xf32>
    %258 = vector.multi_reduction <add>, %257, %cst_60 [1] : vector<8x55xf32> to vector<8xf32>
    %259 = vector.shape_cast %258 : vector<8xf32> to vector<8x1xf32>
    %cst_61 = arith.constant 0.0909090936 : f32
    %260 = vector.broadcast %cst_61 : f32 to vector<8x1xf32>
    %261 = arith.mulf %259, %260 : vector<8x1xf32>
    %262 = vector.shape_cast %53 : vector<1x55xi1> to vector<1x55xi1>
    %263 = vector.broadcast %262 : vector<1x55xi1> to vector<8x55xi1>
    %264 = vector.shape_cast %261 : vector<8x1xf32> to vector<8x1xf32>
    %265 = vector.broadcast %264 : vector<8x1xf32> to vector<8x55xf32>
    %266 = arith.select %263, %265, %253 : vector<8x55xi1>, vector<8x55xf32>
    %267 = arith.subf %198, %266 : vector<8x55xf32>
    %268 = arith.mulf %267, %267 : vector<8x55xf32>
    %cst_62 = arith.constant 0.000000e+00 : f32
    %269 = vector.broadcast %cst_62 : f32 to vector<8x55xf32>
    %cst_63 = arith.constant 0.000000e+00 : f32
    %270 = vector.shape_cast %33 : vector<1x55xi1> to vector<1x55xi1>
    %271 = vector.broadcast %270 : vector<1x55xi1> to vector<8x55xi1>
    %272 = vector.broadcast %cst_63 : f32 to vector<8x55xf32>
    %273 = arith.select %271, %268, %272 : vector<8x55xi1>, vector<8x55xf32>
    %cst_64 = arith.constant dense<0.000000e+00> : vector<8xf32>
    %274 = vector.multi_reduction <add>, %273, %cst_64 [1] : vector<8x55xf32> to vector<8xf32>
    %275 = vector.shape_cast %274 : vector<8xf32> to vector<8x1xf32>
    %cst_65 = arith.constant 0.0909090936 : f32
    %276 = vector.broadcast %cst_65 : f32 to vector<8x1xf32>
    %277 = arith.mulf %275, %276 : vector<8x1xf32>
    %278 = vector.shape_cast %33 : vector<1x55xi1> to vector<1x55xi1>
    %279 = vector.broadcast %278 : vector<1x55xi1> to vector<8x55xi1>
    %280 = vector.shape_cast %277 : vector<8x1xf32> to vector<8x1xf32>
    %281 = vector.broadcast %280 : vector<8x1xf32> to vector<8x55xf32>
    %282 = arith.select %279, %281, %269 : vector<8x55xi1>, vector<8x55xf32>
    %cst_66 = arith.constant 0.000000e+00 : f32
    %283 = vector.shape_cast %38 : vector<1x55xi1> to vector<1x55xi1>
    %284 = vector.broadcast %283 : vector<1x55xi1> to vector<8x55xi1>
    %285 = vector.broadcast %cst_66 : f32 to vector<8x55xf32>
    %286 = arith.select %284, %268, %285 : vector<8x55xi1>, vector<8x55xf32>
    %cst_67 = arith.constant dense<0.000000e+00> : vector<8xf32>
    %287 = vector.multi_reduction <add>, %286, %cst_67 [1] : vector<8x55xf32> to vector<8xf32>
    %288 = vector.shape_cast %287 : vector<8xf32> to vector<8x1xf32>
    %cst_68 = arith.constant 0.0909090936 : f32
    %289 = vector.broadcast %cst_68 : f32 to vector<8x1xf32>
    %290 = arith.mulf %288, %289 : vector<8x1xf32>
    %291 = vector.shape_cast %38 : vector<1x55xi1> to vector<1x55xi1>
    %292 = vector.broadcast %291 : vector<1x55xi1> to vector<8x55xi1>
    %293 = vector.shape_cast %290 : vector<8x1xf32> to vector<8x1xf32>
    %294 = vector.broadcast %293 : vector<8x1xf32> to vector<8x55xf32>
    %295 = arith.select %292, %294, %282 : vector<8x55xi1>, vector<8x55xf32>
    %cst_69 = arith.constant 0.000000e+00 : f32
    %296 = vector.shape_cast %43 : vector<1x55xi1> to vector<1x55xi1>
    %297 = vector.broadcast %296 : vector<1x55xi1> to vector<8x55xi1>
    %298 = vector.broadcast %cst_69 : f32 to vector<8x55xf32>
    %299 = arith.select %297, %268, %298 : vector<8x55xi1>, vector<8x55xf32>
    %cst_70 = arith.constant dense<0.000000e+00> : vector<8xf32>
    %300 = vector.multi_reduction <add>, %299, %cst_70 [1] : vector<8x55xf32> to vector<8xf32>
    %301 = vector.shape_cast %300 : vector<8xf32> to vector<8x1xf32>
    %cst_71 = arith.constant 0.0909090936 : f32
    %302 = vector.broadcast %cst_71 : f32 to vector<8x1xf32>
    %303 = arith.mulf %301, %302 : vector<8x1xf32>
    %304 = vector.shape_cast %43 : vector<1x55xi1> to vector<1x55xi1>
    %305 = vector.broadcast %304 : vector<1x55xi1> to vector<8x55xi1>
    %306 = vector.shape_cast %303 : vector<8x1xf32> to vector<8x1xf32>
    %307 = vector.broadcast %306 : vector<8x1xf32> to vector<8x55xf32>
    %308 = arith.select %305, %307, %295 : vector<8x55xi1>, vector<8x55xf32>
    %cst_72 = arith.constant 0.000000e+00 : f32
    %309 = vector.shape_cast %48 : vector<1x55xi1> to vector<1x55xi1>
    %310 = vector.broadcast %309 : vector<1x55xi1> to vector<8x55xi1>
    %311 = vector.broadcast %cst_72 : f32 to vector<8x55xf32>
    %312 = arith.select %310, %268, %311 : vector<8x55xi1>, vector<8x55xf32>
    %cst_73 = arith.constant dense<0.000000e+00> : vector<8xf32>
    %313 = vector.multi_reduction <add>, %312, %cst_73 [1] : vector<8x55xf32> to vector<8xf32>
    %314 = vector.shape_cast %313 : vector<8xf32> to vector<8x1xf32>
    %cst_74 = arith.constant 0.0909090936 : f32
    %315 = vector.broadcast %cst_74 : f32 to vector<8x1xf32>
    %316 = arith.mulf %314, %315 : vector<8x1xf32>
    %317 = vector.shape_cast %48 : vector<1x55xi1> to vector<1x55xi1>
    %318 = vector.broadcast %317 : vector<1x55xi1> to vector<8x55xi1>
    %319 = vector.shape_cast %316 : vector<8x1xf32> to vector<8x1xf32>
    %320 = vector.broadcast %319 : vector<8x1xf32> to vector<8x55xf32>
    %321 = arith.select %318, %320, %308 : vector<8x55xi1>, vector<8x55xf32>
    %cst_75 = arith.constant 0.000000e+00 : f32
    %322 = vector.shape_cast %53 : vector<1x55xi1> to vector<1x55xi1>
    %323 = vector.broadcast %322 : vector<1x55xi1> to vector<8x55xi1>
    %324 = vector.broadcast %cst_75 : f32 to vector<8x55xf32>
    %325 = arith.select %323, %268, %324 : vector<8x55xi1>, vector<8x55xf32>
    %cst_76 = arith.constant dense<0.000000e+00> : vector<8xf32>
    %326 = vector.multi_reduction <add>, %325, %cst_76 [1] : vector<8x55xf32> to vector<8xf32>
    %327 = vector.shape_cast %326 : vector<8xf32> to vector<8x1xf32>
    %cst_77 = arith.constant 0.0909090936 : f32
    %328 = vector.broadcast %cst_77 : f32 to vector<8x1xf32>
    %329 = arith.mulf %327, %328 : vector<8x1xf32>
    %330 = vector.shape_cast %53 : vector<1x55xi1> to vector<1x55xi1>
    %331 = vector.broadcast %330 : vector<1x55xi1> to vector<8x55xi1>
    %332 = vector.shape_cast %329 : vector<8x1xf32> to vector<8x1xf32>
    %333 = vector.broadcast %332 : vector<8x1xf32> to vector<8x55xf32>
    %334 = arith.select %331, %333, %321 : vector<8x55xi1>, vector<8x55xf32>
    %cst_78 = arith.constant 9.99999974E-6 : f32
    %335 = vector.broadcast %cst_78 : f32 to vector<8x55xf32>
    %336 = arith.addf %334, %335 : vector<8x55xf32>
    %337 = math.rsqrt %336 : vector<8x55xf32>
    %338 = arith.mulf %267, %337 : vector<8x55xf32>
    %339 = arith.extf %199 : vector<1x55xbf16> to vector<1x55xf32>
    %340 = vector.broadcast %339 : vector<1x55xf32> to vector<8x55xf32>
    %341 = arith.mulf %338, %340 : vector<8x55xf32>
    %342 = arith.extf %200 : vector<1x55xbf16> to vector<1x55xf32>
    %343 = vector.broadcast %342 : vector<1x55xf32> to vector<8x55xf32>
    %344 = arith.addf %341, %343 : vector<8x55xf32>
    %c160_79 = arith.constant 160 : index
    %c896 = arith.constant 896 : index
    %345 = vector.load %arg2[%c160_79, %c896] : memref<448x1152xbf16, #tpu.memory_space<vmem>>, vector<55x160xbf16>
    %346 = arith.truncf %344 : vector<8x55xf32> to vector<8x55xbf16>
    %cst_80 = arith.constant dense<0.000000e+00> : vector<8x160xf32>
    %347 = tpu.matmul %346, %345, %cst_80 {dimension_numbers = #tpu.dot_dimension_numbers<[1], [0], [0], [1], [0, 0, 1, 1], [], []>} : vector<8x55xbf16>, vector<55x160xbf16>, vector<8x160xf32> -> vector<8x160xf32>
    %c192 = arith.constant 192 : index
    %c128_81 = arith.constant 128 : index
    %348 = vector.load %arg2[%c192, %c128_81] : memref<448x1152xbf16, #tpu.memory_space<vmem>>, vector<1x160xbf16>
    %349 = arith.extf %348 : vector<1x160xbf16> to vector<1x160xf32>
    %350 = vector.broadcast %349 : vector<1x160xf32> to vector<8x160xf32>
    %351 = arith.addf %347, %350 : vector<8x160xf32>
    %cst_82 = arith.constant 0.000000e+00 : f32
    %352 = vector.broadcast %cst_82 : f32 to vector<8x160xf32>
    %353 = arith.maximumf %351, %352 : vector<8x160xf32>
    %c176 = arith.constant 176 : index
    %c768_83 = arith.constant 768 : index
    %354 = vector.load %arg2[%c176, %c768_83] : memref<448x1152xbf16, #tpu.memory_space<vmem>>, vector<160x55xbf16>
    %355 = arith.truncf %353 : vector<8x160xf32> to vector<8x160xbf16>
    %cst_84 = arith.constant dense<0.000000e+00> : vector<8x55xf32>
    %356 = tpu.matmul %355, %354, %cst_84 {dimension_numbers = #tpu.dot_dimension_numbers<[1], [0], [0], [1], [0, 0, 1, 1], [], []>} : vector<8x160xbf16>, vector<160x55xbf16>, vector<8x55xf32> -> vector<8x55xf32>
    %c192_85 = arith.constant 192 : index
    %c384 = arith.constant 384 : index
    %357 = vector.load %arg2[%c192_85, %c384] : memref<448x1152xbf16, #tpu.memory_space<vmem>>, vector<1x55xbf16>
    %358 = arith.extf %357 : vector<1x55xbf16> to vector<1x55xf32>
    %359 = vector.broadcast %358 : vector<1x55xf32> to vector<8x55xf32>
    %360 = arith.addf %356, %359 : vector<8x55xf32>
    %361 = arith.addf %344, %360 : vector<8x55xf32>
    %c208_86 = arith.constant 208 : index
    %c384_87 = arith.constant 384 : index
    %362 = vector.load %arg2[%c208_86, %c384_87] : memref<448x1152xbf16, #tpu.memory_space<vmem>>, vector<1x55xbf16>
    %c224 = arith.constant 224 : index
    %c128_88 = arith.constant 128 : index
    %363 = vector.load %arg2[%c224, %c128_88] : memref<448x1152xbf16, #tpu.memory_space<vmem>>, vector<1x55xbf16>
    %cst_89 = arith.constant 0.000000e+00 : f32
    %364 = vector.broadcast %cst_89 : f32 to vector<8x55xf32>
    %cst_90 = arith.constant 0.000000e+00 : f32
    %365 = vector.shape_cast %33 : vector<1x55xi1> to vector<1x55xi1>
    %366 = vector.broadcast %365 : vector<1x55xi1> to vector<8x55xi1>
    %367 = vector.broadcast %cst_90 : f32 to vector<8x55xf32>
    %368 = arith.select %366, %361, %367 : vector<8x55xi1>, vector<8x55xf32>
    %cst_91 = arith.constant dense<0.000000e+00> : vector<8xf32>
    %369 = vector.multi_reduction <add>, %368, %cst_91 [1] : vector<8x55xf32> to vector<8xf32>
    %370 = vector.shape_cast %369 : vector<8xf32> to vector<8x1xf32>
    %cst_92 = arith.constant 0.0909090936 : f32
    %371 = vector.broadcast %cst_92 : f32 to vector<8x1xf32>
    %372 = arith.mulf %370, %371 : vector<8x1xf32>
    %373 = vector.shape_cast %33 : vector<1x55xi1> to vector<1x55xi1>
    %374 = vector.broadcast %373 : vector<1x55xi1> to vector<8x55xi1>
    %375 = vector.shape_cast %372 : vector<8x1xf32> to vector<8x1xf32>
    %376 = vector.broadcast %375 : vector<8x1xf32> to vector<8x55xf32>
    %377 = arith.select %374, %376, %364 : vector<8x55xi1>, vector<8x55xf32>
    %cst_93 = arith.constant 0.000000e+00 : f32
    %378 = vector.shape_cast %38 : vector<1x55xi1> to vector<1x55xi1>
    %379 = vector.broadcast %378 : vector<1x55xi1> to vector<8x55xi1>
    %380 = vector.broadcast %cst_93 : f32 to vector<8x55xf32>
    %381 = arith.select %379, %361, %380 : vector<8x55xi1>, vector<8x55xf32>
    %cst_94 = arith.constant dense<0.000000e+00> : vector<8xf32>
    %382 = vector.multi_reduction <add>, %381, %cst_94 [1] : vector<8x55xf32> to vector<8xf32>
    %383 = vector.shape_cast %382 : vector<8xf32> to vector<8x1xf32>
    %cst_95 = arith.constant 0.0909090936 : f32
    %384 = vector.broadcast %cst_95 : f32 to vector<8x1xf32>
    %385 = arith.mulf %383, %384 : vector<8x1xf32>
    %386 = vector.shape_cast %38 : vector<1x55xi1> to vector<1x55xi1>
    %387 = vector.broadcast %386 : vector<1x55xi1> to vector<8x55xi1>
    %388 = vector.shape_cast %385 : vector<8x1xf32> to vector<8x1xf32>
    %389 = vector.broadcast %388 : vector<8x1xf32> to vector<8x55xf32>
    %390 = arith.select %387, %389, %377 : vector<8x55xi1>, vector<8x55xf32>
    %cst_96 = arith.constant 0.000000e+00 : f32
    %391 = vector.shape_cast %43 : vector<1x55xi1> to vector<1x55xi1>
    %392 = vector.broadcast %391 : vector<1x55xi1> to vector<8x55xi1>
    %393 = vector.broadcast %cst_96 : f32 to vector<8x55xf32>
    %394 = arith.select %392, %361, %393 : vector<8x55xi1>, vector<8x55xf32>
    %cst_97 = arith.constant dense<0.000000e+00> : vector<8xf32>
    %395 = vector.multi_reduction <add>, %394, %cst_97 [1] : vector<8x55xf32> to vector<8xf32>
    %396 = vector.shape_cast %395 : vector<8xf32> to vector<8x1xf32>
    %cst_98 = arith.constant 0.0909090936 : f32
    %397 = vector.broadcast %cst_98 : f32 to vector<8x1xf32>
    %398 = arith.mulf %396, %397 : vector<8x1xf32>
    %399 = vector.shape_cast %43 : vector<1x55xi1> to vector<1x55xi1>
    %400 = vector.broadcast %399 : vector<1x55xi1> to vector<8x55xi1>
    %401 = vector.shape_cast %398 : vector<8x1xf32> to vector<8x1xf32>
    %402 = vector.broadcast %401 : vector<8x1xf32> to vector<8x55xf32>
    %403 = arith.select %400, %402, %390 : vector<8x55xi1>, vector<8x55xf32>
    %cst_99 = arith.constant 0.000000e+00 : f32
    %404 = vector.shape_cast %48 : vector<1x55xi1> to vector<1x55xi1>
    %405 = vector.broadcast %404 : vector<1x55xi1> to vector<8x55xi1>
    %406 = vector.broadcast %cst_99 : f32 to vector<8x55xf32>
    %407 = arith.select %405, %361, %406 : vector<8x55xi1>, vector<8x55xf32>
    %cst_100 = arith.constant dense<0.000000e+00> : vector<8xf32>
    %408 = vector.multi_reduction <add>, %407, %cst_100 [1] : vector<8x55xf32> to vector<8xf32>
    %409 = vector.shape_cast %408 : vector<8xf32> to vector<8x1xf32>
    %cst_101 = arith.constant 0.0909090936 : f32
    %410 = vector.broadcast %cst_101 : f32 to vector<8x1xf32>
    %411 = arith.mulf %409, %410 : vector<8x1xf32>
    %412 = vector.shape_cast %48 : vector<1x55xi1> to vector<1x55xi1>
    %413 = vector.broadcast %412 : vector<1x55xi1> to vector<8x55xi1>
    %414 = vector.shape_cast %411 : vector<8x1xf32> to vector<8x1xf32>
    %415 = vector.broadcast %414 : vector<8x1xf32> to vector<8x55xf32>
    %416 = arith.select %413, %415, %403 : vector<8x55xi1>, vector<8x55xf32>
    %cst_102 = arith.constant 0.000000e+00 : f32
    %417 = vector.shape_cast %53 : vector<1x55xi1> to vector<1x55xi1>
    %418 = vector.broadcast %417 : vector<1x55xi1> to vector<8x55xi1>
    %419 = vector.broadcast %cst_102 : f32 to vector<8x55xf32>
    %420 = arith.select %418, %361, %419 : vector<8x55xi1>, vector<8x55xf32>
    %cst_103 = arith.constant dense<0.000000e+00> : vector<8xf32>
    %421 = vector.multi_reduction <add>, %420, %cst_103 [1] : vector<8x55xf32> to vector<8xf32>
    %422 = vector.shape_cast %421 : vector<8xf32> to vector<8x1xf32>
    %cst_104 = arith.constant 0.0909090936 : f32
    %423 = vector.broadcast %cst_104 : f32 to vector<8x1xf32>
    %424 = arith.mulf %422, %423 : vector<8x1xf32>
    %425 = vector.shape_cast %53 : vector<1x55xi1> to vector<1x55xi1>
    %426 = vector.broadcast %425 : vector<1x55xi1> to vector<8x55xi1>
    %427 = vector.shape_cast %424 : vector<8x1xf32> to vector<8x1xf32>
    %428 = vector.broadcast %427 : vector<8x1xf32> to vector<8x55xf32>
    %429 = arith.select %426, %428, %416 : vector<8x55xi1>, vector<8x55xf32>
    %430 = arith.subf %361, %429 : vector<8x55xf32>
    %431 = arith.mulf %430, %430 : vector<8x55xf32>
    %cst_105 = arith.constant 0.000000e+00 : f32
    %432 = vector.broadcast %cst_105 : f32 to vector<8x55xf32>
    %cst_106 = arith.constant 0.000000e+00 : f32
    %433 = vector.shape_cast %33 : vector<1x55xi1> to vector<1x55xi1>
    %434 = vector.broadcast %433 : vector<1x55xi1> to vector<8x55xi1>
    %435 = vector.broadcast %cst_106 : f32 to vector<8x55xf32>
    %436 = arith.select %434, %431, %435 : vector<8x55xi1>, vector<8x55xf32>
    %cst_107 = arith.constant dense<0.000000e+00> : vector<8xf32>
    %437 = vector.multi_reduction <add>, %436, %cst_107 [1] : vector<8x55xf32> to vector<8xf32>
    %438 = vector.shape_cast %437 : vector<8xf32> to vector<8x1xf32>
    %cst_108 = arith.constant 0.0909090936 : f32
    %439 = vector.broadcast %cst_108 : f32 to vector<8x1xf32>
    %440 = arith.mulf %438, %439 : vector<8x1xf32>
    %441 = vector.shape_cast %33 : vector<1x55xi1> to vector<1x55xi1>
    %442 = vector.broadcast %441 : vector<1x55xi1> to vector<8x55xi1>
    %443 = vector.shape_cast %440 : vector<8x1xf32> to vector<8x1xf32>
    %444 = vector.broadcast %443 : vector<8x1xf32> to vector<8x55xf32>
    %445 = arith.select %442, %444, %432 : vector<8x55xi1>, vector<8x55xf32>
    %cst_109 = arith.constant 0.000000e+00 : f32
    %446 = vector.shape_cast %38 : vector<1x55xi1> to vector<1x55xi1>
    %447 = vector.broadcast %446 : vector<1x55xi1> to vector<8x55xi1>
    %448 = vector.broadcast %cst_109 : f32 to vector<8x55xf32>
    %449 = arith.select %447, %431, %448 : vector<8x55xi1>, vector<8x55xf32>
    %cst_110 = arith.constant dense<0.000000e+00> : vector<8xf32>
    %450 = vector.multi_reduction <add>, %449, %cst_110 [1] : vector<8x55xf32> to vector<8xf32>
    %451 = vector.shape_cast %450 : vector<8xf32> to vector<8x1xf32>
    %cst_111 = arith.constant 0.0909090936 : f32
    %452 = vector.broadcast %cst_111 : f32 to vector<8x1xf32>
    %453 = arith.mulf %451, %452 : vector<8x1xf32>
    %454 = vector.shape_cast %38 : vector<1x55xi1> to vector<1x55xi1>
    %455 = vector.broadcast %454 : vector<1x55xi1> to vector<8x55xi1>
    %456 = vector.shape_cast %453 : vector<8x1xf32> to vector<8x1xf32>
    %457 = vector.broadcast %456 : vector<8x1xf32> to vector<8x55xf32>
    %458 = arith.select %455, %457, %445 : vector<8x55xi1>, vector<8x55xf32>
    %cst_112 = arith.constant 0.000000e+00 : f32
    %459 = vector.shape_cast %43 : vector<1x55xi1> to vector<1x55xi1>
    %460 = vector.broadcast %459 : vector<1x55xi1> to vector<8x55xi1>
    %461 = vector.broadcast %cst_112 : f32 to vector<8x55xf32>
    %462 = arith.select %460, %431, %461 : vector<8x55xi1>, vector<8x55xf32>
    %cst_113 = arith.constant dense<0.000000e+00> : vector<8xf32>
    %463 = vector.multi_reduction <add>, %462, %cst_113 [1] : vector<8x55xf32> to vector<8xf32>
    %464 = vector.shape_cast %463 : vector<8xf32> to vector<8x1xf32>
    %cst_114 = arith.constant 0.0909090936 : f32
    %465 = vector.broadcast %cst_114 : f32 to vector<8x1xf32>
    %466 = arith.mulf %464, %465 : vector<8x1xf32>
    %467 = vector.shape_cast %43 : vector<1x55xi1> to vector<1x55xi1>
    %468 = vector.broadcast %467 : vector<1x55xi1> to vector<8x55xi1>
    %469 = vector.shape_cast %466 : vector<8x1xf32> to vector<8x1xf32>
    %470 = vector.broadcast %469 : vector<8x1xf32> to vector<8x55xf32>
    %471 = arith.select %468, %470, %458 : vector<8x55xi1>, vector<8x55xf32>
    %cst_115 = arith.constant 0.000000e+00 : f32
    %472 = vector.shape_cast %48 : vector<1x55xi1> to vector<1x55xi1>
    %473 = vector.broadcast %472 : vector<1x55xi1> to vector<8x55xi1>
    %474 = vector.broadcast %cst_115 : f32 to vector<8x55xf32>
    %475 = arith.select %473, %431, %474 : vector<8x55xi1>, vector<8x55xf32>
    %cst_116 = arith.constant dense<0.000000e+00> : vector<8xf32>
    %476 = vector.multi_reduction <add>, %475, %cst_116 [1] : vector<8x55xf32> to vector<8xf32>
    %477 = vector.shape_cast %476 : vector<8xf32> to vector<8x1xf32>
    %cst_117 = arith.constant 0.0909090936 : f32
    %478 = vector.broadcast %cst_117 : f32 to vector<8x1xf32>
    %479 = arith.mulf %477, %478 : vector<8x1xf32>
    %480 = vector.shape_cast %48 : vector<1x55xi1> to vector<1x55xi1>
    %481 = vector.broadcast %480 : vector<1x55xi1> to vector<8x55xi1>
    %482 = vector.shape_cast %479 : vector<8x1xf32> to vector<8x1xf32>
    %483 = vector.broadcast %482 : vector<8x1xf32> to vector<8x55xf32>
    %484 = arith.select %481, %483, %471 : vector<8x55xi1>, vector<8x55xf32>
    %cst_118 = arith.constant 0.000000e+00 : f32
    %485 = vector.shape_cast %53 : vector<1x55xi1> to vector<1x55xi1>
    %486 = vector.broadcast %485 : vector<1x55xi1> to vector<8x55xi1>
    %487 = vector.broadcast %cst_118 : f32 to vector<8x55xf32>
    %488 = arith.select %486, %431, %487 : vector<8x55xi1>, vector<8x55xf32>
    %cst_119 = arith.constant dense<0.000000e+00> : vector<8xf32>
    %489 = vector.multi_reduction <add>, %488, %cst_119 [1] : vector<8x55xf32> to vector<8xf32>
    %490 = vector.shape_cast %489 : vector<8xf32> to vector<8x1xf32>
    %cst_120 = arith.constant 0.0909090936 : f32
    %491 = vector.broadcast %cst_120 : f32 to vector<8x1xf32>
    %492 = arith.mulf %490, %491 : vector<8x1xf32>
    %493 = vector.shape_cast %53 : vector<1x55xi1> to vector<1x55xi1>
    %494 = vector.broadcast %493 : vector<1x55xi1> to vector<8x55xi1>
    %495 = vector.shape_cast %492 : vector<8x1xf32> to vector<8x1xf32>
    %496 = vector.broadcast %495 : vector<8x1xf32> to vector<8x55xf32>
    %497 = arith.select %494, %496, %484 : vector<8x55xi1>, vector<8x55xf32>
    %cst_121 = arith.constant 9.99999974E-6 : f32
    %498 = vector.broadcast %cst_121 : f32 to vector<8x55xf32>
    %499 = arith.addf %497, %498 : vector<8x55xf32>
    %500 = math.rsqrt %499 : vector<8x55xf32>
    %501 = arith.mulf %430, %500 : vector<8x55xf32>
    %502 = arith.extf %362 : vector<1x55xbf16> to vector<1x55xf32>
    %503 = vector.broadcast %502 : vector<1x55xf32> to vector<8x55xf32>
    %504 = arith.mulf %501, %503 : vector<8x55xf32>
    %505 = arith.extf %363 : vector<1x55xbf16> to vector<1x55xf32>
    %506 = vector.broadcast %505 : vector<1x55xf32> to vector<8x55xf32>
    %507 = arith.addf %504, %506 : vector<8x55xf32>
    %c80 = arith.constant 80 : index
    %c0_122 = arith.constant 0 : index
    %508 = vector.load %arg2[%c80, %c0_122] : memref<448x1152xbf16, #tpu.memory_space<vmem>>, vector<55x1152xbf16>
    %509 = arith.truncf %507 : vector<8x55xf32> to vector<8x55xbf16>
    %cst_123 = arith.constant dense<0.000000e+00> : vector<8x1152xf32>
    %510 = tpu.matmul %509, %508, %cst_123 {dimension_numbers = #tpu.dot_dimension_numbers<[1], [0], [0], [1], [0, 0, 1, 1], [], []>} : vector<8x55xbf16>, vector<55x1152xbf16>, vector<8x1152xf32> -> vector<8x1152xf32>
    %c144 = arith.constant 144 : index
    %c0_124 = arith.constant 0 : index
    %511 = vector.load %arg2[%c144, %c0_124] : memref<448x1152xbf16, #tpu.memory_space<vmem>>, vector<1x1152xbf16>
    %512 = arith.extf %511 : vector<1x1152xbf16> to vector<1x1152xf32>
    %513 = vector.broadcast %512 : vector<1x1152xf32> to vector<8x1152xf32>
    %514 = arith.addf %510, %513 : vector<8x1152xf32>
    %515 = vector.extract_strided_slice %514 {offsets = [0, 0], sizes = [8, 275], strides = [1, 1]} : vector<8x1152xf32> to vector<8x275xf32>
    %516 = vector.extract_strided_slice %514 {offsets = [0, 384], sizes = [8, 275], strides = [1, 1]} : vector<8x1152xf32> to vector<8x275xf32>
    %517 = vector.extract_strided_slice %514 {offsets = [0, 768], sizes = [8, 275], strides = [1, 1]} : vector<8x1152xf32> to vector<8x275xf32>
    %518 = arith.mulf %515, %516 : vector<8x275xf32>
    %519 = arith.truncf %518 : vector<8x275xf32> to vector<8x275xbf16>
    %cst_125 = arith.constant dense<0.000000e+00> : vector<8x25xf32>
    %520 = tpu.matmul %519, %54, %cst_125 {dimension_numbers = #tpu.dot_dimension_numbers<[1], [0], [0], [1], [0, 0, 1, 1], [], []>} : vector<8x275xbf16>, vector<275x25xbf16>, vector<8x25xf32> -> vector<8x25xf32>
    %cst_126 = arith.constant 0.000000e+00 : f32
    %521 = vector.broadcast %cst_126 : f32 to vector<8x25xf32>
    %cst_127 = arith.constant -1.000000e+30 : f32
    %522 = vector.shape_cast %7 : vector<1x25xi1> to vector<1x25xi1>
    %523 = vector.broadcast %522 : vector<1x25xi1> to vector<8x25xi1>
    %524 = vector.broadcast %cst_127 : f32 to vector<8x25xf32>
    %525 = arith.select %523, %520, %524 : vector<8x25xi1>, vector<8x25xf32>
    %cst_128 = arith.constant dense<0xFF800000> : vector<8xf32>
    %526 = vector.multi_reduction <maximumf>, %525, %cst_128 [1] : vector<8x25xf32> to vector<8xf32>
    %527 = vector.shape_cast %526 : vector<8xf32> to vector<8x1xf32>
    %528 = vector.shape_cast %7 : vector<1x25xi1> to vector<1x25xi1>
    %529 = vector.broadcast %528 : vector<1x25xi1> to vector<8x25xi1>
    %530 = vector.shape_cast %527 : vector<8x1xf32> to vector<8x1xf32>
    %531 = vector.broadcast %530 : vector<8x1xf32> to vector<8x25xf32>
    %532 = arith.select %529, %531, %521 : vector<8x25xi1>, vector<8x25xf32>
    %cst_129 = arith.constant -1.000000e+30 : f32
    %533 = vector.shape_cast %12 : vector<1x25xi1> to vector<1x25xi1>
    %534 = vector.broadcast %533 : vector<1x25xi1> to vector<8x25xi1>
    %535 = vector.broadcast %cst_129 : f32 to vector<8x25xf32>
    %536 = arith.select %534, %520, %535 : vector<8x25xi1>, vector<8x25xf32>
    %cst_130 = arith.constant dense<0xFF800000> : vector<8xf32>
    %537 = vector.multi_reduction <maximumf>, %536, %cst_130 [1] : vector<8x25xf32> to vector<8xf32>
    %538 = vector.shape_cast %537 : vector<8xf32> to vector<8x1xf32>
    %539 = vector.shape_cast %12 : vector<1x25xi1> to vector<1x25xi1>
    %540 = vector.broadcast %539 : vector<1x25xi1> to vector<8x25xi1>
    %541 = vector.shape_cast %538 : vector<8x1xf32> to vector<8x1xf32>
    %542 = vector.broadcast %541 : vector<8x1xf32> to vector<8x25xf32>
    %543 = arith.select %540, %542, %532 : vector<8x25xi1>, vector<8x25xf32>
    %cst_131 = arith.constant -1.000000e+30 : f32
    %544 = vector.shape_cast %17 : vector<1x25xi1> to vector<1x25xi1>
    %545 = vector.broadcast %544 : vector<1x25xi1> to vector<8x25xi1>
    %546 = vector.broadcast %cst_131 : f32 to vector<8x25xf32>
    %547 = arith.select %545, %520, %546 : vector<8x25xi1>, vector<8x25xf32>
    %cst_132 = arith.constant dense<0xFF800000> : vector<8xf32>
    %548 = vector.multi_reduction <maximumf>, %547, %cst_132 [1] : vector<8x25xf32> to vector<8xf32>
    %549 = vector.shape_cast %548 : vector<8xf32> to vector<8x1xf32>
    %550 = vector.shape_cast %17 : vector<1x25xi1> to vector<1x25xi1>
    %551 = vector.broadcast %550 : vector<1x25xi1> to vector<8x25xi1>
    %552 = vector.shape_cast %549 : vector<8x1xf32> to vector<8x1xf32>
    %553 = vector.broadcast %552 : vector<8x1xf32> to vector<8x25xf32>
    %554 = arith.select %551, %553, %543 : vector<8x25xi1>, vector<8x25xf32>
    %cst_133 = arith.constant -1.000000e+30 : f32
    %555 = vector.shape_cast %22 : vector<1x25xi1> to vector<1x25xi1>
    %556 = vector.broadcast %555 : vector<1x25xi1> to vector<8x25xi1>
    %557 = vector.broadcast %cst_133 : f32 to vector<8x25xf32>
    %558 = arith.select %556, %520, %557 : vector<8x25xi1>, vector<8x25xf32>
    %cst_134 = arith.constant dense<0xFF800000> : vector<8xf32>
    %559 = vector.multi_reduction <maximumf>, %558, %cst_134 [1] : vector<8x25xf32> to vector<8xf32>
    %560 = vector.shape_cast %559 : vector<8xf32> to vector<8x1xf32>
    %561 = vector.shape_cast %22 : vector<1x25xi1> to vector<1x25xi1>
    %562 = vector.broadcast %561 : vector<1x25xi1> to vector<8x25xi1>
    %563 = vector.shape_cast %560 : vector<8x1xf32> to vector<8x1xf32>
    %564 = vector.broadcast %563 : vector<8x1xf32> to vector<8x25xf32>
    %565 = arith.select %562, %564, %554 : vector<8x25xi1>, vector<8x25xf32>
    %cst_135 = arith.constant -1.000000e+30 : f32
    %566 = vector.shape_cast %27 : vector<1x25xi1> to vector<1x25xi1>
    %567 = vector.broadcast %566 : vector<1x25xi1> to vector<8x25xi1>
    %568 = vector.broadcast %cst_135 : f32 to vector<8x25xf32>
    %569 = arith.select %567, %520, %568 : vector<8x25xi1>, vector<8x25xf32>
    %cst_136 = arith.constant dense<0xFF800000> : vector<8xf32>
    %570 = vector.multi_reduction <maximumf>, %569, %cst_136 [1] : vector<8x25xf32> to vector<8xf32>
    %571 = vector.shape_cast %570 : vector<8xf32> to vector<8x1xf32>
    %572 = vector.shape_cast %27 : vector<1x25xi1> to vector<1x25xi1>
    %573 = vector.broadcast %572 : vector<1x25xi1> to vector<8x25xi1>
    %574 = vector.shape_cast %571 : vector<8x1xf32> to vector<8x1xf32>
    %575 = vector.broadcast %574 : vector<8x1xf32> to vector<8x25xf32>
    %576 = arith.select %573, %575, %565 : vector<8x25xi1>, vector<8x25xf32>
    %577 = arith.subf %520, %576 : vector<8x25xf32>
    %578 = math.exp %577 : vector<8x25xf32>
    %cst_137 = arith.constant 0.000000e+00 : f32
    %579 = vector.broadcast %cst_137 : f32 to vector<8x25xf32>
    %cst_138 = arith.constant 0.000000e+00 : f32
    %580 = vector.shape_cast %7 : vector<1x25xi1> to vector<1x25xi1>
    %581 = vector.broadcast %580 : vector<1x25xi1> to vector<8x25xi1>
    %582 = vector.broadcast %cst_138 : f32 to vector<8x25xf32>
    %583 = arith.select %581, %578, %582 : vector<8x25xi1>, vector<8x25xf32>
    %cst_139 = arith.constant dense<0.000000e+00> : vector<8xf32>
    %584 = vector.multi_reduction <add>, %583, %cst_139 [1] : vector<8x25xf32> to vector<8xf32>
    %585 = vector.shape_cast %584 : vector<8xf32> to vector<8x1xf32>
    %586 = vector.shape_cast %7 : vector<1x25xi1> to vector<1x25xi1>
    %587 = vector.broadcast %586 : vector<1x25xi1> to vector<8x25xi1>
    %588 = vector.shape_cast %585 : vector<8x1xf32> to vector<8x1xf32>
    %589 = vector.broadcast %588 : vector<8x1xf32> to vector<8x25xf32>
    %590 = arith.select %587, %589, %579 : vector<8x25xi1>, vector<8x25xf32>
    %cst_140 = arith.constant 0.000000e+00 : f32
    %591 = vector.shape_cast %12 : vector<1x25xi1> to vector<1x25xi1>
    %592 = vector.broadcast %591 : vector<1x25xi1> to vector<8x25xi1>
    %593 = vector.broadcast %cst_140 : f32 to vector<8x25xf32>
    %594 = arith.select %592, %578, %593 : vector<8x25xi1>, vector<8x25xf32>
    %cst_141 = arith.constant dense<0.000000e+00> : vector<8xf32>
    %595 = vector.multi_reduction <add>, %594, %cst_141 [1] : vector<8x25xf32> to vector<8xf32>
    %596 = vector.shape_cast %595 : vector<8xf32> to vector<8x1xf32>
    %597 = vector.shape_cast %12 : vector<1x25xi1> to vector<1x25xi1>
    %598 = vector.broadcast %597 : vector<1x25xi1> to vector<8x25xi1>
    %599 = vector.shape_cast %596 : vector<8x1xf32> to vector<8x1xf32>
    %600 = vector.broadcast %599 : vector<8x1xf32> to vector<8x25xf32>
    %601 = arith.select %598, %600, %590 : vector<8x25xi1>, vector<8x25xf32>
    %cst_142 = arith.constant 0.000000e+00 : f32
    %602 = vector.shape_cast %17 : vector<1x25xi1> to vector<1x25xi1>
    %603 = vector.broadcast %602 : vector<1x25xi1> to vector<8x25xi1>
    %604 = vector.broadcast %cst_142 : f32 to vector<8x25xf32>
    %605 = arith.select %603, %578, %604 : vector<8x25xi1>, vector<8x25xf32>
    %cst_143 = arith.constant dense<0.000000e+00> : vector<8xf32>
    %606 = vector.multi_reduction <add>, %605, %cst_143 [1] : vector<8x25xf32> to vector<8xf32>
    %607 = vector.shape_cast %606 : vector<8xf32> to vector<8x1xf32>
    %608 = vector.shape_cast %17 : vector<1x25xi1> to vector<1x25xi1>
    %609 = vector.broadcast %608 : vector<1x25xi1> to vector<8x25xi1>
    %610 = vector.shape_cast %607 : vector<8x1xf32> to vector<8x1xf32>
    %611 = vector.broadcast %610 : vector<8x1xf32> to vector<8x25xf32>
    %612 = arith.select %609, %611, %601 : vector<8x25xi1>, vector<8x25xf32>
    %cst_144 = arith.constant 0.000000e+00 : f32
    %613 = vector.shape_cast %22 : vector<1x25xi1> to vector<1x25xi1>
    %614 = vector.broadcast %613 : vector<1x25xi1> to vector<8x25xi1>
    %615 = vector.broadcast %cst_144 : f32 to vector<8x25xf32>
    %616 = arith.select %614, %578, %615 : vector<8x25xi1>, vector<8x25xf32>
    %cst_145 = arith.constant dense<0.000000e+00> : vector<8xf32>
    %617 = vector.multi_reduction <add>, %616, %cst_145 [1] : vector<8x25xf32> to vector<8xf32>
    %618 = vector.shape_cast %617 : vector<8xf32> to vector<8x1xf32>
    %619 = vector.shape_cast %22 : vector<1x25xi1> to vector<1x25xi1>
    %620 = vector.broadcast %619 : vector<1x25xi1> to vector<8x25xi1>
    %621 = vector.shape_cast %618 : vector<8x1xf32> to vector<8x1xf32>
    %622 = vector.broadcast %621 : vector<8x1xf32> to vector<8x25xf32>
    %623 = arith.select %620, %622, %612 : vector<8x25xi1>, vector<8x25xf32>
    %cst_146 = arith.constant 0.000000e+00 : f32
    %624 = vector.shape_cast %27 : vector<1x25xi1> to vector<1x25xi1>
    %625 = vector.broadcast %624 : vector<1x25xi1> to vector<8x25xi1>
    %626 = vector.broadcast %cst_146 : f32 to vector<8x25xf32>
    %627 = arith.select %625, %578, %626 : vector<8x25xi1>, vector<8x25xf32>
    %cst_147 = arith.constant dense<0.000000e+00> : vector<8xf32>
    %628 = vector.multi_reduction <add>, %627, %cst_147 [1] : vector<8x25xf32> to vector<8xf32>
    %629 = vector.shape_cast %628 : vector<8xf32> to vector<8x1xf32>
    %630 = vector.shape_cast %27 : vector<1x25xi1> to vector<1x25xi1>
    %631 = vector.broadcast %630 : vector<1x25xi1> to vector<8x25xi1>
    %632 = vector.shape_cast %629 : vector<8x1xf32> to vector<8x1xf32>
    %633 = vector.broadcast %632 : vector<8x1xf32> to vector<8x25xf32>
    %634 = arith.select %631, %633, %623 : vector<8x25xi1>, vector<8x25xf32>
    %635 = tpu.reciprocal %634 {approx = true} : vector<8x25xf32> -> vector<8x25xf32>
    %636 = arith.mulf %578, %635 : vector<8x25xf32>
    %637 = arith.truncf %636 : vector<8x25xf32> to vector<8x25xbf16>
    %cst_148 = arith.constant dense<0.000000e+00> : vector<8x275xf32>
    %638 = tpu.matmul %637, %55, %cst_148 {dimension_numbers = #tpu.dot_dimension_numbers<[1], [0], [0], [1], [0, 0, 1, 1], [], []>} : vector<8x25xbf16>, vector<25x275xbf16>, vector<8x275xf32> -> vector<8x275xf32>
    %639 = arith.mulf %638, %517 : vector<8x275xf32>
    %640 = arith.truncf %639 : vector<8x275xf32> to vector<8x275xbf16>
    %cst_149 = arith.constant dense<0.000000e+00> : vector<8x55xf32>
    %641 = tpu.matmul %640, %56, %cst_149 {dimension_numbers = #tpu.dot_dimension_numbers<[1], [0], [0], [1], [0, 0, 1, 1], [], []>} : vector<8x275xbf16>, vector<275x55xbf16>, vector<8x55xf32> -> vector<8x55xf32>
    %c224_150 = arith.constant 224 : index
    %c256_151 = arith.constant 256 : index
    %642 = vector.load %arg2[%c224_150, %c256_151] : memref<448x1152xbf16, #tpu.memory_space<vmem>>, vector<55x55xbf16>
    %643 = arith.truncf %641 : vector<8x55xf32> to vector<8x55xbf16>
    %cst_152 = arith.constant dense<0.000000e+00> : vector<8x55xf32>
    %644 = tpu.matmul %643, %642, %cst_152 {dimension_numbers = #tpu.dot_dimension_numbers<[1], [0], [0], [1], [0, 0, 1, 1], [], []>} : vector<8x55xbf16>, vector<55x55xbf16>, vector<8x55xf32> -> vector<8x55xf32>
    %c224_153 = arith.constant 224 : index
    %c384_154 = arith.constant 384 : index
    %645 = vector.load %arg2[%c224_153, %c384_154] : memref<448x1152xbf16, #tpu.memory_space<vmem>>, vector<1x55xbf16>
    %646 = arith.extf %645 : vector<1x55xbf16> to vector<1x55xf32>
    %647 = vector.broadcast %646 : vector<1x55xf32> to vector<8x55xf32>
    %648 = arith.addf %644, %647 : vector<8x55xf32>
    %649 = arith.addf %507, %648 : vector<8x55xf32>
    %c256_155 = arith.constant 256 : index
    %c384_156 = arith.constant 384 : index
    %650 = vector.load %arg2[%c256_155, %c384_156] : memref<448x1152xbf16, #tpu.memory_space<vmem>>, vector<1x55xbf16>
    %c272 = arith.constant 272 : index
    %c384_157 = arith.constant 384 : index
    %651 = vector.load %arg2[%c272, %c384_157] : memref<448x1152xbf16, #tpu.memory_space<vmem>>, vector<1x55xbf16>
    %cst_158 = arith.constant 0.000000e+00 : f32
    %652 = vector.broadcast %cst_158 : f32 to vector<8x55xf32>
    %cst_159 = arith.constant 0.000000e+00 : f32
    %653 = vector.shape_cast %33 : vector<1x55xi1> to vector<1x55xi1>
    %654 = vector.broadcast %653 : vector<1x55xi1> to vector<8x55xi1>
    %655 = vector.broadcast %cst_159 : f32 to vector<8x55xf32>
    %656 = arith.select %654, %649, %655 : vector<8x55xi1>, vector<8x55xf32>
    %cst_160 = arith.constant dense<0.000000e+00> : vector<8xf32>
    %657 = vector.multi_reduction <add>, %656, %cst_160 [1] : vector<8x55xf32> to vector<8xf32>
    %658 = vector.shape_cast %657 : vector<8xf32> to vector<8x1xf32>
    %cst_161 = arith.constant 0.0909090936 : f32
    %659 = vector.broadcast %cst_161 : f32 to vector<8x1xf32>
    %660 = arith.mulf %658, %659 : vector<8x1xf32>
    %661 = vector.shape_cast %33 : vector<1x55xi1> to vector<1x55xi1>
    %662 = vector.broadcast %661 : vector<1x55xi1> to vector<8x55xi1>
    %663 = vector.shape_cast %660 : vector<8x1xf32> to vector<8x1xf32>
    %664 = vector.broadcast %663 : vector<8x1xf32> to vector<8x55xf32>
    %665 = arith.select %662, %664, %652 : vector<8x55xi1>, vector<8x55xf32>
    %cst_162 = arith.constant 0.000000e+00 : f32
    %666 = vector.shape_cast %38 : vector<1x55xi1> to vector<1x55xi1>
    %667 = vector.broadcast %666 : vector<1x55xi1> to vector<8x55xi1>
    %668 = vector.broadcast %cst_162 : f32 to vector<8x55xf32>
    %669 = arith.select %667, %649, %668 : vector<8x55xi1>, vector<8x55xf32>
    %cst_163 = arith.constant dense<0.000000e+00> : vector<8xf32>
    %670 = vector.multi_reduction <add>, %669, %cst_163 [1] : vector<8x55xf32> to vector<8xf32>
    %671 = vector.shape_cast %670 : vector<8xf32> to vector<8x1xf32>
    %cst_164 = arith.constant 0.0909090936 : f32
    %672 = vector.broadcast %cst_164 : f32 to vector<8x1xf32>
    %673 = arith.mulf %671, %672 : vector<8x1xf32>
    %674 = vector.shape_cast %38 : vector<1x55xi1> to vector<1x55xi1>
    %675 = vector.broadcast %674 : vector<1x55xi1> to vector<8x55xi1>
    %676 = vector.shape_cast %673 : vector<8x1xf32> to vector<8x1xf32>
    %677 = vector.broadcast %676 : vector<8x1xf32> to vector<8x55xf32>
    %678 = arith.select %675, %677, %665 : vector<8x55xi1>, vector<8x55xf32>
    %cst_165 = arith.constant 0.000000e+00 : f32
    %679 = vector.shape_cast %43 : vector<1x55xi1> to vector<1x55xi1>
    %680 = vector.broadcast %679 : vector<1x55xi1> to vector<8x55xi1>
    %681 = vector.broadcast %cst_165 : f32 to vector<8x55xf32>
    %682 = arith.select %680, %649, %681 : vector<8x55xi1>, vector<8x55xf32>
    %cst_166 = arith.constant dense<0.000000e+00> : vector<8xf32>
    %683 = vector.multi_reduction <add>, %682, %cst_166 [1] : vector<8x55xf32> to vector<8xf32>
    %684 = vector.shape_cast %683 : vector<8xf32> to vector<8x1xf32>
    %cst_167 = arith.constant 0.0909090936 : f32
    %685 = vector.broadcast %cst_167 : f32 to vector<8x1xf32>
    %686 = arith.mulf %684, %685 : vector<8x1xf32>
    %687 = vector.shape_cast %43 : vector<1x55xi1> to vector<1x55xi1>
    %688 = vector.broadcast %687 : vector<1x55xi1> to vector<8x55xi1>
    %689 = vector.shape_cast %686 : vector<8x1xf32> to vector<8x1xf32>
    %690 = vector.broadcast %689 : vector<8x1xf32> to vector<8x55xf32>
    %691 = arith.select %688, %690, %678 : vector<8x55xi1>, vector<8x55xf32>
    %cst_168 = arith.constant 0.000000e+00 : f32
    %692 = vector.shape_cast %48 : vector<1x55xi1> to vector<1x55xi1>
    %693 = vector.broadcast %692 : vector<1x55xi1> to vector<8x55xi1>
    %694 = vector.broadcast %cst_168 : f32 to vector<8x55xf32>
    %695 = arith.select %693, %649, %694 : vector<8x55xi1>, vector<8x55xf32>
    %cst_169 = arith.constant dense<0.000000e+00> : vector<8xf32>
    %696 = vector.multi_reduction <add>, %695, %cst_169 [1] : vector<8x55xf32> to vector<8xf32>
    %697 = vector.shape_cast %696 : vector<8xf32> to vector<8x1xf32>
    %cst_170 = arith.constant 0.0909090936 : f32
    %698 = vector.broadcast %cst_170 : f32 to vector<8x1xf32>
    %699 = arith.mulf %697, %698 : vector<8x1xf32>
    %700 = vector.shape_cast %48 : vector<1x55xi1> to vector<1x55xi1>
    %701 = vector.broadcast %700 : vector<1x55xi1> to vector<8x55xi1>
    %702 = vector.shape_cast %699 : vector<8x1xf32> to vector<8x1xf32>
    %703 = vector.broadcast %702 : vector<8x1xf32> to vector<8x55xf32>
    %704 = arith.select %701, %703, %691 : vector<8x55xi1>, vector<8x55xf32>
    %cst_171 = arith.constant 0.000000e+00 : f32
    %705 = vector.shape_cast %53 : vector<1x55xi1> to vector<1x55xi1>
    %706 = vector.broadcast %705 : vector<1x55xi1> to vector<8x55xi1>
    %707 = vector.broadcast %cst_171 : f32 to vector<8x55xf32>
    %708 = arith.select %706, %649, %707 : vector<8x55xi1>, vector<8x55xf32>
    %cst_172 = arith.constant dense<0.000000e+00> : vector<8xf32>
    %709 = vector.multi_reduction <add>, %708, %cst_172 [1] : vector<8x55xf32> to vector<8xf32>
    %710 = vector.shape_cast %709 : vector<8xf32> to vector<8x1xf32>
    %cst_173 = arith.constant 0.0909090936 : f32
    %711 = vector.broadcast %cst_173 : f32 to vector<8x1xf32>
    %712 = arith.mulf %710, %711 : vector<8x1xf32>
    %713 = vector.shape_cast %53 : vector<1x55xi1> to vector<1x55xi1>
    %714 = vector.broadcast %713 : vector<1x55xi1> to vector<8x55xi1>
    %715 = vector.shape_cast %712 : vector<8x1xf32> to vector<8x1xf32>
    %716 = vector.broadcast %715 : vector<8x1xf32> to vector<8x55xf32>
    %717 = arith.select %714, %716, %704 : vector<8x55xi1>, vector<8x55xf32>
    %718 = arith.subf %649, %717 : vector<8x55xf32>
    %719 = arith.mulf %718, %718 : vector<8x55xf32>
    %cst_174 = arith.constant 0.000000e+00 : f32
    %720 = vector.broadcast %cst_174 : f32 to vector<8x55xf32>
    %cst_175 = arith.constant 0.000000e+00 : f32
    %721 = vector.shape_cast %33 : vector<1x55xi1> to vector<1x55xi1>
    %722 = vector.broadcast %721 : vector<1x55xi1> to vector<8x55xi1>
    %723 = vector.broadcast %cst_175 : f32 to vector<8x55xf32>
    %724 = arith.select %722, %719, %723 : vector<8x55xi1>, vector<8x55xf32>
    %cst_176 = arith.constant dense<0.000000e+00> : vector<8xf32>
    %725 = vector.multi_reduction <add>, %724, %cst_176 [1] : vector<8x55xf32> to vector<8xf32>
    %726 = vector.shape_cast %725 : vector<8xf32> to vector<8x1xf32>
    %cst_177 = arith.constant 0.0909090936 : f32
    %727 = vector.broadcast %cst_177 : f32 to vector<8x1xf32>
    %728 = arith.mulf %726, %727 : vector<8x1xf32>
    %729 = vector.shape_cast %33 : vector<1x55xi1> to vector<1x55xi1>
    %730 = vector.broadcast %729 : vector<1x55xi1> to vector<8x55xi1>
    %731 = vector.shape_cast %728 : vector<8x1xf32> to vector<8x1xf32>
    %732 = vector.broadcast %731 : vector<8x1xf32> to vector<8x55xf32>
    %733 = arith.select %730, %732, %720 : vector<8x55xi1>, vector<8x55xf32>
    %cst_178 = arith.constant 0.000000e+00 : f32
    %734 = vector.shape_cast %38 : vector<1x55xi1> to vector<1x55xi1>
    %735 = vector.broadcast %734 : vector<1x55xi1> to vector<8x55xi1>
    %736 = vector.broadcast %cst_178 : f32 to vector<8x55xf32>
    %737 = arith.select %735, %719, %736 : vector<8x55xi1>, vector<8x55xf32>
    %cst_179 = arith.constant dense<0.000000e+00> : vector<8xf32>
    %738 = vector.multi_reduction <add>, %737, %cst_179 [1] : vector<8x55xf32> to vector<8xf32>
    %739 = vector.shape_cast %738 : vector<8xf32> to vector<8x1xf32>
    %cst_180 = arith.constant 0.0909090936 : f32
    %740 = vector.broadcast %cst_180 : f32 to vector<8x1xf32>
    %741 = arith.mulf %739, %740 : vector<8x1xf32>
    %742 = vector.shape_cast %38 : vector<1x55xi1> to vector<1x55xi1>
    %743 = vector.broadcast %742 : vector<1x55xi1> to vector<8x55xi1>
    %744 = vector.shape_cast %741 : vector<8x1xf32> to vector<8x1xf32>
    %745 = vector.broadcast %744 : vector<8x1xf32> to vector<8x55xf32>
    %746 = arith.select %743, %745, %733 : vector<8x55xi1>, vector<8x55xf32>
    %cst_181 = arith.constant 0.000000e+00 : f32
    %747 = vector.shape_cast %43 : vector<1x55xi1> to vector<1x55xi1>
    %748 = vector.broadcast %747 : vector<1x55xi1> to vector<8x55xi1>
    %749 = vector.broadcast %cst_181 : f32 to vector<8x55xf32>
    %750 = arith.select %748, %719, %749 : vector<8x55xi1>, vector<8x55xf32>
    %cst_182 = arith.constant dense<0.000000e+00> : vector<8xf32>
    %751 = vector.multi_reduction <add>, %750, %cst_182 [1] : vector<8x55xf32> to vector<8xf32>
    %752 = vector.shape_cast %751 : vector<8xf32> to vector<8x1xf32>
    %cst_183 = arith.constant 0.0909090936 : f32
    %753 = vector.broadcast %cst_183 : f32 to vector<8x1xf32>
    %754 = arith.mulf %752, %753 : vector<8x1xf32>
    %755 = vector.shape_cast %43 : vector<1x55xi1> to vector<1x55xi1>
    %756 = vector.broadcast %755 : vector<1x55xi1> to vector<8x55xi1>
    %757 = vector.shape_cast %754 : vector<8x1xf32> to vector<8x1xf32>
    %758 = vector.broadcast %757 : vector<8x1xf32> to vector<8x55xf32>
    %759 = arith.select %756, %758, %746 : vector<8x55xi1>, vector<8x55xf32>
    %cst_184 = arith.constant 0.000000e+00 : f32
    %760 = vector.shape_cast %48 : vector<1x55xi1> to vector<1x55xi1>
    %761 = vector.broadcast %760 : vector<1x55xi1> to vector<8x55xi1>
    %762 = vector.broadcast %cst_184 : f32 to vector<8x55xf32>
    %763 = arith.select %761, %719, %762 : vector<8x55xi1>, vector<8x55xf32>
    %cst_185 = arith.constant dense<0.000000e+00> : vector<8xf32>
    %764 = vector.multi_reduction <add>, %763, %cst_185 [1] : vector<8x55xf32> to vector<8xf32>
    %765 = vector.shape_cast %764 : vector<8xf32> to vector<8x1xf32>
    %cst_186 = arith.constant 0.0909090936 : f32
    %766 = vector.broadcast %cst_186 : f32 to vector<8x1xf32>
    %767 = arith.mulf %765, %766 : vector<8x1xf32>
    %768 = vector.shape_cast %48 : vector<1x55xi1> to vector<1x55xi1>
    %769 = vector.broadcast %768 : vector<1x55xi1> to vector<8x55xi1>
    %770 = vector.shape_cast %767 : vector<8x1xf32> to vector<8x1xf32>
    %771 = vector.broadcast %770 : vector<8x1xf32> to vector<8x55xf32>
    %772 = arith.select %769, %771, %759 : vector<8x55xi1>, vector<8x55xf32>
    %cst_187 = arith.constant 0.000000e+00 : f32
    %773 = vector.shape_cast %53 : vector<1x55xi1> to vector<1x55xi1>
    %774 = vector.broadcast %773 : vector<1x55xi1> to vector<8x55xi1>
    %775 = vector.broadcast %cst_187 : f32 to vector<8x55xf32>
    %776 = arith.select %774, %719, %775 : vector<8x55xi1>, vector<8x55xf32>
    %cst_188 = arith.constant dense<0.000000e+00> : vector<8xf32>
    %777 = vector.multi_reduction <add>, %776, %cst_188 [1] : vector<8x55xf32> to vector<8xf32>
    %778 = vector.shape_cast %777 : vector<8xf32> to vector<8x1xf32>
    %cst_189 = arith.constant 0.0909090936 : f32
    %779 = vector.broadcast %cst_189 : f32 to vector<8x1xf32>
    %780 = arith.mulf %778, %779 : vector<8x1xf32>
    %781 = vector.shape_cast %53 : vector<1x55xi1> to vector<1x55xi1>
    %782 = vector.broadcast %781 : vector<1x55xi1> to vector<8x55xi1>
    %783 = vector.shape_cast %780 : vector<8x1xf32> to vector<8x1xf32>
    %784 = vector.broadcast %783 : vector<8x1xf32> to vector<8x55xf32>
    %785 = arith.select %782, %784, %772 : vector<8x55xi1>, vector<8x55xf32>
    %cst_190 = arith.constant 9.99999974E-6 : f32
    %786 = vector.broadcast %cst_190 : f32 to vector<8x55xf32>
    %787 = arith.addf %785, %786 : vector<8x55xf32>
    %788 = math.rsqrt %787 : vector<8x55xf32>
    %789 = arith.mulf %718, %788 : vector<8x55xf32>
    %790 = arith.extf %650 : vector<1x55xbf16> to vector<1x55xf32>
    %791 = vector.broadcast %790 : vector<1x55xf32> to vector<8x55xf32>
    %792 = arith.mulf %789, %791 : vector<8x55xf32>
    %793 = arith.extf %651 : vector<1x55xbf16> to vector<1x55xf32>
    %794 = vector.broadcast %793 : vector<1x55xf32> to vector<8x55xf32>
    %795 = arith.addf %792, %794 : vector<8x55xf32>
    %c224_191 = arith.constant 224 : index
    %c896_192 = arith.constant 896 : index
    %796 = vector.load %arg2[%c224_191, %c896_192] : memref<448x1152xbf16, #tpu.memory_space<vmem>>, vector<55x160xbf16>
    %797 = arith.truncf %795 : vector<8x55xf32> to vector<8x55xbf16>
    %cst_193 = arith.constant dense<0.000000e+00> : vector<8x160xf32>
    %798 = tpu.matmul %797, %796, %cst_193 {dimension_numbers = #tpu.dot_dimension_numbers<[1], [0], [0], [1], [0, 0, 1, 1], [], []>} : vector<8x55xbf16>, vector<55x160xbf16>, vector<8x160xf32> -> vector<8x160xf32>
    %c288 = arith.constant 288 : index
    %c128_194 = arith.constant 128 : index
    %799 = vector.load %arg2[%c288, %c128_194] : memref<448x1152xbf16, #tpu.memory_space<vmem>>, vector<1x160xbf16>
    %800 = arith.extf %799 : vector<1x160xbf16> to vector<1x160xf32>
    %801 = vector.broadcast %800 : vector<1x160xf32> to vector<8x160xf32>
    %802 = arith.addf %798, %801 : vector<8x160xf32>
    %cst_195 = arith.constant 0.000000e+00 : f32
    %803 = vector.broadcast %cst_195 : f32 to vector<8x160xf32>
    %804 = arith.maximumf %802, %803 : vector<8x160xf32>
    %c224_196 = arith.constant 224 : index
    %c640_197 = arith.constant 640 : index
    %805 = vector.load %arg2[%c224_196, %c640_197] : memref<448x1152xbf16, #tpu.memory_space<vmem>>, vector<160x55xbf16>
    %806 = arith.truncf %804 : vector<8x160xf32> to vector<8x160xbf16>
    %cst_198 = arith.constant dense<0.000000e+00> : vector<8x55xf32>
    %807 = tpu.matmul %806, %805, %cst_198 {dimension_numbers = #tpu.dot_dimension_numbers<[1], [0], [0], [1], [0, 0, 1, 1], [], []>} : vector<8x160xbf16>, vector<160x55xbf16>, vector<8x55xf32> -> vector<8x55xf32>
    %c240 = arith.constant 240 : index
    %c384_199 = arith.constant 384 : index
    %808 = vector.load %arg2[%c240, %c384_199] : memref<448x1152xbf16, #tpu.memory_space<vmem>>, vector<1x55xbf16>
    %809 = arith.extf %808 : vector<1x55xbf16> to vector<1x55xf32>
    %810 = vector.broadcast %809 : vector<1x55xf32> to vector<8x55xf32>
    %811 = arith.addf %807, %810 : vector<8x55xf32>
    %812 = arith.addf %795, %811 : vector<8x55xf32>
    %c288_200 = arith.constant 288 : index
    %c384_201 = arith.constant 384 : index
    %813 = vector.load %arg2[%c288_200, %c384_201] : memref<448x1152xbf16, #tpu.memory_space<vmem>>, vector<1x55xbf16>
    %c288_202 = arith.constant 288 : index
    %c896_203 = arith.constant 896 : index
    %814 = vector.load %arg2[%c288_202, %c896_203] : memref<448x1152xbf16, #tpu.memory_space<vmem>>, vector<1x55xbf16>
    %cst_204 = arith.constant 0.000000e+00 : f32
    %815 = vector.broadcast %cst_204 : f32 to vector<8x55xf32>
    %cst_205 = arith.constant 0.000000e+00 : f32
    %816 = vector.shape_cast %33 : vector<1x55xi1> to vector<1x55xi1>
    %817 = vector.broadcast %816 : vector<1x55xi1> to vector<8x55xi1>
    %818 = vector.broadcast %cst_205 : f32 to vector<8x55xf32>
    %819 = arith.select %817, %812, %818 : vector<8x55xi1>, vector<8x55xf32>
    %cst_206 = arith.constant dense<0.000000e+00> : vector<8xf32>
    %820 = vector.multi_reduction <add>, %819, %cst_206 [1] : vector<8x55xf32> to vector<8xf32>
    %821 = vector.shape_cast %820 : vector<8xf32> to vector<8x1xf32>
    %cst_207 = arith.constant 0.0909090936 : f32
    %822 = vector.broadcast %cst_207 : f32 to vector<8x1xf32>
    %823 = arith.mulf %821, %822 : vector<8x1xf32>
    %824 = vector.shape_cast %33 : vector<1x55xi1> to vector<1x55xi1>
    %825 = vector.broadcast %824 : vector<1x55xi1> to vector<8x55xi1>
    %826 = vector.shape_cast %823 : vector<8x1xf32> to vector<8x1xf32>
    %827 = vector.broadcast %826 : vector<8x1xf32> to vector<8x55xf32>
    %828 = arith.select %825, %827, %815 : vector<8x55xi1>, vector<8x55xf32>
    %cst_208 = arith.constant 0.000000e+00 : f32
    %829 = vector.shape_cast %38 : vector<1x55xi1> to vector<1x55xi1>
    %830 = vector.broadcast %829 : vector<1x55xi1> to vector<8x55xi1>
    %831 = vector.broadcast %cst_208 : f32 to vector<8x55xf32>
    %832 = arith.select %830, %812, %831 : vector<8x55xi1>, vector<8x55xf32>
    %cst_209 = arith.constant dense<0.000000e+00> : vector<8xf32>
    %833 = vector.multi_reduction <add>, %832, %cst_209 [1] : vector<8x55xf32> to vector<8xf32>
    %834 = vector.shape_cast %833 : vector<8xf32> to vector<8x1xf32>
    %cst_210 = arith.constant 0.0909090936 : f32
    %835 = vector.broadcast %cst_210 : f32 to vector<8x1xf32>
    %836 = arith.mulf %834, %835 : vector<8x1xf32>
    %837 = vector.shape_cast %38 : vector<1x55xi1> to vector<1x55xi1>
    %838 = vector.broadcast %837 : vector<1x55xi1> to vector<8x55xi1>
    %839 = vector.shape_cast %836 : vector<8x1xf32> to vector<8x1xf32>
    %840 = vector.broadcast %839 : vector<8x1xf32> to vector<8x55xf32>
    %841 = arith.select %838, %840, %828 : vector<8x55xi1>, vector<8x55xf32>
    %cst_211 = arith.constant 0.000000e+00 : f32
    %842 = vector.shape_cast %43 : vector<1x55xi1> to vector<1x55xi1>
    %843 = vector.broadcast %842 : vector<1x55xi1> to vector<8x55xi1>
    %844 = vector.broadcast %cst_211 : f32 to vector<8x55xf32>
    %845 = arith.select %843, %812, %844 : vector<8x55xi1>, vector<8x55xf32>
    %cst_212 = arith.constant dense<0.000000e+00> : vector<8xf32>
    %846 = vector.multi_reduction <add>, %845, %cst_212 [1] : vector<8x55xf32> to vector<8xf32>
    %847 = vector.shape_cast %846 : vector<8xf32> to vector<8x1xf32>
    %cst_213 = arith.constant 0.0909090936 : f32
    %848 = vector.broadcast %cst_213 : f32 to vector<8x1xf32>
    %849 = arith.mulf %847, %848 : vector<8x1xf32>
    %850 = vector.shape_cast %43 : vector<1x55xi1> to vector<1x55xi1>
    %851 = vector.broadcast %850 : vector<1x55xi1> to vector<8x55xi1>
    %852 = vector.shape_cast %849 : vector<8x1xf32> to vector<8x1xf32>
    %853 = vector.broadcast %852 : vector<8x1xf32> to vector<8x55xf32>
    %854 = arith.select %851, %853, %841 : vector<8x55xi1>, vector<8x55xf32>
    %cst_214 = arith.constant 0.000000e+00 : f32
    %855 = vector.shape_cast %48 : vector<1x55xi1> to vector<1x55xi1>
    %856 = vector.broadcast %855 : vector<1x55xi1> to vector<8x55xi1>
    %857 = vector.broadcast %cst_214 : f32 to vector<8x55xf32>
    %858 = arith.select %856, %812, %857 : vector<8x55xi1>, vector<8x55xf32>
    %cst_215 = arith.constant dense<0.000000e+00> : vector<8xf32>
    %859 = vector.multi_reduction <add>, %858, %cst_215 [1] : vector<8x55xf32> to vector<8xf32>
    %860 = vector.shape_cast %859 : vector<8xf32> to vector<8x1xf32>
    %cst_216 = arith.constant 0.0909090936 : f32
    %861 = vector.broadcast %cst_216 : f32 to vector<8x1xf32>
    %862 = arith.mulf %860, %861 : vector<8x1xf32>
    %863 = vector.shape_cast %48 : vector<1x55xi1> to vector<1x55xi1>
    %864 = vector.broadcast %863 : vector<1x55xi1> to vector<8x55xi1>
    %865 = vector.shape_cast %862 : vector<8x1xf32> to vector<8x1xf32>
    %866 = vector.broadcast %865 : vector<8x1xf32> to vector<8x55xf32>
    %867 = arith.select %864, %866, %854 : vector<8x55xi1>, vector<8x55xf32>
    %cst_217 = arith.constant 0.000000e+00 : f32
    %868 = vector.shape_cast %53 : vector<1x55xi1> to vector<1x55xi1>
    %869 = vector.broadcast %868 : vector<1x55xi1> to vector<8x55xi1>
    %870 = vector.broadcast %cst_217 : f32 to vector<8x55xf32>
    %871 = arith.select %869, %812, %870 : vector<8x55xi1>, vector<8x55xf32>
    %cst_218 = arith.constant dense<0.000000e+00> : vector<8xf32>
    %872 = vector.multi_reduction <add>, %871, %cst_218 [1] : vector<8x55xf32> to vector<8xf32>
    %873 = vector.shape_cast %872 : vector<8xf32> to vector<8x1xf32>
    %cst_219 = arith.constant 0.0909090936 : f32
    %874 = vector.broadcast %cst_219 : f32 to vector<8x1xf32>
    %875 = arith.mulf %873, %874 : vector<8x1xf32>
    %876 = vector.shape_cast %53 : vector<1x55xi1> to vector<1x55xi1>
    %877 = vector.broadcast %876 : vector<1x55xi1> to vector<8x55xi1>
    %878 = vector.shape_cast %875 : vector<8x1xf32> to vector<8x1xf32>
    %879 = vector.broadcast %878 : vector<8x1xf32> to vector<8x55xf32>
    %880 = arith.select %877, %879, %867 : vector<8x55xi1>, vector<8x55xf32>
    %881 = arith.subf %812, %880 : vector<8x55xf32>
    %882 = arith.mulf %881, %881 : vector<8x55xf32>
    %cst_220 = arith.constant 0.000000e+00 : f32
    %883 = vector.broadcast %cst_220 : f32 to vector<8x55xf32>
    %cst_221 = arith.constant 0.000000e+00 : f32
    %884 = vector.shape_cast %33 : vector<1x55xi1> to vector<1x55xi1>
    %885 = vector.broadcast %884 : vector<1x55xi1> to vector<8x55xi1>
    %886 = vector.broadcast %cst_221 : f32 to vector<8x55xf32>
    %887 = arith.select %885, %882, %886 : vector<8x55xi1>, vector<8x55xf32>
    %cst_222 = arith.constant dense<0.000000e+00> : vector<8xf32>
    %888 = vector.multi_reduction <add>, %887, %cst_222 [1] : vector<8x55xf32> to vector<8xf32>
    %889 = vector.shape_cast %888 : vector<8xf32> to vector<8x1xf32>
    %cst_223 = arith.constant 0.0909090936 : f32
    %890 = vector.broadcast %cst_223 : f32 to vector<8x1xf32>
    %891 = arith.mulf %889, %890 : vector<8x1xf32>
    %892 = vector.shape_cast %33 : vector<1x55xi1> to vector<1x55xi1>
    %893 = vector.broadcast %892 : vector<1x55xi1> to vector<8x55xi1>
    %894 = vector.shape_cast %891 : vector<8x1xf32> to vector<8x1xf32>
    %895 = vector.broadcast %894 : vector<8x1xf32> to vector<8x55xf32>
    %896 = arith.select %893, %895, %883 : vector<8x55xi1>, vector<8x55xf32>
    %cst_224 = arith.constant 0.000000e+00 : f32
    %897 = vector.shape_cast %38 : vector<1x55xi1> to vector<1x55xi1>
    %898 = vector.broadcast %897 : vector<1x55xi1> to vector<8x55xi1>
    %899 = vector.broadcast %cst_224 : f32 to vector<8x55xf32>
    %900 = arith.select %898, %882, %899 : vector<8x55xi1>, vector<8x55xf32>
    %cst_225 = arith.constant dense<0.000000e+00> : vector<8xf32>
    %901 = vector.multi_reduction <add>, %900, %cst_225 [1] : vector<8x55xf32> to vector<8xf32>
    %902 = vector.shape_cast %901 : vector<8xf32> to vector<8x1xf32>
    %cst_226 = arith.constant 0.0909090936 : f32
    %903 = vector.broadcast %cst_226 : f32 to vector<8x1xf32>
    %904 = arith.mulf %902, %903 : vector<8x1xf32>
    %905 = vector.shape_cast %38 : vector<1x55xi1> to vector<1x55xi1>
    %906 = vector.broadcast %905 : vector<1x55xi1> to vector<8x55xi1>
    %907 = vector.shape_cast %904 : vector<8x1xf32> to vector<8x1xf32>
    %908 = vector.broadcast %907 : vector<8x1xf32> to vector<8x55xf32>
    %909 = arith.select %906, %908, %896 : vector<8x55xi1>, vector<8x55xf32>
    %cst_227 = arith.constant 0.000000e+00 : f32
    %910 = vector.shape_cast %43 : vector<1x55xi1> to vector<1x55xi1>
    %911 = vector.broadcast %910 : vector<1x55xi1> to vector<8x55xi1>
    %912 = vector.broadcast %cst_227 : f32 to vector<8x55xf32>
    %913 = arith.select %911, %882, %912 : vector<8x55xi1>, vector<8x55xf32>
    %cst_228 = arith.constant dense<0.000000e+00> : vector<8xf32>
    %914 = vector.multi_reduction <add>, %913, %cst_228 [1] : vector<8x55xf32> to vector<8xf32>
    %915 = vector.shape_cast %914 : vector<8xf32> to vector<8x1xf32>
    %cst_229 = arith.constant 0.0909090936 : f32
    %916 = vector.broadcast %cst_229 : f32 to vector<8x1xf32>
    %917 = arith.mulf %915, %916 : vector<8x1xf32>
    %918 = vector.shape_cast %43 : vector<1x55xi1> to vector<1x55xi1>
    %919 = vector.broadcast %918 : vector<1x55xi1> to vector<8x55xi1>
    %920 = vector.shape_cast %917 : vector<8x1xf32> to vector<8x1xf32>
    %921 = vector.broadcast %920 : vector<8x1xf32> to vector<8x55xf32>
    %922 = arith.select %919, %921, %909 : vector<8x55xi1>, vector<8x55xf32>
    %cst_230 = arith.constant 0.000000e+00 : f32
    %923 = vector.shape_cast %48 : vector<1x55xi1> to vector<1x55xi1>
    %924 = vector.broadcast %923 : vector<1x55xi1> to vector<8x55xi1>
    %925 = vector.broadcast %cst_230 : f32 to vector<8x55xf32>
    %926 = arith.select %924, %882, %925 : vector<8x55xi1>, vector<8x55xf32>
    %cst_231 = arith.constant dense<0.000000e+00> : vector<8xf32>
    %927 = vector.multi_reduction <add>, %926, %cst_231 [1] : vector<8x55xf32> to vector<8xf32>
    %928 = vector.shape_cast %927 : vector<8xf32> to vector<8x1xf32>
    %cst_232 = arith.constant 0.0909090936 : f32
    %929 = vector.broadcast %cst_232 : f32 to vector<8x1xf32>
    %930 = arith.mulf %928, %929 : vector<8x1xf32>
    %931 = vector.shape_cast %48 : vector<1x55xi1> to vector<1x55xi1>
    %932 = vector.broadcast %931 : vector<1x55xi1> to vector<8x55xi1>
    %933 = vector.shape_cast %930 : vector<8x1xf32> to vector<8x1xf32>
    %934 = vector.broadcast %933 : vector<8x1xf32> to vector<8x55xf32>
    %935 = arith.select %932, %934, %922 : vector<8x55xi1>, vector<8x55xf32>
    %cst_233 = arith.constant 0.000000e+00 : f32
    %936 = vector.shape_cast %53 : vector<1x55xi1> to vector<1x55xi1>
    %937 = vector.broadcast %936 : vector<1x55xi1> to vector<8x55xi1>
    %938 = vector.broadcast %cst_233 : f32 to vector<8x55xf32>
    %939 = arith.select %937, %882, %938 : vector<8x55xi1>, vector<8x55xf32>
    %cst_234 = arith.constant dense<0.000000e+00> : vector<8xf32>
    %940 = vector.multi_reduction <add>, %939, %cst_234 [1] : vector<8x55xf32> to vector<8xf32>
    %941 = vector.shape_cast %940 : vector<8xf32> to vector<8x1xf32>
    %cst_235 = arith.constant 0.0909090936 : f32
    %942 = vector.broadcast %cst_235 : f32 to vector<8x1xf32>
    %943 = arith.mulf %941, %942 : vector<8x1xf32>
    %944 = vector.shape_cast %53 : vector<1x55xi1> to vector<1x55xi1>
    %945 = vector.broadcast %944 : vector<1x55xi1> to vector<8x55xi1>
    %946 = vector.shape_cast %943 : vector<8x1xf32> to vector<8x1xf32>
    %947 = vector.broadcast %946 : vector<8x1xf32> to vector<8x55xf32>
    %948 = arith.select %945, %947, %935 : vector<8x55xi1>, vector<8x55xf32>
    %cst_236 = arith.constant 9.99999974E-6 : f32
    %949 = vector.broadcast %cst_236 : f32 to vector<8x55xf32>
    %950 = arith.addf %948, %949 : vector<8x55xf32>
    %951 = math.rsqrt %950 : vector<8x55xf32>
    %952 = arith.mulf %881, %951 : vector<8x55xf32>
    %953 = arith.extf %813 : vector<1x55xbf16> to vector<1x55xf32>
    %954 = vector.broadcast %953 : vector<1x55xf32> to vector<8x55xf32>
    %955 = arith.mulf %952, %954 : vector<8x55xf32>
    %956 = arith.extf %814 : vector<1x55xbf16> to vector<1x55xf32>
    %957 = vector.broadcast %956 : vector<1x55xf32> to vector<8x55xf32>
    %958 = arith.addf %955, %957 : vector<8x55xf32>
    %959 = arith.addf %1, %958 : vector<8x55xf32>
    %c288_237 = arith.constant 288 : index
    %c1024 = arith.constant 1024 : index
    %960 = vector.load %arg2[%c288_237, %c1024] : memref<448x1152xbf16, #tpu.memory_space<vmem>>, vector<1x55xbf16>
    %c304 = arith.constant 304 : index
    %c128_238 = arith.constant 128 : index
    %961 = vector.load %arg2[%c304, %c128_238] : memref<448x1152xbf16, #tpu.memory_space<vmem>>, vector<1x55xbf16>
    %cst_239 = arith.constant dense<0.000000e+00> : vector<8xf32>
    %962 = vector.multi_reduction <add>, %959, %cst_239 [1] : vector<8x55xf32> to vector<8xf32>
    %963 = vector.shape_cast %962 : vector<8xf32> to vector<8x1xf32>
    %cst_240 = arith.constant 5.500000e+01 : f32
    %964 = vector.broadcast %cst_240 : f32 to vector<8x1xf32>
    %965 = arith.divf %963, %964 : vector<8x1xf32>
    %966 = vector.broadcast %965 : vector<8x1xf32> to vector<8x55xf32>
    %967 = arith.subf %959, %966 : vector<8x55xf32>
    %968 = arith.mulf %967, %967 : vector<8x55xf32>
    %cst_241 = arith.constant dense<0.000000e+00> : vector<8xf32>
    %969 = vector.multi_reduction <add>, %968, %cst_241 [1] : vector<8x55xf32> to vector<8xf32>
    %970 = vector.shape_cast %969 : vector<8xf32> to vector<8x1xf32>
    %cst_242 = arith.constant 5.500000e+01 : f32
    %971 = vector.broadcast %cst_242 : f32 to vector<8x1xf32>
    %972 = arith.divf %970, %971 : vector<8x1xf32>
    %cst_243 = arith.constant 9.99999974E-6 : f32
    %973 = vector.broadcast %cst_243 : f32 to vector<8x1xf32>
    %974 = arith.addf %972, %973 : vector<8x1xf32>
    %975 = math.rsqrt %974 : vector<8x1xf32>
    %976 = vector.broadcast %975 : vector<8x1xf32> to vector<8x55xf32>
    %977 = arith.mulf %967, %976 : vector<8x55xf32>
    %978 = arith.extf %960 : vector<1x55xbf16> to vector<1x55xf32>
    %979 = vector.broadcast %978 : vector<1x55xf32> to vector<8x55xf32>
    %980 = arith.mulf %977, %979 : vector<8x55xf32>
    %981 = arith.extf %961 : vector<1x55xbf16> to vector<1x55xf32>
    %982 = vector.broadcast %981 : vector<1x55xf32> to vector<8x55xf32>
    %983 = arith.addf %980, %982 : vector<8x55xf32>
    %c304_244 = arith.constant 304 : index
    %c256_245 = arith.constant 256 : index
    %984 = vector.load %arg2[%c304_244, %c256_245] : memref<448x1152xbf16, #tpu.memory_space<vmem>>, vector<55x20xbf16>
    %985 = arith.truncf %983 : vector<8x55xf32> to vector<8x55xbf16>
    %cst_246 = arith.constant dense<0.000000e+00> : vector<8x20xf32>
    %986 = tpu.matmul %985, %984, %cst_246 {dimension_numbers = #tpu.dot_dimension_numbers<[1], [0], [0], [1], [0, 0, 1, 1], [], []>} : vector<8x55xbf16>, vector<55x20xbf16>, vector<8x20xf32> -> vector<8x20xf32>
    %c304_247 = arith.constant 304 : index
    %c384_248 = arith.constant 384 : index
    %987 = vector.load %arg2[%c304_247, %c384_248] : memref<448x1152xbf16, #tpu.memory_space<vmem>>, vector<1x20xbf16>
    %988 = arith.extf %987 : vector<1x20xbf16> to vector<1x20xf32>
    %989 = vector.broadcast %988 : vector<1x20xf32> to vector<8x20xf32>
    %990 = arith.addf %986, %989 : vector<8x20xf32>
    %cst_249 = arith.constant 0.000000e+00 : f32
    %991 = vector.broadcast %cst_249 : f32 to vector<8x20xf32>
    %992 = arith.cmpf ogt, %990, %991 : vector<8x20xf32>
    %cst_250 = arith.constant 0.000000e+00 : f32
    %993 = vector.broadcast %cst_250 : f32 to vector<8x20xf32>
    %994 = arith.minimumf %990, %993 : vector<8x20xf32>
    %995 = math.exp %994 : vector<8x20xf32>
    %cst_251 = arith.constant 1.000000e+00 : f32
    %996 = vector.broadcast %cst_251 : f32 to vector<8x20xf32>
    %997 = arith.subf %995, %996 : vector<8x20xf32>
    %998 = arith.select %992, %990, %997 : vector<8x20xi1>, vector<8x20xf32>
    %999 = vector.extract_strided_slice %0 {offsets = [0, 6], sizes = [8, 19], strides = [1, 1]} : vector<8x128xf32> to vector<8x19xf32>
    %1000 = tpu.concatenate %998, %999 in 1 : vector<8x20xf32>, vector<8x19xf32> -> vector<8x39xf32>
    %c304_252 = arith.constant 304 : index
    %c896_253 = arith.constant 896 : index
    %1001 = vector.load %arg2[%c304_252, %c896_253] : memref<448x1152xbf16, #tpu.memory_space<vmem>>, vector<1x39xbf16>
    %c304_254 = arith.constant 304 : index
    %c1024_255 = arith.constant 1024 : index
    %1002 = vector.load %arg2[%c304_254, %c1024_255] : memref<448x1152xbf16, #tpu.memory_space<vmem>>, vector<1x39xbf16>
    %cst_256 = arith.constant dense<0.000000e+00> : vector<8xf32>
    %1003 = vector.multi_reduction <add>, %1000, %cst_256 [1] : vector<8x39xf32> to vector<8xf32>
    %1004 = vector.shape_cast %1003 : vector<8xf32> to vector<8x1xf32>
    %cst_257 = arith.constant 3.900000e+01 : f32
    %1005 = vector.broadcast %cst_257 : f32 to vector<8x1xf32>
    %1006 = arith.divf %1004, %1005 : vector<8x1xf32>
    %1007 = vector.broadcast %1006 : vector<8x1xf32> to vector<8x39xf32>
    %1008 = arith.subf %1000, %1007 : vector<8x39xf32>
    %1009 = arith.mulf %1008, %1008 : vector<8x39xf32>
    %cst_258 = arith.constant dense<0.000000e+00> : vector<8xf32>
    %1010 = vector.multi_reduction <add>, %1009, %cst_258 [1] : vector<8x39xf32> to vector<8xf32>
    %1011 = vector.shape_cast %1010 : vector<8xf32> to vector<8x1xf32>
    %cst_259 = arith.constant 3.900000e+01 : f32
    %1012 = vector.broadcast %cst_259 : f32 to vector<8x1xf32>
    %1013 = arith.divf %1011, %1012 : vector<8x1xf32>
    %cst_260 = arith.constant 9.99999974E-6 : f32
    %1014 = vector.broadcast %cst_260 : f32 to vector<8x1xf32>
    %1015 = arith.addf %1013, %1014 : vector<8x1xf32>
    %1016 = math.rsqrt %1015 : vector<8x1xf32>
    %1017 = vector.broadcast %1016 : vector<8x1xf32> to vector<8x39xf32>
    %1018 = arith.mulf %1008, %1017 : vector<8x39xf32>
    %1019 = arith.extf %1001 : vector<1x39xbf16> to vector<1x39xf32>
    %1020 = vector.broadcast %1019 : vector<1x39xf32> to vector<8x39xf32>
    %1021 = arith.mulf %1018, %1020 : vector<8x39xf32>
    %1022 = arith.extf %1002 : vector<1x39xbf16> to vector<1x39xf32>
    %1023 = vector.broadcast %1022 : vector<1x39xf32> to vector<8x39xf32>
    %1024 = arith.addf %1021, %1023 : vector<8x39xf32>
    %c320 = arith.constant 320 : index
    %c128_261 = arith.constant 128 : index
    %1025 = vector.load %arg2[%c320, %c128_261] : memref<448x1152xbf16, #tpu.memory_space<vmem>>, vector<39x12xbf16>
    %1026 = arith.truncf %1024 : vector<8x39xf32> to vector<8x39xbf16>
    %cst_262 = arith.constant dense<0.000000e+00> : vector<8x12xf32>
    %1027 = tpu.matmul %1026, %1025, %cst_262 {dimension_numbers = #tpu.dot_dimension_numbers<[1], [0], [0], [1], [0, 0, 1, 1], [], []>} : vector<8x39xbf16>, vector<39x12xbf16>, vector<8x12xf32> -> vector<8x12xf32>
    %c320_263 = arith.constant 320 : index
    %c384_264 = arith.constant 384 : index
    %1028 = vector.load %arg2[%c320_263, %c384_264] : memref<448x1152xbf16, #tpu.memory_space<vmem>>, vector<1x12xbf16>
    %1029 = arith.extf %1028 : vector<1x12xbf16> to vector<1x12xf32>
    %1030 = vector.broadcast %1029 : vector<1x12xf32> to vector<8x12xf32>
    %1031 = arith.addf %1027, %1030 : vector<8x12xf32>
    %cst_265 = arith.constant 0.000000e+00 : f32
    %1032 = vector.broadcast %cst_265 : f32 to vector<8x12xf32>
    %1033 = arith.cmpf ogt, %1031, %1032 : vector<8x12xf32>
    %cst_266 = arith.constant 0.000000e+00 : f32
    %1034 = vector.broadcast %cst_266 : f32 to vector<8x12xf32>
    %1035 = arith.minimumf %1031, %1034 : vector<8x12xf32>
    %1036 = math.exp %1035 : vector<8x12xf32>
    %cst_267 = arith.constant 1.000000e+00 : f32
    %1037 = vector.broadcast %cst_267 : f32 to vector<8x12xf32>
    %1038 = arith.subf %1036, %1037 : vector<8x12xf32>
    %1039 = arith.select %1033, %1031, %1038 : vector<8x12xi1>, vector<8x12xf32>
    %1040 = vector.extract_strided_slice %0 {offsets = [0, 0], sizes = [8, 6], strides = [1, 1]} : vector<8x128xf32> to vector<8x6xf32>
    %1041 = tpu.concatenate %1039, %1040 in 1 : vector<8x12xf32>, vector<8x6xf32> -> vector<8x18xf32>
    %c320_268 = arith.constant 320 : index
    %c896_269 = arith.constant 896 : index
    %1042 = vector.load %arg2[%c320_268, %c896_269] : memref<448x1152xbf16, #tpu.memory_space<vmem>>, vector<1x18xbf16>
    %c320_270 = arith.constant 320 : index
    %c1024_271 = arith.constant 1024 : index
    %1043 = vector.load %arg2[%c320_270, %c1024_271] : memref<448x1152xbf16, #tpu.memory_space<vmem>>, vector<1x18xbf16>
    %cst_272 = arith.constant dense<0.000000e+00> : vector<8xf32>
    %1044 = vector.multi_reduction <add>, %1041, %cst_272 [1] : vector<8x18xf32> to vector<8xf32>
    %1045 = vector.shape_cast %1044 : vector<8xf32> to vector<8x1xf32>
    %cst_273 = arith.constant 1.800000e+01 : f32
    %1046 = vector.broadcast %cst_273 : f32 to vector<8x1xf32>
    %1047 = arith.divf %1045, %1046 : vector<8x1xf32>
    %1048 = vector.broadcast %1047 : vector<8x1xf32> to vector<8x18xf32>
    %1049 = arith.subf %1041, %1048 : vector<8x18xf32>
    %1050 = arith.mulf %1049, %1049 : vector<8x18xf32>
    %cst_274 = arith.constant dense<0.000000e+00> : vector<8xf32>
    %1051 = vector.multi_reduction <add>, %1050, %cst_274 [1] : vector<8x18xf32> to vector<8xf32>
    %1052 = vector.shape_cast %1051 : vector<8xf32> to vector<8x1xf32>
    %cst_275 = arith.constant 1.800000e+01 : f32
    %1053 = vector.broadcast %cst_275 : f32 to vector<8x1xf32>
    %1054 = arith.divf %1052, %1053 : vector<8x1xf32>
    %cst_276 = arith.constant 9.99999974E-6 : f32
    %1055 = vector.broadcast %cst_276 : f32 to vector<8x1xf32>
    %1056 = arith.addf %1054, %1055 : vector<8x1xf32>
    %1057 = math.rsqrt %1056 : vector<8x1xf32>
    %1058 = vector.broadcast %1057 : vector<8x1xf32> to vector<8x18xf32>
    %1059 = arith.mulf %1049, %1058 : vector<8x18xf32>
    %1060 = arith.extf %1042 : vector<1x18xbf16> to vector<1x18xf32>
    %1061 = vector.broadcast %1060 : vector<1x18xf32> to vector<8x18xf32>
    %1062 = arith.mulf %1059, %1061 : vector<8x18xf32>
    %1063 = arith.extf %1043 : vector<1x18xbf16> to vector<1x18xf32>
    %1064 = vector.broadcast %1063 : vector<1x18xf32> to vector<8x18xf32>
    %1065 = arith.addf %1062, %1064 : vector<8x18xf32>
    %c336 = arith.constant 336 : index
    %c384_277 = arith.constant 384 : index
    %1066 = vector.load %arg2[%c336, %c384_277] : memref<448x1152xbf16, #tpu.memory_space<vmem>>, vector<18x128xbf16>
    %1067 = arith.truncf %1065 : vector<8x18xf32> to vector<8x18xbf16>
    %cst_278 = arith.constant dense<0.000000e+00> : vector<8x128xf32>
    %1068 = tpu.matmul %1067, %1066, %cst_278 {dimension_numbers = #tpu.dot_dimension_numbers<[1], [0], [0], [1], [0, 0, 1, 1], [], []>} : vector<8x18xbf16>, vector<18x128xbf16>, vector<8x128xf32> -> vector<8x128xf32>
    %c336_279 = arith.constant 336 : index
    %c768_280 = arith.constant 768 : index
    %1069 = vector.load %arg2[%c336_279, %c768_280] : memref<448x1152xbf16, #tpu.memory_space<vmem>>, vector<1x128xbf16>
    %1070 = arith.extf %1069 : vector<1x128xbf16> to vector<1x128xf32>
    %1071 = vector.broadcast %1070 : vector<1x128xf32> to vector<8x128xf32>
    %1072 = arith.addf %1068, %1071 : vector<8x128xf32>
    %c0_281 = arith.constant 0 : index
    %c0_282 = arith.constant 0 : index
    %1073 = vector.load %arg3[%c0_281, %c0_282] : memref<8x128xf32, #tpu.memory_space<vmem>>, vector<8x128xf32>
    tpu.vector_store %arg3[%c0_281, %c0_282], %1072 {strides = array<i32>} : memref<8x128xf32, #tpu.memory_space<vmem>>, vector<8x128xf32>,
    return
  }
  func.func @transform_0(%arg0: i32) -> (i32, i32) {
    %c0_i32 = arith.constant 0 : i32
    %c0_i32_0 = arith.constant 0 : i32
    return %arg0, %c0_i32 : i32, i32
  }
  func.func @transform_1(%arg0: i32) -> (i32, i32) {
    %c0_i32 = arith.constant 0 : i32
    %c0_i32_0 = arith.constant 0 : i32
    %c0_i32_1 = arith.constant 0 : i32
    return %c0_i32, %c0_i32_0 : i32, i32
  }
  func.func @transform_2(%arg0: i32) -> (i32, i32) {
    %c0_i32 = arith.constant 0 : i32
    %c0_i32_0 = arith.constant 0 : i32
    return %arg0, %c0_i32 : i32, i32
  }
}

</mosaic_0001>

<bundles_post_ra>
// kernel: tpu_custom_call.1
= control target key start
LH: loop header
LB: loop body
LE: loop exit
PB: predicated region body
PF: predicated region fallthrough
CT: control target
= control target key end

     0   :  { %7 = vsyncpa [#allocation3], 0  ;;  %s5048_s0 = inlined_call_operand.hbm [shape: f32[8,128], index: 0, kind: input, shape index: {}]   ;;  %s5049_s1 = inlined_call_operand.hbm [shape: bf16[448,1152], index: 1, kind: input, shape index: {}]   ;;  %s5050_s2 = inlined_call_operand.hbm [shape: f32[8,128], index: 2, kind: output, shape index: {}]  }
   0x1   :  { %8 = vsyncpa [#allocation6], 0 }
   0x2   :  { %9 = vsyncpa [#allocation4], 0  ;;  %s4290_s9 = smov [#allocation2]   ;;  %s4291_s11 = smov [#allocation5]  }
   0x3   :  { %s16_s10 = sshll.u32 %s4290_s9, 4  ;;  %s25_s12 = sshll.u32 %s4291_s11, 4  ;;  %s17_s10 = int_to_ptr.vmem [resolvable:$true] %s16_s10  ;;  %s4318_s12 = int_to_ptr.vmem [resolvable:$true] %s25_s12 }
   0x4   :  { %s4218_s15 = scalar_lea.hbm %s5048_s0, 128 }
   0x5   :  { %p4219_p0 = scmp.ne.s32.totalorder %s5048_s0, %s4218_s15  ;;  %p4222_p1 = scmp.lt.u32.totalorder %s4218_s15, %s5048_s0 }
   0x7   :  { %p4224_p2 = pnand %p4222_p1, %p4219_p0 }
   0x9   :  { %4227 = shalt.err (!%p4224_p2)
}
   0xa   :  { %s4228_s20 = scalar_lea.vmem %s17_s10, 128  ;;  %p4233_p4 = scmp.lt.s32.totalorder %s17_s10, %s17_s10 }
   0xb   :  { %p4229_p3 = scmp.ne.s32.totalorder %s17_s10, %s4228_s20  ;;  %p4234_p5 = scmp.lt.s32.totalorder %s4228_s20, %s4228_s20 }
   0xd   :  { %p4235_p6 = por %p4234_p5, %p4233_p4 }
   0xf   :  { %p4236_p7 = pnand %p4235_p6, %p4229_p3 }
  0x11   :  { %4239 = shalt.err (!%p4236_p7)
}
  0x12   :  { %19 = dma.hbm_to_vmem [thread:$0]  %s5048_s0, 128, %s17_s10, [#allocation3]  }
  0x13   :  { %s4240_s25 = scalar_lea.hbm %s5049_s1, 32256 }
  0x14   :  { %p4241_p8 = scmp.ne.s32.totalorder %s5049_s1, %s4240_s25  ;;  %p4244_p9 = scmp.lt.u32.totalorder %s4240_s25, %s5049_s1 }
  0x16   :  { %p4246_p10 = pnand %p4244_p9, %p4241_p8 }
  0x18   :  { %4249 = shalt.err (!%p4246_p10)
}
  0x19   :  { %s4250_s30 = scalar_lea.vmem %s4318_s12, 32256  ;;  %p4255_p12 = scmp.lt.s32.totalorder %s4318_s12, %s4318_s12 }
  0x1a   :  { %p4251_p11 = scmp.ne.s32.totalorder %s4318_s12, %s4250_s30  ;;  %p4256_p13 = scmp.lt.s32.totalorder %s4250_s30, %s4250_s30 }
  0x1c   :  { %p4257_p0 = por %p4256_p13, %p4255_p12 }
  0x1e   :  { %p4258_p1 = pnand %p4257_p0, %p4251_p11 }
  0x20   :  { %4261 = shalt.err (!%p4258_p1)
}
  0x21   :  { %s4292_s0 = smov 576   ;;  %s4293_s3 = smov 36  }
  0x22   :  { %31 = dma.hbm_to_vmem [thread:$0]  %s5049_s1, 32256, %s4318_s12, [#allocation6], %s4292_s0, %s4292_s0, %s4293_s3  }
  0x23   :  { %4284 = dma.done.wait [#allocation3], 128  }
  0x24   :  { %4285 = vsyncadd [#allocation3], 4294967168 }
  0x25   :  { %4286 = dma.done.wait [#allocation6], 32256  }
  0x26   :  { %4287 = vsyncadd [#allocation6], 4294935040  ;;  %v4294_v0 = vmov 0   ;;  %v39_v1 = vld [vmem:[#allocation2] sm:$0xff]  ;;  %v3954_v3 = vld [vmem:[#allocation5 + $0x4] ss:$36 sps:$4 sm:$0xff]  }
  0x27   :  { %466 = vmatprep.mubr.bf16.mxu0 %v4294_v0  ;;  %507 = vmatprep.mubr.bf16.mxu1 %v4294_v0  ;;  %v184_v2 = vpack.c.bf16 %v39_v1, %v39_v1  ;;  %vm403_vm0 = vcmask 1042432   ;;  %v3956_v4 = vld [vmem:[#allocation5 + $0xc] ss:$36 sps:$4 sm:$0xff]   ;;  %v3958_v5 = vld [vmem:[#allocation5] ss:$36 sps:$4 sm:$0xff]   ;;  %s4295_s6 = smov 103  }
  0x28   :  { %v3959_v6 = vld [vmem:[#allocation5 + $0x8] ss:$36 sps:$4 sm:$0xff]   ;;  %434 = vmatprep.subr.bf16.mxu0 %v3954_v3  ;;  %475 = vmatprep.subr.bf16.mxu1 %v3956_v4  ;;  %v3962_v8 = vld [vmem:[#allocation5 + $0x54] ss:$36 sps:$4 sm:$0xff]   ;;  %vm404_vm1 = vcmask 1043456   ;;  %v4296_v11 = vmov 65535  }
  0x29   :  { %236 = vrot.lane.b32.xlu0 %v184_v2, %s4295_s6  ;;  %v3960_v7 = vld [vmem:[#allocation5 + $0x4c] ss:$36 sps:$4 sm:$0xff]   ;;  %435 = vmatpush1.bf16.msra.mxu0 %v3958_v5  ;;  %v405_v12 = vsel %vm403_vm0, 4294967295, %v4296_v11  ;;  %v3966_v13 = vld [vmem:[#allocation5 + $0x94] ss:$36 sps:$4 sm:$0xff]   ;;  %v180_v18 = vld [vmem:[#allocation5 + $0xe0] sm:$0xff] }
  0x2a   :  { %476 = vmatpush1.bf16.msra.mxu1 %v3959_v6  ;;  %436 = vmatprep.subr.bf16.mxu0 %v3960_v7  ;;  %v3964_v9 = vld [vmem:[#allocation5 + $0x48] ss:$36 sps:$4 sm:$0xff]   ;;  %v3965_v10 = vld [vmem:[#allocation5 + $0x50] ss:$36 sps:$4 sm:$0xff]   ;;  %v3968_v14 = vld [vmem:[#allocation5 + $0x9c] ss:$36 sps:$4 sm:$0xff]   ;;  %v3511_v21 = vcombine.high %v180_v18, %v180_v18  ;;  %v3510_v23 = vcombine.low %v180_v18, %v180_v18 }
  0x2b   :  { %477 = vmatprep.subr.bf16.mxu1 %v3962_v8  ;;  %v3970_v15 = vld [vmem:[#allocation5 + $0x90] ss:$36 sps:$4 sm:$0xff]   ;;  %v179_v16 = vld [vmem:[#allocation5 + $0xd8] sm:$0xff]  ;;  %v4355_v17 = vsel %vm404_vm1, %v405_v12, 0  ;;  %vm399_vm2 = vcmask 449536   ;;  %v181_v35 = vld [vmem:[#allocation5 + $0xe8] sm:$0xff] }
  0x2c   :  { %v3971_v19 = vld [vmem:[#allocation5 + $0x98] ss:$36 sps:$4 sm:$0xff]   ;;  %v3509_v20 = vcombine.high %v179_v16, %v179_v16  ;;  %v3508_v22 = vcombine.low %v179_v16, %v179_v16  ;;  %v417_v25 = vand.u32 %v3511_v21, %v4355_v17  ;;  %v414_v27 = vand.u32 %v3510_v23, %v4355_v17  ;;  %v3976_v30 = vld [vmem:[#allocation5 + $0x10] ss:$36 sps:$4 sm:$0xff]   ;;  %v3987_v33 = vld [vmem:[#allocation5 + $0x64] ss:$36 sps:$4 sm:$0xff]  }
  0x2d   :  { %437 = vmatpush1.bf16.msra.mxu0 %v3964_v9  ;;  %v3978_v28 = vld [vmem:[#allocation5 + $0x14] ss:$36 sps:$4 sm:$0xff]   ;;  %v3981_v29 = vld [vmem:[#allocation5 + $0x1c] ss:$36 sps:$4 sm:$0xff]   ;;  %v3990_v39 = vld [vmem:[#allocation5 + $0xa4] ss:$36 sps:$4 sm:$0xff]   ;;  %v3513_v41 = vcombine.high %v181_v35, %v181_v35  ;;  %v3512_v45 = vcombine.low %v181_v35, %v181_v35  ;;  %v40_v16 = vlaneseq }
  0x2e   :  { %478 = vmatpush1.bf16.msra.mxu1 %v3965_v10  ;;  %438 = vmatprep.subr.bf16.mxu0 %v3966_v13  ;;  %v411_v24 = vand.u32 %v3509_v20, %v4355_v17  ;;  %v408_v26 = vand.u32 %v3508_v22, %v4355_v17  ;;  %v3979_v31 = vld [vmem:[#allocation5 + $0x18] ss:$36 sps:$4 sm:$0xff]   ;;  %v182_v36 = vld [vmem:[#allocation5 + $0xf0] sm:$0xff]  ;;  %v3985_v38 = vld [vmem:[#allocation5 + $0x60] ss:$36 sps:$4 sm:$0xff]   ;;  %v4297_v53 = vmov 0.0  }
  0x2f   :  { %479 = vmatprep.subr.bf16.mxu1 %v3968_v14  ;;  %v3984_v32 = vld [vmem:[#allocation5 + $0x5c] ss:$36 sps:$4 sm:$0xff]   ;;  %v3993_v40 = vld [vmem:[#allocation5 + $0xac] ss:$36 sps:$4 sm:$0xff]   ;;  %v3515_v42 = vcombine.high %v182_v36, %v182_v36  ;;  %v3514_v46 = vcombine.low %v182_v36, %v182_v36  ;;  %v423_v47 = vand.u32 %v3513_v41, %v4355_v17  ;;  %v420_v49 = vand.u32 %v3512_v45, %v4355_v17  ;;  %v4001_v60 = vld [vmem:[#allocation5 + $0xf8] ss:$0 sps:$4 sm:$0xff]  }
  0x30   :  { %v3982_v37 = vld [vmem:[#allocation5 + $0x58] ss:$36 sps:$4 sm:$0xff]   ;;  %v3988_v43 = vld [vmem:[#allocation5 + $0xa0] ss:$36 sps:$4 sm:$0xff]   ;;  %v3991_v44 = vld [vmem:[#allocation5 + $0xa8] ss:$36 sps:$4 sm:$0xff]   ;;  %v432_v61 = vand.u32 %v4001_v60, %v4355_v17 }
  0x31   :  { %439 = vmatpush1.bf16.msra.mxu0 %v3970_v15  ;;  %v429_v48 = vand.u32 %v3515_v42, %v4355_v17  ;;  %v426_v50 = vand.u32 %v3514_v46, %v4355_v17  ;;  %v4002_v51 = vld [vmem:[#allocation5 + $0x510] ss:$36 sps:$4 sm:$0xff]   ;;  %v3998_v52 = vld [vmem:[#allocation5 + $0x20] ss:$36 sps:$4 sm:$0xff]   ;;  %v4004_v55 = vld [vmem:[#allocation5 + $0x558] ss:$36 sps:$4 sm:$0xff]  }
  0x32   :  { %480 = vmatpush1.bf16.msra.mxu1 %v3971_v19  ;;  %440 = vmatprep.subr.bf16.mxu0 %v411_v24  ;;  %v4003_v54 = vld [vmem:[#allocation5 + $0x2d0] ss:$36 sps:$4 sm:$0xff]   ;;  %v3999_v56 = vld [vmem:[#allocation5 + $0x68] ss:$36 sps:$4 sm:$0xff]   ;;  %vm4298_vm3 = vmmov 0   ;;  %vm5051_vm4 = vcmask 1040384  }
  0x33   :  { %481 = vmatprep.subr.bf16.mxu1 %v417_v25  ;;  %v4005_v57 = vld [vmem:[#allocation5 + $0x318] ss:$36 sps:$4 sm:$0xff]   ;;  %v4006_v58 = vld [vmem:[#allocation5 + $0x5a0] ss:$36 sps:$4 sm:$0xff]   ;;  %v4000_v59 = vld [vmem:[#allocation5 + $0xb0] ss:$36 sps:$4 sm:$0xff]  }
  0x34   :  { %v4007_v62 = vld [vmem:[#allocation5 + $0x360] ss:$36 sps:$4 sm:$0xff]   ;;  %v4008_v63 = vld [vmem:[#allocation5 + $0x5e8] ss:$36 sps:$4 sm:$0xff]   ;;  %v4010_v2 = vld [vmem:[#allocation5 + $0x630] ss:$36 sps:$4 sm:$0xff]  }
  0x35   :  { %441 = vmatpush1.bf16.msra.mxu0 %v408_v26  ;;  %v4009_v1 = vld [vmem:[#allocation5 + $0x3a8] ss:$36 sps:$4 sm:$0xff]   ;;  %v4011_v3 = vld [vmem:[#allocation5 + $0x3f0] ss:$36 sps:$4 sm:$0xff]   ;;  %v4012_v4 = vld [vmem:[#allocation5 + $0x678] ss:$36 sps:$4 sm:$0xff]  }
  0x36   :  { %482 = vmatpush1.bf16.msra.mxu1 %v414_v27  ;;  %516 = vmatprep.subr.bf16.mxu0 %v3978_v28  ;;  %v4013_v5 = vld [vmem:[#allocation5 + $0x438] ss:$36 sps:$4 sm:$0xff]   ;;  %v4014_v6 = vld [vmem:[#allocation5 + $0x6c0] ss:$36 sps:$4 sm:$0xff]   ;;  %v4016_v8 = vld [vmem:[#allocation5 + $0x750] ss:$36 sps:$4 sm:$0xff]  }
  0x37   :  { %557 = vmatprep.subr.bf16.mxu1 %v3981_v29  ;;  %v4015_v7 = vld [vmem:[#allocation5 + $0x480] ss:$36 sps:$4 sm:$0xff]   ;;  %v4019_v9 = vld [vmem:[#allocation5 + $0x798] ss:$0 sps:$4 sm:$0x33]   ;;  %vm754_vm5 = vcmask 1041408  }
  0x38   :  { %v755_v10 = vsel %vm5051_vm4, 4294967295, %v4296_v11  ;;  %v4017_v12 = vld [vmem:[#allocation5 + $0x708] ss:$36 sps:$4 sm:$0xff]   ;;  %v200_v18 = vshrl.u32 %v40_v16, 7  ;;  %v185_v19 = vld [vmem:[#allocation5 + $0x120] sm:$0x11] }
  0x39   :  { %v4392_v13 = vsel %vm754_vm5, %v755_v10, 0  ;;  %v4018_v14 = vld [vmem:[#allocation5 + $0x4c8] ss:$36 sps:$4 sm:$0xff]   ;;  %v190_v21 = vunpack.c.l.bf16 %v185_v19  ;;  %vm5054_vm6 = vcmask 154624   ;;  %vm5052_vm13 = vcmask 203776   ;;  %s4299_s1 = smov 25  }
  0x3a   :  { %v4395_v15 = vand.u32 %v4019_v9, %v4392_v13  ;;  %v186_v20 = vld [vmem:[#allocation5 + $0x128] sm:$0x11]  ;;  %v4398_v22 = vsub.s32 0, %v200_v18  ;;  %s4300_s7 = smov 14   ;;  %s4301_s8 = smov 12  }
  0x3b   :  { %v193_v23 = vunpack.c.h.bf16 %v186_v20  ;;  %s4302_s9 = smov [#allocation7]  }
  0x3c   :  { %v202_v24 = vrot.slane %v190_v21, %v4398_v22  ;;  %v4216_v21 = vld [vmem:[#allocation5 + $0x760] ss:$36 sps:$4 sm:$0xff]   ;;  %s3471_s10 = sshll.u32 %s4302_s9, 4  ;;  %s3472_s10 = int_to_ptr.vmem [resolvable:$true] %s3471_s10 }
  0x3d   :  { %v214_v25 = vrot.slane %v193_v23, %v4398_v22  ;;  %s4262_s11 = scalar_lea.vmem %s3472_s10, 128  ;;  %p4267_p3 = scmp.lt.s32.totalorder %s3472_s10, %s3472_s10 }
  0x3e   :  { %p4263_p2 = scmp.ne.s32.totalorder %s3472_s10, %s4262_s11  ;;  %p4268_p4 = scmp.lt.s32.totalorder %s4262_s11, %s4262_s11 }
  0x40   :  { %p4269_p5 = por %p4268_p4, %p4267_p3 }
  0x42   :  { %p4270_p6 = pnand %p4269_p5, %p4263_p2 }
  0x9b   :  { %v4361_v34 = vpop.permute.xlu0 %236 }
  0x9c   :  { %3517 = vmatmul.mubr.msk.bf16.vlgmr.msra.gmra.mrb[0].mxu0 %vm399_vm2, %v4361_v34  ;;  %3518 = vmatmul.mubr.msk.bf16.vlgmr.msra.gmra.mrb[0].mxu1 %vm399_vm2, %v4361_v34 }
  0x9d   :  { %517 = vmatpush1.bf16.msra.mxu0 %v3976_v30  ;;  %558 = vmatpush1.bf16.msra.mxu1 %v3979_v31 }
  0x9e   :  { %518 = vmatprep.subr.bf16.mxu0 %v3984_v32  ;;  %559 = vmatprep.subr.bf16.mxu1 %v3987_v33 }
  0x9f   :  { %548 = vmatprep.mubr.bf16.mxu0 %v4294_v0  ;;  %589 = vmatprep.mubr.bf16.mxu1 %v4294_v0 }
  0xa1   :  { %519 = vmatpush1.bf16.msra.mxu0 %v3982_v37  ;;  %560 = vmatpush1.bf16.msra.mxu1 %v3985_v38  ;;  %v187_v37 = vld [vmem:[#allocation5 + $0x130] sm:$0x11]  ;;  %v191_v38 = vunpack.c.h.bf16 %v185_v19 }
  0xa2   :  { %520 = vmatprep.subr.bf16.mxu0 %v3990_v39  ;;  %561 = vmatprep.subr.bf16.mxu1 %v3993_v40  ;;  %v194_v39 = vunpack.c.l.bf16 %v187_v37  ;;  %v192_v40 = vunpack.c.l.bf16 %v186_v20  ;;  %v195_v41 = vunpack.c.h.bf16 %v187_v37 }
  0xa3   :  { %v206_v42 = vrot.slane %v191_v38, %v4398_v22 }
  0xa4   :  { %v222_v45 = vrot.slane %v195_v41, %v4398_v22 }
  0xa5   :  { %521 = vmatpush1.bf16.msra.mxu0 %v3988_v43  ;;  %562 = vmatpush1.bf16.msra.mxu1 %v3991_v44  ;;  %v218_v43 = vrot.slane %v194_v39, %v4398_v22  ;;  %v210_v44 = vrot.slane %v192_v40, %v4398_v22 }
  0xa6   :  { %522 = vmatprep.subr.bf16.mxu0 %v423_v47  ;;  %563 = vmatprep.subr.bf16.mxu1 %v429_v48 }
  0xa9   :  { %523 = vmatpush1.bf16.msra.mxu0 %v420_v49  ;;  %564 = vmatpush1.bf16.msra.mxu1 %v426_v50 }
  0xaa   :  { %3815 = vmatprep.subr.bf16.mxu0 %v4297_v53  ;;  %3682 = vmatprep.subr.bf16.mxu1 %v4002_v51 }
  0xac   :  { %3519 = vmatmul.mubr.msk.bf16.vlgmr.msra.gmra.mrb[4].mxu0 %vm399_vm2, %v4361_v34  ;;  %3520 = vmatmul.mubr.msk.bf16.vlgmr.msra.gmra.mrb[4].mxu1 %vm399_vm2, %v4361_v34 }
  0xad   :  { %3816 = vmatpush3.bf16.msra.mxu0 %v3998_v52  ;;  %3823 = vmatprep.mubr.msk.bf16.mxu0 %vm4298_vm3, %v4297_v53 }
  0xae   :  { %3817 = vmatprep.subr.bf16.mxu0 %v4297_v53  ;;  %3683 = vmatpush3.bf16.msra.mxu1 %v4003_v54 }
  0xaf   :  { %3684 = vmatprep.subr.bf16.mxu1 %v4004_v55 }
  0xb1   :  { %3818 = vmatpush3.bf16.msra.mxu0 %v3999_v56 }
  0xb2   :  { %3819 = vmatprep.subr.bf16.mxu0 %v4297_v53  ;;  %3685 = vmatpush3.bf16.msra.mxu1 %v4005_v57 }
  0xb3   :  { %3686 = vmatprep.subr.bf16.mxu1 %v4006_v58 }
  0xb5   :  { %3820 = vmatpush3.bf16.msra.mxu0 %v4000_v59 }
  0xb6   :  { %3821 = vmatprep.subr.bf16.mxu0 %v4297_v53  ;;  %3687 = vmatpush3.bf16.msra.mxu1 %v4007_v62 }
  0xb7   :  { %3688 = vmatprep.subr.bf16.mxu1 %v4008_v63 }
  0xb9   :  { %3822 = vmatpush3.bf16.msra.mxu0 %v432_v61 }
  0xba   :  { %3827 = vmatprep.subr.bf16.mxu0 %v4297_v53  ;;  %3689 = vmatpush3.bf16.msra.mxu1 %v4009_v1 }
  0xbb   :  { %3690 = vmatprep.subr.bf16.mxu1 %v4010_v2 }
  0xbc   :  { %3824 = vmatmul.mubr.msk.bf16.vlgmr.msra.gmra.mrb[8].mxu0 %vm399_vm2, %v4361_v34 }
  0xbd   :  { %3831 = vmatprep.mubr.msk.bf16.mxu0 %vm4298_vm3, %v4297_v53  ;;  %3828 = vmatpush3.bf16.msra.mxu0 %v4016_v8 }
  0xbe   :  { %3691 = vmatpush3.bf16.msra.mxu1 %v4011_v3  ;;  %3829 = vmatprep.subr.bf16.mxu0 %v4297_v53 }
  0xbf   :  { %3692 = vmatprep.subr.bf16.mxu1 %v4012_v4 }
  0xc1   :  { %3830 = vmatpush3.bf16.msra.mxu0 %v4395_v15 }
  0xc2   :  { %3693 = vmatpush3.bf16.msra.mxu1 %v4013_v5  ;;  %v4414_v5 = vand.u32 127, %v40_v16  ;;  %v4215_v16 = vld [vmem:[#allocation5 + $0x2dc] ss:$36 sps:$4 sm:$0xff]  }
  0xc3   :  { %3694 = vmatprep.subr.bf16.mxu1 %v4014_v6 }
  0xc4   :  { %vm45_vm7 = vcmp.ge.s32.totalorder %v4414_v5, 5  ;;  %vm46_vm8 = vcmp.lt.s32.totalorder %v4414_v5, 10  ;;  %vm48_vm9 = vcmp.ge.s32.totalorder %v4414_v5, 10  ;;  %vm49_vm10 = vcmp.lt.s32.totalorder %v4414_v5, 15 }
  0xc5   :  { %vm4420_vm11 = vmand %vm45_vm7, %vm46_vm8  ;;  %vm5053_vm12 = vcmp.lt.s32.totalorder %v4414_v5, 5  ;;  %vm51_vm15 = vcmp.ge.s32.totalorder %v4414_v5, 15  ;;  %vm52_vm0 = vcmp.lt.s32.totalorder %v4414_v5, 20  ;;  %vm54_vm7 = vcmp.ge.s32.totalorder %v4414_v5, 20 }
  0xc6   :  { %3695 = vmatpush3.bf16.msra.mxu1 %v4015_v7  ;;  %vm4425_vm14 = vmand %vm48_vm9, %vm49_vm10  ;;  %vm55_vm8 = vcmp.lt.s32.totalorder %v4414_v5, 25  ;;  %vm939_vm10 = vcmask 1044480  }
  0xc7   :  { %3696 = vmatprep.subr.bf16.mxu1 %v4017_v12  ;;  %vm4439_vm5 = vmand %vm51_vm15, %vm52_vm0  ;;  %vm60_vm15 = vcmp.lt.s32.totalorder %v4414_v5, 22  ;;  %vm62_vm0 = vcmp.ge.s32.totalorder %v4414_v5, 22 }
  0xc8   :  { %vm4448_vm9 = vmand %vm54_vm7, %vm55_vm8  ;;  %vm63_vm7 = vcmp.lt.s32.totalorder %v4414_v5, 33  ;;  %vm65_vm8 = vcmp.ge.s32.totalorder %v4414_v5, 33 }
  0xca   :  { %3697 = vmatpush3.bf16.msra.mxu1 %v4018_v14 }
 0x16f   :  { %v468_v26 = vpop.f32.mrb[0].mxu0  ;;  %v509_v27 = vpop.f32.mrb[0].mxu1 }
 0x170   :  { %v469_v28 = vadd.f32 %v468_v26, %v202_v24  ;;  %v470_v29 = vpop.f32.mrb[1].mxu0  ;;  %v511_v30 = vpop.f32.mrb[1].mxu1  ;;  %v510_v52 = vadd.f32 %v509_v27, %v210_v44 }
 0x171   :  { %v512_v31 = vadd.f32 %v511_v30, %v214_v25  ;;  %v472_v32 = vpop.f32.mrb[2].mxu0  ;;  %v513_v33 = vpop.f32.mrb[2].mxu1  ;;  %v471_v48 = vadd.f32 %v470_v29, %v206_v42 }
 0x172   :  { %v473_v34 = vpop.f32.mrb[3].mxu0  ;;  %v514_v35 = vpop.f32.mrb[3].mxu1 }
 0x173   :  { %v638_v36 = vmul.f32 %v512_v31, %v469_v28  ;;  %v1816_v28 = vld [vmem:[#allocation5 + $0x2a0] sm:$0x11] }
 0x174   :  { %v1824_v31 = vunpack.c.l.bf16 %v1816_v28 }
 0x175   :  { %v641_v62 = vpack.c.bf16 %v638_v36, %v638_v36 }
 0x17f   :  { %v550_v46 = vpop.f32.mrb[4].mxu0  ;;  %v4406_v47 = vpop.f32.mrb[4].mxu1 }
 0x180   :  { %v551_v49 = vadd.f32 %v550_v46, %v218_v43  ;;  %v552_v50 = vpop.f32.mrb[5].mxu0  ;;  %v4408_v51 = vpop.f32.mrb[5].mxu1 }
 0x181   :  { %v553_v54 = vadd.f32 %v552_v50, %v222_v45  ;;  %v554_v55 = vpop.f32.mrb[6].mxu0  ;;  %v595_v56 = vpop.f32.mrb[6].mxu1 }
 0x182   :  { %v639_v57 = vmul.f32 %v551_v49, %v471_v48  ;;  %v555_v58 = vpop.f32.mrb[7].mxu0  ;;  %v596_v59 = vpop.f32.mrb[7].mxu1 }
 0x183   :  { %v640_v60 = vmul.f32 %v553_v54, %v510_v52 }
 0x184   :  { %v642_v61 = vpack.c.bf16 %v639_v57, %v639_v57 }
 0x185   :  { %v643_v63 = vpack.c.bf16 %v640_v60, %v640_v60 }
 0x186   :  { %792 = vmatprep.mubr.bf16.mxu1 %v642_v61  ;;  %v4020_v61 = vld [vmem:[#allocation5 + $0x2d4] ss:$36 sps:$4 sm:$0xff]  }
 0x187   :  { %793 = vmatmul.mubr.bf16.vlgmr.msra.gmra.mrb[8].mxu1 %v641_v62  ;;  %3832 = vmatmul.mubr.msk.bf16.vlgmr.msra.gmra.mrb[12].mxu0 %vm5054_vm6, %v643_v63  ;;  %v4022_v62 = vld [vmem:[#allocation5 + $0x2d8] ss:$36 sps:$4 sm:$0xff]   ;;  %v940_v63 = vsel %vm404_vm1, 4294967295, %v4296_v11  ;;  %v4031_v11 = vld [vmem:[#allocation5 + $0x328] ss:$36 sps:$4 sm:$0xff]   ;;  %vm59_vm1 = vcmp.ge.s32.totalorder %v4414_v5, 11 }
 0x188   :  { %983 = vmatprep.mubr.bf16.mxu0 %v4294_v0  ;;  %951 = vmatprep.subr.bf16.mxu0 %v4022_v62  ;;  %vm4550_vm4 = vmand %vm59_vm1, %vm60_vm15  ;;  %vm68_vm1 = vcmp.ge.s32.totalorder %v4414_v5, 44  ;;  %vm69_vm15 = vcmp.lt.s32.totalorder %v4414_v5, 55 }
 0x189   :  { %952 = vmatpush1.bf16.msra.mxu0 %v4020_v61 }
 0x18f   :  { %v4412_v1 = vpop.f32.mrb[8].mxu0 }
 0x190   :  { %v3825_v2 = vpop.f32.mrb[9].mxu0 }
 0x191   :  { %v635_v3 = vpop.f32.mrb[10].mxu0  ;;  %v4023_v2 = vld [vmem:[#allocation5 + $0x31c] ss:$36 sps:$4 sm:$0x1f]  }
 0x192   :  { %v3826_v4 = vpop.f32.mrb[11].mxu0  ;;  %v4025_v3 = vld [vmem:[#allocation5 + $0x320] ss:$36 sps:$4 sm:$0x1f]  }
 0x193   :  { %v941_v4 = vsel %vm939_vm10, %v940_v63, 0  ;;  %vm66_vm10 = vcmp.lt.s32.totalorder %v4414_v5, 44 }
 0x25a   :  { %v3698_v6 = vpop.f32.mrb[8].mxu1  ;;  %v834_v7 = vpop.f32.mrb[12].mxu0 }
 0x25b   :  { %v3699_v8 = vpop.f32.mrb[9].mxu1  ;;  %v3833_v9 = vpop.f32.mrb[13].mxu0 }
 0x25c   :  { %v3700_v10 = vadd.f32 %v3699_v8, %v3698_v6  ;;  %v3701_v12 = vpop.f32.mrb[10].mxu1  ;;  %v837_v14 = vpop.f32.mrb[14].mxu0  ;;  %v4490_v6 = vand.u32 %v4025_v3, %v941_v4  ;;  %v4028_v8 = vld [vmem:[#allocation5 + $0x520] ss:$36 sps:$4 sm:$0xff]  }
 0x25d   :  { %v3702_v18 = vpop.f32.mrb[11].mxu1  ;;  %v3834_v19 = vpop.f32.mrb[15].mxu0  ;;  %v4029_v9 = vld [vmem:[#allocation5 + $0x2e0] ss:$36 sps:$4 sm:$0xff]   ;;  %3710 = vmatprep.subr.bf16.mxu1 %v4028_v8  ;;  %v4032_v12 = vld [vmem:[#allocation5 + $0x5b0] ss:$36 sps:$4 sm:$0xff]  }
 0x25e   :  { %v835_v20 = vadd.f32 %v3700_v10, %v834_v7  ;;  %v4492_v7 = vand.u32 %v4023_v2, %v941_v4  ;;  %953 = vmatprep.subr.bf16.mxu0 %v4490_v6  ;;  %v4030_v10 = vld [vmem:[#allocation5 + $0x568] ss:$36 sps:$4 sm:$0xff]   ;;  %3711 = vmatpush3.bf16.msra.mxu1 %v4029_v9  ;;  %v4033_v14 = vld [vmem:[#allocation5 + $0x370] ss:$36 sps:$4 sm:$0xff]   ;;  %v4034_v18 = vld [vmem:[#allocation5 + $0x5f8] ss:$36 sps:$4 sm:$0xff]  }
 0x25f   :  { %3712 = vmatprep.subr.bf16.mxu1 %v4030_v10  ;;  %v4035_v19 = vld [vmem:[#allocation5 + $0x3b8] ss:$36 sps:$4 sm:$0xff]  }
 0x260   :  { %v850_v23 = vsel %vm4420_vm11, %v835_v20, -1e+30  ;;  %v842_v24 = vsel %vm5053_vm12, %v835_v20, -1e+30  ;;  %v857_v27 = vsel %vm4425_vm14, %v835_v20, -1e+30  ;;  %954 = vmatpush1.bf16.msra.mxu0 %v4492_v7 }
 0x261   :  { %v851_v25 = vsel %vm5052_vm13, %v850_v23, -inf  ;;  %v844_v26 = vsel %vm5052_vm13, %v842_v24, -inf  ;;  %v858_v29 = vsel %vm5052_vm13, %v857_v27, -inf  ;;  %v864_v30 = vsel %vm4439_vm5, %v835_v20, -1e+30  ;;  %3835 = vmatprep.subr.bf16.mxu0 %v4297_v53 }
 0x262   :  { %852 = vmax.xlane.f32.xlu1 %v851_v25  ;;  %845 = vmax.xlane.f32.xlu0 %v844_v26  ;;  %v865_v32 = vsel %vm5052_vm13, %v864_v30, -inf  ;;  %v871_v33 = vsel %vm4448_vm9, %v835_v20, -1e+30  ;;  %v4037_v23 = vld [vmem:[#allocation5 + $0x400] ss:$36 sps:$4 sm:$0xff]  }
 0x263   :  { %v872_v34 = vsel %vm5052_vm13, %v871_v33, -inf  ;;  %3713 = vmatpush3.bf16.msra.mxu1 %v4031_v11  ;;  %v4038_v24 = vld [vmem:[#allocation5 + $0x688] ss:$36 sps:$4 sm:$0xff]   ;;  %v4040_v26 = vld [vmem:[#allocation5 + $0x6d0] ss:$36 sps:$4 sm:$0xff]  }
 0x264   :  { %3714 = vmatprep.subr.bf16.mxu1 %v4032_v12  ;;  %v4039_v25 = vld [vmem:[#allocation5 + $0x448] ss:$36 sps:$4 sm:$0xff]  }
 0x266   :  { %859 = vmax.xlane.f32.xlu1 %v858_v29 }
 0x267   :  { %3715 = vmatpush3.bf16.msra.mxu1 %v4033_v14 }
 0x268   :  { %3716 = vmatprep.subr.bf16.mxu1 %v4034_v18 }
 0x26a   :  { %866 = vmax.xlane.f32.xlu1 %v865_v32 }
 0x26b   :  { %3717 = vmatpush3.bf16.msra.mxu1 %v4035_v19 }
 0x26e   :  { %873 = vmax.xlane.f32.xlu1 %v872_v34 }
 0x2ef   :  { %v853_v35 = vpop.xlane.xlu1 %852  ;;  %v846_v36 = vpop.xlane.xlu0 %845 }
 0x2f0   :  { %v847_v38 = vsel %vm5053_vm12, %v846_v36, 0.0 }
 0x2f1   :  { %v854_v40 = vsel %vm4420_vm11, %v853_v35, %v847_v38 }
 0x2f3   :  { %v860_v37 = vpop.xlane.xlu1 %859 }
 0x2f4   :  { %v861_v41 = vsel %vm4425_vm14, %v860_v37, %v854_v40 }
 0x2f7   :  { %v867_v39 = vpop.xlane.xlu1 %866 }
 0x2f8   :  { %v868_v42 = vsel %vm4439_vm5, %v867_v39, %v861_v41  ;;  %v4026_v41 = vld [vmem:[#allocation5 + $0x2dc] ss:$36 sps:$4 sm:$0xff]  }
 0x2fb   :  { %v874_v43 = vpop.xlane.xlu1 %873 }
 0x2fc   :  { %v875_v44 = vsel %vm4448_vm9, %v874_v43, %v868_v42  ;;  %v4027_v42 = vld [vmem:[#allocation5 + $0x324] ss:$36 sps:$4 sm:$0x1f]  }
 0x2fd   :  { %v876_v45 = vsub.f32 %v835_v20, %v875_v44  ;;  %v4036_v20 = vld [vmem:[#allocation5 + $0x640] ss:$36 sps:$4 sm:$0xff]   ;;  %v4509_v44 = vand.u32 %v4027_v42, %v941_v4 }
 0x2fe   :  { %3718 = vmatprep.subr.bf16.mxu1 %v4036_v20  ;;  %v4046_v20 = vld [vmem:[#allocation5 + $0x2e4] ss:$36 sps:$4 sm:$0xff]  }
 0x2ff   :  { %v877_v46 = vmul.f32 1.442695, %v876_v45  ;;  %3719 = vmatpush3.bf16.msra.mxu1 %v4037_v23  ;;  %v4041_v45 = vld [vmem:[#allocation5 + $0x490] ss:$36 sps:$4 sm:$0xff]  }
 0x300   :  { %3720 = vmatprep.subr.bf16.mxu1 %v4038_v24  ;;  %v4047_v24 = vld [vmem:[#allocation5 + $0x32c] ss:$36 sps:$4 sm:$0xff]  }
 0x301   :  { %4153 = vpow2.f32 %v877_v46  ;;  %v4042_v46 = vld [vmem:[#allocation5 + $0x718] ss:$36 sps:$4 sm:$0xff]  }
 0x303   :  { %3721 = vmatpush3.bf16.msra.mxu1 %v4039_v25  ;;  %v4049_v25 = vld [vmem:[#allocation5 + $0x3bc] ss:$0 sps:$4 sm:$0xff]  }
 0x304   :  { %3722 = vmatprep.subr.bf16.mxu1 %v4040_v26  ;;  %v1268_v26 = vand.u32 %v4049_v25, %v4355_v17 }
 0x307   :  { %3723 = vmatpush3.bf16.msra.mxu1 %v4041_v45 }
 0x308   :  { %3724 = vmatprep.subr.bf16.mxu1 %v4042_v46 }
 0x30b   :  { %v4466_v48 = vpop.eup %4153 }
 0x30c   :  { %v879_v49 = vsel %vm5053_vm12, %v4466_v48, 0.0  ;;  %v884_v52 = vsel %vm4420_vm11, %v4466_v48, 0.0  ;;  %v889_v55 = vsel %vm4425_vm14, %v4466_v48, 0.0  ;;  %v894_v57 = vsel %vm4439_vm5, %v4466_v48, 0.0 }
 0x30d   :  { %v880_v50 = vsel %vm5052_vm13, %v879_v49, 0.0  ;;  %v885_v54 = vsel %vm5052_vm13, %v884_v52, 0.0  ;;  %v890_v56 = vsel %vm5052_vm13, %v889_v55, 0.0  ;;  %v895_v58 = vsel %vm5052_vm13, %v894_v57, 0.0  ;;  %v4044_v49 = vld [vmem:[#allocation5 + $0x760] ss:$36 sps:$4 sm:$0xff]  }
 0x30e   :  { %881 = vadd.xlane.f32.xlu1 %v880_v50  ;;  %v899_v59 = vsel %vm4448_vm9, %v4466_v48, 0.0  ;;  %v4045_v50 = vld [vmem:[#allocation5 + $0x7a8] ss:$0 sps:$4 sm:$0x33]  }
 0x30f   :  { %v900_v60 = vsel %vm5052_vm13, %v899_v59, 0.0  ;;  %v4522_v52 = vand.u32 %v4045_v50, %v4392_v13  ;;  %v189_v59 = vld [vmem:[#allocation5 + $0x140] sm:$0x1] }
 0x310   :  { %v198_v61 = vunpack.c.l.bf16 %v189_v59 }
 0x312   :  { %886 = vadd.xlane.f32.xlu1 %v885_v54  ;;  %v188_v54 = vld [vmem:[#allocation5 + $0x138] sm:$0x11]  ;;  %v234_v8 = vrot.slane %v198_v61, %v4398_v22 }
 0x313   :  { %v196_v55 = vunpack.c.l.bf16 %v188_v54 }
 0x314   :  { %v633_v12 = vadd.f32 %v4412_v1, %v234_v8  ;;  %v4048_v1 = vld [vmem:[#allocation5 + $0x374] ss:$36 sps:$4 sm:$0xff]  }
 0x315   :  { %v226_v57 = vrot.slane %v196_v55, %v4398_v22 }
 0x316   :  { %891 = vadd.xlane.f32.xlu1 %v890_v56  ;;  %v197_v56 = vunpack.c.h.bf16 %v188_v54  ;;  %v4179_v54 = vld [vmem:[#allocation2] sm:$0xff] }
 0x31a   :  { %896 = vadd.xlane.f32.xlu1 %v895_v58  ;;  %v230_v58 = vrot.slane %v197_v56, %v4398_v22 }
 0x31c   :  { %v594_v62 = vadd.f32 %v4408_v51, %v230_v58 }
 0x31e   :  { %901 = vadd.xlane.f32.xlu1 %v900_v60  ;;  %v592_v60 = vadd.f32 %v4406_v47, %v226_v57 }
 0x39b   :  { %v882_v27 = vpop.xlane.xlu1 %881 }
 0x39c   :  { %v883_v33 = vsel %vm5053_vm12, %v882_v27, 0.0  ;;  %vm4555_vm12 = vmand %vm62_vm0, %vm63_vm7  ;;  %vm5055_vm7 = vcmask 261120  }
 0x39d   :  { %vm4575_vm0 = vmand %vm68_vm1, %vm69_vm15  ;;  %vm5074_vm1 = vcmask 203776  }
 0x39e   :  { %vm5075_vm15 = vmmov %vm5074_vm1 }
 0x39f   :  { %v887_v29 = vpop.xlane.xlu1 %886 }
 0x3a0   :  { %v888_v34 = vsel %vm4420_vm11, %v887_v29, %v883_v33 }
 0x3a3   :  { %v892_v30 = vpop.xlane.xlu1 %891 }
 0x3a4   :  { %v893_v35 = vsel %vm4425_vm14, %v892_v30, %v888_v34 }
 0x3a7   :  { %v897_v32 = vpop.xlane.xlu1 %896 }
 0x3a8   :  { %v898_v36 = vsel %vm4439_vm5, %v897_v32, %v893_v35 }
 0x3ab   :  { %v902_v37 = vpop.xlane.xlu1 %901 }
 0x3ac   :  { %v903_v38 = vsel %vm4448_vm9, %v902_v37, %v898_v36 }
 0x3ad   :  { %4155 = vrcp.f32 %v903_v38 }
 0x3b7   :  { %v4156_v39 = vpop.eup %4155 }
 0x3b8   :  { %v905_v40 = vmul.f32 %v4156_v39, %v4466_v48  ;;  %v4043_v48 = vld [vmem:[#allocation5 + $0x4d8] ss:$36 sps:$4 sm:$0xff]  }
 0x3b9   :  { %3725 = vmatpush3.bf16.msra.mxu1 %v4043_v48 }
 0x3ba   :  { %v906_v43 = vpack.c.bf16 %v905_v40, %v905_v40  ;;  %1629 = vmatprep.subr.bf16.mxu1 %v4294_v0  ;;  %v1237_v40 = vld [vmem:[#allocation5 + $0x2e8] sm:$0x1] }
 0x3bc   :  { %3547 = vmatmul.mubr.msk.bf16.vlgmr.msra.gmra.mrb[16].mxu0 %vm5052_vm13, %v906_v43 }
 0x3bd   :  { %3836 = vmatpush3.bf16.msra.mxu0 %v4026_v41  ;;  %3839 = vmatprep.mubr.msk.bf16.mxu0 %vm4298_vm3, %v4297_v53  ;;  %v1238_v41 = vunpack.c.l.bf16 %v1237_v40 }
 0x3be   :  { %3837 = vmatprep.subr.bf16.mxu0 %v4297_v53 }
 0x3bf   :  { %v1242_v42 = vrot.slane %v1238_v41, %v4398_v22 }
 0x3c1   :  { %3838 = vmatpush3.bf16.msra.mxu0 %v4509_v44 }
 0x3c2   :  { %3843 = vmatprep.subr.bf16.mxu0 %v4297_v53 }
 0x3c4   :  { %3840 = vmatmul.mubr.msk.bf16.vlgmr.msra.gmra.mrb[20].mxu0 %vm5052_vm13, %v906_v43  ;;  %vm57_vm13 = vcmp.lt.s32.totalorder %v4414_v5, 11 }
 0x3c5   :  { %3847 = vmatprep.mubr.msk.bf16.mxu0 %vm4298_vm3, %v4297_v53  ;;  %3844 = vmatpush3.bf16.msra.mxu0 %v4044_v49 }
 0x3c6   :  { %3845 = vmatprep.subr.bf16.mxu0 %v4297_v53 }
 0x3c9   :  { %3846 = vmatpush3.bf16.msra.mxu0 %v4522_v52 }
 0x3ca   :  { %3851 = vmatprep.subr.bf16.mxu0 %v4297_v53 }
 0x48f   :  { %v985_v63 = vpop.f32.mrb[16].mxu0 }
 0x490   :  { %v1032_v13 = vmul.f32 %v985_v63, %v592_v60  ;;  %v987_v2 = vpop.f32.mrb[17].mxu0 }
 0x491   :  { %v1033_v3 = vmul.f32 %v987_v2, %v594_v62  ;;  %v989_v4 = vpop.f32.mrb[18].mxu0 }
 0x492   :  { %v990_v9 = vpop.f32.mrb[19].mxu0  ;;  %v1035_v11 = vpack.c.bf16 %v1032_v13, %v1032_v13 }
 0x493   :  { %v1036_v10 = vpack.c.bf16 %v1033_v3, %v1033_v3 }
 0x495   :  { %1181 = vmatprep.mubr.bf16.mxu1 %v1036_v10 }
 0x496   :  { %1182 = vmatmul.mubr.bf16.vlgmr.msra.gmra.mrb[12].mxu1 %v1035_v11 }
 0x497   :  { %v1026_v14 = vpop.f32.mrb[20].mxu0 }
 0x498   :  { %v1034_v18 = vmul.f32 %v1026_v14, %v633_v12  ;;  %v3841_v47 = vpop.f32.mrb[21].mxu0 }
 0x499   :  { %v1029_v19 = vpop.f32.mrb[22].mxu0 }
 0x49a   :  { %v1037_v51 = vpack.c.bf16 %v1034_v18, %v1034_v18  ;;  %v3842_v23 = vpop.f32.mrb[23].mxu0 }
 0x49c   :  { %3848 = vmatmul.mubr.msk.bf16.vlgmr.msra.gmra.mrb[24].mxu0 %vm5054_vm6, %v1037_v51  ;;  %vm4559_vm6 = vmand %vm65_vm8, %vm66_vm10  ;;  %vm5072_vm8 = vcmask 154624   ;;  %vm5073_vm10 = vcmp.lt.s32.totalorder %v4414_v5, 5 }
 0x49d   :  { %3852 = vmatpush3.bf16.msra.mxu0 %v4046_v20  ;;  %3859 = vmatprep.mubr.msk.bf16.mxu0 %vm4298_vm3, %v4297_v53 }
 0x49e   :  { %3853 = vmatprep.subr.bf16.mxu0 %v4297_v53 }
 0x4a1   :  { %3854 = vmatpush3.bf16.msra.mxu0 %v4047_v24 }
 0x4a2   :  { %3855 = vmatprep.subr.bf16.mxu0 %v4297_v53 }
 0x4a5   :  { %3856 = vmatpush3.bf16.msra.mxu0 %v4048_v1 }
 0x4a6   :  { %3857 = vmatprep.subr.bf16.mxu0 %v4297_v53 }
 0x4a9   :  { %3858 = vmatpush3.bf16.msra.mxu0 %v1268_v26 }
 0x569   :  { %v3726_v27 = vpop.f32.mrb[12].mxu1 }
 0x56a   :  { %v3727_v29 = vpop.f32.mrb[13].mxu1 }
 0x56b   :  { %v3728_v30 = vadd.f32 %v3727_v29, %v3726_v27  ;;  %v3729_v32 = vpop.f32.mrb[14].mxu1 }
 0x56c   :  { %v3730_v33 = vpop.f32.mrb[15].mxu1 }
 0x56f   :  { %v1223_v34 = vpop.f32.mrb[24].mxu0 }
 0x570   :  { %v1224_v35 = vadd.f32 %v3728_v30, %v1223_v34  ;;  %v3849_v36 = vpop.f32.mrb[25].mxu0 }
 0x571   :  { %v1226_v37 = vpop.f32.mrb[26].mxu0 }
 0x572   :  { %v1236_v38 = vpack.c.bf16 %v1224_v35, %v1224_v35  ;;  %v3850_v39 = vpop.f32.mrb[27].mxu0 }
 0x574   :  { %3860 = vmatmul.mubr.msk.bf16.vlgmr.msra.gmra.mrb[28].mxu0 %vm399_vm2, %v1236_v38 }
 0x575   :  { %1526 = vmatprep.mubr.bf16.mxu0 %v4294_v0 }
 0x647   :  { %v1304_v43 = vpop.f32.mrb[28].mxu0 }
 0x648   :  { %v1305_v45 = vadd.f32 %v1304_v43, %v1242_v42  ;;  %v3861_v46 = vpop.f32.mrb[29].mxu0 }
 0x649   :  { %v1307_v48 = vpop.f32.mrb[30].mxu0  ;;  %v1315_v46 = vld [vmem:[#allocation5 + $0x3ac] sm:$0x1] }
 0x64a   :  { %1311 = vrot.lane.b32.xlu0 %v1305_v45, %s4299_s1  ;;  %v3862_v49 = vpop.f32.mrb[31].mxu0  ;;  %v1408_v48 = vunpack.c.l.bf16 %v1315_v46  ;;  %v4065_v46 = vld [vmem:[#allocation5 + $0x450] ss:$36 sps:$4 sm:$0xff]  }
 0x64c   :  { %v1412_v49 = vrot.slane %v1408_v48, %v4398_v22  ;;  %v4067_v48 = vld [vmem:[#allocation5 + $0x4e0] ss:$36 sps:$4 sm:$0xff]  }
 0x6bc   :  { %v1312_v50 = vpop.permute.xlu0 %1311 }
 0x6bd   :  { %v1314_v55 = vadd.f32 %v4179_v54, %v1312_v50  ;;  %v1316_v50 = vld [vmem:[#allocation5 + $0x3b0] sm:$0x1] }
 0x6be   :  { %v1418_v54 = vunpack.c.l.bf16 %v1316_v50 }
 0x6bf   :  { %1320 = vrot.lane.b32.xlu1 %v1314_v55, %s4295_s6 }
 0x731   :  { %v1321_v58 = vpop.permute.xlu1 %1320 }
 0x732   :  { %v1331_v60 = vsel %vm4550_vm4, %v1321_v58, 0.0  ;;  %v1323_v61 = vsel %vm57_vm13, %v1321_v58, 0.0  ;;  %v1339_v13 = vsel %vm4555_vm12, %v1321_v58, 0.0  ;;  %v1347_v2 = vsel %vm4559_vm6, %v1321_v58, 0.0 }
 0x733   :  { %v1332_v62 = vsel %vm399_vm2, %v1331_v60, 0.0  ;;  %v1324_v63 = vsel %vm399_vm2, %v1323_v61, 0.0  ;;  %v1340_v4 = vsel %vm399_vm2, %v1339_v13, 0.0  ;;  %v1348_v8 = vsel %vm399_vm2, %v1347_v2, 0.0 }
 0x734   :  { %1333 = vadd.xlane.f32.xlu0 %v1332_v62  ;;  %1325 = vadd.xlane.f32.xlu1 %v1324_v63  ;;  %v1355_v9 = vsel %vm4575_vm0, %v1321_v58, 0.0 }
 0x735   :  { %v1356_v10 = vsel %vm399_vm2, %v1355_v9, 0.0 }
 0x738   :  { %1341 = vadd.xlane.f32.xlu0 %v1340_v4  ;;  %1349 = vadd.xlane.f32.xlu1 %v1348_v8 }
 0x73c   :  { %1357 = vadd.xlane.f32.xlu0 %v1356_v10 }
 0x7c1   :  { %v1334_v11 = vpop.xlane.xlu0 %1333  ;;  %v1326_v12 = vpop.xlane.xlu1 %1325 }
 0x7c2   :  { %v1327_v14 = vmul.f32 0.09090909, %v1326_v12  ;;  %v1335_v18 = vmul.f32 0.09090909, %v1334_v11 }
 0x7c4   :  { %v1328_v47 = vsel %vm57_vm13, %v1327_v14, 0.0 }
 0x7c5   :  { %v1342_v19 = vpop.xlane.xlu0 %1341  ;;  %v1350_v20 = vpop.xlane.xlu1 %1349  ;;  %v1336_v23 = vsel %vm4550_vm4, %v1335_v18, %v1328_v47 }
 0x7c6   :  { %v1343_v51 = vmul.f32 0.09090909, %v1342_v19  ;;  %v1351_v24 = vmul.f32 0.09090909, %v1350_v20  ;;  %v4050_v19 = vld [vmem:[#allocation5 + $0x2ec] ss:$36 sps:$4 sm:$0xff]  }
 0x7c7   :  { %v4052_v20 = vld [vmem:[#allocation5 + $0x2f0] ss:$36 sps:$4 sm:$0xff]  }
 0x7c8   :  { %v1344_v1 = vsel %vm4555_vm12, %v1343_v51, %v1336_v23  ;;  %v4055_v51 = vld [vmem:[#allocation5 + $0x338] ss:$36 sps:$4 sm:$0xff]   ;;  %1494 = vmatprep.subr.bf16.mxu0 %v4052_v20  ;;  %v1434_v23 = vld [vmem:[#allocation5 + $0x3c4] sm:$0xff] }
 0x7c9   :  { %v1358_v25 = vpop.xlane.xlu0 %1357  ;;  %v1352_v27 = vsel %vm4559_vm6, %v1351_v24, %v1344_v1  ;;  %1495 = vmatpush1.bf16.msra.mxu0 %v4050_v19  ;;  %v4053_v24 = vld [vmem:[#allocation5 + $0x334] ss:$36 sps:$4 sm:$0xff]  }
 0x7ca   :  { %v1359_v26 = vmul.f32 0.09090909, %v1358_v25  ;;  %1496 = vmatprep.subr.bf16.mxu0 %v4055_v51  ;;  %v4058_v25 = vld [vmem:[#allocation5 + $0x380] ss:$36 sps:$4 sm:$0xff]  }
 0x7cc   :  { %v1360_v29 = vsel %vm4575_vm0, %v1359_v26, %v1352_v27  ;;  %v3580_v26 = vcombine.high %v1434_v23, %v1434_v23  ;;  %v4056_v27 = vld [vmem:[#allocation5 + $0x37c] ss:$36 sps:$4 sm:$0xff]  }
 0x7cd   :  { %1362 = vrot.lane.b32.xlu1 %v1360_v29, %s4299_s1  ;;  %1497 = vmatpush1.bf16.msra.mxu0 %v4053_v24  ;;  %v3579_v29 = vcombine.low %v1434_v23, %v1434_v23 }
 0x7ce   :  { %1498 = vmatprep.subr.bf16.mxu0 %v4058_v25 }
 0x7d1   :  { %1499 = vmatpush1.bf16.msra.mxu0 %v4056_v27 }
 0x83f   :  { %v1363_v30 = vpop.permute.xlu1 %1362 }
 0x840   :  { %v4595_v32 = vsub.f32 %v1314_v55, %v1363_v30  ;;  %v1422_v55 = vrot.slane %v1418_v54, %v4398_v22  ;;  %v1492_v30 = vand.u32 %v3580_v26, %v4355_v17  ;;  %v4069_v54 = vld [vmem:[#allocation5 + $0x570] ss:$36 sps:$4 sm:$0xff]  }
 0x842   :  { %v1366_v33 = vmul.f32 %v4595_v32, %v4595_v32  ;;  %1500 = vmatprep.subr.bf16.mxu0 %v1492_v30 }
 0x844   :  { %1368 = vrot.lane.b32.xlu0 %v1366_v33, %s4295_s6  ;;  %v1489_v33 = vand.u32 %v3579_v29, %v4355_v17 }
 0x846   :  { %1501 = vmatpush1.bf16.msra.mxu0 %v1489_v33 }
 0x8b6   :  { %v1369_v34 = vpop.permute.xlu0 %1368 }
 0x8b7   :  { %v1377_v35 = vsel %vm4550_vm4, %v1369_v34, 0.0  ;;  %v1371_v36 = vsel %vm57_vm13, %v1369_v34, 0.0  ;;  %v1389_v39 = vsel %vm4559_vm6, %v1369_v34, 0.0  ;;  %v1383_v40 = vsel %vm4555_vm12, %v1369_v34, 0.0 }
 0x8b8   :  { %v1378_v37 = vsel %vm399_vm2, %v1377_v35, 0.0  ;;  %v1372_v38 = vsel %vm399_vm2, %v1371_v36, 0.0  ;;  %v1390_v41 = vsel %vm399_vm2, %v1389_v39, 0.0  ;;  %v1384_v42 = vsel %vm399_vm2, %v1383_v40, 0.0  ;;  %v4061_v35 = vld [vmem:[#allocation5 + $0x330] ss:$36 sps:$4 sm:$0xff]  }
 0x8b9   :  { %1379 = vadd.xlane.f32.xlu0 %v1378_v37  ;;  %1373 = vadd.xlane.f32.xlu1 %v1372_v38  ;;  %v1395_v43 = vsel %vm4575_vm0, %v1369_v34, 0.0  ;;  %v4062_v36 = vld [vmem:[#allocation5 + $0x378] ss:$36 sps:$4 sm:$0xff]   ;;  %v4063_v40 = vld [vmem:[#allocation5 + $0x3c0] ss:$36 sps:$4 sm:$0xff]  }
 0x8ba   :  { %v1396_v45 = vsel %vm399_vm2, %v1395_v43, 0.0  ;;  %1630 = vmatpush1.bf16.msra.mxu1 %v4061_v35  ;;  %v4064_v43 = vld [vmem:[#allocation5 + $0x408] ss:$36 sps:$4 sm:$0xff]  }
 0x8bb   :  { %1631 = vmatprep.subr.bf16.mxu1 %v4294_v0 }
 0x8bd   :  { %1391 = vadd.xlane.f32.xlu0 %v1390_v41  ;;  %1385 = vadd.xlane.f32.xlu1 %v1384_v42 }
 0x8be   :  { %1632 = vmatpush1.bf16.msra.mxu1 %v4062_v36 }
 0x8bf   :  { %1633 = vmatprep.subr.bf16.mxu1 %v4294_v0 }
 0x8c1   :  { %1397 = vadd.xlane.f32.xlu1 %v1396_v45 }
 0x8c2   :  { %1634 = vmatpush1.bf16.msra.mxu1 %v4063_v40 }
 0x8c3   :  { %1635 = vmatprep.subr.bf16.mxu1 %v4294_v0 }
 0x8c6   :  { %1636 = vmatpush1.bf16.msra.mxu1 %v4064_v43 }
 0x8c7   :  { %1637 = vmatprep.subr.bf16.mxu1 %v4294_v0 }
 0x8ca   :  { %1638 = vmatpush1.bf16.msra.mxu1 %v4065_v46 }
 0x8cb   :  { %1639 = vmatprep.subr.bf16.mxu1 %v4294_v0 }
 0x8d2   :  { %1414 = vrot.lane.b32.xlu1 %v1412_v49, %s4299_s1  ;;  %v4068_v49 = vld [vmem:[#allocation5 + $0x528] ss:$36 sps:$4 sm:$0xff]  }
 0x8d6   :  { %1424 = vrot.lane.b32.xlu1 %v1422_v55, %s4299_s1  ;;  %v4070_v55 = vld [vmem:[#allocation5 + $0x5b8] ss:$36 sps:$4 sm:$0xff]  }
 0x946   :  { %v1380_v58 = vpop.xlane.xlu0 %1379  ;;  %v1374_v60 = vpop.xlane.xlu1 %1373 }
 0x947   :  { %v1375_v61 = vmul.f32 0.09090909, %v1374_v60  ;;  %v1381_v62 = vmul.f32 0.09090909, %v1380_v58  ;;  %v1436_v58 = vld [vmem:[#allocation5 + $0x364] sm:$0x11] }
 0x948   :  { %v1437_v60 = vunpack.c.l.bf16 %v1436_v58 }
 0x949   :  { %v1376_v63 = vsel %vm57_vm13, %v1375_v61, 0.0  ;;  %v1438_v61 = vunpack.c.h.bf16 %v1436_v58 }
 0x94a   :  { %v1392_v13 = vpop.xlane.xlu0 %1391  ;;  %v1386_v2 = vpop.xlane.xlu1 %1385  ;;  %v1382_v8 = vsel %vm4550_vm4, %v1381_v62, %v1376_v63  ;;  %v1442_v62 = vrot.slane %v1437_v60, %v4398_v22 }
 0x94b   :  { %v1387_v4 = vmul.f32 0.09090909, %v1386_v2  ;;  %v1393_v9 = vmul.f32 0.09090909, %v1392_v13  ;;  %v1446_v63 = vrot.slane %v1438_v61, %v4398_v22 }
 0x94d   :  { %v1388_v10 = vsel %vm4555_vm12, %v1387_v4, %v1382_v8 }
 0x94e   :  { %v1398_v11 = vpop.xlane.xlu1 %1397  ;;  %v1394_v14 = vsel %vm4559_vm6, %v1393_v9, %v1388_v10 }
 0x94f   :  { %v1399_v12 = vmul.f32 0.09090909, %v1398_v11 }
 0x951   :  { %v1400_v18 = vsel %vm4575_vm0, %v1399_v12, %v1394_v14 }
 0x952   :  { %v1401_v47 = vadd.f32 1e-05, %v1400_v18  ;;  %v1415_v34 = vpop.permute.xlu1 %1414 }
 0x954   :  { %4157 = vrsqrt.f32 %v1401_v47  ;;  %v1559_v47 = vld [vmem:[#allocation5 + $0x36c] sm:$0x1] }
 0x955   :  { %v1560_v19 = vunpack.c.l.bf16 %v1559_v47 }
 0x956   :  { %v1425_v39 = vpop.permute.xlu1 %1424 }
 0x957   :  { %v1564_v20 = vrot.slane %v1560_v19, %v4398_v22 }
 0x95e   :  { %v4158_v1 = vpop.eup %4157 }
 0x95f   :  { %1404 = vrot.lane.b32.xlu0 %v4158_v1, %s4299_s1 }
 0x9d1   :  { %v1405_v37 = vpop.permute.xlu0 %1404 }
 0x9d2   :  { %v1407_v38 = vmul.f32 %v1405_v37, %v4595_v32  ;;  %v4066_v32 = vld [vmem:[#allocation5 + $0x498] ss:$36 sps:$4 sm:$0xff]  }
 0x9d3   :  { %1640 = vmatpush1.bf16.msra.mxu1 %v4066_v32 }
 0x9d4   :  { %v1417_v41 = vmul.f32 %v1415_v34, %v1407_v38  ;;  %1641 = vmatprep.subr.bf16.mxu1 %v4294_v0 }
 0x9d6   :  { %v1427_v42 = vadd.f32 %v1425_v39, %v1417_v41 }
 0x9d7   :  { %1642 = vmatpush1.bf16.msra.mxu1 %v4067_v48 }
 0x9d8   :  { %v1435_v45 = vpack.c.bf16 %v1427_v42, %v1427_v42  ;;  %1643 = vmatprep.subr.bf16.mxu1 %v4294_v0 }
 0x9da   :  { %1448 = vrot.lane.b32.xlu0 %v1435_v45, %s4295_s6 }
 0x9db   :  { %1644 = vmatpush1.bf16.msra.mxu1 %v4068_v49 }
 0x9dc   :  { %1645 = vmatprep.subr.bf16.mxu1 %v4294_v0 }
 0x9df   :  { %1646 = vmatpush1.bf16.msra.mxu1 %v4069_v54 }
 0x9e0   :  { %1647 = vmatprep.subr.bf16.mxu1 %v4294_v0 }
 0x9e3   :  { %1648 = vmatpush1.bf16.msra.mxu1 %v4070_v55 }
 0xa4c   :  { %v1449_v50 = vpop.permute.xlu0 %1448 }
 0xa4d   :  { %3581 = vmatmul.mubr.msk.bf16.vlgmr.msra.gmra.mrb[32].mxu0 %vm399_vm2, %v1449_v50 }
 0xa4e   :  { %2089 = vmatprep.mubr.bf16.mxu0 %v4294_v0 }
 0xb20   :  { %v1528_v13 = vpop.f32.mrb[32].mxu0 }
 0xb21   :  { %v1529_v2 = vadd.f32 %v1528_v13, %v1442_v62  ;;  %v1530_v4 = vpop.f32.mrb[33].mxu0 }
 0xb22   :  { %v1531_v8 = vadd.f32 %v1530_v4, %v1446_v63  ;;  %v1532_v9 = vpop.f32.mrb[34].mxu0 }
 0xb23   :  { %v1535_v10 = vmax.f32 %v1529_v2, 0.0  ;;  %v1533_v11 = vpop.f32.mrb[35].mxu0 }
 0xb24   :  { %v1536_v12 = vmax.f32 %v1531_v8, 0.0 }
 0xb25   :  { %v1557_v18 = vpack.c.bf16 %v1535_v10, %v1535_v10 }
 0xb26   :  { %v1558_v14 = vpack.c.bf16 %v1536_v12, %v1536_v12 }
 0xb28   :  { %3592 = vmatprep.mubr.msk.bf16.mxu1 %vm5055_vm7, %v1558_v14  ;;  %vm5077_vm7 = vmmov %vm5074_vm1 }
 0xb29   :  { %1662 = vmatmul.mubr.bf16.vlgmr.msra.gmra.mrb[16].mxu1 %v1557_v18 }
 0xb2a   :  { %2171 = vmatprep.mubr.bf16.mxu1 %v4294_v0 }
 0xbfc   :  { %v1663_v51 = vpop.f32.mrb[16].mxu1 }
 0xbfd   :  { %v1664_v23 = vadd.f32 %v1663_v51, %v1564_v20  ;;  %v1665_v24 = vpop.f32.mrb[17].mxu1 }
 0xbfe   :  { %v1666_v1 = vpop.f32.mrb[18].mxu1 }
 0xbff   :  { %v1667_v25 = vpop.f32.mrb[19].mxu1  ;;  %1670 = vrot.lane.b32.xlu1 %v1664_v23, %s4299_s1  ;;  %v1674_v23 = vld [vmem:[#allocation5 + $0x3b4] sm:$0x1] }
 0xc00   :  { %v1757_v24 = vunpack.c.l.bf16 %v1674_v23  ;;  %v1675_v25 = vld [vmem:[#allocation5 + $0x3f4] sm:$0x1] }
 0xc01   :  { %v4095_v23 = vld [vmem:[#allocation5 + $0x174] ss:$36 sps:$4 sm:$0xff]  }
 0xc02   :  { %v1761_v1 = vrot.slane %v1757_v24, %v4398_v22 }
 0xc71   :  { %v1671_v26 = vpop.permute.xlu1 %1670 }
 0xc72   :  { %v1673_v27 = vadd.f32 %v1671_v26, %v1427_v42  ;;  %v1767_v26 = vunpack.c.l.bf16 %v1675_v25 }
 0xc74   :  { %1677 = vrot.lane.b32.xlu0 %v1673_v27, %s4295_s6 }
 0xce6   :  { %v1678_v29 = vpop.permute.xlu0 %1677 }
 0xce7   :  { %v1686_v30 = vsel %vm4550_vm4, %v1678_v29, 0.0  ;;  %v1680_v33 = vsel %vm57_vm13, %v1678_v29, 0.0  ;;  %v1692_v36 = vsel %vm4555_vm12, %v1678_v29, 0.0  ;;  %v1698_v37 = vsel %vm4559_vm6, %v1678_v29, 0.0 }
 0xce8   :  { %v1687_v34 = vsel %vm399_vm2, %v1686_v30, 0.0  ;;  %v1681_v35 = vsel %vm399_vm2, %v1680_v33, 0.0  ;;  %v1693_v38 = vsel %vm399_vm2, %v1692_v36, 0.0  ;;  %v1699_v39 = vsel %vm399_vm2, %v1698_v37, 0.0 }
 0xce9   :  { %1688 = vadd.xlane.f32.xlu0 %v1687_v34  ;;  %1682 = vadd.xlane.f32.xlu1 %v1681_v35  ;;  %v1704_v40 = vsel %vm4575_vm0, %v1678_v29, 0.0 }
 0xcea   :  { %v1705_v41 = vsel %vm399_vm2, %v1704_v40, 0.0 }
 0xced   :  { %1694 = vadd.xlane.f32.xlu0 %v1693_v38  ;;  %1700 = vadd.xlane.f32.xlu1 %v1699_v39 }
 0xcf1   :  { %1706 = vadd.xlane.f32.xlu0 %v1705_v41 }
 0xd76   :  { %v1689_v42 = vpop.xlane.xlu0 %1688  ;;  %v1683_v43 = vpop.xlane.xlu1 %1682 }
 0xd77   :  { %v1684_v45 = vmul.f32 0.09090909, %v1683_v43  ;;  %v1690_v46 = vmul.f32 0.09090909, %v1689_v42 }
 0xd79   :  { %v1685_v32 = vsel %vm57_vm13, %v1684_v45, 0.0 }
 0xd7a   :  { %v1695_v48 = vpop.xlane.xlu0 %1694  ;;  %v1701_v49 = vpop.xlane.xlu1 %1700  ;;  %v1691_v54 = vsel %vm4550_vm4, %v1690_v46, %v1685_v32 }
 0xd7b   :  { %v1696_v50 = vmul.f32 0.09090909, %v1695_v48  ;;  %v1702_v55 = vmul.f32 0.09090909, %v1701_v49  ;;  %v4071_v48 = vld [vmem:[#allocation5 + $0x168] ss:$36 sps:$4 sm:$0xff]  }
 0xd7c   :  { %v4073_v49 = vld [vmem:[#allocation5 + $0x16c] ss:$36 sps:$4 sm:$0xff]  }
 0xd7d   :  { %v1697_v58 = vsel %vm4555_vm12, %v1696_v50, %v1691_v54  ;;  %v4074_v50 = vld [vmem:[#allocation5 + $0x178] ss:$36 sps:$4 sm:$0xff]   ;;  %2057 = vmatprep.subr.bf16.mxu0 %v4073_v49  ;;  %v4110_v49 = vld [vmem:[#allocation5 + $0x184] ss:$36 sps:$4 sm:$0xff]  }
 0xd7e   :  { %v1707_v60 = vpop.xlane.xlu0 %1706  ;;  %v1703_v62 = vsel %vm4559_vm6, %v1702_v55, %v1697_v58  ;;  %v4076_v54 = vld [vmem:[#allocation5 + $0x17c] ss:$36 sps:$4 sm:$0xff]   ;;  %v4079_v55 = vld [vmem:[#allocation5 + $0x1b4] ss:$36 sps:$4 sm:$0xff]   ;;  %v4082_v58 = vld [vmem:[#allocation5 + $0x1c4] ss:$36 sps:$4 sm:$0xff]   ;;  %2058 = vmatpush1.bf16.msra.mxu0 %v4071_v48 }
 0xd7f   :  { %v1708_v61 = vmul.f32 0.09090909, %v1707_v60  ;;  %2139 = vmatprep.subr.bf16.mxu1 %v4076_v54  ;;  %v4077_v60 = vld [vmem:[#allocation5 + $0x1b0] ss:$36 sps:$4 sm:$0xff]   ;;  %2059 = vmatprep.subr.bf16.mxu0 %v4079_v55  ;;  %v1810_v55 = vld [vmem:[#allocation5 + $0x258] sm:$0xff] }
 0xd80   :  { %2140 = vmatpush1.bf16.msra.mxu1 %v4074_v50  ;;  %v4108_v50 = vld [vmem:[#allocation5 + $0x180] ss:$36 sps:$4 sm:$0xff]   ;;  %v4113_v54 = vld [vmem:[#allocation5 + $0x1cc] ss:$36 sps:$4 sm:$0xff]  }
 0xd81   :  { %v1709_v63 = vsel %vm4575_vm0, %v1708_v61, %v1703_v62  ;;  %v4080_v61 = vld [vmem:[#allocation5 + $0x1c0] ss:$36 sps:$4 sm:$0xff]   ;;  %2141 = vmatprep.subr.bf16.mxu1 %v4082_v58  ;;  %v4111_v58 = vld [vmem:[#allocation5 + $0x1c8] ss:$36 sps:$4 sm:$0xff]  }
 0xd82   :  { %1711 = vrot.lane.b32.xlu1 %v1709_v63, %s4299_s1  ;;  %v4085_v63 = vld [vmem:[#allocation5 + $0x1fc] ss:$36 sps:$4 sm:$0xff]   ;;  %2060 = vmatpush1.bf16.msra.mxu0 %v4077_v60  ;;  %v4116_v60 = vld [vmem:[#allocation5 + $0x214] ss:$36 sps:$4 sm:$0xff]  }
 0xd83   :  { %2061 = vmatprep.subr.bf16.mxu0 %v4085_v63  ;;  %v4114_v63 = vld [vmem:[#allocation5 + $0x210] ss:$36 sps:$4 sm:$0xff]  }
 0xd84   :  { %2142 = vmatpush1.bf16.msra.mxu1 %v4080_v61  ;;  %v3627_v61 = vcombine.high %v1810_v55, %v1810_v55 }
 0xdf4   :  { %v1712_v13 = vpop.permute.xlu1 %1711 }
 0xdf5   :  { %v4678_v2 = vsub.f32 %v1673_v27, %v1712_v13  ;;  %v1771_v27 = vrot.slane %v1767_v26, %v4398_v22  ;;  %v1807_v13 = vld [vmem:[#allocation5 + $0x240] sm:$0xff] }
 0xdf7   :  { %v1715_v4 = vmul.f32 %v4678_v2, %v4678_v2 }
 0xdf9   :  { %1717 = vrot.lane.b32.xlu0 %v1715_v4, %s4295_s6  ;;  %v1809_v4 = vld [vmem:[#allocation5 + $0x250] sm:$0xff] }
 0xe6b   :  { %v1718_v8 = vpop.permute.xlu0 %1717 }
 0xe6c   :  { %v1726_v9 = vsel %vm4550_vm4, %v1718_v8, 0.0  ;;  %v1720_v10 = vsel %vm57_vm13, %v1718_v8, 0.0  ;;  %v1738_v14 = vsel %vm4559_vm6, %v1718_v8, 0.0  ;;  %v1732_v18 = vsel %vm4555_vm12, %v1718_v8, 0.0 }
 0xe6d   :  { %v1727_v11 = vsel %vm399_vm2, %v1726_v9, 0.0  ;;  %v1721_v12 = vsel %vm399_vm2, %v1720_v10, 0.0  ;;  %v1739_v47 = vsel %vm399_vm2, %v1738_v14, 0.0  ;;  %v1733_v19 = vsel %vm399_vm2, %v1732_v18, 0.0  ;;  %v4086_v14 = vld [vmem:[#allocation5 + $0x208] ss:$36 sps:$4 sm:$0xff]  }
 0xe6e   :  { %1728 = vadd.xlane.f32.xlu0 %v1727_v11  ;;  %1722 = vadd.xlane.f32.xlu1 %v1721_v12  ;;  %v1744_v20 = vsel %vm4575_vm0, %v1718_v8, 0.0  ;;  %v4088_v8 = vld [vmem:[#allocation5 + $0x20c] ss:$36 sps:$4 sm:$0xff]   ;;  %v3621_v9 = vcombine.high %v1807_v13, %v1807_v13  ;;  %v3625_v10 = vcombine.high %v1809_v4, %v1809_v4  ;;  %v4083_v11 = vld [vmem:[#allocation5 + $0x1f8] ss:$36 sps:$4 sm:$0xff]   ;;  %v3620_v12 = vcombine.low %v1807_v13, %v1807_v13 }
 0xe6f   :  { %v1745_v51 = vsel %vm399_vm2, %v1744_v20, 0.0  ;;  %2143 = vmatprep.subr.bf16.mxu1 %v4088_v8  ;;  %2062 = vmatpush1.bf16.msra.mxu0 %v4083_v11  ;;  %v3626_v13 = vcombine.low %v1810_v55, %v1810_v55  ;;  %v4181_v8 = vld [vmem:[#allocation5 + $0x2d8] ss:$36 sps:$4 sm:$0xff]   ;;  %v4183_v11 = vld [vmem:[#allocation5 + $0x2d0] ss:$36 sps:$4 sm:$0xff]  }
 0xe70   :  { %v2034_v18 = vand.u32 %v3621_v9, %v4355_v17  ;;  %v2031_v20 = vand.u32 %v3620_v12, %v4355_v17  ;;  %2144 = vmatpush1.bf16.msra.mxu1 %v4086_v14  ;;  %v4184_v12 = vld [vmem:[#allocation5 + $0x558] ss:$36 sps:$4 sm:$0xff]  }
 0xe71   :  { %v2049_v9 = vand.u32 %v3626_v13, %v4355_v17  ;;  %v4185_v14 = vld [vmem:[#allocation5 + $0x318] ss:$36 sps:$4 sm:$0xff]  }
 0xe72   :  { %1740 = vadd.xlane.f32.xlu0 %v1739_v47  ;;  %1734 = vadd.xlane.f32.xlu1 %v1733_v19  ;;  %v3624_v47 = vcombine.low %v1809_v4, %v1809_v4  ;;  %v2046_v19 = vand.u32 %v3625_v10, %v4355_v17  ;;  %v2052_v4 = vand.u32 %v3627_v61, %v4355_v17  ;;  %v4182_v10 = vld [vmem:[#allocation5 + $0x510] ss:$36 sps:$4 sm:$0xff]  }
 0xe73   :  { %2063 = vmatprep.subr.bf16.mxu0 %v2034_v18  ;;  %v4186_v18 = vld [vmem:[#allocation5 + $0x5a0] ss:$36 sps:$4 sm:$0xff]  }
 0xe74   :  { %2145 = vmatprep.subr.bf16.mxu1 %v2046_v19  ;;  %2064 = vmatpush1.bf16.msra.mxu0 %v2031_v20  ;;  %v4189_v19 = vld [vmem:[#allocation5 + $0x3a8] ss:$36 sps:$4 sm:$0xff]   ;;  %v4190_v20 = vld [vmem:[#allocation5 + $0x630] ss:$36 sps:$4 sm:$0xff]  }
 0xe75   :  { %2098 = vmatprep.subr.bf16.mxu0 %v4095_v23  ;;  %v4192_v23 = vld [vmem:[#allocation5 + $0x678] ss:$36 sps:$4 sm:$0xff]  }
 0xe76   :  { %1746 = vadd.xlane.f32.xlu1 %v1745_v51  ;;  %v2043_v51 = vand.u32 %v3624_v47, %v4355_v17  ;;  %v4188_v47 = vld [vmem:[#allocation5 + $0x5e8] ss:$36 sps:$4 sm:$0xff]  }
 0xe78   :  { %2146 = vmatpush1.bf16.msra.mxu1 %v2043_v51  ;;  %v4191_v51 = vld [vmem:[#allocation5 + $0x3f0] ss:$36 sps:$4 sm:$0xff]  }
 0xe79   :  { %3863 = vmatprep.subr.bf16.mxu1 %v4297_v53 }
 0xe87   :  { %1763 = vrot.lane.b32.xlu1 %v1761_v1, %s4299_s1 }
 0xe8b   :  { %1773 = vrot.lane.b32.xlu1 %v1771_v27, %s4299_s1 }
 0xefb   :  { %v1729_v29 = vpop.xlane.xlu0 %1728  ;;  %v1723_v30 = vpop.xlane.xlu1 %1722 }
 0xefc   :  { %v1724_v33 = vmul.f32 0.09090909, %v1723_v30  ;;  %v1730_v34 = vmul.f32 0.09090909, %v1729_v29 }
 0xefe   :  { %v1725_v35 = vsel %vm57_vm13, %v1724_v33, 0.0  ;;  %v4093_v33 = vld [vmem:[#allocation5 + $0x170] ss:$36 sps:$4 sm:$0xff]  }
 0xeff   :  { %v1741_v36 = vpop.xlane.xlu0 %1740  ;;  %v1735_v37 = vpop.xlane.xlu1 %1734  ;;  %v1731_v39 = vsel %vm4550_vm4, %v1730_v34, %v1725_v35  ;;  %v4096_v34 = vld [vmem:[#allocation5 + $0x188] ss:$36 sps:$4 sm:$0xff]   ;;  %v4099_v35 = vld [vmem:[#allocation5 + $0x1bc] ss:$36 sps:$4 sm:$0xff]  }
 0xf00   :  { %v1736_v38 = vmul.f32 0.09090909, %v1735_v37  ;;  %v1742_v40 = vmul.f32 0.09090909, %v1741_v36  ;;  %v1808_v37 = vld [vmem:[#allocation5 + $0x248] sm:$0xff] }
 0xf02   :  { %v1737_v41 = vsel %vm4555_vm12, %v1736_v38, %v1731_v39  ;;  %v4100_v38 = vld [vmem:[#allocation5 + $0x1d0] ss:$36 sps:$4 sm:$0xff]   ;;  %v4103_v39 = vld [vmem:[#allocation5 + $0x204] ss:$36 sps:$4 sm:$0xff]  }
 0xf03   :  { %v1747_v42 = vpop.xlane.xlu1 %1746  ;;  %v1743_v45 = vsel %vm4559_vm6, %v1742_v40, %v1737_v41  ;;  %v3623_v40 = vcombine.high %v1808_v37, %v1808_v37  ;;  %v4101_v41 = vld [vmem:[#allocation5 + $0x200] ss:$36 sps:$4 sm:$0xff]  }
 0xf04   :  { %v1748_v43 = vmul.f32 0.09090909, %v1747_v42  ;;  %v4104_v42 = vld [vmem:[#allocation5 + $0x218] ss:$36 sps:$4 sm:$0xff]  }
 0xf06   :  { %v1749_v46 = vsel %vm4575_vm0, %v1748_v43, %v1743_v45  ;;  %v3622_v43 = vcombine.low %v1808_v37, %v1808_v37  ;;  %v4107_v45 = vld [vmem:[#allocation5 + $0x260] ss:$0 sps:$4 sm:$0xff]  }
 0xf07   :  { %v1750_v32 = vadd.f32 1e-05, %v1749_v46  ;;  %v1764_v24 = vpop.permute.xlu1 %1763  ;;  %v2040_v46 = vand.u32 %v3623_v40, %v4355_v17  ;;  %v2055_v48 = vand.u32 %v4107_v45, %v4355_v17 }
 0xf09   :  { %4159 = vrsqrt.f32 %v1750_v32  ;;  %v2037_v32 = vand.u32 %v3622_v43, %v4355_v17 }
 0xf0b   :  { %v1774_v26 = vpop.permute.xlu1 %1773 }
 0xf13   :  { %v4160_v62 = vpop.eup %4159 }
 0xf14   :  { %1753 = vrot.lane.b32.xlu0 %v4160_v62, %s4299_s1  ;;  %v4180_v62 = vld [vmem:[#allocation5 + $0x750] ss:$36 sps:$4 sm:$0xff]  }
 0xf86   :  { %v1754_v1 = vpop.permute.xlu0 %1753 }
 0xf87   :  { %v1756_v25 = vmul.f32 %v1754_v1, %v4678_v2  ;;  %v4097_v2 = vld [vmem:[#allocation5 + $0x1b8] ss:$36 sps:$4 sm:$0xff]   ;;  %v4194_v1 = vld [vmem:[#allocation5 + $0x6c0] ss:$36 sps:$4 sm:$0xff]  }
 0xf89   :  { %v1766_v27 = vmul.f32 %v1764_v24, %v1756_v25  ;;  %v4193_v24 = vld [vmem:[#allocation5 + $0x438] ss:$36 sps:$4 sm:$0xff]   ;;  %v4195_v25 = vld [vmem:[#allocation5 + $0x480] ss:$36 sps:$4 sm:$0xff]  }
 0xf8b   :  { %v4719_v29 = vadd.f32 %v1774_v26, %v1766_v27  ;;  %v4196_v26 = vld [vmem:[#allocation5 + $0x708] ss:$36 sps:$4 sm:$0xff]  }
 0xf8c   :  { %v4197_v27 = vld [vmem:[#allocation5 + $0x4c8] ss:$36 sps:$4 sm:$0xff]  }
 0xf8d   :  { %v1812_v30 = vpack.c.bf16 %v4719_v29, %v4719_v29 }
 0xf8f   :  { %1864 = vrot.lane.b32.xlu0 %v1812_v30, %s4295_s6  ;;  %v4198_v30 = vld [vmem:[#allocation5 + $0x520] ss:$36 sps:$4 sm:$0xff]  }
0x1001   :  { %v4724_v36 = vpop.permute.xlu0 %1864 }
0x1002   :  { %3629 = vmatmul.mubr.msk.bf16.vlgmr.msra.gmra.mrb[36].mxu0 %vm399_vm2, %v4724_v36  ;;  %3631 = vmatmul.mubr.msk.bf16.vlgmr.msra.gmra.mrb[20].mxu1 %vm399_vm2, %v4724_v36 }
0x1003   :  { %2099 = vmatpush1.bf16.msra.mxu0 %v4093_v33  ;;  %3864 = vmatpush3.bf16.msra.mxu1 %v4096_v34  ;;  %v1815_v33 = vld [vmem:[#allocation5 + $0x298] sm:$0x11]  ;;  %v1813_v34 = vld [vmem:[#allocation5 + $0x288] sm:$0x11] }
0x1004   :  { %2100 = vmatprep.subr.bf16.mxu0 %v4099_v35  ;;  %3865 = vmatprep.subr.bf16.mxu1 %v4297_v53  ;;  %v1822_v35 = vunpack.c.l.bf16 %v1815_v33  ;;  %v1823_v55 = vunpack.c.h.bf16 %v1815_v33  ;;  %v4202_v33 = vld [vmem:[#allocation5 + $0x328] ss:$36 sps:$4 sm:$0xff]  }
0x1005   :  { %2130 = vmatprep.mubr.bf16.mxu0 %v4294_v0  ;;  %3871 = vmatprep.mubr.msk.bf16.mxu1 %vm4298_vm3, %v4297_v53 }
0x1006   :  { %v1846_v37 = vrot.slane %v1822_v35, %v4398_v22 }
0x1007   :  { %2101 = vmatpush1.bf16.msra.mxu0 %v4097_v2  ;;  %3866 = vmatpush3.bf16.msra.mxu1 %v4100_v38 }
0x1008   :  { %2102 = vmatprep.subr.bf16.mxu0 %v4103_v39  ;;  %3867 = vmatprep.subr.bf16.mxu1 %v4297_v53 }
0x100b   :  { %2103 = vmatpush1.bf16.msra.mxu0 %v4101_v41  ;;  %3868 = vmatpush3.bf16.msra.mxu1 %v4104_v42 }
0x100c   :  { %2104 = vmatprep.subr.bf16.mxu0 %v2040_v46  ;;  %3869 = vmatprep.subr.bf16.mxu1 %v4297_v53 }
0x100f   :  { %2105 = vmatpush1.bf16.msra.mxu0 %v2037_v32  ;;  %3870 = vmatpush3.bf16.msra.mxu1 %v2055_v48 }
0x1010   :  { %2180 = vmatprep.subr.bf16.mxu0 %v4110_v49  ;;  %3875 = vmatprep.subr.bf16.mxu1 %v4297_v53 }
0x1012   :  { %3630 = vmatmul.mubr.msk.bf16.vlgmr.msra.gmra.mrb[40].mxu0 %vm399_vm2, %v4724_v36  ;;  %3872 = vmatmul.mubr.msk.bf16.vlgmr.msra.gmra.mrb[24].mxu1 %vm399_vm2, %v4724_v36 }
0x1013   :  { %2181 = vmatpush1.bf16.msra.mxu0 %v4108_v50  ;;  %2212 = vmatprep.mubr.bf16.mxu0 %v4294_v0 }
0x1014   :  { %2182 = vmatprep.subr.bf16.mxu0 %v4113_v54  ;;  %3876 = vmatpush3.bf16.msra.mxu1 %v4180_v62  ;;  %v1814_v54 = vld [vmem:[#allocation5 + $0x290] sm:$0x11]  ;;  %v1850_v62 = vrot.slane %v1823_v55, %v4398_v22 }
0x1015   :  { %3877 = vmatprep.subr.bf16.mxu1 %v4297_v53  ;;  %3879 = vmatprep.mubr.msk.bf16.mxu1 %vm4298_vm3, %v4297_v53  ;;  %v1821_v61 = vunpack.c.h.bf16 %v1814_v54 }
0x1017   :  { %2183 = vmatpush1.bf16.msra.mxu0 %v4111_v58  ;;  %v1820_v58 = vunpack.c.l.bf16 %v1814_v54 }
0x1018   :  { %2184 = vmatprep.subr.bf16.mxu0 %v4116_v60  ;;  %3878 = vmatpush3.bf16.msra.mxu1 %v4395_v15  ;;  %v4187_v15 = vld [vmem:[#allocation5 + $0x360] ss:$36 sps:$4 sm:$0xff]   ;;  %v1818_v60 = vunpack.c.l.bf16 %v1813_v34 }
0x1019   :  { %2409 = vmatprep.subr.bf16.mxu1 %v4181_v8 }
0x101a   :  { %v1830_v13 = vrot.slane %v1818_v60, %v4398_v22 }
0x101b   :  { %2185 = vmatpush1.bf16.msra.mxu0 %v4114_v63  ;;  %v1838_v63 = vrot.slane %v1820_v58, %v4398_v22 }
0x101c   :  { %2186 = vmatprep.subr.bf16.mxu0 %v2052_v4  ;;  %v1842_v4 = vrot.slane %v1821_v61, %v4398_v22 }
0x101f   :  { %2187 = vmatpush1.bf16.msra.mxu0 %v2049_v9 }
0x1020   :  { %3745 = vmatprep.subr.bf16.mxu0 %v4182_v10 }
0x1022   :  { %3632 = vmatmul.mubr.msk.bf16.vlgmr.msra.gmra.mrb[44].mxu0 %vm399_vm2, %v4724_v36  ;;  %v1819_v36 = vunpack.c.h.bf16 %v1813_v34  ;;  %v4203_v34 = vld [vmem:[#allocation5 + $0x5b0] ss:$36 sps:$4 sm:$0xff]  }
0x1023   :  { %3746 = vmatpush3.bf16.msra.mxu0 %v4183_v11 }
0x1024   :  { %3747 = vmatprep.subr.bf16.mxu0 %v4184_v12  ;;  %v1834_v2 = vrot.slane %v1819_v36, %v4398_v22 }
0x1027   :  { %3748 = vmatpush3.bf16.msra.mxu0 %v4185_v14 }
0x1028   :  { %3749 = vmatprep.subr.bf16.mxu0 %v4186_v18 }
0x102b   :  { %3750 = vmatpush3.bf16.msra.mxu0 %v4187_v15 }
0x102c   :  { %3751 = vmatprep.subr.bf16.mxu0 %v4188_v47 }
0x102f   :  { %3752 = vmatpush3.bf16.msra.mxu0 %v4189_v19 }
0x1030   :  { %3753 = vmatprep.subr.bf16.mxu0 %v4190_v20 }
0x1033   :  { %3754 = vmatpush3.bf16.msra.mxu0 %v4191_v51 }
0x1034   :  { %3755 = vmatprep.subr.bf16.mxu0 %v4192_v23 }
0x1037   :  { %3756 = vmatpush3.bf16.msra.mxu0 %v4193_v24 }
0x1038   :  { %3757 = vmatprep.subr.bf16.mxu0 %v4194_v1 }
0x103b   :  { %3758 = vmatpush3.bf16.msra.mxu0 %v4195_v25 }
0x103c   :  { %3759 = vmatprep.subr.bf16.mxu0 %v4196_v26  ;;  %v4199_v26 = vld [vmem:[#allocation5 + $0x2d4] ss:$36 sps:$4 sm:$0xff]  }
0x103f   :  { %3760 = vmatpush3.bf16.msra.mxu0 %v4197_v27  ;;  %v4200_v27 = vld [vmem:[#allocation5 + $0x2e0] ss:$36 sps:$4 sm:$0xff]  }
0x1040   :  { %3773 = vmatprep.subr.bf16.mxu0 %v4198_v30  ;;  %v4201_v30 = vld [vmem:[#allocation5 + $0x568] ss:$36 sps:$4 sm:$0xff]  }
0x10d5   :  { %v2091_v38 = vpop.f32.mrb[36].mxu0  ;;  %v2173_v39 = vpop.f32.mrb[20].mxu1 }
0x10d6   :  { %v2174_v40 = vadd.f32 %v2173_v39, %v1846_v37  ;;  %v2093_v41 = vpop.f32.mrb[37].mxu0  ;;  %v2175_v42 = vpop.f32.mrb[21].mxu1  ;;  %v2092_v18 = vadd.f32 %v2091_v38, %v1830_v13  ;;  %v4205_v38 = vld [vmem:[#allocation5 + $0x5f8] ss:$36 sps:$4 sm:$0xff]  }
0x10d7   :  { %v2094_v43 = vadd.f32 %v2093_v41, %v1834_v2  ;;  %v2095_v45 = vpop.f32.mrb[38].mxu0  ;;  %v2177_v46 = vpop.f32.mrb[22].mxu1  ;;  %v2176_v10 = vadd.f32 %v2175_v42, %v1850_v62  ;;  %v4206_v39 = vld [vmem:[#allocation5 + $0x3b8] ss:$36 sps:$4 sm:$0xff]   ;;  %v4209_v41 = vld [vmem:[#allocation5 + $0x688] ss:$36 sps:$4 sm:$0xff]  }
0x10d8   :  { %v2096_v32 = vpop.f32.mrb[39].mxu0  ;;  %v2178_v48 = vpop.f32.mrb[23].mxu1  ;;  %v4210_v42 = vld [vmem:[#allocation5 + $0x448] ss:$36 sps:$4 sm:$0xff]   ;;  %v4212_v45 = vld [vmem:[#allocation5 + $0x490] ss:$36 sps:$4 sm:$0xff]  }
0x10d9   :  { %v2262_v49 = vmul.f32 %v2174_v40, %v2094_v43  ;;  %v4207_v40 = vld [vmem:[#allocation5 + $0x640] ss:$36 sps:$4 sm:$0xff]   ;;  %v4211_v43 = vld [vmem:[#allocation5 + $0x6d0] ss:$36 sps:$4 sm:$0xff]   ;;  %v4213_v46 = vld [vmem:[#allocation5 + $0x718] ss:$36 sps:$4 sm:$0xff]  }
0x10da   :  { %v4214_v32 = vld [vmem:[#allocation5 + $0x4d8] ss:$36 sps:$4 sm:$0xff]  }
0x10db   :  { %v2265_v50 = vpack.c.bf16 %v2262_v49, %v2262_v49 }
0x10dd   :  { %2302 = vmatprep.mubr.bf16.mxu0 %v2265_v50 }
0x10e5   :  { %v2132_v8 = vpop.f32.mrb[40].mxu0  ;;  %v4759_v9 = vpop.f32.mrb[24].mxu1 }
0x10e6   :  { %v2133_v11 = vadd.f32 %v2132_v8, %v1838_v63  ;;  %v2134_v12 = vpop.f32.mrb[41].mxu0  ;;  %v3873_v14 = vpop.f32.mrb[25].mxu1 }
0x10e7   :  { %v2135_v15 = vadd.f32 %v2134_v12, %v1842_v4  ;;  %v2136_v47 = vpop.f32.mrb[42].mxu0  ;;  %v2258_v19 = vpop.f32.mrb[26].mxu1 }
0x10e8   :  { %v2263_v20 = vmul.f32 %v2176_v10, %v2133_v11  ;;  %v2137_v51 = vpop.f32.mrb[43].mxu0  ;;  %v3874_v23 = vpop.f32.mrb[27].mxu1 }
0x10e9   :  { %v2261_v24 = vmul.f32 %v2135_v15, %v2092_v18 }
0x10ea   :  { %v2266_v1 = vpack.c.bf16 %v2263_v20, %v2263_v20 }
0x10eb   :  { %v2264_v25 = vpack.c.bf16 %v2261_v24, %v2261_v24 }
0x10ec   :  { %3880 = vmatmul.mubr.msk.bf16.vlgmr.msra.gmra.mrb[28].mxu1 %vm5072_vm8, %v2266_v1  ;;  %vm5076_vm8 = vmmov %vm5074_vm1 }
0x10ed   :  { %2303 = vmatmul.mubr.bf16.vlgmr.msra.gmra.mrb[48].mxu0 %v2264_v25  ;;  %2410 = vmatpush1.bf16.msra.mxu1 %v4199_v26 }
0x10ee   :  { %2411 = vmatprep.subr.bf16.mxu1 %v4490_v6  ;;  %2441 = vmatprep.mubr.bf16.mxu1 %v4294_v0  ;;  %v4204_v6 = vld [vmem:[#allocation5 + $0x370] ss:$36 sps:$4 sm:$0xff]  }
0x10ef   :  { %3774 = vmatpush3.bf16.msra.mxu0 %v4200_v27 }
0x10f0   :  { %3775 = vmatprep.subr.bf16.mxu0 %v4201_v30 }
0x10f1   :  { %2412 = vmatpush1.bf16.msra.mxu1 %v4492_v7  ;;  %v4208_v7 = vld [vmem:[#allocation5 + $0x400] ss:$36 sps:$4 sm:$0xff]  }
0x10f2   :  { %3883 = vmatprep.subr.bf16.mxu1 %v4297_v53 }
0x10f3   :  { %3776 = vmatpush3.bf16.msra.mxu0 %v4202_v33 }
0x10f4   :  { %3777 = vmatprep.subr.bf16.mxu0 %v4203_v34 }
0x10f5   :  { %v4766_v35 = vpop.f32.mrb[44].mxu0 }
0x10f6   :  { %v4768_v36 = vpop.f32.mrb[45].mxu0 }
0x10f7   :  { %v2218_v37 = vpop.f32.mrb[46].mxu0  ;;  %3778 = vmatpush3.bf16.msra.mxu0 %v4204_v6 }
0x10f8   :  { %v2219_v2 = vpop.f32.mrb[47].mxu0  ;;  %3779 = vmatprep.subr.bf16.mxu0 %v4205_v38 }
0x10fb   :  { %3780 = vmatpush3.bf16.msra.mxu0 %v4206_v39 }
0x10fc   :  { %3781 = vmatprep.subr.bf16.mxu0 %v4207_v40 }
0x10ff   :  { %3782 = vmatpush3.bf16.msra.mxu0 %v4208_v7 }
0x1100   :  { %3783 = vmatprep.subr.bf16.mxu0 %v4209_v41 }
0x1103   :  { %3784 = vmatpush3.bf16.msra.mxu0 %v4210_v42 }
0x1104   :  { %3785 = vmatprep.subr.bf16.mxu0 %v4211_v43 }
0x1107   :  { %3786 = vmatpush3.bf16.msra.mxu0 %v4212_v45 }
0x1108   :  { %3787 = vmatprep.subr.bf16.mxu0 %v4213_v46 }
0x110b   :  { %3788 = vmatpush3.bf16.msra.mxu0 %v4214_v32 }
0x110c   :  { %2968 = vmatprep.subr.bf16.mxu0 %v4294_v0 }
0x11bf   :  { %v2344_v48 = vpop.f32.mrb[28].mxu1 }
0x11c0   :  { %v3761_v49 = vpop.f32.mrb[48].mxu0  ;;  %v3881_v50 = vpop.f32.mrb[29].mxu1 }
0x11c1   :  { %v3762_v54 = vpop.f32.mrb[49].mxu0  ;;  %v2347_v55 = vpop.f32.mrb[30].mxu1 }
0x11c2   :  { %v3763_v58 = vadd.f32 %v3762_v54, %v3761_v49  ;;  %v3764_v60 = vpop.f32.mrb[50].mxu0  ;;  %v3882_v61 = vpop.f32.mrb[31].mxu1 }
0x11c3   :  { %v3765_v62 = vpop.f32.mrb[51].mxu0 }
0x11c4   :  { %v2345_v63 = vadd.f32 %v3763_v58, %v2344_v48 }
0x11c6   :  { %v2355_v13 = vsel %vm4420_vm11, %v2345_v63, -1e+30  ;;  %v2350_v4 = vsel %vm5073_vm10, %v2345_v63, -1e+30  ;;  %v2360_v11 = vsel %vm4425_vm14, %v2345_v63, -1e+30  ;;  %vm5078_vm10 = vmmov %vm5074_vm1 }
0x11c7   :  { %v2356_v8 = vsel %vm5074_vm1, %v2355_v13, -inf  ;;  %v2351_v10 = vsel %vm5075_vm15, %v2350_v4, -inf  ;;  %v2365_v12 = vsel %vm4439_vm5, %v2345_v63, -1e+30  ;;  %v2361_v14 = vsel %vm5076_vm8, %v2360_v11, -inf  ;;  %vm5081_vm15 = vmmov %vm5076_vm8 }
0x11c8   :  { %2357 = vmax.xlane.f32.xlu0 %v2356_v8  ;;  %2352 = vmax.xlane.f32.xlu1 %v2351_v10  ;;  %v2366_v18 = vsel %vm5077_vm7, %v2365_v12, -inf  ;;  %v2370_v15 = vsel %vm4448_vm9, %v2345_v63, -1e+30  ;;  %vm5079_vm1 = vcmp.lt.s32.totalorder %v4414_v5, 5  ;;  %v1825_v4 = vunpack.c.h.bf16 %v1816_v28  ;;  %v1817_v8 = vld [vmem:[#allocation5 + $0x2a8] sm:$0x1] }
0x11c9   :  { %v2371_v47 = vsel %vm5078_vm10, %v2370_v15, -inf  ;;  %vm5080_vm7 = vmmov %vm5079_vm1  ;;  %v1826_v11 = vunpack.c.l.bf16 %v1817_v8 }
0x11ca   :  { %vm5082_vm10 = vmmov %vm5076_vm8  ;;  %v1858_v10 = vrot.slane %v1825_v4, %v4398_v22 }
0x11cc   :  { %2362 = vmax.xlane.f32.xlu0 %v2361_v14  ;;  %2367 = vmax.xlane.f32.xlu1 %v2366_v18  ;;  %v2217_v14 = vadd.f32 %v4768_v36, %v1858_v10 }
0x11d0   :  { %2372 = vmax.xlane.f32.xlu0 %v2371_v47 }
0x1255   :  { %v2358_v19 = vpop.xlane.xlu0 %2357  ;;  %v2353_v20 = vpop.xlane.xlu1 %2352 }
0x1256   :  { %v2354_v51 = vsel %vm5079_vm1, %v2353_v20, 0.0  ;;  %vm5083_vm1 = vmmov %vm5076_vm8  ;;  %v1862_v20 = vrot.slane %v1826_v11, %v4398_v22 }
0x1257   :  { %v2359_v23 = vsel %vm4420_vm11, %v2358_v19, %v2354_v51 }
0x1259   :  { %v2363_v24 = vpop.xlane.xlu0 %2362  ;;  %v2368_v25 = vpop.xlane.xlu1 %2367 }
0x125a   :  { %v2364_v1 = vsel %vm4425_vm14, %v2363_v24, %v2359_v23 }
0x125b   :  { %v2369_v26 = vsel %vm4439_vm5, %v2368_v25, %v2364_v1  ;;  %v2256_v1 = vadd.f32 %v4759_v9, %v1862_v20  ;;  %v4121_v9 = vld [vmem:[#allocation5 + $0x488] ss:$36 sps:$4 sm:$0xff]  }
0x125d   :  { %v2373_v27 = vpop.xlane.xlu0 %2372 }
0x125e   :  { %v2374_v30 = vsel %vm4448_vm9, %v2373_v27, %v2369_v26 }
0x125f   :  { %v2375_v33 = vsub.f32 %v2345_v63, %v2374_v30  ;;  %v4119_v30 = vld [vmem:[#allocation5 + $0x3f8] ss:$36 sps:$4 sm:$0xff]  }
0x1261   :  { %v2376_v34 = vmul.f32 1.442695, %v2375_v33 }
0x1263   :  { %4161 = vpow2.f32 %v2376_v34  ;;  %v4120_v34 = vld [vmem:[#allocation5 + $0x440] ss:$36 sps:$4 sm:$0xff]  }
0x126d   :  { %v4162_v37 = vpop.eup %4161 }
0x126e   :  { %v2383_v6 = vsel %vm4420_vm11, %v4162_v37, 0.0  ;;  %v2378_v2 = vsel %vm5080_vm7, %v4162_v37, 0.0  ;;  %v2393_v40 = vsel %vm4439_vm5, %v4162_v37, 0.0  ;;  %v2388_v7 = vsel %vm4425_vm14, %v4162_v37, 0.0  ;;  %vm5084_vm7 = vmmov %vm5083_vm1 }
0x126f   :  { %v2384_v38 = vsel %vm5081_vm15, %v2383_v6, 0.0  ;;  %v2379_v39 = vsel %vm5076_vm8, %v2378_v2, 0.0  ;;  %v2394_v41 = vsel %vm5082_vm10, %v2393_v40, 0.0  ;;  %v2389_v42 = vsel %vm5083_vm1, %v2388_v7, 0.0  ;;  %vm5086_vm8 = vmmov %vm5083_vm1 }
0x1270   :  { %2385 = vadd.xlane.f32.xlu0 %v2384_v38  ;;  %2380 = vadd.xlane.f32.xlu1 %v2379_v39  ;;  %v2398_v43 = vsel %vm4448_vm9, %v4162_v37, 0.0  ;;  %vm5085_vm15 = vcmp.lt.s32.totalorder %v4414_v5, 5 }
0x1271   :  { %v2399_v45 = vsel %vm5084_vm7, %v2398_v43, 0.0 }
0x1274   :  { %2395 = vadd.xlane.f32.xlu0 %v2394_v41  ;;  %2390 = vadd.xlane.f32.xlu1 %v2389_v42 }
0x1278   :  { %2400 = vadd.xlane.f32.xlu1 %v2399_v45 }
0x12fd   :  { %v2386_v46 = vpop.xlane.xlu0 %2385  ;;  %v2381_v32 = vpop.xlane.xlu1 %2380 }
0x12fe   :  { %v2382_v48 = vsel %vm5085_vm15, %v2381_v32, 0.0 }
0x12ff   :  { %v2387_v49 = vsel %vm4420_vm11, %v2386_v46, %v2382_v48  ;;  %vm5087_vm11 = vmmov %vm5083_vm1  ;;  %v2587_v48 = vld [vmem:[#allocation5 + $0x3fc] sm:$0x1] }
0x1301   :  { %v2391_v50 = vpop.xlane.xlu1 %2390  ;;  %v2396_v54 = vpop.xlane.xlu0 %2395 }
0x1302   :  { %v2392_v55 = vsel %vm4425_vm14, %v2391_v50, %v2387_v49  ;;  %vm5088_vm14 = vcmask 154624   ;;  %v2588_v49 = vunpack.c.l.bf16 %v2587_v48 }
0x1303   :  { %v2397_v58 = vsel %vm4439_vm5, %v2396_v54, %v2392_v55  ;;  %vm5089_vm5 = vcmask 261120  }
0x1304   :  { %v2592_v50 = vrot.slane %v2588_v49, %v4398_v22 }
0x1305   :  { %v2401_v60 = vpop.xlane.xlu1 %2400 }
0x1306   :  { %v2402_v61 = vsel %vm4448_vm9, %v2401_v60, %v2397_v58  ;;  %vm3372_vm9 = vcmask 146432  }
0x1307   :  { %4163 = vrcp.f32 %v2402_v61 }
0x1311   :  { %v4164_v62 = vpop.eup %4163 }
0x1312   :  { %v2404_v63 = vmul.f32 %v4164_v62, %v4162_v37  ;;  %v4122_v37 = vld [vmem:[#allocation5 + $0x4d0] ss:$0 sps:$4 sm:$0xff]  }
0x1313   :  { %v2618_v6 = vand.u32 %v4122_v37, %v4355_v17 }
0x1314   :  { %v2405_v13 = vpack.c.bf16 %v2404_v63, %v2404_v63 }
0x1316   :  { %3635 = vmatmul.mubr.msk.bf16.vlgmr.msra.gmra.mrb[32].mxu1 %vm5086_vm8, %v2405_v13 }
0x1317   :  { %3884 = vmatpush3.bf16.msra.mxu1 %v4215_v16  ;;  %3887 = vmatprep.mubr.msk.bf16.mxu1 %vm4298_vm3, %v4297_v53 }
0x1318   :  { %3885 = vmatprep.subr.bf16.mxu1 %v4297_v53 }
0x131b   :  { %3886 = vmatpush3.bf16.msra.mxu1 %v4509_v44  ;;  %v1854_v44 = vrot.slane %v1824_v31, %v4398_v22 }
0x131c   :  { %3891 = vmatprep.subr.bf16.mxu1 %v4297_v53 }
0x131d   :  { %v2215_v12 = vadd.f32 %v4766_v35, %v1854_v44 }
0x131e   :  { %3888 = vmatmul.mubr.msk.bf16.vlgmr.msra.gmra.mrb[36].mxu1 %vm5087_vm11, %v2405_v13 }
0x131f   :  { %3892 = vmatpush3.bf16.msra.mxu1 %v4216_v21  ;;  %3895 = vmatprep.mubr.msk.bf16.mxu1 %vm4298_vm3, %v4297_v53 }
0x1320   :  { %3893 = vmatprep.subr.bf16.mxu1 %v4297_v53 }
0x1323   :  { %3894 = vmatpush3.bf16.msra.mxu1 %v4522_v52 }
0x1324   :  { %3899 = vmatprep.subr.bf16.mxu1 %v4297_v53 }
0x13e9   :  { %v2443_v18 = vpop.f32.mrb[32].mxu1 }
0x13ea   :  { %v2490_v15 = vmul.f32 %v2443_v18, %v2215_v12  ;;  %v2445_v47 = vpop.f32.mrb[33].mxu1 }
0x13eb   :  { %v2491_v19 = vmul.f32 %v2445_v47, %v2217_v14  ;;  %v2447_v52 = vpop.f32.mrb[34].mxu1 }
0x13ec   :  { %v2448_v51 = vpop.f32.mrb[35].mxu1  ;;  %v2493_v24 = vpack.c.bf16 %v2490_v15, %v2490_v15 }
0x13ed   :  { %v2494_v23 = vpack.c.bf16 %v2491_v19, %v2491_v19 }
0x13ef   :  { %2531 = vmatprep.mubr.bf16.mxu0 %v2494_v23 }
0x13f0   :  { %2532 = vmatmul.mubr.bf16.vlgmr.msra.gmra.mrb[52].mxu0 %v2493_v24 }
0x13f1   :  { %v2484_v25 = vpop.f32.mrb[36].mxu1 }
0x13f2   :  { %v2492_v26 = vmul.f32 %v2484_v25, %v2256_v1  ;;  %v3889_v27 = vpop.f32.mrb[37].mxu1 }
0x13f3   :  { %v2487_v35 = vpop.f32.mrb[38].mxu1 }
0x13f4   :  { %v2495_v36 = vpack.c.bf16 %v2492_v26, %v2492_v26  ;;  %v3890_v33 = vpop.f32.mrb[39].mxu1 }
0x13f6   :  { %3896 = vmatmul.mubr.msk.bf16.vlgmr.msra.gmra.mrb[40].mxu1 %vm5088_vm14, %v2495_v36 }
0x13f7   :  { %3900 = vmatpush3.bf16.msra.mxu1 %v4119_v30  ;;  %3907 = vmatprep.mubr.msk.bf16.mxu1 %vm4298_vm3, %v4297_v53 }
0x13f8   :  { %3901 = vmatprep.subr.bf16.mxu1 %v4297_v53 }
0x13fb   :  { %3902 = vmatpush3.bf16.msra.mxu1 %v4120_v34 }
0x13fc   :  { %3903 = vmatprep.subr.bf16.mxu1 %v4297_v53 }
0x13ff   :  { %3904 = vmatpush3.bf16.msra.mxu1 %v4121_v9 }
0x1400   :  { %3905 = vmatprep.subr.bf16.mxu1 %v4297_v53 }
0x1403   :  { %3906 = vmatpush3.bf16.msra.mxu1 %v2618_v6 }
0x14c3   :  { %v3789_v2 = vpop.f32.mrb[52].mxu0 }
0x14c4   :  { %v3790_v38 = vpop.f32.mrb[53].mxu0 }
0x14c5   :  { %v3791_v39 = vadd.f32 %v3790_v38, %v3789_v2  ;;  %v3792_v40 = vpop.f32.mrb[54].mxu0 }
0x14c6   :  { %v3793_v7 = vpop.f32.mrb[55].mxu0 }
0x14c9   :  { %v2573_v41 = vpop.f32.mrb[40].mxu1 }
0x14ca   :  { %v2574_v42 = vadd.f32 %v3791_v39, %v2573_v41  ;;  %v3897_v43 = vpop.f32.mrb[41].mxu1 }
0x14cb   :  { %v2576_v45 = vpop.f32.mrb[42].mxu1 }
0x14cc   :  { %v2586_v46 = vpack.c.bf16 %v2574_v42, %v2574_v42  ;;  %v3898_v32 = vpop.f32.mrb[43].mxu1  ;;  %v2665_v42 = vld [vmem:[#allocation5 + $0x48c] sm:$0x1] }
0x14cd   :  { %v2748_v43 = vunpack.c.l.bf16 %v2665_v42 }
0x14ce   :  { %3908 = vmatmul.mubr.msk.bf16.vlgmr.msra.gmra.mrb[44].mxu1 %vm399_vm2, %v2586_v46  ;;  %v2666_v46 = vld [vmem:[#allocation5 + $0x4d4] sm:$0x1] }
0x14cf   :  { %2866 = vmatprep.mubr.bf16.mxu1 %v4294_v0  ;;  %v2752_v45 = vrot.slane %v2748_v43, %v4398_v22  ;;  %v2758_v32 = vunpack.c.l.bf16 %v2666_v46 }
0x14d1   :  { %v2762_v48 = vrot.slane %v2758_v32, %v4398_v22 }
0x15a1   :  { %v2654_v54 = vpop.f32.mrb[44].mxu1 }
0x15a2   :  { %v2655_v55 = vadd.f32 %v2654_v54, %v2592_v50  ;;  %v3909_v58 = vpop.f32.mrb[45].mxu1 }
0x15a3   :  { %v2657_v60 = vpop.f32.mrb[46].mxu1 }
0x15a4   :  { %2661 = vrot.lane.b32.xlu0 %v2655_v55, %s4299_s1  ;;  %v3910_v61 = vpop.f32.mrb[47].mxu1 }
0x1616   :  { %v2662_v62 = vpop.permute.xlu0 %2661 }
0x1617   :  { %v2664_v63 = vadd.f32 %v2662_v62, %v4719_v29 }
0x1619   :  { %2668 = vrot.lane.b32.xlu1 %v2664_v63, %s4295_s6 }
0x168b   :  { %v2669_v13 = vpop.permute.xlu1 %2668 }
0x168c   :  { %v2677_v16 = vsel %vm4550_vm4, %v2669_v13, 0.0  ;;  %v2671_v21 = vsel %vm57_vm13, %v2669_v13, 0.0  ;;  %v2683_v4 = vsel %vm4555_vm12, %v2669_v13, 0.0  ;;  %v2689_v29 = vsel %vm4559_vm6, %v2669_v13, 0.0 }
0x168d   :  { %v2678_v28 = vsel %vm399_vm2, %v2677_v16, 0.0  ;;  %v2672_v31 = vsel %vm399_vm2, %v2671_v21, 0.0  ;;  %v2684_v44 = vsel %vm399_vm2, %v2683_v4, 0.0  ;;  %v2690_v8 = vsel %vm399_vm2, %v2689_v29, 0.0 }
0x168e   :  { %2679 = vadd.xlane.f32.xlu0 %v2678_v28  ;;  %2673 = vadd.xlane.f32.xlu1 %v2672_v31  ;;  %v2695_v10 = vsel %vm4575_vm0, %v2669_v13, 0.0 }
0x168f   :  { %v2696_v11 = vsel %vm399_vm2, %v2695_v10, 0.0  ;;  %v4128_v10 = vld [vmem:[#allocation5 + $0x458] ss:$36 sps:$4 sm:$0xff]  }
0x1692   :  { %2685 = vadd.xlane.f32.xlu0 %v2684_v44  ;;  %2691 = vadd.xlane.f32.xlu1 %v2690_v8  ;;  %v4123_v44 = vld [vmem:[#allocation5 + $0x40c] ss:$36 sps:$4 sm:$0xff]  }
0x1693   :  { %v4125_v8 = vld [vmem:[#allocation5 + $0x410] ss:$36 sps:$4 sm:$0xff]  }
0x1694   :  { %2834 = vmatprep.subr.bf16.mxu1 %v4125_v8 }
0x1695   :  { %2835 = vmatpush1.bf16.msra.mxu1 %v4123_v44 }
0x1696   :  { %2697 = vadd.xlane.f32.xlu0 %v2696_v11  ;;  %v2774_v11 = vld [vmem:[#allocation5 + $0x4e4] sm:$0xff]  ;;  %2836 = vmatprep.subr.bf16.mxu1 %v4128_v10 }
0x171b   :  { %v2680_v12 = vpop.xlane.xlu0 %2679  ;;  %v2674_v14 = vpop.xlane.xlu1 %2673 }
0x171c   :  { %v2675_v18 = vmul.f32 0.09090909, %v2674_v14  ;;  %v2681_v15 = vmul.f32 0.09090909, %v2680_v12  ;;  %v4126_v12 = vld [vmem:[#allocation5 + $0x454] ss:$36 sps:$4 sm:$0xff]  }
0x171d   :  { %2837 = vmatpush1.bf16.msra.mxu1 %v4126_v12 }
0x171e   :  { %v2676_v47 = vsel %vm57_vm13, %v2675_v18, 0.0  ;;  %v4131_v18 = vld [vmem:[#allocation5 + $0x4a0] ss:$36 sps:$4 sm:$0xff]  }
0x171f   :  { %v2686_v19 = vpop.xlane.xlu0 %2685  ;;  %v2692_v52 = vpop.xlane.xlu1 %2691  ;;  %v2682_v51 = vsel %vm4550_vm4, %v2681_v15, %v2676_v47  ;;  %v3650_v15 = vcombine.high %v2774_v11, %v2774_v11  ;;  %v4129_v47 = vld [vmem:[#allocation5 + $0x49c] ss:$36 sps:$4 sm:$0xff]   ;;  %2838 = vmatprep.subr.bf16.mxu1 %v4131_v18 }
0x1720   :  { %v2687_v20 = vmul.f32 0.09090909, %v2686_v19  ;;  %v2693_v23 = vmul.f32 0.09090909, %v2692_v52  ;;  %v3649_v19 = vcombine.low %v2774_v11, %v2774_v11 }
0x1721   :  { %v2832_v52 = vand.u32 %v3650_v15, %v4355_v17  ;;  %2839 = vmatpush1.bf16.msra.mxu1 %v4129_v47 }
0x1722   :  { %v2688_v24 = vsel %vm4555_vm12, %v2687_v20, %v2682_v51  ;;  %v2829_v20 = vand.u32 %v3649_v19, %v4355_v17 }
0x1723   :  { %v2698_v1 = vpop.xlane.xlu0 %2697  ;;  %v2694_v26 = vsel %vm4559_vm6, %v2693_v23, %v2688_v24  ;;  %2840 = vmatprep.subr.bf16.mxu1 %v2832_v52  ;;  %v4134_v23 = vld [vmem:[#allocation5 + $0x404] ss:$36 sps:$4 sm:$0xff]   ;;  %v4135_v24 = vld [vmem:[#allocation5 + $0x44c] ss:$36 sps:$4 sm:$0xff]  }
0x1724   :  { %v2699_v25 = vmul.f32 0.09090909, %v2698_v1  ;;  %2969 = vmatpush1.bf16.msra.mxu0 %v4134_v23 }
0x1725   :  { %2841 = vmatpush1.bf16.msra.mxu1 %v2829_v20  ;;  %2970 = vmatprep.subr.bf16.mxu0 %v4294_v0 }
0x1726   :  { %v2700_v27 = vsel %vm4575_vm0, %v2699_v25, %v2694_v26  ;;  %3911 = vmatprep.subr.bf16.mxu1 %v4297_v53 }
0x1727   :  { %2702 = vrot.lane.b32.xlu1 %v2700_v27, %s4299_s1  ;;  %v4136_v27 = vld [vmem:[#allocation5 + $0x494] ss:$36 sps:$4 sm:$0xff]  }
0x1728   :  { %2971 = vmatpush1.bf16.msra.mxu0 %v4135_v24 }
0x1729   :  { %2972 = vmatprep.subr.bf16.mxu0 %v4294_v0 }
0x172c   :  { %2973 = vmatpush1.bf16.msra.mxu0 %v4136_v27 }
0x172d   :  { %2974 = vmatprep.subr.bf16.mxu0 %v4294_v0 }
0x1799   :  { %v2703_v35 = vpop.permute.xlu1 %2702 }
0x179a   :  { %v4878_v30 = vsub.f32 %v2664_v63, %v2703_v35 }
0x179c   :  { %v2706_v36 = vmul.f32 %v4878_v30, %v4878_v30 }
0x179e   :  { %2708 = vrot.lane.b32.xlu0 %v2706_v36, %s4295_s6 }
0x1810   :  { %v2709_v33 = vpop.permute.xlu0 %2708 }
0x1811   :  { %v2717_v34 = vsel %vm4550_vm4, %v2709_v33, 0.0  ;;  %v2711_v9 = vsel %vm57_vm13, %v2709_v33, 0.0  ;;  %v2729_v2 = vsel %vm4559_vm6, %v2709_v33, 0.0  ;;  %v2723_v38 = vsel %vm4555_vm12, %v2709_v33, 0.0 }
0x1812   :  { %v2718_v37 = vsel %vm399_vm2, %v2717_v34, 0.0  ;;  %v2712_v6 = vsel %vm399_vm2, %v2711_v9, 0.0  ;;  %v2730_v39 = vsel %vm399_vm2, %v2729_v2, 0.0  ;;  %v2724_v40 = vsel %vm399_vm2, %v2723_v38, 0.0  ;;  %v4138_v9 = vld [vmem:[#allocation5 + $0x524] ss:$36 sps:$4 sm:$0xff]  }
0x1813   :  { %2719 = vadd.xlane.f32.xlu0 %v2718_v37  ;;  %2713 = vadd.xlane.f32.xlu1 %v2712_v6  ;;  %v2735_v7 = vsel %vm4575_vm0, %v2709_v33, 0.0  ;;  %v4137_v33 = vld [vmem:[#allocation5 + $0x4dc] ss:$36 sps:$4 sm:$0xff]   ;;  %v4140_v37 = vld [vmem:[#allocation5 + $0x5b4] ss:$36 sps:$4 sm:$0xff]  }
0x1814   :  { %v2736_v41 = vsel %vm399_vm2, %v2735_v7, 0.0  ;;  %2975 = vmatpush1.bf16.msra.mxu0 %v4137_v33  ;;  %v4141_v6 = vld [vmem:[#allocation5 + $0x5fc] ss:$36 sps:$4 sm:$0xff]   ;;  %v4142_v38 = vld [vmem:[#allocation5 + $0x644] ss:$36 sps:$4 sm:$0xff]  }
0x1815   :  { %2976 = vmatprep.subr.bf16.mxu0 %v4294_v0 }
0x1817   :  { %2731 = vadd.xlane.f32.xlu0 %v2730_v39  ;;  %2725 = vadd.xlane.f32.xlu1 %v2724_v40  ;;  %v4143_v39 = vld [vmem:[#allocation5 + $0x68c] ss:$36 sps:$4 sm:$0xff]   ;;  %v2776_v40 = vld [vmem:[#allocation5 + $0x514] sm:$0x11] }
0x1818   :  { %2977 = vmatpush1.bf16.msra.mxu0 %v4138_v9  ;;  %v2777_v7 = vunpack.c.l.bf16 %v2776_v40 }
0x1819   :  { %2978 = vmatprep.subr.bf16.mxu0 %v4294_v0 }
0x181a   :  { %v2782_v42 = vrot.slane %v2777_v7, %v4398_v22 }
0x181b   :  { %2737 = vadd.xlane.f32.xlu1 %v2736_v41  ;;  %v2778_v41 = vunpack.c.h.bf16 %v2776_v40 }
0x181d   :  { %v2786_v43 = vrot.slane %v2778_v41, %v4398_v22 }
0x182c   :  { %2754 = vrot.lane.b32.xlu1 %v2752_v45, %s4299_s1 }
0x1830   :  { %2764 = vrot.lane.b32.xlu1 %v2762_v48, %s4299_s1 }
0x18a0   :  { %v2720_v49 = vpop.xlane.xlu0 %2719  ;;  %v2714_v50 = vpop.xlane.xlu1 %2713 }
0x18a1   :  { %v2715_v54 = vmul.f32 0.09090909, %v2714_v50  ;;  %v2721_v55 = vmul.f32 0.09090909, %v2720_v49 }
0x18a3   :  { %v2716_v58 = vsel %vm57_vm13, %v2715_v54, 0.0 }
0x18a4   :  { %v2732_v60 = vpop.xlane.xlu0 %2731  ;;  %v2726_v61 = vpop.xlane.xlu1 %2725  ;;  %v2722_v63 = vsel %vm4550_vm4, %v2721_v55, %v2716_v58 }
0x18a5   :  { %v2727_v62 = vmul.f32 0.09090909, %v2726_v61  ;;  %v2733_v13 = vmul.f32 0.09090909, %v2732_v60 }
0x18a7   :  { %v2728_v16 = vsel %vm4555_vm12, %v2727_v62, %v2722_v63 }
0x18a8   :  { %v2738_v21 = vpop.xlane.xlu1 %2737  ;;  %v2734_v31 = vsel %vm4559_vm6, %v2733_v13, %v2728_v16 }
0x18a9   :  { %v2739_v28 = vmul.f32 0.09090909, %v2738_v21 }
0x18ab   :  { %v2740_v4 = vsel %vm4575_vm0, %v2739_v28, %v2734_v31 }
0x18ac   :  { %v2741_v29 = vadd.f32 1e-05, %v2740_v4  ;;  %v2755_v51 = vpop.permute.xlu1 %2754 }
0x18ae   :  { %4165 = vrsqrt.f32 %v2741_v29 }
0x18b0   :  { %v2765_v26 = vpop.permute.xlu1 %2764 }
0x18b8   :  { %v4166_v14 = vpop.eup %4165 }
0x18b9   :  { %2744 = vrot.lane.b32.xlu0 %v4166_v14, %s4299_s1 }
0x192b   :  { %v2745_v1 = vpop.permute.xlu0 %2744 }
0x192c   :  { %v2747_v25 = vmul.f32 %v2745_v1, %v4878_v30  ;;  %v4139_v30 = vld [vmem:[#allocation5 + $0x56c] ss:$36 sps:$4 sm:$0xff]  }
0x192d   :  { %2979 = vmatpush1.bf16.msra.mxu0 %v4139_v30 }
0x192e   :  { %v2757_v35 = vmul.f32 %v2755_v51, %v2747_v25  ;;  %2980 = vmatprep.subr.bf16.mxu0 %v4294_v0 }
0x1930   :  { %v2767_v36 = vadd.f32 %v2765_v26, %v2757_v35 }
0x1931   :  { %2981 = vmatpush1.bf16.msra.mxu0 %v4140_v37 }
0x1932   :  { %v2775_v34 = vpack.c.bf16 %v2767_v36, %v2767_v36  ;;  %2982 = vmatprep.subr.bf16.mxu0 %v4294_v0 }
0x1934   :  { %2788 = vrot.lane.b32.xlu0 %v2775_v34, %s4295_s6 }
0x1935   :  { %2983 = vmatpush1.bf16.msra.mxu0 %v4141_v6 }
0x1936   :  { %2984 = vmatprep.subr.bf16.mxu0 %v4294_v0 }
0x1939   :  { %2985 = vmatpush1.bf16.msra.mxu0 %v4142_v38 }
0x193a   :  { %2986 = vmatprep.subr.bf16.mxu0 %v4294_v0  ;;  %v2899_v0 = vld [vmem:[#allocation5 + $0x444] sm:$0x1] }
0x193b   :  { %v2900_v61 = vunpack.c.l.bf16 %v2899_v0 }
0x193d   :  { %2987 = vmatpush1.bf16.msra.mxu0 %v4143_v39  ;;  %v2904_v62 = vrot.slane %v2900_v61, %v4398_v22 }
0x19a6   :  { %v2789_v2 = vpop.permute.xlu0 %2788 }
0x19a7   :  { %3651 = vmatmul.mubr.msk.bf16.vlgmr.msra.gmra.mrb[48].mxu1 %vm399_vm2, %v2789_v2 }
0x19a8   :  { %3919 = vmatprep.mubr.msk.bf16.mxu1 %vm4298_vm3, %v4297_v53 }
0x1a7a   :  { %v2868_v45 = vpop.f32.mrb[48].mxu1 }
0x1a7b   :  { %v2869_v46 = vadd.f32 %v2868_v45, %v2782_v42  ;;  %v2870_v32 = vpop.f32.mrb[49].mxu1 }
0x1a7c   :  { %v2871_v48 = vadd.f32 %v2870_v32, %v2786_v43  ;;  %v2872_v49 = vpop.f32.mrb[50].mxu1 }
0x1a7d   :  { %v2875_v50 = vmax.f32 %v2869_v46, 0.0  ;;  %v2873_v54 = vpop.f32.mrb[51].mxu1  ;;  %v3013_v49 = vld [vmem:[#allocation5 + $0x51c] sm:$0x1] }
0x1a7e   :  { %v2876_v55 = vmax.f32 %v2871_v48, 0.0 }
0x1a7f   :  { %v2897_v60 = vpack.c.bf16 %v2875_v50, %v2875_v50  ;;  %v3096_v50 = vunpack.c.l.bf16 %v3013_v49  ;;  %v3169_v49 = vld [vmem:[#allocation5 + $0x564] sm:$0x1] }
0x1a80   :  { %v2898_v58 = vpack.c.bf16 %v2876_v55, %v2876_v55  ;;  %v3014_v55 = vld [vmem:[#allocation5 + $0x52c] sm:$0x1] }
0x1a81   :  { %v3100_v54 = vrot.slane %v3096_v50, %v4398_v22  ;;  %v3170_v50 = vunpack.c.l.bf16 %v3169_v49 }
0x1a82   :  { %3662 = vmatprep.mubr.msk.bf16.mxu0 %vm5089_vm5, %v2898_v58  ;;  %v3106_v58 = vunpack.c.l.bf16 %v3014_v55 }
0x1a83   :  { %3001 = vmatmul.mubr.bf16.vlgmr.msra.gmra.mrb[56].mxu0 %v2897_v60 }
0x1a84   :  { %v3110_v60 = vrot.slane %v3106_v58, %v4398_v22 }
0x1b56   :  { %v3002_v63 = vpop.f32.mrb[56].mxu0 }
0x1b57   :  { %v3003_v13 = vadd.f32 %v3002_v63, %v2904_v62  ;;  %v3004_v16 = vpop.f32.mrb[57].mxu0 }
0x1b58   :  { %v3005_v21 = vpop.f32.mrb[58].mxu0 }
0x1b59   :  { %v3006_v28 = vpop.f32.mrb[59].mxu0  ;;  %3009 = vrot.lane.b32.xlu1 %v3003_v13, %s4299_s1 }
0x1bcb   :  { %v3010_v31 = vpop.permute.xlu1 %3009 }
0x1bcc   :  { %v3012_v4 = vadd.f32 %v3010_v31, %v2767_v36 }
0x1bce   :  { %3016 = vrot.lane.b32.xlu0 %v3012_v4, %s4295_s6 }
0x1c40   :  { %v3017_v29 = vpop.permute.xlu0 %3016 }
0x1c41   :  { %v3025_v44 = vsel %vm4550_vm4, %v3017_v29, 0.0  ;;  %v3019_v8 = vsel %vm57_vm13, %v3017_v29, 0.0  ;;  %v3031_v12 = vsel %vm4555_vm12, %v3017_v29, 0.0  ;;  %v3037_v14 = vsel %vm4559_vm6, %v3017_v29, 0.0 }
0x1c42   :  { %v3026_v10 = vsel %vm399_vm2, %v3025_v44, 0.0  ;;  %v3020_v11 = vsel %vm399_vm2, %v3019_v8, 0.0  ;;  %v3032_v18 = vsel %vm399_vm2, %v3031_v12, 0.0  ;;  %v3038_v15 = vsel %vm399_vm2, %v3037_v14, 0.0 }
0x1c43   :  { %3027 = vadd.xlane.f32.xlu0 %v3026_v10  ;;  %3021 = vadd.xlane.f32.xlu1 %v3020_v11  ;;  %v3043_v47 = vsel %vm4575_vm0, %v3017_v29, 0.0 }
0x1c44   :  { %v3044_v19 = vsel %vm399_vm2, %v3043_v47, 0.0 }
0x1c47   :  { %3033 = vadd.xlane.f32.xlu0 %v3032_v18  ;;  %3039 = vadd.xlane.f32.xlu1 %v3038_v15 }
0x1c4b   :  { %3045 = vadd.xlane.f32.xlu0 %v3044_v19  ;;  %v4993_v19 = vld [vmem:[#allocation2] sm:$0xff] }
0x1cd0   :  { %v3028_v52 = vpop.xlane.xlu0 %3027  ;;  %v3022_v20 = vpop.xlane.xlu1 %3021 }
0x1cd1   :  { %v3023_v51 = vmul.f32 0.09090909, %v3022_v20  ;;  %v3029_v23 = vmul.f32 0.09090909, %v3028_v52  ;;  %v3117_v20 = vld [vmem:[#allocation5 + $0x530] sm:$0x1] }
0x1cd3   :  { %v3024_v24 = vsel %vm57_vm13, %v3023_v51, 0.0  ;;  %v3141_v51 = vunpack.c.l.bf16 %v3117_v20 }
0x1cd4   :  { %v3034_v1 = vpop.xlane.xlu0 %3033  ;;  %v3040_v25 = vpop.xlane.xlu1 %3039  ;;  %v3030_v27 = vsel %vm4550_vm4, %v3029_v23, %v3024_v24 }
0x1cd5   :  { %v3035_v26 = vmul.f32 0.09090909, %v3034_v1  ;;  %v3041_v35 = vmul.f32 0.09090909, %v3040_v25  ;;  %v3145_v23 = vrot.slane %v3141_v51, %v4398_v22 }
0x1cd7   :  { %v3036_v36 = vsel %vm4555_vm12, %v3035_v26, %v3030_v27 }
0x1cd8   :  { %v3046_v33 = vpop.xlane.xlu0 %3045  ;;  %v3042_v9 = vsel %vm4559_vm6, %v3041_v35, %v3036_v36  ;;  %v3118_v36 = vld [vmem:[#allocation5 + $0x55c] sm:$0x1] }
0x1cd9   :  { %v3047_v34 = vmul.f32 0.09090909, %v3046_v33  ;;  %v3151_v33 = vunpack.c.l.bf16 %v3118_v36 }
0x1cdb   :  { %v3048_v30 = vsel %vm4575_vm0, %v3047_v34, %v3042_v9  ;;  %v3155_v34 = vrot.slane %v3151_v33, %v4398_v22  ;;  %v4144_v9 = vld [vmem:[#allocation5 + $0x560] ss:$36 sps:$4 sm:$0xff]  }
0x1cdc   :  { %3050 = vrot.lane.b32.xlu1 %v3048_v30, %s4299_s1  ;;  %3912 = vmatpush3.bf16.msra.mxu1 %v4144_v9  ;;  %v4145_v30 = vld [vmem:[#allocation5 + $0x5a8] ss:$36 sps:$4 sm:$0xff]  }
0x1cdd   :  { %3913 = vmatprep.subr.bf16.mxu1 %v4297_v53 }
0x1ce0   :  { %3914 = vmatpush3.bf16.msra.mxu1 %v4145_v30 }
0x1ce1   :  { %3915 = vmatprep.subr.bf16.mxu1 %v4297_v53 }
0x1d4e   :  { %v3051_v37 = vpop.permute.xlu1 %3050 }
0x1d4f   :  { %v3053_v6 = vsub.f32 %v3012_v4, %v3051_v37  ;;  %v4146_v37 = vld [vmem:[#allocation5 + $0x5f0] ss:$36 sps:$4 sm:$0xff]  }
0x1d50   :  { %3916 = vmatpush3.bf16.msra.mxu1 %v4146_v37 }
0x1d51   :  { %v3054_v2 = vmul.f32 %v3053_v6, %v3053_v6  ;;  %3917 = vmatprep.subr.bf16.mxu1 %v4297_v53 }
0x1d53   :  { %3056 = vrot.lane.b32.xlu0 %v3054_v2, %s4295_s6 }
0x1dc5   :  { %v3057_v38 = vpop.permute.xlu0 %3056 }
0x1dc6   :  { %v3065_v39 = vsel %vm4550_vm4, %v3057_v38, 0.0  ;;  %v3059_v40 = vsel %vm57_vm13, %v3057_v38, 0.0  ;;  %v3077_v42 = vsel %vm4559_vm6, %v3057_v38, 0.0  ;;  %v3071_v43 = vsel %vm4555_vm12, %v3057_v38, 0.0 }
0x1dc7   :  { %v3066_v7 = vsel %vm399_vm2, %v3065_v39, 0.0  ;;  %v3060_v41 = vsel %vm399_vm2, %v3059_v40, 0.0  ;;  %v3078_v45 = vsel %vm399_vm2, %v3077_v42, 0.0  ;;  %v3072_v46 = vsel %vm399_vm2, %v3071_v43, 0.0 }
0x1dc8   :  { %3067 = vadd.xlane.f32.xlu0 %v3066_v7  ;;  %3061 = vadd.xlane.f32.xlu1 %v3060_v41  ;;  %v3083_v32 = vsel %vm4575_vm0, %v3057_v38, 0.0 }
0x1dc9   :  { %v3084_v48 = vsel %vm399_vm2, %v3083_v32, 0.0 }
0x1dcc   :  { %3079 = vadd.xlane.f32.xlu0 %v3078_v45  ;;  %3073 = vadd.xlane.f32.xlu1 %v3072_v46 }
0x1dd0   :  { %3085 = vadd.xlane.f32.xlu1 %v3084_v48 }
0x1de1   :  { %3102 = vrot.lane.b32.xlu1 %v3100_v54, %s4299_s1  ;;  %v3174_v54 = vrot.slane %v3170_v50, %v4398_v22 }
0x1de5   :  { %3112 = vrot.lane.b32.xlu1 %v3110_v60, %s4299_s1 }
0x1e55   :  { %v3068_v0 = vpop.xlane.xlu0 %3067  ;;  %v3062_v61 = vpop.xlane.xlu1 %3061 }
0x1e56   :  { %v3063_v62 = vmul.f32 0.09090909, %v3062_v61  ;;  %v3069_v63 = vmul.f32 0.09090909, %v3068_v0 }
0x1e58   :  { %v3064_v13 = vsel %vm57_vm13, %v3063_v62, 0.0 }
0x1e59   :  { %v3080_v16 = vpop.xlane.xlu0 %3079  ;;  %v3074_v21 = vpop.xlane.xlu1 %3073  ;;  %v3070_v31 = vsel %vm4550_vm4, %v3069_v63, %v3064_v13  ;;  %vm3255_vm4 = vcmask 162816  }
0x1e5a   :  { %v3075_v28 = vmul.f32 0.09090909, %v3074_v21  ;;  %v3081_v4 = vmul.f32 0.09090909, %v3080_v16 }
0x1e5c   :  { %v3076_v29 = vsel %vm4555_vm12, %v3075_v28, %v3070_v31  ;;  %vm3368_vm12 = vcmask 97280  }
0x1e5d   :  { %v3086_v44 = vpop.xlane.xlu1 %3085  ;;  %v3082_v10 = vsel %vm4559_vm6, %v3081_v4, %v3076_v29  ;;  %vm3259_vm6 = vcmask 318464  }
0x1e5e   :  { %v3087_v8 = vmul.f32 0.09090909, %v3086_v44 }
0x1e60   :  { %v3088_v11 = vsel %vm4575_vm0, %v3087_v8, %v3082_v10 }
0x1e61   :  { %v3089_v5 = vadd.f32 1e-05, %v3088_v11  ;;  %v3103_v14 = vpop.permute.xlu1 %3102 }
0x1e63   :  { %4167 = vrsqrt.f32 %v3089_v5  ;;  %v4148_v5 = vld [vmem:[#allocation5 + $0x5a4] ss:$36 sps:$4 sm:$0xff]  }
0x1e65   :  { %v3113_v15 = vpop.permute.xlu1 %3112 }
0x1e6d   :  { %v4168_v12 = vpop.eup %4167 }
0x1e6e   :  { %3092 = vrot.lane.b32.xlu0 %v4168_v12, %s4299_s1  ;;  %v4149_v12 = vld [vmem:[#allocation5 + $0x5ec] ss:$36 sps:$4 sm:$0xff]  }
0x1ee0   :  { %v3093_v56 = vpop.permute.xlu0 %3092 }
0x1ee1   :  { %v3095_v18 = vmul.f32 %v3093_v56, %v3053_v6  ;;  %v4147_v6 = vld [vmem:[#allocation5 + $0x638] ss:$0 sps:$4 sm:$0xff]  }
0x1ee2   :  { %v3203_v2 = vand.u32 %v4147_v6, %v4355_v17 }
0x1ee3   :  { %v3105_v47 = vmul.f32 %v3103_v14, %v3095_v18  ;;  %v4150_v14 = vld [vmem:[#allocation5 + $0x634] ss:$0 sps:$4 sm:$0xff]  }
0x1ee4   :  { %3918 = vmatpush3.bf16.msra.mxu1 %v3203_v2  ;;  %v3317_v56 = vand.u32 %v4150_v14, %v4355_v17 }
0x1ee5   :  { %v3115_v57 = vadd.f32 %v3113_v15, %v3105_v47  ;;  %3923 = vmatprep.subr.bf16.mxu1 %v4297_v53 }
0x1ee7   :  { %v3116_v52 = vadd.f32 %v4993_v19, %v3115_v57  ;;  %v3257_v57 = vld [vmem:[#allocation5 + $0x574] sm:$0x1] }
0x1ee9   :  { %3120 = vrot.lane.b32.xlu0 %v3116_v52, %s4295_s6 }
0x1f5b   :  { %v3121_v59 = vpop.permute.xlu0 %3120 }
0x1f5c   :  { %v3123_v3 = vsel %vm399_vm2, %v3121_v59, 0.0  ;;  %v3274_v59 = vunpack.c.l.bf16 %v3257_v57 }
0x1f5d   :  { %3124 = vadd.xlane.f32.xlu1 %v3123_v3 }
0x1f5e   :  { %v3278_v20 = vrot.slane %v3274_v59, %v4398_v22 }
0x1f6e   :  { %3147 = vrot.lane.b32.xlu1 %v3145_v23, %s4299_s1 }
0x1fea   :  { %v3125_v24 = vpop.xlane.xlu1 %3124 }
0x1feb   :  { %v3127_v1 = vmul.f32 0.018181818, %v3125_v24 }
0x1fed   :  { %v3128_v25 = vsub.f32 %v3116_v52, %v3127_v1  ;;  %v3258_v52 = vld [vmem:[#allocation5 + $0x578] sm:$0x1] }
0x1fee   :  { %v3148_v41 = vpop.permute.xlu1 %3147  ;;  %v3280_v3 = vunpack.c.l.bf16 %v3258_v52 }
0x1fef   :  { %v3129_v26 = vmul.f32 %v3128_v25, %v3128_v25 }
0x1ff0   :  { %v3284_v23 = vrot.slane %v3280_v3, %v4398_v22 }
0x1ff1   :  { %3131 = vrot.lane.b32.xlu0 %v3129_v26, %s4295_s6 }
0x2063   :  { %v3132_v27 = vpop.permute.xlu0 %3131 }
0x2064   :  { %v3134_v35 = vsel %vm399_vm2, %v3132_v27, 0.0 }
0x2065   :  { %3135 = vadd.xlane.f32.xlu0 %v3134_v35 }
0x207b   :  { %3157 = vrot.lane.b32.xlu0 %v3155_v34, %s4299_s1 }
0x20f2   :  { %v3136_v38 = vpop.xlane.xlu0 %3135 }
0x20f3   :  { %v3137_v39 = vmul.f32 0.018181818, %v3136_v38 }
0x20f5   :  { %v3138_v40 = vadd.f32 1e-05, %v3137_v39 }
0x20f6   :  { %v3158_v43 = vpop.permute.xlu0 %3157 }
0x20f7   :  { %4169 = vrsqrt.f32 %v3138_v40 }
0x2101   :  { %v4170_v7 = vpop.eup %4169 }
0x2102   :  { %v3140_v42 = vmul.f32 %v4170_v7, %v3128_v25 }
0x2104   :  { %v3150_v45 = vmul.f32 %v3148_v41, %v3140_v42 }
0x2106   :  { %v3160_v46 = vadd.f32 %v3158_v43, %v3150_v45 }
0x2108   :  { %v3168_v32 = vpack.c.bf16 %v3160_v46, %v3160_v46 }
0x210a   :  { %3176 = vrot.lane.b32.xlu1 %v3168_v32, %s4295_s6  ;;  %v4151_v32 = vld [vmem:[#allocation5 + $0x5f4] ss:$36 sps:$4 sm:$0xff]  }
0x210e   :  { %3252 = vrot.lane.b32.xlu1 %v4993_v19, %s4300_s7 }
0x217c   :  { %v3177_v48 = vpop.permute.xlu1 %3176 }
0x217d   :  { %3920 = vmatmul.mubr.msk.bf16.vlgmr.msra.gmra.mrb[52].mxu1 %vm399_vm2, %v3177_v48  ;;  %v4152_v48 = vld [vmem:[#allocation5 + $0x63c] ss:$0 sps:$4 sm:$0x11]  }
0x217e   :  { %3929 = vmatprep.mubr.msk.bf16.mxu1 %vm4298_vm3, %v4297_v53  ;;  %3924 = vmatpush3.bf16.msra.mxu1 %v4148_v5 }
0x217f   :  { %3925 = vmatprep.subr.bf16.mxu1 %v4297_v53 }
0x2180   :  { %v3253_v16 = vpop.permute.xlu1 %3252 }
0x2182   :  { %3926 = vmatpush3.bf16.msra.mxu1 %v4149_v12 }
0x2183   :  { %3927 = vmatprep.subr.bf16.mxu1 %v4297_v53 }
0x2186   :  { %3928 = vmatpush3.bf16.msra.mxu1 %v3317_v56 }
0x2187   :  { %3933 = vmatprep.subr.bf16.mxu1 %v4297_v53 }
0x2250   :  { %v3239_v55 = vpop.f32.mrb[52].mxu1 }
0x2251   :  { %v3240_v58 = vadd.f32 %v3239_v55, %v3174_v54  ;;  %v3921_v60 = vpop.f32.mrb[53].mxu1 }
0x2252   :  { %v3242_v0 = vpop.f32.mrb[54].mxu1  ;;  %v3371_v60 = vld [vmem:[#allocation5 + $0x5c0] sm:$0x1] }
0x2253   :  { %v3246_v61 = vmin.f32 %v3240_v58, 0.0  ;;  %v3922_v62 = vpop.f32.mrb[55].mxu1  ;;  %vm3245_vm2 = vcmp.gt.f32.partialorder %v3240_v58, 0.0 }
0x2255   :  { %v3247_v63 = vmul.f32 1.442695, %v3246_v61  ;;  %v3393_v61 = vunpack.c.l.bf16 %v3371_v60 }
0x2257   :  { %4171 = vpow2.f32 %v3247_v63 }
0x2261   :  { %v4172_v13 = vpop.eup %4171 }
0x2262   :  { %v3668_v21 = vadd.f32 -1.0, %v4172_v13 }
0x2264   :  { %v3250_v28 = vsel %vm3245_vm2, %v3240_v58, %v3668_v21  ;;  %v3370_v58 = vld [vmem:[#allocation5 + $0x5bc] sm:$0x1] }
0x2265   :  { %v3256_v31 = vsel %vm3255_vm4, %v3250_v28, %v3253_v16  ;;  %v3387_v0 = vunpack.c.l.bf16 %v3370_v58  ;;  %v3397_v16 = vrot.slane %v3393_v61, %v4398_v22 }
0x2266   :  { %v3260_v4 = vsel %vm3259_vm6, %v3256_v31, 0.0 }
0x2267   :  { %3261 = vadd.xlane.f32.xlu0 %v3260_v4  ;;  %v3391_v62 = vrot.slane %v3387_v0, %v4398_v22 }
0x227d   :  { %3365 = vrot.lane.b32.xlu0 %v4993_v19, %s4301_s8  ;;  %v3292_v19 = vld [vmem:[#allocation5 + $0x5ac] sm:$0x1] }
0x227e   :  { %v3293_v26 = vunpack.c.l.bf16 %v3292_v19 }
0x2280   :  { %v3297_v27 = vrot.slane %v3293_v26, %v4398_v22 }
0x22f4   :  { %v3262_v29 = vpop.xlane.xlu0 %3261 }
0x22f5   :  { %v3264_v44 = vmul.f32 0.025641026, %v3262_v29 }
0x22f7   :  { %v3265_v8 = vsub.f32 %v3256_v31, %v3264_v44  ;;  %v3403_v31 = vld [vmem:[#allocation5 + $0x600] sm:$0x1] }
0x22f8   :  { %v3366_v38 = vpop.permute.xlu0 %3365  ;;  %v3404_v4 = vunpack.c.l.bf16 %v3403_v31 }
0x22f9   :  { %v3266_v10 = vmul.f32 %v3265_v8, %v3265_v8 }
0x22fa   :  { %v3408_v29 = vrot.slane %v3404_v4, %v4398_v22 }
0x22fb   :  { %v3267_v11 = vsel %vm3259_vm6, %v3266_v10, 0.0 }
0x22fc   :  { %3268 = vadd.xlane.f32.xlu1 %v3267_v11 }
0x2389   :  { %v3269_v18 = vpop.xlane.xlu1 %3268 }
0x238a   :  { %v3270_v15 = vmul.f32 0.025641026, %v3269_v18 }
0x238c   :  { %v3271_v47 = vadd.f32 1e-05, %v3270_v15 }
0x238e   :  { %4173 = vrsqrt.f32 %v3271_v47 }
0x2398   :  { %v4174_v51 = vpop.eup %4173 }
0x2399   :  { %v3273_v17 = vmul.f32 %v4174_v51, %v3265_v8 }
0x239b   :  { %v3279_v24 = vmul.f32 %v3278_v20, %v3273_v17 }
0x239d   :  { %v3285_v1 = vadd.f32 %v3284_v23, %v3279_v24 }
0x239f   :  { %v3291_v25 = vpack.c.bf16 %v3285_v1, %v3285_v1 }
0x23a1   :  { %3930 = vmatmul.mubr.msk.bf16.vlgmr.msra.gmra.mrb[56].mxu1 %vm3259_vm6, %v3291_v25 }
0x23a2   :  { %3937 = vmatprep.mubr.msk.bf16.mxu1 %vm4298_vm3, %v4297_v53  ;;  %3934 = vmatpush3.bf16.msra.mxu1 %v4151_v32  ;;  %vm5090_vm3 = vcmask 1040384  }
0x23a3   :  { %3935 = vmatprep.subr.bf16.mxu1 %v4297_v53  ;;  %v3422_v49 = vsel %vm5090_vm3, %v4152_v48, 0 }
0x23a6   :  { %3936 = vmatpush3.bf16.msra.mxu1 %v3422_v49 }
0x2474   :  { %v3353_v35 = vpop.f32.mrb[56].mxu1 }
0x2475   :  { %v3354_v36 = vadd.f32 %v3353_v35, %v3297_v27  ;;  %v3931_v33 = vpop.f32.mrb[57].mxu1 }
0x2476   :  { %v3356_v34 = vpop.f32.mrb[58].mxu1 }
0x2477   :  { %v3360_v9 = vmin.f32 %v3354_v36, 0.0  ;;  %v3932_v30 = vpop.f32.mrb[59].mxu1  ;;  %vm3359_vm13 = vcmp.gt.f32.partialorder %v3354_v36, 0.0 }
0x2479   :  { %v3361_v37 = vmul.f32 1.442695, %v3360_v9 }
0x247b   :  { %4175 = vpow2.f32 %v3361_v37 }
0x2485   :  { %v4176_v6 = vpop.eup %4175 }
0x2486   :  { %v3673_v2 = vadd.f32 -1.0, %v4176_v6 }
0x2488   :  { %v3364_v39 = vsel %vm3359_vm13, %v3354_v36, %v3673_v2 }
0x2489   :  { %v3369_v40 = vsel %vm3368_vm12, %v3364_v39, %v3366_v38 }
0x248a   :  { %v3373_v7 = vsel %vm3372_vm9, %v3369_v40, 0.0 }
0x248b   :  { %3374 = vadd.xlane.f32.xlu1 %v3373_v7 }
0x2518   :  { %v3375_v41 = vpop.xlane.xlu1 %3374 }
0x2519   :  { %v3377_v42 = vmul.f32 0.055555556, %v3375_v41 }
0x251b   :  { %v3378_v43 = vsub.f32 %v3369_v40, %v3377_v42 }
0x251d   :  { %v3379_v45 = vmul.f32 %v3378_v43, %v3378_v43 }
0x251f   :  { %v3380_v46 = vsel %vm3372_vm9, %v3379_v45, 0.0 }
0x2520   :  { %3381 = vadd.xlane.f32.xlu1 %v3380_v46 }
0x25ad   :  { %v3382_v50 = vpop.xlane.xlu1 %3381 }
0x25ae   :  { %v3383_v54 = vmul.f32 0.055555556, %v3382_v50 }
0x25b0   :  { %v3384_v55 = vadd.f32 1e-05, %v3383_v54 }
0x25b2   :  { %4177 = vrsqrt.f32 %v3384_v55 }
0x25bc   :  { %v4178_v63 = vpop.eup %4177 }
0x25bd   :  { %v3386_v13 = vmul.f32 %v4178_v63, %v3378_v43 }
0x25bf   :  { %v3392_v21 = vmul.f32 %v3391_v62, %v3386_v13 }
0x25c1   :  { %v3398_v28 = vadd.f32 %v3397_v16, %v3392_v21 }
0x25c3   :  { %v3402_v53 = vpack.c.bf16 %v3398_v28, %v3398_v28 }
0x25c5   :  { %3938 = vmatmul.mubr.msk.bf16.vlgmr.msra.gmra.mrb[60].mxu1 %vm3372_vm9, %v3402_v53 }
0x2698   :  { %v3458_v44 = vpop.f32.mrb[60].mxu1 }
0x2699   :  { %v3459_v8 = vadd.f32 %v3458_v44, %v3408_v29  ;;  %v3939_v10 = vpop.f32.mrb[61].mxu1 }
0x269a   :  { %v3461_v11 = vpop.f32.mrb[62].mxu1 }
0x269b   :  { %3464 = vst [vmem:[#allocation7] sm:$0xff] %v3459_v8  ;;  %v3940_v5 = vpop.f32.mrb[63].mxu1 }
0x269c   :  { %4273 = shalt.err (!%p4270_p6)
}
0x269d   :  { %s4274_s14 = scalar_lea.hbm %s5050_s2, 128 }
0x269e   :  { %p4275_p7 = scmp.ne.s32.totalorder %s5050_s2, %s4274_s14  ;;  %p4278_p8 = scmp.lt.u32.totalorder %s4274_s14, %s5050_s2 }
0x26a0   :  { %p4280_p9 = pnand %p4278_p8, %p4275_p7 }
0x26a2   :  { %4283 = shalt.err (!%p4280_p9)
}
0x26a3   :  { %3474 = dma.vmem_to_hbm [thread:$0]  %s3472_s10, 128, %s5050_s2, [#allocation4]  }
0x26a4   :  { %4288 = dma.done.wait [#allocation4], 128  }
0x26a5   :  { %4289 = vsyncadd [#allocation4], 4294967168 }
0x26a6   :  { %3478 = vsyncpa [#allocation3], 1 }
0x26a7   :  { %3479 = vsyncpa [#allocation6], 1 }
0x26a8   :  { %3480 = vsyncpa [#allocation4], 1 }

// kernel: tpu_custom_call.1
= control target key start
LH: loop header
LB: loop body
LE: loop exit
PB: predicated region body
PF: predicated region fallthrough
CT: control target
= control target key end

     0   :  { %7 = vsyncpa [#allocation3], 0  ;;  %s5048_s0 = inlined_call_operand.hbm [shape: f32[8,128], index: 0, kind: input, shape index: {}]   ;;  %s5049_s1 = inlined_call_operand.hbm [shape: bf16[448,1152], index: 1, kind: input, shape index: {}]   ;;  %s5050_s2 = inlined_call_operand.hbm [shape: f32[8,128], index: 2, kind: output, shape index: {}]  }
   0x1   :  { %8 = vsyncpa [#allocation6], 0 }
   0x2   :  { %9 = vsyncpa [#allocation4], 0  ;;  %s4290_s9 = smov [#allocation2]   ;;  %s4291_s11 = smov [#allocation5]  }
   0x3   :  { %s16_s10 = sshll.u32 %s4290_s9, 4  ;;  %s25_s12 = sshll.u32 %s4291_s11, 4  ;;  %s17_s10 = int_to_ptr.vmem [resolvable:$true] %s16_s10  ;;  %s4318_s12 = int_to_ptr.vmem [resolvable:$true] %s25_s12 }
   0x4   :  { %s4218_s15 = scalar_lea.hbm %s5048_s0, 128 }
   0x5   :  { %p4219_p0 = scmp.ne.s32.totalorder %s5048_s0, %s4218_s15  ;;  %p4222_p1 = scmp.lt.u32.totalorder %s4218_s15, %s5048_s0 }
   0x7   :  { %p4224_p2 = pnand %p4222_p1, %p4219_p0 }
   0x9   :  { %4227 = shalt.err (!%p4224_p2)
}
   0xa   :  { %s4228_s20 = scalar_lea.vmem %s17_s10, 128  ;;  %p4233_p4 = scmp.lt.s32.totalorder %s17_s10, %s17_s10 }
   0xb   :  { %p4229_p3 = scmp.ne.s32.totalorder %s17_s10, %s4228_s20  ;;  %p4234_p5 = scmp.lt.s32.totalorder %s4228_s20, %s4228_s20 }
   0xd   :  { %p4235_p6 = por %p4234_p5, %p4233_p4 }
   0xf   :  { %p4236_p7 = pnand %p4235_p6, %p4229_p3 }
  0x11   :  { %4239 = shalt.err (!%p4236_p7)
}
  0x12   :  { %19 = dma.hbm_to_vmem [thread:$0]  %s5048_s0, 128, %s17_s10, [#allocation3]  }
  0x13   :  { %s4240_s25 = scalar_lea.hbm %s5049_s1, 32256 }
  0x14   :  { %p4241_p8 = scmp.ne.s32.totalorder %s5049_s1, %s4240_s25  ;;  %p4244_p9 = scmp.lt.u32.totalorder %s4240_s25, %s5049_s1 }
  0x16   :  { %p4246_p10 = pnand %p4244_p9, %p4241_p8 }
  0x18   :  { %4249 = shalt.err (!%p4246_p10)
}
  0x19   :  { %s4250_s30 = scalar_lea.vmem %s4318_s12, 32256  ;;  %p4255_p12 = scmp.lt.s32.totalorder %s4318_s12, %s4318_s12 }
  0x1a   :  { %p4251_p11 = scmp.ne.s32.totalorder %s4318_s12, %s4250_s30  ;;  %p4256_p13 = scmp.lt.s32.totalorder %s4250_s30, %s4250_s30 }
  0x1c   :  { %p4257_p0 = por %p4256_p13, %p4255_p12 }
  0x1e   :  { %p4258_p1 = pnand %p4257_p0, %p4251_p11 }
  0x20   :  { %4261 = shalt.err (!%p4258_p1)
}
  0x21   :  { %s4292_s0 = smov 576   ;;  %s4293_s3 = smov 36  }
  0x22   :  { %31 = dma.hbm_to_vmem [thread:$0]  %s5049_s1, 32256, %s4318_s12, [#allocation6], %s4292_s0, %s4292_s0, %s4293_s3  }
  0x23   :  { %4284 = dma.done.wait [#allocation3], 128  }
  0x24   :  { %4285 = vsyncadd [#allocation3], 4294967168 }
  0x25   :  { %4286 = dma.done.wait [#allocation6], 32256  }
  0x26   :  { %4287 = vsyncadd [#allocation6], 4294935040  ;;  %v4294_v0 = vmov 0   ;;  %v39_v1 = vld [vmem:[#allocation2] sm:$0xff]  ;;  %v3954_v3 = vld [vmem:[#allocation5 + $0x4] ss:$36 sps:$4 sm:$0xff]  }
  0x27   :  { %466 = vmatprep.mubr.bf16.mxu0 %v4294_v0  ;;  %507 = vmatprep.mubr.bf16.mxu1 %v4294_v0  ;;  %v184_v2 = vpack.c.bf16 %v39_v1, %v39_v1  ;;  %vm403_vm0 = vcmask 1042432   ;;  %v3956_v4 = vld [vmem:[#allocation5 + $0xc] ss:$36 sps:$4 sm:$0xff]   ;;  %v3958_v5 = vld [vmem:[#allocation5] ss:$36 sps:$4 sm:$0xff]   ;;  %s4295_s6 = smov 103  }
  0x28   :  { %v3959_v6 = vld [vmem:[#allocation5 + $0x8] ss:$36 sps:$4 sm:$0xff]   ;;  %434 = vmatprep.subr.bf16.mxu0 %v3954_v3  ;;  %475 = vmatprep.subr.bf16.mxu1 %v3956_v4  ;;  %v3962_v8 = vld [vmem:[#allocation5 + $0x54] ss:$36 sps:$4 sm:$0xff]   ;;  %vm404_vm1 = vcmask 1043456   ;;  %v4296_v11 = vmov 65535  }
  0x29   :  { %236 = vrot.lane.b32.xlu0 %v184_v2, %s4295_s6  ;;  %v3960_v7 = vld [vmem:[#allocation5 + $0x4c] ss:$36 sps:$4 sm:$0xff]   ;;  %435 = vmatpush1.bf16.msra.mxu0 %v3958_v5  ;;  %v405_v12 = vsel %vm403_vm0, 4294967295, %v4296_v11  ;;  %v3966_v13 = vld [vmem:[#allocation5 + $0x94] ss:$36 sps:$4 sm:$0xff]   ;;  %v180_v18 = vld [vmem:[#allocation5 + $0xe0] sm:$0xff] }
  0x2a   :  { %476 = vmatpush1.bf16.msra.mxu1 %v3959_v6  ;;  %436 = vmatprep.subr.bf16.mxu0 %v3960_v7  ;;  %v3964_v9 = vld [vmem:[#allocation5 + $0x48] ss:$36 sps:$4 sm:$0xff]   ;;  %v3965_v10 = vld [vmem:[#allocation5 + $0x50] ss:$36 sps:$4 sm:$0xff]   ;;  %v3968_v14 = vld [vmem:[#allocation5 + $0x9c] ss:$36 sps:$4 sm:$0xff]   ;;  %v3511_v21 = vcombine.high %v180_v18, %v180_v18  ;;  %v3510_v23 = vcombine.low %v180_v18, %v180_v18 }
  0x2b   :  { %477 = vmatprep.subr.bf16.mxu1 %v3962_v8  ;;  %v3970_v15 = vld [vmem:[#allocation5 + $0x90] ss:$36 sps:$4 sm:$0xff]   ;;  %v179_v16 = vld [vmem:[#allocation5 + $0xd8] sm:$0xff]  ;;  %v4355_v17 = vsel %vm404_vm1, %v405_v12, 0  ;;  %vm399_vm2 = vcmask 449536   ;;  %v181_v35 = vld [vmem:[#allocation5 + $0xe8] sm:$0xff] }
  0x2c   :  { %v3971_v19 = vld [vmem:[#allocation5 + $0x98] ss:$36 sps:$4 sm:$0xff]   ;;  %v3509_v20 = vcombine.high %v179_v16, %v179_v16  ;;  %v3508_v22 = vcombine.low %v179_v16, %v179_v16  ;;  %v417_v25 = vand.u32 %v3511_v21, %v4355_v17  ;;  %v414_v27 = vand.u32 %v3510_v23, %v4355_v17  ;;  %v3976_v30 = vld [vmem:[#allocation5 + $0x10] ss:$36 sps:$4 sm:$0xff]   ;;  %v3987_v33 = vld [vmem:[#allocation5 + $0x64] ss:$36 sps:$4 sm:$0xff]  }
  0x2d   :  { %437 = vmatpush1.bf16.msra.mxu0 %v3964_v9  ;;  %v3978_v28 = vld [vmem:[#allocation5 + $0x14] ss:$36 sps:$4 sm:$0xff]   ;;  %v3981_v29 = vld [vmem:[#allocation5 + $0x1c] ss:$36 sps:$4 sm:$0xff]   ;;  %v3990_v39 = vld [vmem:[#allocation5 + $0xa4] ss:$36 sps:$4 sm:$0xff]   ;;  %v3513_v41 = vcombine.high %v181_v35, %v181_v35  ;;  %v3512_v45 = vcombine.low %v181_v35, %v181_v35  ;;  %v40_v16 = vlaneseq }
  0x2e   :  { %478 = vmatpush1.bf16.msra.mxu1 %v3965_v10  ;;  %438 = vmatprep.subr.bf16.mxu0 %v3966_v13  ;;  %v411_v24 = vand.u32 %v3509_v20, %v4355_v17  ;;  %v408_v26 = vand.u32 %v3508_v22, %v4355_v17  ;;  %v3979_v31 = vld [vmem:[#allocation5 + $0x18] ss:$36 sps:$4 sm:$0xff]   ;;  %v182_v36 = vld [vmem:[#allocation5 + $0xf0] sm:$0xff]  ;;  %v3985_v38 = vld [vmem:[#allocation5 + $0x60] ss:$36 sps:$4 sm:$0xff]   ;;  %v4297_v53 = vmov 0.0  }
  0x2f   :  { %479 = vmatprep.subr.bf16.mxu1 %v3968_v14  ;;  %v3984_v32 = vld [vmem:[#allocation5 + $0x5c] ss:$36 sps:$4 sm:$0xff]   ;;  %v3993_v40 = vld [vmem:[#allocation5 + $0xac] ss:$36 sps:$4 sm:$0xff]   ;;  %v3515_v42 = vcombine.high %v182_v36, %v182_v36  ;;  %v3514_v46 = vcombine.low %v182_v36, %v182_v36  ;;  %v423_v47 = vand.u32 %v3513_v41, %v4355_v17  ;;  %v420_v49 = vand.u32 %v3512_v45, %v4355_v17  ;;  %v4001_v60 = vld [vmem:[#allocation5 + $0xf8] ss:$0 sps:$4 sm:$0xff]  }
  0x30   :  { %v3982_v37 = vld [vmem:[#allocation5 + $0x58] ss:$36 sps:$4 sm:$0xff]   ;;  %v3988_v43 = vld [vmem:[#allocation5 + $0xa0] ss:$36 sps:$4 sm:$0xff]   ;;  %v3991_v44 = vld [vmem:[#allocation5 + $0xa8] ss:$36 sps:$4 sm:$0xff]   ;;  %v432_v61 = vand.u32 %v4001_v60, %v4355_v17 }
  0x31   :  { %439 = vmatpush1.bf16.msra.mxu0 %v3970_v15  ;;  %v429_v48 = vand.u32 %v3515_v42, %v4355_v17  ;;  %v426_v50 = vand.u32 %v3514_v46, %v4355_v17  ;;  %v4002_v51 = vld [vmem:[#allocation5 + $0x510] ss:$36 sps:$4 sm:$0xff]   ;;  %v3998_v52 = vld [vmem:[#allocation5 + $0x20] ss:$36 sps:$4 sm:$0xff]   ;;  %v4004_v55 = vld [vmem:[#allocation5 + $0x558] ss:$36 sps:$4 sm:$0xff]  }
  0x32   :  { %480 = vmatpush1.bf16.msra.mxu1 %v3971_v19  ;;  %440 = vmatprep.subr.bf16.mxu0 %v411_v24  ;;  %v4003_v54 = vld [vmem:[#allocation5 + $0x2d0] ss:$36 sps:$4 sm:$0xff]   ;;  %v3999_v56 = vld [vmem:[#allocation5 + $0x68] ss:$36 sps:$4 sm:$0xff]   ;;  %vm4298_vm3 = vmmov 0   ;;  %vm5051_vm4 = vcmask 1040384  }
  0x33   :  { %481 = vmatprep.subr.bf16.mxu1 %v417_v25  ;;  %v4005_v57 = vld [vmem:[#allocation5 + $0x318] ss:$36 sps:$4 sm:$0xff]   ;;  %v4006_v58 = vld [vmem:[#allocation5 + $0x5a0] ss:$36 sps:$4 sm:$0xff]   ;;  %v4000_v59 = vld [vmem:[#allocation5 + $0xb0] ss:$36 sps:$4 sm:$0xff]  }
  0x34   :  { %v4007_v62 = vld [vmem:[#allocation5 + $0x360] ss:$36 sps:$4 sm:$0xff]   ;;  %v4008_v63 = vld [vmem:[#allocation5 + $0x5e8] ss:$36 sps:$4 sm:$0xff]   ;;  %v4010_v2 = vld [vmem:[#allocation5 + $0x630] ss:$36 sps:$4 sm:$0xff]  }
  0x35   :  { %441 = vmatpush1.bf16.msra.mxu0 %v408_v26  ;;  %v4009_v1 = vld [vmem:[#allocation5 + $0x3a8] ss:$36 sps:$4 sm:$0xff]   ;;  %v4011_v3 = vld [vmem:[#allocation5 + $0x3f0] ss:$36 sps:$4 sm:$0xff]   ;;  %v4012_v4 = vld [vmem:[#allocation5 + $0x678] ss:$36 sps:$4 sm:$0xff]  }
  0x36   :  { %482 = vmatpush1.bf16.msra.mxu1 %v414_v27  ;;  %516 = vmatprep.subr.bf16.mxu0 %v3978_v28  ;;  %v4013_v5 = vld [vmem:[#allocation5 + $0x438] ss:$36 sps:$4 sm:$0xff]   ;;  %v4014_v6 = vld [vmem:[#allocation5 + $0x6c0] ss:$36 sps:$4 sm:$0xff]   ;;  %v4016_v8 = vld [vmem:[#allocation5 + $0x750] ss:$36 sps:$4 sm:$0xff]  }
  0x37   :  { %557 = vmatprep.subr.bf16.mxu1 %v3981_v29  ;;  %v4015_v7 = vld [vmem:[#allocation5 + $0x480] ss:$36 sps:$4 sm:$0xff]   ;;  %v4019_v9 = vld [vmem:[#allocation5 + $0x798] ss:$0 sps:$4 sm:$0x33]   ;;  %vm754_vm5 = vcmask 1041408  }
  0x38   :  { %v755_v10 = vsel %vm5051_vm4, 4294967295, %v4296_v11  ;;  %v4017_v12 = vld [vmem:[#allocation5 + $0x708] ss:$36 sps:$4 sm:$0xff]   ;;  %v200_v18 = vshrl.u32 %v40_v16, 7  ;;  %v185_v19 = vld [vmem:[#allocation5 + $0x120] sm:$0x11] }
  0x39   :  { %v4392_v13 = vsel %vm754_vm5, %v755_v10, 0  ;;  %v4018_v14 = vld [vmem:[#allocation5 + $0x4c8] ss:$36 sps:$4 sm:$0xff]   ;;  %v190_v21 = vunpack.c.l.bf16 %v185_v19  ;;  %vm5054_vm6 = vcmask 154624   ;;  %vm5052_vm13 = vcmask 203776   ;;  %s4299_s1 = smov 25  }
  0x3a   :  { %v4395_v15 = vand.u32 %v4019_v9, %v4392_v13  ;;  %v186_v20 = vld [vmem:[#allocation5 + $0x128] sm:$0x11]  ;;  %v4398_v22 = vsub.s32 0, %v200_v18  ;;  %s4300_s7 = smov 14   ;;  %s4301_s8 = smov 12  }
  0x3b   :  { %v193_v23 = vunpack.c.h.bf16 %v186_v20  ;;  %s4302_s9 = smov [#allocation7]  }
  0x3c   :  { %v202_v24 = vrot.slane %v190_v21, %v4398_v22  ;;  %v4216_v21 = vld [vmem:[#allocation5 + $0x760] ss:$36 sps:$4 sm:$0xff]   ;;  %s3471_s10 = sshll.u32 %s4302_s9, 4  ;;  %s3472_s10 = int_to_ptr.vmem [resolvable:$true] %s3471_s10 }
  0x3d   :  { %v214_v25 = vrot.slane %v193_v23, %v4398_v22  ;;  %s4262_s11 = scalar_lea.vmem %s3472_s10, 128  ;;  %p4267_p3 = scmp.lt.s32.totalorder %s3472_s10, %s3472_s10 }
  0x3e   :  { %p4263_p2 = scmp.ne.s32.totalorder %s3472_s10, %s4262_s11  ;;  %p4268_p4 = scmp.lt.s32.totalorder %s4262_s11, %s4262_s11 }
  0x40   :  { %p4269_p5 = por %p4268_p4, %p4267_p3 }
  0x42   :  { %p4270_p6 = pnand %p4269_p5, %p4263_p2 }
  0x9b   :  { %v4361_v34 = vpop.permute.xlu0 %236 }
  0x9c   :  { %3517 = vmatmul.mubr.msk.bf16.vlgmr.msra.gmra.mrb[0].mxu0 %vm399_vm2, %v4361_v34  ;;  %3518 = vmatmul.mubr.msk.bf16.vlgmr.msra.gmra.mrb[0].mxu1 %vm399_vm2, %v4361_v34 }
  0x9d   :  { %517 = vmatpush1.bf16.msra.mxu0 %v3976_v30  ;;  %558 = vmatpush1.bf16.msra.mxu1 %v3979_v31 }
  0x9e   :  { %518 = vmatprep.subr.bf16.mxu0 %v3984_v32  ;;  %559 = vmatprep.subr.bf16.mxu1 %v3987_v33 }
  0x9f   :  { %548 = vmatprep.mubr.bf16.mxu0 %v4294_v0  ;;  %589 = vmatprep.mubr.bf16.mxu1 %v4294_v0 }
  0xa1   :  { %519 = vmatpush1.bf16.msra.mxu0 %v3982_v37  ;;  %560 = vmatpush1.bf16.msra.mxu1 %v3985_v38  ;;  %v187_v37 = vld [vmem:[#allocation5 + $0x130] sm:$0x11]  ;;  %v191_v38 = vunpack.c.h.bf16 %v185_v19 }
  0xa2   :  { %520 = vmatprep.subr.bf16.mxu0 %v3990_v39  ;;  %561 = vmatprep.subr.bf16.mxu1 %v3993_v40  ;;  %v194_v39 = vunpack.c.l.bf16 %v187_v37  ;;  %v192_v40 = vunpack.c.l.bf16 %v186_v20  ;;  %v195_v41 = vunpack.c.h.bf16 %v187_v37 }
  0xa3   :  { %v206_v42 = vrot.slane %v191_v38, %v4398_v22 }
  0xa4   :  { %v222_v45 = vrot.slane %v195_v41, %v4398_v22 }
  0xa5   :  { %521 = vmatpush1.bf16.msra.mxu0 %v3988_v43  ;;  %562 = vmatpush1.bf16.msra.mxu1 %v3991_v44  ;;  %v218_v43 = vrot.slane %v194_v39, %v4398_v22  ;;  %v210_v44 = vrot.slane %v192_v40, %v4398_v22 }
  0xa6   :  { %522 = vmatprep.subr.bf16.mxu0 %v423_v47  ;;  %563 = vmatprep.subr.bf16.mxu1 %v429_v48 }
  0xa9   :  { %523 = vmatpush1.bf16.msra.mxu0 %v420_v49  ;;  %564 = vmatpush1.bf16.msra.mxu1 %v426_v50 }
  0xaa   :  { %3815 = vmatprep.subr.bf16.mxu0 %v4297_v53  ;;  %3682 = vmatprep.subr.bf16.mxu1 %v4002_v51 }
  0xac   :  { %3519 = vmatmul.mubr.msk.bf16.vlgmr.msra.gmra.mrb[4].mxu0 %vm399_vm2, %v4361_v34  ;;  %3520 = vmatmul.mubr.msk.bf16.vlgmr.msra.gmra.mrb[4].mxu1 %vm399_vm2, %v4361_v34 }
  0xad   :  { %3816 = vmatpush3.bf16.msra.mxu0 %v3998_v52  ;;  %3823 = vmatprep.mubr.msk.bf16.mxu0 %vm4298_vm3, %v4297_v53 }
  0xae   :  { %3817 = vmatprep.subr.bf16.mxu0 %v4297_v53  ;;  %3683 = vmatpush3.bf16.msra.mxu1 %v4003_v54 }
  0xaf   :  { %3684 = vmatprep.subr.bf16.mxu1 %v4004_v55 }
  0xb1   :  { %3818 = vmatpush3.bf16.msra.mxu0 %v3999_v56 }
  0xb2   :  { %3819 = vmatprep.subr.bf16.mxu0 %v4297_v53  ;;  %3685 = vmatpush3.bf16.msra.mxu1 %v4005_v57 }
  0xb3   :  { %3686 = vmatprep.subr.bf16.mxu1 %v4006_v58 }
  0xb5   :  { %3820 = vmatpush3.bf16.msra.mxu0 %v4000_v59 }
  0xb6   :  { %3821 = vmatprep.subr.bf16.mxu0 %v4297_v53  ;;  %3687 = vmatpush3.bf16.msra.mxu1 %v4007_v62 }
  0xb7   :  { %3688 = vmatprep.subr.bf16.mxu1 %v4008_v63 }
  0xb9   :  { %3822 = vmatpush3.bf16.msra.mxu0 %v432_v61 }
  0xba   :  { %3827 = vmatprep.subr.bf16.mxu0 %v4297_v53  ;;  %3689 = vmatpush3.bf16.msra.mxu1 %v4009_v1 }
  0xbb   :  { %3690 = vmatprep.subr.bf16.mxu1 %v4010_v2 }
  0xbc   :  { %3824 = vmatmul.mubr.msk.bf16.vlgmr.msra.gmra.mrb[8].mxu0 %vm399_vm2, %v4361_v34 }
  0xbd   :  { %3831 = vmatprep.mubr.msk.bf16.mxu0 %vm4298_vm3, %v4297_v53  ;;  %3828 = vmatpush3.bf16.msra.mxu0 %v4016_v8 }
  0xbe   :  { %3691 = vmatpush3.bf16.msra.mxu1 %v4011_v3  ;;  %3829 = vmatprep.subr.bf16.mxu0 %v4297_v53 }
  0xbf   :  { %3692 = vmatprep.subr.bf16.mxu1 %v4012_v4 }
  0xc1   :  { %3830 = vmatpush3.bf16.msra.mxu0 %v4395_v15 }
  0xc2   :  { %3693 = vmatpush3.bf16.msra.mxu1 %v4013_v5  ;;  %v4414_v5 = vand.u32 127, %v40_v16  ;;  %v4215_v16 = vld [vmem:[#allocation5 + $0x2dc] ss:$36 sps:$4 sm:$0xff]  }
  0xc3   :  { %3694 = vmatprep.subr.bf16.mxu1 %v4014_v6 }
  0xc4   :  { %vm45_vm7 = vcmp.ge.s32.totalorder %v4414_v5, 5  ;;  %vm46_vm8 = vcmp.lt.s32.totalorder %v4414_v5, 10  ;;  %vm48_vm9 = vcmp.ge.s32.totalorder %v4414_v5, 10  ;;  %vm49_vm10 = vcmp.lt.s32.totalorder %v4414_v5, 15 }
  0xc5   :  { %vm4420_vm11 = vmand %vm45_vm7, %vm46_vm8  ;;  %vm5053_vm12 = vcmp.lt.s32.totalorder %v4414_v5, 5  ;;  %vm51_vm15 = vcmp.ge.s32.totalorder %v4414_v5, 15  ;;  %vm52_vm0 = vcmp.lt.s32.totalorder %v4414_v5, 20  ;;  %vm54_vm7 = vcmp.ge.s32.totalorder %v4414_v5, 20 }
  0xc6   :  { %3695 = vmatpush3.bf16.msra.mxu1 %v4015_v7  ;;  %vm4425_vm14 = vmand %vm48_vm9, %vm49_vm10  ;;  %vm55_vm8 = vcmp.lt.s32.totalorder %v4414_v5, 25  ;;  %vm939_vm10 = vcmask 1044480  }
  0xc7   :  { %3696 = vmatprep.subr.bf16.mxu1 %v4017_v12  ;;  %vm4439_vm5 = vmand %vm51_vm15, %vm52_vm0  ;;  %vm60_vm15 = vcmp.lt.s32.totalorder %v4414_v5, 22  ;;  %vm62_vm0 = vcmp.ge.s32.totalorder %v4414_v5, 22 }
  0xc8   :  { %vm4448_vm9 = vmand %vm54_vm7, %vm55_vm8  ;;  %vm63_vm7 = vcmp.lt.s32.totalorder %v4414_v5, 33  ;;  %vm65_vm8 = vcmp.ge.s32.totalorder %v4414_v5, 33 }
  0xca   :  { %3697 = vmatpush3.bf16.msra.mxu1 %v4018_v14 }
 0x16f   :  { %v468_v26 = vpop.f32.mrb[0].mxu0  ;;  %v509_v27 = vpop.f32.mrb[0].mxu1 }
 0x170   :  { %v469_v28 = vadd.f32 %v468_v26, %v202_v24  ;;  %v470_v29 = vpop.f32.mrb[1].mxu0  ;;  %v511_v30 = vpop.f32.mrb[1].mxu1  ;;  %v510_v52 = vadd.f32 %v509_v27, %v210_v44 }
 0x171   :  { %v512_v31 = vadd.f32 %v511_v30, %v214_v25  ;;  %v472_v32 = vpop.f32.mrb[2].mxu0  ;;  %v513_v33 = vpop.f32.mrb[2].mxu1  ;;  %v471_v48 = vadd.f32 %v470_v29, %v206_v42 }
 0x172   :  { %v473_v34 = vpop.f32.mrb[3].mxu0  ;;  %v514_v35 = vpop.f32.mrb[3].mxu1 }
 0x173   :  { %v638_v36 = vmul.f32 %v512_v31, %v469_v28  ;;  %v1816_v28 = vld [vmem:[#allocation5 + $0x2a0] sm:$0x11] }
 0x174   :  { %v1824_v31 = vunpack.c.l.bf16 %v1816_v28 }
 0x175   :  { %v641_v62 = vpack.c.bf16 %v638_v36, %v638_v36 }
 0x17f   :  { %v550_v46 = vpop.f32.mrb[4].mxu0  ;;  %v4406_v47 = vpop.f32.mrb[4].mxu1 }
 0x180   :  { %v551_v49 = vadd.f32 %v550_v46, %v218_v43  ;;  %v552_v50 = vpop.f32.mrb[5].mxu0  ;;  %v4408_v51 = vpop.f32.mrb[5].mxu1 }
 0x181   :  { %v553_v54 = vadd.f32 %v552_v50, %v222_v45  ;;  %v554_v55 = vpop.f32.mrb[6].mxu0  ;;  %v595_v56 = vpop.f32.mrb[6].mxu1 }
 0x182   :  { %v639_v57 = vmul.f32 %v551_v49, %v471_v48  ;;  %v555_v58 = vpop.f32.mrb[7].mxu0  ;;  %v596_v59 = vpop.f32.mrb[7].mxu1 }
 0x183   :  { %v640_v60 = vmul.f32 %v553_v54, %v510_v52 }
 0x184   :  { %v642_v61 = vpack.c.bf16 %v639_v57, %v639_v57 }
 0x185   :  { %v643_v63 = vpack.c.bf16 %v640_v60, %v640_v60 }
 0x186   :  { %792 = vmatprep.mubr.bf16.mxu1 %v642_v61  ;;  %v4020_v61 = vld [vmem:[#allocation5 + $0x2d4] ss:$36 sps:$4 sm:$0xff]  }
 0x187   :  { %793 = vmatmul.mubr.bf16.vlgmr.msra.gmra.mrb[8].mxu1 %v641_v62  ;;  %3832 = vmatmul.mubr.msk.bf16.vlgmr.msra.gmra.mrb[12].mxu0 %vm5054_vm6, %v643_v63  ;;  %v4022_v62 = vld [vmem:[#allocation5 + $0x2d8] ss:$36 sps:$4 sm:$0xff]   ;;  %v940_v63 = vsel %vm404_vm1, 4294967295, %v4296_v11  ;;  %v4031_v11 = vld [vmem:[#allocation5 + $0x328] ss:$36 sps:$4 sm:$0xff]   ;;  %vm59_vm1 = vcmp.ge.s32.totalorder %v4414_v5, 11 }
 0x188   :  { %983 = vmatprep.mubr.bf16.mxu0 %v4294_v0  ;;  %951 = vmatprep.subr.bf16.mxu0 %v4022_v62  ;;  %vm4550_vm4 = vmand %vm59_vm1, %vm60_vm15  ;;  %vm68_vm1 = vcmp.ge.s32.totalorder %v4414_v5, 44  ;;  %vm69_vm15 = vcmp.lt.s32.totalorder %v4414_v5, 55 }
 0x189   :  { %952 = vmatpush1.bf16.msra.mxu0 %v4020_v61 }
 0x18f   :  { %v4412_v1 = vpop.f32.mrb[8].mxu0 }
 0x190   :  { %v3825_v2 = vpop.f32.mrb[9].mxu0 }
 0x191   :  { %v635_v3 = vpop.f32.mrb[10].mxu0  ;;  %v4023_v2 = vld [vmem:[#allocation5 + $0x31c] ss:$36 sps:$4 sm:$0x1f]  }
 0x192   :  { %v3826_v4 = vpop.f32.mrb[11].mxu0  ;;  %v4025_v3 = vld [vmem:[#allocation5 + $0x320] ss:$36 sps:$4 sm:$0x1f]  }
 0x193   :  { %v941_v4 = vsel %vm939_vm10, %v940_v63, 0  ;;  %vm66_vm10 = vcmp.lt.s32.totalorder %v4414_v5, 44 }
 0x25a   :  { %v3698_v6 = vpop.f32.mrb[8].mxu1  ;;  %v834_v7 = vpop.f32.mrb[12].mxu0 }
 0x25b   :  { %v3699_v8 = vpop.f32.mrb[9].mxu1  ;;  %v3833_v9 = vpop.f32.mrb[13].mxu0 }
 0x25c   :  { %v3700_v10 = vadd.f32 %v3699_v8, %v3698_v6  ;;  %v3701_v12 = vpop.f32.mrb[10].mxu1  ;;  %v837_v14 = vpop.f32.mrb[14].mxu0  ;;  %v4490_v6 = vand.u32 %v4025_v3, %v941_v4  ;;  %v4028_v8 = vld [vmem:[#allocation5 + $0x520] ss:$36 sps:$4 sm:$0xff]  }
 0x25d   :  { %v3702_v18 = vpop.f32.mrb[11].mxu1  ;;  %v3834_v19 = vpop.f32.mrb[15].mxu0  ;;  %v4029_v9 = vld [vmem:[#allocation5 + $0x2e0] ss:$36 sps:$4 sm:$0xff]   ;;  %3710 = vmatprep.subr.bf16.mxu1 %v4028_v8  ;;  %v4032_v12 = vld [vmem:[#allocation5 + $0x5b0] ss:$36 sps:$4 sm:$0xff]  }
 0x25e   :  { %v835_v20 = vadd.f32 %v3700_v10, %v834_v7  ;;  %v4492_v7 = vand.u32 %v4023_v2, %v941_v4  ;;  %953 = vmatprep.subr.bf16.mxu0 %v4490_v6  ;;  %v4030_v10 = vld [vmem:[#allocation5 + $0x568] ss:$36 sps:$4 sm:$0xff]   ;;  %3711 = vmatpush3.bf16.msra.mxu1 %v4029_v9  ;;  %v4033_v14 = vld [vmem:[#allocation5 + $0x370] ss:$36 sps:$4 sm:$0xff]   ;;  %v4034_v18 = vld [vmem:[#allocation5 + $0x5f8] ss:$36 sps:$4 sm:$0xff]  }
 0x25f   :  { %3712 = vmatprep.subr.bf16.mxu1 %v4030_v10  ;;  %v4035_v19 = vld [vmem:[#allocation5 + $0x3b8] ss:$36 sps:$4 sm:$0xff]  }
 0x260   :  { %v850_v23 = vsel %vm4420_vm11, %v835_v20, -1e+30  ;;  %v842_v24 = vsel %vm5053_vm12, %v835_v20, -1e+30  ;;  %v857_v27 = vsel %vm4425_vm14, %v835_v20, -1e+30  ;;  %954 = vmatpush1.bf16.msra.mxu0 %v4492_v7 }
 0x261   :  { %v851_v25 = vsel %vm5052_vm13, %v850_v23, -inf  ;;  %v844_v26 = vsel %vm5052_vm13, %v842_v24, -inf  ;;  %v858_v29 = vsel %vm5052_vm13, %v857_v27, -inf  ;;  %v864_v30 = vsel %vm4439_vm5, %v835_v20, -1e+30  ;;  %3835 = vmatprep.subr.bf16.mxu0 %v4297_v53 }
 0x262   :  { %852 = vmax.xlane.f32.xlu1 %v851_v25  ;;  %845 = vmax.xlane.f32.xlu0 %v844_v26  ;;  %v865_v32 = vsel %vm5052_vm13, %v864_v30, -inf  ;;  %v871_v33 = vsel %vm4448_vm9, %v835_v20, -1e+30  ;;  %v4037_v23 = vld [vmem:[#allocation5 + $0x400] ss:$36 sps:$4 sm:$0xff]  }
 0x263   :  { %v872_v34 = vsel %vm5052_vm13, %v871_v33, -inf  ;;  %3713 = vmatpush3.bf16.msra.mxu1 %v4031_v11  ;;  %v4038_v24 = vld [vmem:[#allocation5 + $0x688] ss:$36 sps:$4 sm:$0xff]   ;;  %v4040_v26 = vld [vmem:[#allocation5 + $0x6d0] ss:$36 sps:$4 sm:$0xff]  }
 0x264   :  { %3714 = vmatprep.subr.bf16.mxu1 %v4032_v12  ;;  %v4039_v25 = vld [vmem:[#allocation5 + $0x448] ss:$36 sps:$4 sm:$0xff]  }
 0x266   :  { %859 = vmax.xlane.f32.xlu1 %v858_v29 }
 0x267   :  { %3715 = vmatpush3.bf16.msra.mxu1 %v4033_v14 }
 0x268   :  { %3716 = vmatprep.subr.bf16.mxu1 %v4034_v18 }
 0x26a   :  { %866 = vmax.xlane.f32.xlu1 %v865_v32 }
 0x26b   :  { %3717 = vmatpush3.bf16.msra.mxu1 %v4035_v19 }
 0x26e   :  { %873 = vmax.xlane.f32.xlu1 %v872_v34 }
 0x2ef   :  { %v853_v35 = vpop.xlane.xlu1 %852  ;;  %v846_v36 = vpop.xlane.xlu0 %845 }
 0x2f0   :  { %v847_v38 = vsel %vm5053_vm12, %v846_v36, 0.0 }
 0x2f1   :  { %v854_v40 = vsel %vm4420_vm11, %v853_v35, %v847_v38 }
 0x2f3   :  { %v860_v37 = vpop.xlane.xlu1 %859 }
 0x2f4   :  { %v861_v41 = vsel %vm4425_vm14, %v860_v37, %v854_v40 }
 0x2f7   :  { %v867_v39 = vpop.xlane.xlu1 %866 }
 0x2f8   :  { %v868_v42 = vsel %vm4439_vm5, %v867_v39, %v861_v41  ;;  %v4026_v41 = vld [vmem:[#allocation5 + $0x2dc] ss:$36 sps:$4 sm:$0xff]  }
 0x2fb   :  { %v874_v43 = vpop.xlane.xlu1 %873 }
 0x2fc   :  { %v875_v44 = vsel %vm4448_vm9, %v874_v43, %v868_v42  ;;  %v4027_v42 = vld [vmem:[#allocation5 + $0x324] ss:$36 sps:$4 sm:$0x1f]  }
 0x2fd   :  { %v876_v45 = vsub.f32 %v835_v20, %v875_v44  ;;  %v4036_v20 = vld [vmem:[#allocation5 + $0x640] ss:$36 sps:$4 sm:$0xff]   ;;  %v4509_v44 = vand.u32 %v4027_v42, %v941_v4 }
 0x2fe   :  { %3718 = vmatprep.subr.bf16.mxu1 %v4036_v20  ;;  %v4046_v20 = vld [vmem:[#allocation5 + $0x2e4] ss:$36 sps:$4 sm:$0xff]  }
 0x2ff   :  { %v877_v46 = vmul.f32 1.442695, %v876_v45  ;;  %3719 = vmatpush3.bf16.msra.mxu1 %v4037_v23  ;;  %v4041_v45 = vld [vmem:[#allocation5 + $0x490] ss:$36 sps:$4 sm:$0xff]  }
 0x300   :  { %3720 = vmatprep.subr.bf16.mxu1 %v4038_v24  ;;  %v4047_v24 = vld [vmem:[#allocation5 + $0x32c] ss:$36 sps:$4 sm:$0xff]  }
 0x301   :  { %4153 = vpow2.f32 %v877_v46  ;;  %v4042_v46 = vld [vmem:[#allocation5 + $0x718] ss:$36 sps:$4 sm:$0xff]  }
 0x303   :  { %3721 = vmatpush3.bf16.msra.mxu1 %v4039_v25  ;;  %v4049_v25 = vld [vmem:[#allocation5 + $0x3bc] ss:$0 sps:$4 sm:$0xff]  }
 0x304   :  { %3722 = vmatprep.subr.bf16.mxu1 %v4040_v26  ;;  %v1268_v26 = vand.u32 %v4049_v25, %v4355_v17 }
 0x307   :  { %3723 = vmatpush3.bf16.msra.mxu1 %v4041_v45 }
 0x308   :  { %3724 = vmatprep.subr.bf16.mxu1 %v4042_v46 }
 0x30b   :  { %v4466_v48 = vpop.eup %4153 }
 0x30c   :  { %v879_v49 = vsel %vm5053_vm12, %v4466_v48, 0.0  ;;  %v884_v52 = vsel %vm4420_vm11, %v4466_v48, 0.0  ;;  %v889_v55 = vsel %vm4425_vm14, %v4466_v48, 0.0  ;;  %v894_v57 = vsel %vm4439_vm5, %v4466_v48, 0.0 }
 0x30d   :  { %v880_v50 = vsel %vm5052_vm13, %v879_v49, 0.0  ;;  %v885_v54 = vsel %vm5052_vm13, %v884_v52, 0.0  ;;  %v890_v56 = vsel %vm5052_vm13, %v889_v55, 0.0  ;;  %v895_v58 = vsel %vm5052_vm13, %v894_v57, 0.0  ;;  %v4044_v49 = vld [vmem:[#allocation5 + $0x760] ss:$36 sps:$4 sm:$0xff]  }
 0x30e   :  { %881 = vadd.xlane.f32.xlu1 %v880_v50  ;;  %v899_v59 = vsel %vm4448_vm9, %v4466_v48, 0.0  ;;  %v4045_v50 = vld [vmem:[#allocation5 + $0x7a8] ss:$0 sps:$4 sm:$0x33]  }
 0x30f   :  { %v900_v60 = vsel %vm5052_vm13, %v899_v59, 0.0  ;;  %v4522_v52 = vand.u32 %v4045_v50, %v4392_v13  ;;  %v189_v59 = vld [vmem:[#allocation5 + $0x140] sm:$0x1] }
 0x310   :  { %v198_v61 = vunpack.c.l.bf16 %v189_v59 }
 0x312   :  { %886 = vadd.xlane.f32.xlu1 %v885_v54  ;;  %v188_v54 = vld [vmem:[#allocation5 + $0x138] sm:$0x11]  ;;  %v234_v8 = vrot.slane %v198_v61, %v4398_v22 }
 0x313   :  { %v196_v55 = vunpack.c.l.bf16 %v188_v54 }
 0x314   :  { %v633_v12 = vadd.f32 %v4412_v1, %v234_v8  ;;  %v4048_v1 = vld [vmem:[#allocation5 + $0x374] ss:$36 sps:$4 sm:$0xff]  }
 0x315   :  { %v226_v57 = vrot.slane %v196_v55, %v4398_v22 }
 0x316   :  { %891 = vadd.xlane.f32.xlu1 %v890_v56  ;;  %v197_v56 = vunpack.c.h.bf16 %v188_v54  ;;  %v4179_v54 = vld [vmem:[#allocation2] sm:$0xff] }
 0x31a   :  { %896 = vadd.xlane.f32.xlu1 %v895_v58  ;;  %v230_v58 = vrot.slane %v197_v56, %v4398_v22 }
 0x31c   :  { %v594_v62 = vadd.f32 %v4408_v51, %v230_v58 }
 0x31e   :  { %901 = vadd.xlane.f32.xlu1 %v900_v60  ;;  %v592_v60 = vadd.f32 %v4406_v47, %v226_v57 }
 0x39b   :  { %v882_v27 = vpop.xlane.xlu1 %881 }
 0x39c   :  { %v883_v33 = vsel %vm5053_vm12, %v882_v27, 0.0  ;;  %vm4555_vm12 = vmand %vm62_vm0, %vm63_vm7  ;;  %vm5055_vm7 = vcmask 261120  }
 0x39d   :  { %vm4575_vm0 = vmand %vm68_vm1, %vm69_vm15  ;;  %vm5074_vm1 = vcmask 203776  }
 0x39e   :  { %vm5075_vm15 = vmmov %vm5074_vm1 }
 0x39f   :  { %v887_v29 = vpop.xlane.xlu1 %886 }
 0x3a0   :  { %v888_v34 = vsel %vm4420_vm11, %v887_v29, %v883_v33 }
 0x3a3   :  { %v892_v30 = vpop.xlane.xlu1 %891 }
 0x3a4   :  { %v893_v35 = vsel %vm4425_vm14, %v892_v30, %v888_v34 }
 0x3a7   :  { %v897_v32 = vpop.xlane.xlu1 %896 }
 0x3a8   :  { %v898_v36 = vsel %vm4439_vm5, %v897_v32, %v893_v35 }
 0x3ab   :  { %v902_v37 = vpop.xlane.xlu1 %901 }
 0x3ac   :  { %v903_v38 = vsel %vm4448_vm9, %v902_v37, %v898_v36 }
 0x3ad   :  { %4155 = vrcp.f32 %v903_v38 }
 0x3b7   :  { %v4156_v39 = vpop.eup %4155 }
 0x3b8   :  { %v905_v40 = vmul.f32 %v4156_v39, %v4466_v48  ;;  %v4043_v48 = vld [vmem:[#allocation5 + $0x4d8] ss:$36 sps:$4 sm:$0xff]  }
 0x3b9   :  { %3725 = vmatpush3.bf16.msra.mxu1 %v4043_v48 }
 0x3ba   :  { %v906_v43 = vpack.c.bf16 %v905_v40, %v905_v40  ;;  %1629 = vmatprep.subr.bf16.mxu1 %v4294_v0  ;;  %v1237_v40 = vld [vmem:[#allocation5 + $0x2e8] sm:$0x1] }
 0x3bc   :  { %3547 = vmatmul.mubr.msk.bf16.vlgmr.msra.gmra.mrb[16].mxu0 %vm5052_vm13, %v906_v43 }
 0x3bd   :  { %3836 = vmatpush3.bf16.msra.mxu0 %v4026_v41  ;;  %3839 = vmatprep.mubr.msk.bf16.mxu0 %vm4298_vm3, %v4297_v53  ;;  %v1238_v41 = vunpack.c.l.bf16 %v1237_v40 }
 0x3be   :  { %3837 = vmatprep.subr.bf16.mxu0 %v4297_v53 }
 0x3bf   :  { %v1242_v42 = vrot.slane %v1238_v41, %v4398_v22 }
 0x3c1   :  { %3838 = vmatpush3.bf16.msra.mxu0 %v4509_v44 }
 0x3c2   :  { %3843 = vmatprep.subr.bf16.mxu0 %v4297_v53 }
 0x3c4   :  { %3840 = vmatmul.mubr.msk.bf16.vlgmr.msra.gmra.mrb[20].mxu0 %vm5052_vm13, %v906_v43  ;;  %vm57_vm13 = vcmp.lt.s32.totalorder %v4414_v5, 11 }
 0x3c5   :  { %3847 = vmatprep.mubr.msk.bf16.mxu0 %vm4298_vm3, %v4297_v53  ;;  %3844 = vmatpush3.bf16.msra.mxu0 %v4044_v49 }
 0x3c6   :  { %3845 = vmatprep.subr.bf16.mxu0 %v4297_v53 }
 0x3c9   :  { %3846 = vmatpush3.bf16.msra.mxu0 %v4522_v52 }
 0x3ca   :  { %3851 = vmatprep.subr.bf16.mxu0 %v4297_v53 }
 0x48f   :  { %v985_v63 = vpop.f32.mrb[16].mxu0 }
 0x490   :  { %v1032_v13 = vmul.f32 %v985_v63, %v592_v60  ;;  %v987_v2 = vpop.f32.mrb[17].mxu0 }
 0x491   :  { %v1033_v3 = vmul.f32 %v987_v2, %v594_v62  ;;  %v989_v4 = vpop.f32.mrb[18].mxu0 }
 0x492   :  { %v990_v9 = vpop.f32.mrb[19].mxu0  ;;  %v1035_v11 = vpack.c.bf16 %v1032_v13, %v1032_v13 }
 0x493   :  { %v1036_v10 = vpack.c.bf16 %v1033_v3, %v1033_v3 }
 0x495   :  { %1181 = vmatprep.mubr.bf16.mxu1 %v1036_v10 }
 0x496   :  { %1182 = vmatmul.mubr.bf16.vlgmr.msra.gmra.mrb[12].mxu1 %v1035_v11 }
 0x497   :  { %v1026_v14 = vpop.f32.mrb[20].mxu0 }
 0x498   :  { %v1034_v18 = vmul.f32 %v1026_v14, %v633_v12  ;;  %v3841_v47 = vpop.f32.mrb[21].mxu0 }
 0x499   :  { %v1029_v19 = vpop.f32.mrb[22].mxu0 }
 0x49a   :  { %v1037_v51 = vpack.c.bf16 %v1034_v18, %v1034_v18  ;;  %v3842_v23 = vpop.f32.mrb[23].mxu0 }
 0x49c   :  { %3848 = vmatmul.mubr.msk.bf16.vlgmr.msra.gmra.mrb[24].mxu0 %vm5054_vm6, %v1037_v51  ;;  %vm4559_vm6 = vmand %vm65_vm8, %vm66_vm10  ;;  %vm5072_vm8 = vcmask 154624   ;;  %vm5073_vm10 = vcmp.lt.s32.totalorder %v4414_v5, 5 }
 0x49d   :  { %3852 = vmatpush3.bf16.msra.mxu0 %v4046_v20  ;;  %3859 = vmatprep.mubr.msk.bf16.mxu0 %vm4298_vm3, %v4297_v53 }
 0x49e   :  { %3853 = vmatprep.subr.bf16.mxu0 %v4297_v53 }
 0x4a1   :  { %3854 = vmatpush3.bf16.msra.mxu0 %v4047_v24 }
 0x4a2   :  { %3855 = vmatprep.subr.bf16.mxu0 %v4297_v53 }
 0x4a5   :  { %3856 = vmatpush3.bf16.msra.mxu0 %v4048_v1 }
 0x4a6   :  { %3857 = vmatprep.subr.bf16.mxu0 %v4297_v53 }
 0x4a9   :  { %3858 = vmatpush3.bf16.msra.mxu0 %v1268_v26 }
 0x569   :  { %v3726_v27 = vpop.f32.mrb[12].mxu1 }
 0x56a   :  { %v3727_v29 = vpop.f32.mrb[13].mxu1 }
 0x56b   :  { %v3728_v30 = vadd.f32 %v3727_v29, %v3726_v27  ;;  %v3729_v32 = vpop.f32.mrb[14].mxu1 }
 0x56c   :  { %v3730_v33 = vpop.f32.mrb[15].mxu1 }
 0x56f   :  { %v1223_v34 = vpop.f32.mrb[24].mxu0 }
 0x570   :  { %v1224_v35 = vadd.f32 %v3728_v30, %v1223_v34  ;;  %v3849_v36 = vpop.f32.mrb[25].mxu0 }
 0x571   :  { %v1226_v37 = vpop.f32.mrb[26].mxu0 }
 0x572   :  { %v1236_v38 = vpack.c.bf16 %v1224_v35, %v1224_v35  ;;  %v3850_v39 = vpop.f32.mrb[27].mxu0 }
 0x574   :  { %3860 = vmatmul.mubr.msk.bf16.vlgmr.msra.gmra.mrb[28].mxu0 %vm399_vm2, %v1236_v38 }
 0x575   :  { %1526 = vmatprep.mubr.bf16.mxu0 %v4294_v0 }
 0x647   :  { %v1304_v43 = vpop.f32.mrb[28].mxu0 }
 0x648   :  { %v1305_v45 = vadd.f32 %v1304_v43, %v1242_v42  ;;  %v3861_v46 = vpop.f32.mrb[29].mxu0 }
 0x649   :  { %v1307_v48 = vpop.f32.mrb[30].mxu0  ;;  %v1315_v46 = vld [vmem:[#allocation5 + $0x3ac] sm:$0x1] }
 0x64a   :  { %1311 = vrot.lane.b32.xlu0 %v1305_v45, %s4299_s1  ;;  %v3862_v49 = vpop.f32.mrb[31].mxu0  ;;  %v1408_v48 = vunpack.c.l.bf16 %v1315_v46  ;;  %v4065_v46 = vld [vmem:[#allocation5 + $0x450] ss:$36 sps:$4 sm:$0xff]  }
 0x64c   :  { %v1412_v49 = vrot.slane %v1408_v48, %v4398_v22  ;;  %v4067_v48 = vld [vmem:[#allocation5 + $0x4e0] ss:$36 sps:$4 sm:$0xff]  }
 0x6bc   :  { %v1312_v50 = vpop.permute.xlu0 %1311 }
 0x6bd   :  { %v1314_v55 = vadd.f32 %v4179_v54, %v1312_v50  ;;  %v1316_v50 = vld [vmem:[#allocation5 + $0x3b0] sm:$0x1] }
 0x6be   :  { %v1418_v54 = vunpack.c.l.bf16 %v1316_v50 }
 0x6bf   :  { %1320 = vrot.lane.b32.xlu1 %v1314_v55, %s4295_s6 }
 0x731   :  { %v1321_v58 = vpop.permute.xlu1 %1320 }
 0x732   :  { %v1331_v60 = vsel %vm4550_vm4, %v1321_v58, 0.0  ;;  %v1323_v61 = vsel %vm57_vm13, %v1321_v58, 0.0  ;;  %v1339_v13 = vsel %vm4555_vm12, %v1321_v58, 0.0  ;;  %v1347_v2 = vsel %vm4559_vm6, %v1321_v58, 0.0 }
 0x733   :  { %v1332_v62 = vsel %vm399_vm2, %v1331_v60, 0.0  ;;  %v1324_v63 = vsel %vm399_vm2, %v1323_v61, 0.0  ;;  %v1340_v4 = vsel %vm399_vm2, %v1339_v13, 0.0  ;;  %v1348_v8 = vsel %vm399_vm2, %v1347_v2, 0.0 }
 0x734   :  { %1333 = vadd.xlane.f32.xlu0 %v1332_v62  ;;  %1325 = vadd.xlane.f32.xlu1 %v1324_v63  ;;  %v1355_v9 = vsel %vm4575_vm0, %v1321_v58, 0.0 }
 0x735   :  { %v1356_v10 = vsel %vm399_vm2, %v1355_v9, 0.0 }
 0x738   :  { %1341 = vadd.xlane.f32.xlu0 %v1340_v4  ;;  %1349 = vadd.xlane.f32.xlu1 %v1348_v8 }
 0x73c   :  { %1357 = vadd.xlane.f32.xlu0 %v1356_v10 }
 0x7c1   :  { %v1334_v11 = vpop.xlane.xlu0 %1333  ;;  %v1326_v12 = vpop.xlane.xlu1 %1325 }
 0x7c2   :  { %v1327_v14 = vmul.f32 0.09090909, %v1326_v12  ;;  %v1335_v18 = vmul.f32 0.09090909, %v1334_v11 }
 0x7c4   :  { %v1328_v47 = vsel %vm57_vm13, %v1327_v14, 0.0 }
 0x7c5   :  { %v1342_v19 = vpop.xlane.xlu0 %1341  ;;  %v1350_v20 = vpop.xlane.xlu1 %1349  ;;  %v1336_v23 = vsel %vm4550_vm4, %v1335_v18, %v1328_v47 }
 0x7c6   :  { %v1343_v51 = vmul.f32 0.09090909, %v1342_v19  ;;  %v1351_v24 = vmul.f32 0.09090909, %v1350_v20  ;;  %v4050_v19 = vld [vmem:[#allocation5 + $0x2ec] ss:$36 sps:$4 sm:$0xff]  }
 0x7c7   :  { %v4052_v20 = vld [vmem:[#allocation5 + $0x2f0] ss:$36 sps:$4 sm:$0xff]  }
 0x7c8   :  { %v1344_v1 = vsel %vm4555_vm12, %v1343_v51, %v1336_v23  ;;  %v4055_v51 = vld [vmem:[#allocation5 + $0x338] ss:$36 sps:$4 sm:$0xff]   ;;  %1494 = vmatprep.subr.bf16.mxu0 %v4052_v20  ;;  %v1434_v23 = vld [vmem:[#allocation5 + $0x3c4] sm:$0xff] }
 0x7c9   :  { %v1358_v25 = vpop.xlane.xlu0 %1357  ;;  %v1352_v27 = vsel %vm4559_vm6, %v1351_v24, %v1344_v1  ;;  %1495 = vmatpush1.bf16.msra.mxu0 %v4050_v19  ;;  %v4053_v24 = vld [vmem:[#allocation5 + $0x334] ss:$36 sps:$4 sm:$0xff]  }
 0x7ca   :  { %v1359_v26 = vmul.f32 0.09090909, %v1358_v25  ;;  %1496 = vmatprep.subr.bf16.mxu0 %v4055_v51  ;;  %v4058_v25 = vld [vmem:[#allocation5 + $0x380] ss:$36 sps:$4 sm:$0xff]  }
 0x7cc   :  { %v1360_v29 = vsel %vm4575_vm0, %v1359_v26, %v1352_v27  ;;  %v3580_v26 = vcombine.high %v1434_v23, %v1434_v23  ;;  %v4056_v27 = vld [vmem:[#allocation5 + $0x37c] ss:$36 sps:$4 sm:$0xff]  }
 0x7cd   :  { %1362 = vrot.lane.b32.xlu1 %v1360_v29, %s4299_s1  ;;  %1497 = vmatpush1.bf16.msra.mxu0 %v4053_v24  ;;  %v3579_v29 = vcombine.low %v1434_v23, %v1434_v23 }
 0x7ce   :  { %1498 = vmatprep.subr.bf16.mxu0 %v4058_v25 }
 0x7d1   :  { %1499 = vmatpush1.bf16.msra.mxu0 %v4056_v27 }
 0x83f   :  { %v1363_v30 = vpop.permute.xlu1 %1362 }
 0x840   :  { %v4595_v32 = vsub.f32 %v1314_v55, %v1363_v30  ;;  %v1422_v55 = vrot.slane %v1418_v54, %v4398_v22  ;;  %v1492_v30 = vand.u32 %v3580_v26, %v4355_v17  ;;  %v4069_v54 = vld [vmem:[#allocation5 + $0x570] ss:$36 sps:$4 sm:$0xff]  }
 0x842   :  { %v1366_v33 = vmul.f32 %v4595_v32, %v4595_v32  ;;  %1500 = vmatprep.subr.bf16.mxu0 %v1492_v30 }
 0x844   :  { %1368 = vrot.lane.b32.xlu0 %v1366_v33, %s4295_s6  ;;  %v1489_v33 = vand.u32 %v3579_v29, %v4355_v17 }
 0x846   :  { %1501 = vmatpush1.bf16.msra.mxu0 %v1489_v33 }
 0x8b6   :  { %v1369_v34 = vpop.permute.xlu0 %1368 }
 0x8b7   :  { %v1377_v35 = vsel %vm4550_vm4, %v1369_v34, 0.0  ;;  %v1371_v36 = vsel %vm57_vm13, %v1369_v34, 0.0  ;;  %v1389_v39 = vsel %vm4559_vm6, %v1369_v34, 0.0  ;;  %v1383_v40 = vsel %vm4555_vm12, %v1369_v34, 0.0 }
 0x8b8   :  { %v1378_v37 = vsel %vm399_vm2, %v1377_v35, 0.0  ;;  %v1372_v38 = vsel %vm399_vm2, %v1371_v36, 0.0  ;;  %v1390_v41 = vsel %vm399_vm2, %v1389_v39, 0.0  ;;  %v1384_v42 = vsel %vm399_vm2, %v1383_v40, 0.0  ;;  %v4061_v35 = vld [vmem:[#allocation5 + $0x330] ss:$36 sps:$4 sm:$0xff]  }
 0x8b9   :  { %1379 = vadd.xlane.f32.xlu0 %v1378_v37  ;;  %1373 = vadd.xlane.f32.xlu1 %v1372_v38  ;;  %v1395_v43 = vsel %vm4575_vm0, %v1369_v34, 0.0  ;;  %v4062_v36 = vld [vmem:[#allocation5 + $0x378] ss:$36 sps:$4 sm:$0xff]   ;;  %v4063_v40 = vld [vmem:[#allocation5 + $0x3c0] ss:$36 sps:$4 sm:$0xff]  }
 0x8ba   :  { %v1396_v45 = vsel %vm399_vm2, %v1395_v43, 0.0  ;;  %1630 = vmatpush1.bf16.msra.mxu1 %v4061_v35  ;;  %v4064_v43 = vld [vmem:[#allocation5 + $0x408] ss:$36 sps:$4 sm:$0xff]  }
 0x8bb   :  { %1631 = vmatprep.subr.bf16.mxu1 %v4294_v0 }
 0x8bd   :  { %1391 = vadd.xlane.f32.xlu0 %v1390_v41  ;;  %1385 = vadd.xlane.f32.xlu1 %v1384_v42 }
 0x8be   :  { %1632 = vmatpush1.bf16.msra.mxu1 %v4062_v36 }
 0x8bf   :  { %1633 = vmatprep.subr.bf16.mxu1 %v4294_v0 }
 0x8c1   :  { %1397 = vadd.xlane.f32.xlu1 %v1396_v45 }
 0x8c2   :  { %1634 = vmatpush1.bf16.msra.mxu1 %v4063_v40 }
 0x8c3   :  { %1635 = vmatprep.subr.bf16.mxu1 %v4294_v0 }
 0x8c6   :  { %1636 = vmatpush1.bf16.msra.mxu1 %v4064_v43 }
 0x8c7   :  { %1637 = vmatprep.subr.bf16.mxu1 %v4294_v0 }
 0x8ca   :  { %1638 = vmatpush1.bf16.msra.mxu1 %v4065_v46 }
 0x8cb   :  { %1639 = vmatprep.subr.bf16.mxu1 %v4294_v0 }
 0x8d2   :  { %1414 = vrot.lane.b32.xlu1 %v1412_v49, %s4299_s1  ;;  %v4068_v49 = vld [vmem:[#allocation5 + $0x528] ss:$36 sps:$4 sm:$0xff]  }
 0x8d6   :  { %1424 = vrot.lane.b32.xlu1 %v1422_v55, %s4299_s1  ;;  %v4070_v55 = vld [vmem:[#allocation5 + $0x5b8] ss:$36 sps:$4 sm:$0xff]  }
 0x946   :  { %v1380_v58 = vpop.xlane.xlu0 %1379  ;;  %v1374_v60 = vpop.xlane.xlu1 %1373 }
 0x947   :  { %v1375_v61 = vmul.f32 0.09090909, %v1374_v60  ;;  %v1381_v62 = vmul.f32 0.09090909, %v1380_v58  ;;  %v1436_v58 = vld [vmem:[#allocation5 + $0x364] sm:$0x11] }
 0x948   :  { %v1437_v60 = vunpack.c.l.bf16 %v1436_v58 }
 0x949   :  { %v1376_v63 = vsel %vm57_vm13, %v1375_v61, 0.0  ;;  %v1438_v61 = vunpack.c.h.bf16 %v1436_v58 }
 0x94a   :  { %v1392_v13 = vpop.xlane.xlu0 %1391  ;;  %v1386_v2 = vpop.xlane.xlu1 %1385  ;;  %v1382_v8 = vsel %vm4550_vm4, %v1381_v62, %v1376_v63  ;;  %v1442_v62 = vrot.slane %v1437_v60, %v4398_v22 }
 0x94b   :  { %v1387_v4 = vmul.f32 0.09090909, %v1386_v2  ;;  %v1393_v9 = vmul.f32 0.09090909, %v1392_v13  ;;  %v1446_v63 = vrot.slane %v1438_v61, %v4398_v22 }
 0x94d   :  { %v1388_v10 = vsel %vm4555_vm12, %v1387_v4, %v1382_v8 }
 0x94e   :  { %v1398_v11 = vpop.xlane.xlu1 %1397  ;;  %v1394_v14 = vsel %vm4559_vm6, %v1393_v9, %v1388_v10 }
 0x94f   :  { %v1399_v12 = vmul.f32 0.09090909, %v1398_v11 }
 0x951   :  { %v1400_v18 = vsel %vm4575_vm0, %v1399_v12, %v1394_v14 }
 0x952   :  { %v1401_v47 = vadd.f32 1e-05, %v1400_v18  ;;  %v1415_v34 = vpop.permute.xlu1 %1414 }
 0x954   :  { %4157 = vrsqrt.f32 %v1401_v47  ;;  %v1559_v47 = vld [vmem:[#allocation5 + $0x36c] sm:$0x1] }
 0x955   :  { %v1560_v19 = vunpack.c.l.bf16 %v1559_v47 }
 0x956   :  { %v1425_v39 = vpop.permute.xlu1 %1424 }
 0x957   :  { %v1564_v20 = vrot.slane %v1560_v19, %v4398_v22 }
 0x95e   :  { %v4158_v1 = vpop.eup %4157 }
 0x95f   :  { %1404 = vrot.lane.b32.xlu0 %v4158_v1, %s4299_s1 }
 0x9d1   :  { %v1405_v37 = vpop.permute.xlu0 %1404 }
 0x9d2   :  { %v1407_v38 = vmul.f32 %v1405_v37, %v4595_v32  ;;  %v4066_v32 = vld [vmem:[#allocation5 + $0x498] ss:$36 sps:$4 sm:$0xff]  }
 0x9d3   :  { %1640 = vmatpush1.bf16.msra.mxu1 %v4066_v32 }
 0x9d4   :  { %v1417_v41 = vmul.f32 %v1415_v34, %v1407_v38  ;;  %1641 = vmatprep.subr.bf16.mxu1 %v4294_v0 }
 0x9d6   :  { %v1427_v42 = vadd.f32 %v1425_v39, %v1417_v41 }
 0x9d7   :  { %1642 = vmatpush1.bf16.msra.mxu1 %v4067_v48 }
 0x9d8   :  { %v1435_v45 = vpack.c.bf16 %v1427_v42, %v1427_v42  ;;  %1643 = vmatprep.subr.bf16.mxu1 %v4294_v0 }
 0x9da   :  { %1448 = vrot.lane.b32.xlu0 %v1435_v45, %s4295_s6 }
 0x9db   :  { %1644 = vmatpush1.bf16.msra.mxu1 %v4068_v49 }
 0x9dc   :  { %1645 = vmatprep.subr.bf16.mxu1 %v4294_v0 }
 0x9df   :  { %1646 = vmatpush1.bf16.msra.mxu1 %v4069_v54 }
 0x9e0   :  { %1647 = vmatprep.subr.bf16.mxu1 %v4294_v0 }
 0x9e3   :  { %1648 = vmatpush1.bf16.msra.mxu1 %v4070_v55 }
 0xa4c   :  { %v1449_v50 = vpop.permute.xlu0 %1448 }
 0xa4d   :  { %3581 = vmatmul.mubr.msk.bf16.vlgmr.msra.gmra.mrb[32].mxu0 %vm399_vm2, %v1449_v50 }
 0xa4e   :  { %2089 = vmatprep.mubr.bf16.mxu0 %v4294_v0 }
 0xb20   :  { %v1528_v13 = vpop.f32.mrb[32].mxu0 }
 0xb21   :  { %v1529_v2 = vadd.f32 %v1528_v13, %v1442_v62  ;;  %v1530_v4 = vpop.f32.mrb[33].mxu0 }
 0xb22   :  { %v1531_v8 = vadd.f32 %v1530_v4, %v1446_v63  ;;  %v1532_v9 = vpop.f32.mrb[34].mxu0 }
 0xb23   :  { %v1535_v10 = vmax.f32 %v1529_v2, 0.0  ;;  %v1533_v11 = vpop.f32.mrb[35].mxu0 }
 0xb24   :  { %v1536_v12 = vmax.f32 %v1531_v8, 0.0 }
 0xb25   :  { %v1557_v18 = vpack.c.bf16 %v1535_v10, %v1535_v10 }
 0xb26   :  { %v1558_v14 = vpack.c.bf16 %v1536_v12, %v1536_v12 }
 0xb28   :  { %3592 = vmatprep.mubr.msk.bf16.mxu1 %vm5055_vm7, %v1558_v14  ;;  %vm5077_vm7 = vmmov %vm5074_vm1 }
 0xb29   :  { %1662 = vmatmul.mubr.bf16.vlgmr.msra.gmra.mrb[16].mxu1 %v1557_v18 }
 0xb2a   :  { %2171 = vmatprep.mubr.bf16.mxu1 %v4294_v0 }
 0xbfc   :  { %v1663_v51 = vpop.f32.mrb[16].mxu1 }
 0xbfd   :  { %v1664_v23 = vadd.f32 %v1663_v51, %v1564_v20  ;;  %v1665_v24 = vpop.f32.mrb[17].mxu1 }
 0xbfe   :  { %v1666_v1 = vpop.f32.mrb[18].mxu1 }
 0xbff   :  { %v1667_v25 = vpop.f32.mrb[19].mxu1  ;;  %1670 = vrot.lane.b32.xlu1 %v1664_v23, %s4299_s1  ;;  %v1674_v23 = vld [vmem:[#allocation5 + $0x3b4] sm:$0x1] }
 0xc00   :  { %v1757_v24 = vunpack.c.l.bf16 %v1674_v23  ;;  %v1675_v25 = vld [vmem:[#allocation5 + $0x3f4] sm:$0x1] }
 0xc01   :  { %v4095_v23 = vld [vmem:[#allocation5 + $0x174] ss:$36 sps:$4 sm:$0xff]  }
 0xc02   :  { %v1761_v1 = vrot.slane %v1757_v24, %v4398_v22 }
 0xc71   :  { %v1671_v26 = vpop.permute.xlu1 %1670 }
 0xc72   :  { %v1673_v27 = vadd.f32 %v1671_v26, %v1427_v42  ;;  %v1767_v26 = vunpack.c.l.bf16 %v1675_v25 }
 0xc74   :  { %1677 = vrot.lane.b32.xlu0 %v1673_v27, %s4295_s6 }
 0xce6   :  { %v1678_v29 = vpop.permute.xlu0 %1677 }
 0xce7   :  { %v1686_v30 = vsel %vm4550_vm4, %v1678_v29, 0.0  ;;  %v1680_v33 = vsel %vm57_vm13, %v1678_v29, 0.0  ;;  %v1692_v36 = vsel %vm4555_vm12, %v1678_v29, 0.0  ;;  %v1698_v37 = vsel %vm4559_vm6, %v1678_v29, 0.0 }
 0xce8   :  { %v1687_v34 = vsel %vm399_vm2, %v1686_v30, 0.0  ;;  %v1681_v35 = vsel %vm399_vm2, %v1680_v33, 0.0  ;;  %v1693_v38 = vsel %vm399_vm2, %v1692_v36, 0.0  ;;  %v1699_v39 = vsel %vm399_vm2, %v1698_v37, 0.0 }
 0xce9   :  { %1688 = vadd.xlane.f32.xlu0 %v1687_v34  ;;  %1682 = vadd.xlane.f32.xlu1 %v1681_v35  ;;  %v1704_v40 = vsel %vm4575_vm0, %v1678_v29, 0.0 }
 0xcea   :  { %v1705_v41 = vsel %vm399_vm2, %v1704_v40, 0.0 }
 0xced   :  { %1694 = vadd.xlane.f32.xlu0 %v1693_v38  ;;  %1700 = vadd.xlane.f32.xlu1 %v1699_v39 }
 0xcf1   :  { %1706 = vadd.xlane.f32.xlu0 %v1705_v41 }
 0xd76   :  { %v1689_v42 = vpop.xlane.xlu0 %1688  ;;  %v1683_v43 = vpop.xlane.xlu1 %1682 }
 0xd77   :  { %v1684_v45 = vmul.f32 0.09090909, %v1683_v43  ;;  %v1690_v46 = vmul.f32 0.09090909, %v1689_v42 }
 0xd79   :  { %v1685_v32 = vsel %vm57_vm13, %v1684_v45, 0.0 }
 0xd7a   :  { %v1695_v48 = vpop.xlane.xlu0 %1694  ;;  %v1701_v49 = vpop.xlane.xlu1 %1700  ;;  %v1691_v54 = vsel %vm4550_vm4, %v1690_v46, %v1685_v32 }
 0xd7b   :  { %v1696_v50 = vmul.f32 0.09090909, %v1695_v48  ;;  %v1702_v55 = vmul.f32 0.09090909, %v1701_v49  ;;  %v4071_v48 = vld [vmem:[#allocation5 + $0x168] ss:$36 sps:$4 sm:$0xff]  }
 0xd7c   :  { %v4073_v49 = vld [vmem:[#allocation5 + $0x16c] ss:$36 sps:$4 sm:$0xff]  }
 0xd7d   :  { %v1697_v58 = vsel %vm4555_vm12, %v1696_v50, %v1691_v54  ;;  %v4074_v50 = vld [vmem:[#allocation5 + $0x178] ss:$36 sps:$4 sm:$0xff]   ;;  %2057 = vmatprep.subr.bf16.mxu0 %v4073_v49  ;;  %v4110_v49 = vld [vmem:[#allocation5 + $0x184] ss:$36 sps:$4 sm:$0xff]  }
 0xd7e   :  { %v1707_v60 = vpop.xlane.xlu0 %1706  ;;  %v1703_v62 = vsel %vm4559_vm6, %v1702_v55, %v1697_v58  ;;  %v4076_v54 = vld [vmem:[#allocation5 + $0x17c] ss:$36 sps:$4 sm:$0xff]   ;;  %v4079_v55 = vld [vmem:[#allocation5 + $0x1b4] ss:$36 sps:$4 sm:$0xff]   ;;  %v4082_v58 = vld [vmem:[#allocation5 + $0x1c4] ss:$36 sps:$4 sm:$0xff]   ;;  %2058 = vmatpush1.bf16.msra.mxu0 %v4071_v48 }
 0xd7f   :  { %v1708_v61 = vmul.f32 0.09090909, %v1707_v60  ;;  %2139 = vmatprep.subr.bf16.mxu1 %v4076_v54  ;;  %v4077_v60 = vld [vmem:[#allocation5 + $0x1b0] ss:$36 sps:$4 sm:$0xff]   ;;  %2059 = vmatprep.subr.bf16.mxu0 %v4079_v55  ;;  %v1810_v55 = vld [vmem:[#allocation5 + $0x258] sm:$0xff] }
 0xd80   :  { %2140 = vmatpush1.bf16.msra.mxu1 %v4074_v50  ;;  %v4108_v50 = vld [vmem:[#allocation5 + $0x180] ss:$36 sps:$4 sm:$0xff]   ;;  %v4113_v54 = vld [vmem:[#allocation5 + $0x1cc] ss:$36 sps:$4 sm:$0xff]  }
 0xd81   :  { %v1709_v63 = vsel %vm4575_vm0, %v1708_v61, %v1703_v62  ;;  %v4080_v61 = vld [vmem:[#allocation5 + $0x1c0] ss:$36 sps:$4 sm:$0xff]   ;;  %2141 = vmatprep.subr.bf16.mxu1 %v4082_v58  ;;  %v4111_v58 = vld [vmem:[#allocation5 + $0x1c8] ss:$36 sps:$4 sm:$0xff]  }
 0xd82   :  { %1711 = vrot.lane.b32.xlu1 %v1709_v63, %s4299_s1  ;;  %v4085_v63 = vld [vmem:[#allocation5 + $0x1fc] ss:$36 sps:$4 sm:$0xff]   ;;  %2060 = vmatpush1.bf16.msra.mxu0 %v4077_v60  ;;  %v4116_v60 = vld [vmem:[#allocation5 + $0x214] ss:$36 sps:$4 sm:$0xff]  }
 0xd83   :  { %2061 = vmatprep.subr.bf16.mxu0 %v4085_v63  ;;  %v4114_v63 = vld [vmem:[#allocation5 + $0x210] ss:$36 sps:$4 sm:$0xff]  }
 0xd84   :  { %2142 = vmatpush1.bf16.msra.mxu1 %v4080_v61  ;;  %v3627_v61 = vcombine.high %v1810_v55, %v1810_v55 }
 0xdf4   :  { %v1712_v13 = vpop.permute.xlu1 %1711 }
 0xdf5   :  { %v4678_v2 = vsub.f32 %v1673_v27, %v1712_v13  ;;  %v1771_v27 = vrot.slane %v1767_v26, %v4398_v22  ;;  %v1807_v13 = vld [vmem:[#allocation5 + $0x240] sm:$0xff] }
 0xdf7   :  { %v1715_v4 = vmul.f32 %v4678_v2, %v4678_v2 }
 0xdf9   :  { %1717 = vrot.lane.b32.xlu0 %v1715_v4, %s4295_s6  ;;  %v1809_v4 = vld [vmem:[#allocation5 + $0x250] sm:$0xff] }
 0xe6b   :  { %v1718_v8 = vpop.permute.xlu0 %1717 }
 0xe6c   :  { %v1726_v9 = vsel %vm4550_vm4, %v1718_v8, 0.0  ;;  %v1720_v10 = vsel %vm57_vm13, %v1718_v8, 0.0  ;;  %v1738_v14 = vsel %vm4559_vm6, %v1718_v8, 0.0  ;;  %v1732_v18 = vsel %vm4555_vm12, %v1718_v8, 0.0 }
 0xe6d   :  { %v1727_v11 = vsel %vm399_vm2, %v1726_v9, 0.0  ;;  %v1721_v12 = vsel %vm399_vm2, %v1720_v10, 0.0  ;;  %v1739_v47 = vsel %vm399_vm2, %v1738_v14, 0.0  ;;  %v1733_v19 = vsel %vm399_vm2, %v1732_v18, 0.0  ;;  %v4086_v14 = vld [vmem:[#allocation5 + $0x208] ss:$36 sps:$4 sm:$0xff]  }
 0xe6e   :  { %1728 = vadd.xlane.f32.xlu0 %v1727_v11  ;;  %1722 = vadd.xlane.f32.xlu1 %v1721_v12  ;;  %v1744_v20 = vsel %vm4575_vm0, %v1718_v8, 0.0  ;;  %v4088_v8 = vld [vmem:[#allocation5 + $0x20c] ss:$36 sps:$4 sm:$0xff]   ;;  %v3621_v9 = vcombine.high %v1807_v13, %v1807_v13  ;;  %v3625_v10 = vcombine.high %v1809_v4, %v1809_v4  ;;  %v4083_v11 = vld [vmem:[#allocation5 + $0x1f8] ss:$36 sps:$4 sm:$0xff]   ;;  %v3620_v12 = vcombine.low %v1807_v13, %v1807_v13 }
 0xe6f   :  { %v1745_v51 = vsel %vm399_vm2, %v1744_v20, 0.0  ;;  %2143 = vmatprep.subr.bf16.mxu1 %v4088_v8  ;;  %2062 = vmatpush1.bf16.msra.mxu0 %v4083_v11  ;;  %v3626_v13 = vcombine.low %v1810_v55, %v1810_v55  ;;  %v4181_v8 = vld [vmem:[#allocation5 + $0x2d8] ss:$36 sps:$4 sm:$0xff]   ;;  %v4183_v11 = vld [vmem:[#allocation5 + $0x2d0] ss:$36 sps:$4 sm:$0xff]  }
 0xe70   :  { %v2034_v18 = vand.u32 %v3621_v9, %v4355_v17  ;;  %v2031_v20 = vand.u32 %v3620_v12, %v4355_v17  ;;  %2144 = vmatpush1.bf16.msra.mxu1 %v4086_v14  ;;  %v4184_v12 = vld [vmem:[#allocation5 + $0x558] ss:$36 sps:$4 sm:$0xff]  }
 0xe71   :  { %v2049_v9 = vand.u32 %v3626_v13, %v4355_v17  ;;  %v4185_v14 = vld [vmem:[#allocation5 + $0x318] ss:$36 sps:$4 sm:$0xff]  }
 0xe72   :  { %1740 = vadd.xlane.f32.xlu0 %v1739_v47  ;;  %1734 = vadd.xlane.f32.xlu1 %v1733_v19  ;;  %v3624_v47 = vcombine.low %v1809_v4, %v1809_v4  ;;  %v2046_v19 = vand.u32 %v3625_v10, %v4355_v17  ;;  %v2052_v4 = vand.u32 %v3627_v61, %v4355_v17  ;;  %v4182_v10 = vld [vmem:[#allocation5 + $0x510] ss:$36 sps:$4 sm:$0xff]  }
 0xe73   :  { %2063 = vmatprep.subr.bf16.mxu0 %v2034_v18  ;;  %v4186_v18 = vld [vmem:[#allocation5 + $0x5a0] ss:$36 sps:$4 sm:$0xff]  }
 0xe74   :  { %2145 = vmatprep.subr.bf16.mxu1 %v2046_v19  ;;  %2064 = vmatpush1.bf16.msra.mxu0 %v2031_v20  ;;  %v4189_v19 = vld [vmem:[#allocation5 + $0x3a8] ss:$36 sps:$4 sm:$0xff]   ;;  %v4190_v20 = vld [vmem:[#allocation5 + $0x630] ss:$36 sps:$4 sm:$0xff]  }
 0xe75   :  { %2098 = vmatprep.subr.bf16.mxu0 %v4095_v23  ;;  %v4192_v23 = vld [vmem:[#allocation5 + $0x678] ss:$36 sps:$4 sm:$0xff]  }
 0xe76   :  { %1746 = vadd.xlane.f32.xlu1 %v1745_v51  ;;  %v2043_v51 = vand.u32 %v3624_v47, %v4355_v17  ;;  %v4188_v47 = vld [vmem:[#allocation5 + $0x5e8] ss:$36 sps:$4 sm:$0xff]  }
 0xe78   :  { %2146 = vmatpush1.bf16.msra.mxu1 %v2043_v51  ;;  %v4191_v51 = vld [vmem:[#allocation5 + $0x3f0] ss:$36 sps:$4 sm:$0xff]  }
 0xe79   :  { %3863 = vmatprep.subr.bf16.mxu1 %v4297_v53 }
 0xe87   :  { %1763 = vrot.lane.b32.xlu1 %v1761_v1, %s4299_s1 }
 0xe8b   :  { %1773 = vrot.lane.b32.xlu1 %v1771_v27, %s4299_s1 }
 0xefb   :  { %v1729_v29 = vpop.xlane.xlu0 %1728  ;;  %v1723_v30 = vpop.xlane.xlu1 %1722 }
 0xefc   :  { %v1724_v33 = vmul.f32 0.09090909, %v1723_v30  ;;  %v1730_v34 = vmul.f32 0.09090909, %v1729_v29 }
 0xefe   :  { %v1725_v35 = vsel %vm57_vm13, %v1724_v33, 0.0  ;;  %v4093_v33 = vld [vmem:[#allocation5 + $0x170] ss:$36 sps:$4 sm:$0xff]  }
 0xeff   :  { %v1741_v36 = vpop.xlane.xlu0 %1740  ;;  %v1735_v37 = vpop.xlane.xlu1 %1734  ;;  %v1731_v39 = vsel %vm4550_vm4, %v1730_v34, %v1725_v35  ;;  %v4096_v34 = vld [vmem:[#allocation5 + $0x188] ss:$36 sps:$4 sm:$0xff]   ;;  %v4099_v35 = vld [vmem:[#allocation5 + $0x1bc] ss:$36 sps:$4 sm:$0xff]  }
 0xf00   :  { %v1736_v38 = vmul.f32 0.09090909, %v1735_v37  ;;  %v1742_v40 = vmul.f32 0.09090909, %v1741_v36  ;;  %v1808_v37 = vld [vmem:[#allocation5 + $0x248] sm:$0xff] }
 0xf02   :  { %v1737_v41 = vsel %vm4555_vm12, %v1736_v38, %v1731_v39  ;;  %v4100_v38 = vld [vmem:[#allocation5 + $0x1d0] ss:$36 sps:$4 sm:$0xff]   ;;  %v4103_v39 = vld [vmem:[#allocation5 + $0x204] ss:$36 sps:$4 sm:$0xff]  }
 0xf03   :  { %v1747_v42 = vpop.xlane.xlu1 %1746  ;;  %v1743_v45 = vsel %vm4559_vm6, %v1742_v40, %v1737_v41  ;;  %v3623_v40 = vcombine.high %v1808_v37, %v1808_v37  ;;  %v4101_v41 = vld [vmem:[#allocation5 + $0x200] ss:$36 sps:$4 sm:$0xff]  }
 0xf04   :  { %v1748_v43 = vmul.f32 0.09090909, %v1747_v42  ;;  %v4104_v42 = vld [vmem:[#allocation5 + $0x218] ss:$36 sps:$4 sm:$0xff]  }
 0xf06   :  { %v1749_v46 = vsel %vm4575_vm0, %v1748_v43, %v1743_v45  ;;  %v3622_v43 = vcombine.low %v1808_v37, %v1808_v37  ;;  %v4107_v45 = vld [vmem:[#allocation5 + $0x260] ss:$0 sps:$4 sm:$0xff]  }
 0xf07   :  { %v1750_v32 = vadd.f32 1e-05, %v1749_v46  ;;  %v1764_v24 = vpop.permute.xlu1 %1763  ;;  %v2040_v46 = vand.u32 %v3623_v40, %v4355_v17  ;;  %v2055_v48 = vand.u32 %v4107_v45, %v4355_v17 }
 0xf09   :  { %4159 = vrsqrt.f32 %v1750_v32  ;;  %v2037_v32 = vand.u32 %v3622_v43, %v4355_v17 }
 0xf0b   :  { %v1774_v26 = vpop.permute.xlu1 %1773 }
 0xf13   :  { %v4160_v62 = vpop.eup %4159 }
 0xf14   :  { %1753 = vrot.lane.b32.xlu0 %v4160_v62, %s4299_s1  ;;  %v4180_v62 = vld [vmem:[#allocation5 + $0x750] ss:$36 sps:$4 sm:$0xff]  }
 0xf86   :  { %v1754_v1 = vpop.permute.xlu0 %1753 }
 0xf87   :  { %v1756_v25 = vmul.f32 %v1754_v1, %v4678_v2  ;;  %v4097_v2 = vld [vmem:[#allocation5 + $0x1b8] ss:$36 sps:$4 sm:$0xff]   ;;  %v4194_v1 = vld [vmem:[#allocation5 + $0x6c0] ss:$36 sps:$4 sm:$0xff]  }
 0xf89   :  { %v1766_v27 = vmul.f32 %v1764_v24, %v1756_v25  ;;  %v4193_v24 = vld [vmem:[#allocation5 + $0x438] ss:$36 sps:$4 sm:$0xff]   ;;  %v4195_v25 = vld [vmem:[#allocation5 + $0x480] ss:$36 sps:$4 sm:$0xff]  }
 0xf8b   :  { %v4719_v29 = vadd.f32 %v1774_v26, %v1766_v27  ;;  %v4196_v26 = vld [vmem:[#allocation5 + $0x708] ss:$36 sps:$4 sm:$0xff]  }
 0xf8c   :  { %v4197_v27 = vld [vmem:[#allocation5 + $0x4c8] ss:$36 sps:$4 sm:$0xff]  }
 0xf8d   :  { %v1812_v30 = vpack.c.bf16 %v4719_v29, %v4719_v29 }
 0xf8f   :  { %1864 = vrot.lane.b32.xlu0 %v1812_v30, %s4295_s6  ;;  %v4198_v30 = vld [vmem:[#allocation5 + $0x520] ss:$36 sps:$4 sm:$0xff]  }
0x1001   :  { %v4724_v36 = vpop.permute.xlu0 %1864 }
0x1002   :  { %3629 = vmatmul.mubr.msk.bf16.vlgmr.msra.gmra.mrb[36].mxu0 %vm399_vm2, %v4724_v36  ;;  %3631 = vmatmul.mubr.msk.bf16.vlgmr.msra.gmra.mrb[20].mxu1 %vm399_vm2, %v4724_v36 }
0x1003   :  { %2099 = vmatpush1.bf16.msra.mxu0 %v4093_v33  ;;  %3864 = vmatpush3.bf16.msra.mxu1 %v4096_v34  ;;  %v1815_v33 = vld [vmem:[#allocation5 + $0x298] sm:$0x11]  ;;  %v1813_v34 = vld [vmem:[#allocation5 + $0x288] sm:$0x11] }
0x1004   :  { %2100 = vmatprep.subr.bf16.mxu0 %v4099_v35  ;;  %3865 = vmatprep.subr.bf16.mxu1 %v4297_v53  ;;  %v1822_v35 = vunpack.c.l.bf16 %v1815_v33  ;;  %v1823_v55 = vunpack.c.h.bf16 %v1815_v33  ;;  %v4202_v33 = vld [vmem:[#allocation5 + $0x328] ss:$36 sps:$4 sm:$0xff]  }
0x1005   :  { %2130 = vmatprep.mubr.bf16.mxu0 %v4294_v0  ;;  %3871 = vmatprep.mubr.msk.bf16.mxu1 %vm4298_vm3, %v4297_v53 }
0x1006   :  { %v1846_v37 = vrot.slane %v1822_v35, %v4398_v22 }
0x1007   :  { %2101 = vmatpush1.bf16.msra.mxu0 %v4097_v2  ;;  %3866 = vmatpush3.bf16.msra.mxu1 %v4100_v38 }
0x1008   :  { %2102 = vmatprep.subr.bf16.mxu0 %v4103_v39  ;;  %3867 = vmatprep.subr.bf16.mxu1 %v4297_v53 }
0x100b   :  { %2103 = vmatpush1.bf16.msra.mxu0 %v4101_v41  ;;  %3868 = vmatpush3.bf16.msra.mxu1 %v4104_v42 }
0x100c   :  { %2104 = vmatprep.subr.bf16.mxu0 %v2040_v46  ;;  %3869 = vmatprep.subr.bf16.mxu1 %v4297_v53 }
0x100f   :  { %2105 = vmatpush1.bf16.msra.mxu0 %v2037_v32  ;;  %3870 = vmatpush3.bf16.msra.mxu1 %v2055_v48 }
0x1010   :  { %2180 = vmatprep.subr.bf16.mxu0 %v4110_v49  ;;  %3875 = vmatprep.subr.bf16.mxu1 %v4297_v53 }
0x1012   :  { %3630 = vmatmul.mubr.msk.bf16.vlgmr.msra.gmra.mrb[40].mxu0 %vm399_vm2, %v4724_v36  ;;  %3872 = vmatmul.mubr.msk.bf16.vlgmr.msra.gmra.mrb[24].mxu1 %vm399_vm2, %v4724_v36 }
0x1013   :  { %2181 = vmatpush1.bf16.msra.mxu0 %v4108_v50  ;;  %2212 = vmatprep.mubr.bf16.mxu0 %v4294_v0 }
0x1014   :  { %2182 = vmatprep.subr.bf16.mxu0 %v4113_v54  ;;  %3876 = vmatpush3.bf16.msra.mxu1 %v4180_v62  ;;  %v1814_v54 = vld [vmem:[#allocation5 + $0x290] sm:$0x11]  ;;  %v1850_v62 = vrot.slane %v1823_v55, %v4398_v22 }
0x1015   :  { %3877 = vmatprep.subr.bf16.mxu1 %v4297_v53  ;;  %3879 = vmatprep.mubr.msk.bf16.mxu1 %vm4298_vm3, %v4297_v53  ;;  %v1821_v61 = vunpack.c.h.bf16 %v1814_v54 }
0x1017   :  { %2183 = vmatpush1.bf16.msra.mxu0 %v4111_v58  ;;  %v1820_v58 = vunpack.c.l.bf16 %v1814_v54 }
0x1018   :  { %2184 = vmatprep.subr.bf16.mxu0 %v4116_v60  ;;  %3878 = vmatpush3.bf16.msra.mxu1 %v4395_v15  ;;  %v4187_v15 = vld [vmem:[#allocation5 + $0x360] ss:$36 sps:$4 sm:$0xff]   ;;  %v1818_v60 = vunpack.c.l.bf16 %v1813_v34 }
0x1019   :  { %2409 = vmatprep.subr.bf16.mxu1 %v4181_v8 }
0x101a   :  { %v1830_v13 = vrot.slane %v1818_v60, %v4398_v22 }
0x101b   :  { %2185 = vmatpush1.bf16.msra.mxu0 %v4114_v63  ;;  %v1838_v63 = vrot.slane %v1820_v58, %v4398_v22 }
0x101c   :  { %2186 = vmatprep.subr.bf16.mxu0 %v2052_v4  ;;  %v1842_v4 = vrot.slane %v1821_v61, %v4398_v22 }
0x101f   :  { %2187 = vmatpush1.bf16.msra.mxu0 %v2049_v9 }
0x1020   :  { %3745 = vmatprep.subr.bf16.mxu0 %v4182_v10 }
0x1022   :  { %3632 = vmatmul.mubr.msk.bf16.vlgmr.msra.gmra.mrb[44].mxu0 %vm399_vm2, %v4724_v36  ;;  %v1819_v36 = vunpack.c.h.bf16 %v1813_v34  ;;  %v4203_v34 = vld [vmem:[#allocation5 + $0x5b0] ss:$36 sps:$4 sm:$0xff]  }
0x1023   :  { %3746 = vmatpush3.bf16.msra.mxu0 %v4183_v11 }
0x1024   :  { %3747 = vmatprep.subr.bf16.mxu0 %v4184_v12  ;;  %v1834_v2 = vrot.slane %v1819_v36, %v4398_v22 }
0x1027   :  { %3748 = vmatpush3.bf16.msra.mxu0 %v4185_v14 }
0x1028   :  { %3749 = vmatprep.subr.bf16.mxu0 %v4186_v18 }
0x102b   :  { %3750 = vmatpush3.bf16.msra.mxu0 %v4187_v15 }
0x102c   :  { %3751 = vmatprep.subr.bf16.mxu0 %v4188_v47 }
0x102f   :  { %3752 = vmatpush3.bf16.msra.mxu0 %v4189_v19 }
0x1030   :  { %3753 = vmatprep.subr.bf16.mxu0 %v4190_v20 }
0x1033   :  { %3754 = vmatpush3.bf16.msra.mxu0 %v4191_v51 }
0x1034   :  { %3755 = vmatprep.subr.bf16.mxu0 %v4192_v23 }
0x1037   :  { %3756 = vmatpush3.bf16.msra.mxu0 %v4193_v24 }
0x1038   :  { %3757 = vmatprep.subr.bf16.mxu0 %v4194_v1 }
0x103b   :  { %3758 = vmatpush3.bf16.msra.mxu0 %v4195_v25 }
0x103c   :  { %3759 = vmatprep.subr.bf16.mxu0 %v4196_v26  ;;  %v4199_v26 = vld [vmem:[#allocation5 + $0x2d4] ss:$36 sps:$4 sm:$0xff]  }
0x103f   :  { %3760 = vmatpush3.bf16.msra.mxu0 %v4197_v27  ;;  %v4200_v27 = vld [vmem:[#allocation5 + $0x2e0] ss:$36 sps:$4 sm:$0xff]  }
0x1040   :  { %3773 = vmatprep.subr.bf16.mxu0 %v4198_v30  ;;  %v4201_v30 = vld [vmem:[#allocation5 + $0x568] ss:$36 sps:$4 sm:$0xff]  }
0x10d5   :  { %v2091_v38 = vpop.f32.mrb[36].mxu0  ;;  %v2173_v39 = vpop.f32.mrb[20].mxu1 }
0x10d6   :  { %v2174_v40 = vadd.f32 %v2173_v39, %v1846_v37  ;;  %v2093_v41 = vpop.f32.mrb[37].mxu0  ;;  %v2175_v42 = vpop.f32.mrb[21].mxu1  ;;  %v2092_v18 = vadd.f32 %v2091_v38, %v1830_v13  ;;  %v4205_v38 = vld [vmem:[#allocation5 + $0x5f8] ss:$36 sps:$4 sm:$0xff]  }
0x10d7   :  { %v2094_v43 = vadd.f32 %v2093_v41, %v1834_v2  ;;  %v2095_v45 = vpop.f32.mrb[38].mxu0  ;;  %v2177_v46 = vpop.f32.mrb[22].mxu1  ;;  %v2176_v10 = vadd.f32 %v2175_v42, %v1850_v62  ;;  %v4206_v39 = vld [vmem:[#allocation5 + $0x3b8] ss:$36 sps:$4 sm:$0xff]   ;;  %v4209_v41 = vld [vmem:[#allocation5 + $0x688] ss:$36 sps:$4 sm:$0xff]  }
0x10d8   :  { %v2096_v32 = vpop.f32.mrb[39].mxu0  ;;  %v2178_v48 = vpop.f32.mrb[23].mxu1  ;;  %v4210_v42 = vld [vmem:[#allocation5 + $0x448] ss:$36 sps:$4 sm:$0xff]   ;;  %v4212_v45 = vld [vmem:[#allocation5 + $0x490] ss:$36 sps:$4 sm:$0xff]  }
0x10d9   :  { %v2262_v49 = vmul.f32 %v2174_v40, %v2094_v43  ;;  %v4207_v40 = vld [vmem:[#allocation5 + $0x640] ss:$36 sps:$4 sm:$0xff]   ;;  %v4211_v43 = vld [vmem:[#allocation5 + $0x6d0] ss:$36 sps:$4 sm:$0xff]   ;;  %v4213_v46 = vld [vmem:[#allocation5 + $0x718] ss:$36 sps:$4 sm:$0xff]  }
0x10da   :  { %v4214_v32 = vld [vmem:[#allocation5 + $0x4d8] ss:$36 sps:$4 sm:$0xff]  }
0x10db   :  { %v2265_v50 = vpack.c.bf16 %v2262_v49, %v2262_v49 }
0x10dd   :  { %2302 = vmatprep.mubr.bf16.mxu0 %v2265_v50 }
0x10e5   :  { %v2132_v8 = vpop.f32.mrb[40].mxu0  ;;  %v4759_v9 = vpop.f32.mrb[24].mxu1 }
0x10e6   :  { %v2133_v11 = vadd.f32 %v2132_v8, %v1838_v63  ;;  %v2134_v12 = vpop.f32.mrb[41].mxu0  ;;  %v3873_v14 = vpop.f32.mrb[25].mxu1 }
0x10e7   :  { %v2135_v15 = vadd.f32 %v2134_v12, %v1842_v4  ;;  %v2136_v47 = vpop.f32.mrb[42].mxu0  ;;  %v2258_v19 = vpop.f32.mrb[26].mxu1 }
0x10e8   :  { %v2263_v20 = vmul.f32 %v2176_v10, %v2133_v11  ;;  %v2137_v51 = vpop.f32.mrb[43].mxu0  ;;  %v3874_v23 = vpop.f32.mrb[27].mxu1 }
0x10e9   :  { %v2261_v24 = vmul.f32 %v2135_v15, %v2092_v18 }
0x10ea   :  { %v2266_v1 = vpack.c.bf16 %v2263_v20, %v2263_v20 }
0x10eb   :  { %v2264_v25 = vpack.c.bf16 %v2261_v24, %v2261_v24 }
0x10ec   :  { %3880 = vmatmul.mubr.msk.bf16.vlgmr.msra.gmra.mrb[28].mxu1 %vm5072_vm8, %v2266_v1  ;;  %vm5076_vm8 = vmmov %vm5074_vm1 }
0x10ed   :  { %2303 = vmatmul.mubr.bf16.vlgmr.msra.gmra.mrb[48].mxu0 %v2264_v25  ;;  %2410 = vmatpush1.bf16.msra.mxu1 %v4199_v26 }
0x10ee   :  { %2411 = vmatprep.subr.bf16.mxu1 %v4490_v6  ;;  %2441 = vmatprep.mubr.bf16.mxu1 %v4294_v0  ;;  %v4204_v6 = vld [vmem:[#allocation5 + $0x370] ss:$36 sps:$4 sm:$0xff]  }
0x10ef   :  { %3774 = vmatpush3.bf16.msra.mxu0 %v4200_v27 }
0x10f0   :  { %3775 = vmatprep.subr.bf16.mxu0 %v4201_v30 }
0x10f1   :  { %2412 = vmatpush1.bf16.msra.mxu1 %v4492_v7  ;;  %v4208_v7 = vld [vmem:[#allocation5 + $0x400] ss:$36 sps:$4 sm:$0xff]  }
0x10f2   :  { %3883 = vmatprep.subr.bf16.mxu1 %v4297_v53 }
0x10f3   :  { %3776 = vmatpush3.bf16.msra.mxu0 %v4202_v33 }
0x10f4   :  { %3777 = vmatprep.subr.bf16.mxu0 %v4203_v34 }
0x10f5   :  { %v4766_v35 = vpop.f32.mrb[44].mxu0 }
0x10f6   :  { %v4768_v36 = vpop.f32.mrb[45].mxu0 }
0x10f7   :  { %v2218_v37 = vpop.f32.mrb[46].mxu0  ;;  %3778 = vmatpush3.bf16.msra.mxu0 %v4204_v6 }
0x10f8   :  { %v2219_v2 = vpop.f32.mrb[47].mxu0  ;;  %3779 = vmatprep.subr.bf16.mxu0 %v4205_v38 }
0x10fb   :  { %3780 = vmatpush3.bf16.msra.mxu0 %v4206_v39 }
0x10fc   :  { %3781 = vmatprep.subr.bf16.mxu0 %v4207_v40 }
0x10ff   :  { %3782 = vmatpush3.bf16.msra.mxu0 %v4208_v7 }
0x1100   :  { %3783 = vmatprep.subr.bf16.mxu0 %v4209_v41 }
0x1103   :  { %3784 = vmatpush3.bf16.msra.mxu0 %v4210_v42 }
0x1104   :  { %3785 = vmatprep.subr.bf16.mxu0 %v4211_v43 }
0x1107   :  { %3786 = vmatpush3.bf16.msra.mxu0 %v4212_v45 }
0x1108   :  { %3787 = vmatprep.subr.bf16.mxu0 %v4213_v46 }
0x110b   :  { %3788 = vmatpush3.bf16.msra.mxu0 %v4214_v32 }
0x110c   :  { %2968 = vmatprep.subr.bf16.mxu0 %v4294_v0 }
0x11bf   :  { %v2344_v48 = vpop.f32.mrb[28].mxu1 }
0x11c0   :  { %v3761_v49 = vpop.f32.mrb[48].mxu0  ;;  %v3881_v50 = vpop.f32.mrb[29].mxu1 }
0x11c1   :  { %v3762_v54 = vpop.f32.mrb[49].mxu0  ;;  %v2347_v55 = vpop.f32.mrb[30].mxu1 }
0x11c2   :  { %v3763_v58 = vadd.f32 %v3762_v54, %v3761_v49  ;;  %v3764_v60 = vpop.f32.mrb[50].mxu0  ;;  %v3882_v61 = vpop.f32.mrb[31].mxu1 }
0x11c3   :  { %v3765_v62 = vpop.f32.mrb[51].mxu0 }
0x11c4   :  { %v2345_v63 = vadd.f32 %v3763_v58, %v2344_v48 }
0x11c6   :  { %v2355_v13 = vsel %vm4420_vm11, %v2345_v63, -1e+30  ;;  %v2350_v4 = vsel %vm5073_vm10, %v2345_v63, -1e+30  ;;  %v2360_v11 = vsel %vm4425_vm14, %v2345_v63, -1e+30  ;;  %vm5078_vm10 = vmmov %vm5074_vm1 }
0x11c7   :  { %v2356_v8 = vsel %vm5074_vm1, %v2355_v13, -inf  ;;  %v2351_v10 = vsel %vm5075_vm15, %v2350_v4, -inf  ;;  %v2365_v12 = vsel %vm4439_vm5, %v2345_v63, -1e+30  ;;  %v2361_v14 = vsel %vm5076_vm8, %v2360_v11, -inf  ;;  %vm5081_vm15 = vmmov %vm5076_vm8 }
0x11c8   :  { %2357 = vmax.xlane.f32.xlu0 %v2356_v8  ;;  %2352 = vmax.xlane.f32.xlu1 %v2351_v10  ;;  %v2366_v18 = vsel %vm5077_vm7, %v2365_v12, -inf  ;;  %v2370_v15 = vsel %vm4448_vm9, %v2345_v63, -1e+30  ;;  %vm5079_vm1 = vcmp.lt.s32.totalorder %v4414_v5, 5  ;;  %v1825_v4 = vunpack.c.h.bf16 %v1816_v28  ;;  %v1817_v8 = vld [vmem:[#allocation5 + $0x2a8] sm:$0x1] }
0x11c9   :  { %v2371_v47 = vsel %vm5078_vm10, %v2370_v15, -inf  ;;  %vm5080_vm7 = vmmov %vm5079_vm1  ;;  %v1826_v11 = vunpack.c.l.bf16 %v1817_v8 }
0x11ca   :  { %vm5082_vm10 = vmmov %vm5076_vm8  ;;  %v1858_v10 = vrot.slane %v1825_v4, %v4398_v22 }
0x11cc   :  { %2362 = vmax.xlane.f32.xlu0 %v2361_v14  ;;  %2367 = vmax.xlane.f32.xlu1 %v2366_v18  ;;  %v2217_v14 = vadd.f32 %v4768_v36, %v1858_v10 }
0x11d0   :  { %2372 = vmax.xlane.f32.xlu0 %v2371_v47 }
0x1255   :  { %v2358_v19 = vpop.xlane.xlu0 %2357  ;;  %v2353_v20 = vpop.xlane.xlu1 %2352 }
0x1256   :  { %v2354_v51 = vsel %vm5079_vm1, %v2353_v20, 0.0  ;;  %vm5083_vm1 = vmmov %vm5076_vm8  ;;  %v1862_v20 = vrot.slane %v1826_v11, %v4398_v22 }
0x1257   :  { %v2359_v23 = vsel %vm4420_vm11, %v2358_v19, %v2354_v51 }
0x1259   :  { %v2363_v24 = vpop.xlane.xlu0 %2362  ;;  %v2368_v25 = vpop.xlane.xlu1 %2367 }
0x125a   :  { %v2364_v1 = vsel %vm4425_vm14, %v2363_v24, %v2359_v23 }
0x125b   :  { %v2369_v26 = vsel %vm4439_vm5, %v2368_v25, %v2364_v1  ;;  %v2256_v1 = vadd.f32 %v4759_v9, %v1862_v20  ;;  %v4121_v9 = vld [vmem:[#allocation5 + $0x488] ss:$36 sps:$4 sm:$0xff]  }
0x125d   :  { %v2373_v27 = vpop.xlane.xlu0 %2372 }
0x125e   :  { %v2374_v30 = vsel %vm4448_vm9, %v2373_v27, %v2369_v26 }
0x125f   :  { %v2375_v33 = vsub.f32 %v2345_v63, %v2374_v30  ;;  %v4119_v30 = vld [vmem:[#allocation5 + $0x3f8] ss:$36 sps:$4 sm:$0xff]  }
0x1261   :  { %v2376_v34 = vmul.f32 1.442695, %v2375_v33 }
0x1263   :  { %4161 = vpow2.f32 %v2376_v34  ;;  %v4120_v34 = vld [vmem:[#allocation5 + $0x440] ss:$36 sps:$4 sm:$0xff]  }
0x126d   :  { %v4162_v37 = vpop.eup %4161 }
0x126e   :  { %v2383_v6 = vsel %vm4420_vm11, %v4162_v37, 0.0  ;;  %v2378_v2 = vsel %vm5080_vm7, %v4162_v37, 0.0  ;;  %v2393_v40 = vsel %vm4439_vm5, %v4162_v37, 0.0  ;;  %v2388_v7 = vsel %vm4425_vm14, %v4162_v37, 0.0  ;;  %vm5084_vm7 = vmmov %vm5083_vm1 }
0x126f   :  { %v2384_v38 = vsel %vm5081_vm15, %v2383_v6, 0.0  ;;  %v2379_v39 = vsel %vm5076_vm8, %v2378_v2, 0.0  ;;  %v2394_v41 = vsel %vm5082_vm10, %v2393_v40, 0.0  ;;  %v2389_v42 = vsel %vm5083_vm1, %v2388_v7, 0.0  ;;  %vm5086_vm8 = vmmov %vm5083_vm1 }
0x1270   :  { %2385 = vadd.xlane.f32.xlu0 %v2384_v38  ;;  %2380 = vadd.xlane.f32.xlu1 %v2379_v39  ;;  %v2398_v43 = vsel %vm4448_vm9, %v4162_v37, 0.0  ;;  %vm5085_vm15 = vcmp.lt.s32.totalorder %v4414_v5, 5 }
0x1271   :  { %v2399_v45 = vsel %vm5084_vm7, %v2398_v43, 0.0 }
0x1274   :  { %2395 = vadd.xlane.f32.xlu0 %v2394_v41  ;;  %2390 = vadd.xlane.f32.xlu1 %v2389_v42 }
0x1278   :  { %2400 = vadd.xlane.f32.xlu1 %v2399_v45 }
0x12fd   :  { %v2386_v46 = vpop.xlane.xlu0 %2385  ;;  %v2381_v32 = vpop.xlane.xlu1 %2380 }
0x12fe   :  { %v2382_v48 = vsel %vm5085_vm15, %v2381_v32, 0.0 }
0x12ff   :  { %v2387_v49 = vsel %vm4420_vm11, %v2386_v46, %v2382_v48  ;;  %vm5087_vm11 = vmmov %vm5083_vm1  ;;  %v2587_v48 = vld [vmem:[#allocation5 + $0x3fc] sm:$0x1] }
0x1301   :  { %v2391_v50 = vpop.xlane.xlu1 %2390  ;;  %v2396_v54 = vpop.xlane.xlu0 %2395 }
0x1302   :  { %v2392_v55 = vsel %vm4425_vm14, %v2391_v50, %v2387_v49  ;;  %vm5088_vm14 = vcmask 154624   ;;  %v2588_v49 = vunpack.c.l.bf16 %v2587_v48 }
0x1303   :  { %v2397_v58 = vsel %vm4439_vm5, %v2396_v54, %v2392_v55  ;;  %vm5089_vm5 = vcmask 261120  }
0x1304   :  { %v2592_v50 = vrot.slane %v2588_v49, %v4398_v22 }
0x1305   :  { %v2401_v60 = vpop.xlane.xlu1 %2400 }
0x1306   :  { %v2402_v61 = vsel %vm4448_vm9, %v2401_v60, %v2397_v58  ;;  %vm3372_vm9 = vcmask 146432  }
0x1307   :  { %4163 = vrcp.f32 %v2402_v61 }
0x1311   :  { %v4164_v62 = vpop.eup %4163 }
0x1312   :  { %v2404_v63 = vmul.f32 %v4164_v62, %v4162_v37  ;;  %v4122_v37 = vld [vmem:[#allocation5 + $0x4d0] ss:$0 sps:$4 sm:$0xff]  }
0x1313   :  { %v2618_v6 = vand.u32 %v4122_v37, %v4355_v17 }
0x1314   :  { %v2405_v13 = vpack.c.bf16 %v2404_v63, %v2404_v63 }
0x1316   :  { %3635 = vmatmul.mubr.msk.bf16.vlgmr.msra.gmra.mrb[32].mxu1 %vm5086_vm8, %v2405_v13 }
0x1317   :  { %3884 = vmatpush3.bf16.msra.mxu1 %v4215_v16  ;;  %3887 = vmatprep.mubr.msk.bf16.mxu1 %vm4298_vm3, %v4297_v53 }
0x1318   :  { %3885 = vmatprep.subr.bf16.mxu1 %v4297_v53 }
0x131b   :  { %3886 = vmatpush3.bf16.msra.mxu1 %v4509_v44  ;;  %v1854_v44 = vrot.slane %v1824_v31, %v4398_v22 }
0x131c   :  { %3891 = vmatprep.subr.bf16.mxu1 %v4297_v53 }
0x131d   :  { %v2215_v12 = vadd.f32 %v4766_v35, %v1854_v44 }
0x131e   :  { %3888 = vmatmul.mubr.msk.bf16.vlgmr.msra.gmra.mrb[36].mxu1 %vm5087_vm11, %v2405_v13 }
0x131f   :  { %3892 = vmatpush3.bf16.msra.mxu1 %v4216_v21  ;;  %3895 = vmatprep.mubr.msk.bf16.mxu1 %vm4298_vm3, %v4297_v53 }
0x1320   :  { %3893 = vmatprep.subr.bf16.mxu1 %v4297_v53 }
0x1323   :  { %3894 = vmatpush3.bf16.msra.mxu1 %v4522_v52 }
0x1324   :  { %3899 = vmatprep.subr.bf16.mxu1 %v4297_v53 }
0x13e9   :  { %v2443_v18 = vpop.f32.mrb[32].mxu1 }
0x13ea   :  { %v2490_v15 = vmul.f32 %v2443_v18, %v2215_v12  ;;  %v2445_v47 = vpop.f32.mrb[33].mxu1 }
0x13eb   :  { %v2491_v19 = vmul.f32 %v2445_v47, %v2217_v14  ;;  %v2447_v52 = vpop.f32.mrb[34].mxu1 }
0x13ec   :  { %v2448_v51 = vpop.f32.mrb[35].mxu1  ;;  %v2493_v24 = vpack.c.bf16 %v2490_v15, %v2490_v15 }
0x13ed   :  { %v2494_v23 = vpack.c.bf16 %v2491_v19, %v2491_v19 }
0x13ef   :  { %2531 = vmatprep.mubr.bf16.mxu0 %v2494_v23 }
0x13f0   :  { %2532 = vmatmul.mubr.bf16.vlgmr.msra.gmra.mrb[52].mxu0 %v2493_v24 }
0x13f1   :  { %v2484_v25 = vpop.f32.mrb[36].mxu1 }
0x13f2   :  { %v2492_v26 = vmul.f32 %v2484_v25, %v2256_v1  ;;  %v3889_v27 = vpop.f32.mrb[37].mxu1 }
0x13f3   :  { %v2487_v35 = vpop.f32.mrb[38].mxu1 }
0x13f4   :  { %v2495_v36 = vpack.c.bf16 %v2492_v26, %v2492_v26  ;;  %v3890_v33 = vpop.f32.mrb[39].mxu1 }
0x13f6   :  { %3896 = vmatmul.mubr.msk.bf16.vlgmr.msra.gmra.mrb[40].mxu1 %vm5088_vm14, %v2495_v36 }
0x13f7   :  { %3900 = vmatpush3.bf16.msra.mxu1 %v4119_v30  ;;  %3907 = vmatprep.mubr.msk.bf16.mxu1 %vm4298_vm3, %v4297_v53 }
0x13f8   :  { %3901 = vmatprep.subr.bf16.mxu1 %v4297_v53 }
0x13fb   :  { %3902 = vmatpush3.bf16.msra.mxu1 %v4120_v34 }
0x13fc   :  { %3903 = vmatprep.subr.bf16.mxu1 %v4297_v53 }
0x13ff   :  { %3904 = vmatpush3.bf16.msra.mxu1 %v4121_v9 }
0x1400   :  { %3905 = vmatprep.subr.bf16.mxu1 %v4297_v53 }
0x1403   :  { %3906 = vmatpush3.bf16.msra.mxu1 %v2618_v6 }
0x14c3   :  { %v3789_v2 = vpop.f32.mrb[52].mxu0 }
0x14c4   :  { %v3790_v38 = vpop.f32.mrb[53].mxu0 }
0x14c5   :  { %v3791_v39 = vadd.f32 %v3790_v38, %v3789_v2  ;;  %v3792_v40 = vpop.f32.mrb[54].mxu0 }
0x14c6   :  { %v3793_v7 = vpop.f32.mrb[55].mxu0 }
0x14c9   :  { %v2573_v41 = vpop.f32.mrb[40].mxu1 }
0x14ca   :  { %v2574_v42 = vadd.f32 %v3791_v39, %v2573_v41  ;;  %v3897_v43 = vpop.f32.mrb[41].mxu1 }
0x14cb   :  { %v2576_v45 = vpop.f32.mrb[42].mxu1 }
0x14cc   :  { %v2586_v46 = vpack.c.bf16 %v2574_v42, %v2574_v42  ;;  %v3898_v32 = vpop.f32.mrb[43].mxu1  ;;  %v2665_v42 = vld [vmem:[#allocation5 + $0x48c] sm:$0x1] }
0x14cd   :  { %v2748_v43 = vunpack.c.l.bf16 %v2665_v42 }
0x14ce   :  { %3908 = vmatmul.mubr.msk.bf16.vlgmr.msra.gmra.mrb[44].mxu1 %vm399_vm2, %v2586_v46  ;;  %v2666_v46 = vld [vmem:[#allocation5 + $0x4d4] sm:$0x1] }
0x14cf   :  { %2866 = vmatprep.mubr.bf16.mxu1 %v4294_v0  ;;  %v2752_v45 = vrot.slane %v2748_v43, %v4398_v22  ;;  %v2758_v32 = vunpack.c.l.bf16 %v2666_v46 }
0x14d1   :  { %v2762_v48 = vrot.slane %v2758_v32, %v4398_v22 }
0x15a1   :  { %v2654_v54 = vpop.f32.mrb[44].mxu1 }
0x15a2   :  { %v2655_v55 = vadd.f32 %v2654_v54, %v2592_v50  ;;  %v3909_v58 = vpop.f32.mrb[45].mxu1 }
0x15a3   :  { %v2657_v60 = vpop.f32.mrb[46].mxu1 }
0x15a4   :  { %2661 = vrot.lane.b32.xlu0 %v2655_v55, %s4299_s1  ;;  %v3910_v61 = vpop.f32.mrb[47].mxu1 }
0x1616   :  { %v2662_v62 = vpop.permute.xlu0 %2661 }
0x1617   :  { %v2664_v63 = vadd.f32 %v2662_v62, %v4719_v29 }
0x1619   :  { %2668 = vrot.lane.b32.xlu1 %v2664_v63, %s4295_s6 }
0x168b   :  { %v2669_v13 = vpop.permute.xlu1 %2668 }
0x168c   :  { %v2677_v16 = vsel %vm4550_vm4, %v2669_v13, 0.0  ;;  %v2671_v21 = vsel %vm57_vm13, %v2669_v13, 0.0  ;;  %v2683_v4 = vsel %vm4555_vm12, %v2669_v13, 0.0  ;;  %v2689_v29 = vsel %vm4559_vm6, %v2669_v13, 0.0 }
0x168d   :  { %v2678_v28 = vsel %vm399_vm2, %v2677_v16, 0.0  ;;  %v2672_v31 = vsel %vm399_vm2, %v2671_v21, 0.0  ;;  %v2684_v44 = vsel %vm399_vm2, %v2683_v4, 0.0  ;;  %v2690_v8 = vsel %vm399_vm2, %v2689_v29, 0.0 }
0x168e   :  { %2679 = vadd.xlane.f32.xlu0 %v2678_v28  ;;  %2673 = vadd.xlane.f32.xlu1 %v2672_v31  ;;  %v2695_v10 = vsel %vm4575_vm0, %v2669_v13, 0.0 }
0x168f   :  { %v2696_v11 = vsel %vm399_vm2, %v2695_v10, 0.0  ;;  %v4128_v10 = vld [vmem:[#allocation5 + $0x458] ss:$36 sps:$4 sm:$0xff]  }
0x1692   :  { %2685 = vadd.xlane.f32.xlu0 %v2684_v44  ;;  %2691 = vadd.xlane.f32.xlu1 %v2690_v8  ;;  %v4123_v44 = vld [vmem:[#allocation5 + $0x40c] ss:$36 sps:$4 sm:$0xff]  }
0x1693   :  { %v4125_v8 = vld [vmem:[#allocation5 + $0x410] ss:$36 sps:$4 sm:$0xff]  }
0x1694   :  { %2834 = vmatprep.subr.bf16.mxu1 %v4125_v8 }
0x1695   :  { %2835 = vmatpush1.bf16.msra.mxu1 %v4123_v44 }
0x1696   :  { %2697 = vadd.xlane.f32.xlu0 %v2696_v11  ;;  %v2774_v11 = vld [vmem:[#allocation5 + $0x4e4] sm:$0xff]  ;;  %2836 = vmatprep.subr.bf16.mxu1 %v4128_v10 }
0x171b   :  { %v2680_v12 = vpop.xlane.xlu0 %2679  ;;  %v2674_v14 = vpop.xlane.xlu1 %2673 }
0x171c   :  { %v2675_v18 = vmul.f32 0.09090909, %v2674_v14  ;;  %v2681_v15 = vmul.f32 0.09090909, %v2680_v12  ;;  %v4126_v12 = vld [vmem:[#allocation5 + $0x454] ss:$36 sps:$4 sm:$0xff]  }
0x171d   :  { %2837 = vmatpush1.bf16.msra.mxu1 %v4126_v12 }
0x171e   :  { %v2676_v47 = vsel %vm57_vm13, %v2675_v18, 0.0  ;;  %v4131_v18 = vld [vmem:[#allocation5 + $0x4a0] ss:$36 sps:$4 sm:$0xff]  }
0x171f   :  { %v2686_v19 = vpop.xlane.xlu0 %2685  ;;  %v2692_v52 = vpop.xlane.xlu1 %2691  ;;  %v2682_v51 = vsel %vm4550_vm4, %v2681_v15, %v2676_v47  ;;  %v3650_v15 = vcombine.high %v2774_v11, %v2774_v11  ;;  %v4129_v47 = vld [vmem:[#allocation5 + $0x49c] ss:$36 sps:$4 sm:$0xff]   ;;  %2838 = vmatprep.subr.bf16.mxu1 %v4131_v18 }
0x1720   :  { %v2687_v20 = vmul.f32 0.09090909, %v2686_v19  ;;  %v2693_v23 = vmul.f32 0.09090909, %v2692_v52  ;;  %v3649_v19 = vcombine.low %v2774_v11, %v2774_v11 }
0x1721   :  { %v2832_v52 = vand.u32 %v3650_v15, %v4355_v17  ;;  %2839 = vmatpush1.bf16.msra.mxu1 %v4129_v47 }
0x1722   :  { %v2688_v24 = vsel %vm4555_vm12, %v2687_v20, %v2682_v51  ;;  %v2829_v20 = vand.u32 %v3649_v19, %v4355_v17 }
0x1723   :  { %v2698_v1 = vpop.xlane.xlu0 %2697  ;;  %v2694_v26 = vsel %vm4559_vm6, %v2693_v23, %v2688_v24  ;;  %2840 = vmatprep.subr.bf16.mxu1 %v2832_v52  ;;  %v4134_v23 = vld [vmem:[#allocation5 + $0x404] ss:$36 sps:$4 sm:$0xff]   ;;  %v4135_v24 = vld [vmem:[#allocation5 + $0x44c] ss:$36 sps:$4 sm:$0xff]  }
0x1724   :  { %v2699_v25 = vmul.f32 0.09090909, %v2698_v1  ;;  %2969 = vmatpush1.bf16.msra.mxu0 %v4134_v23 }
0x1725   :  { %2841 = vmatpush1.bf16.msra.mxu1 %v2829_v20  ;;  %2970 = vmatprep.subr.bf16.mxu0 %v4294_v0 }
0x1726   :  { %v2700_v27 = vsel %vm4575_vm0, %v2699_v25, %v2694_v26  ;;  %3911 = vmatprep.subr.bf16.mxu1 %v4297_v53 }
0x1727   :  { %2702 = vrot.lane.b32.xlu1 %v2700_v27, %s4299_s1  ;;  %v4136_v27 = vld [vmem:[#allocation5 + $0x494] ss:$36 sps:$4 sm:$0xff]  }
0x1728   :  { %2971 = vmatpush1.bf16.msra.mxu0 %v4135_v24 }
0x1729   :  { %2972 = vmatprep.subr.bf16.mxu0 %v4294_v0 }
0x172c   :  { %2973 = vmatpush1.bf16.msra.mxu0 %v4136_v27 }
0x172d   :  { %2974 = vmatprep.subr.bf16.mxu0 %v4294_v0 }
0x1799   :  { %v2703_v35 = vpop.permute.xlu1 %2702 }
0x179a   :  { %v4878_v30 = vsub.f32 %v2664_v63, %v2703_v35 }
0x179c   :  { %v2706_v36 = vmul.f32 %v4878_v30, %v4878_v30 }
0x179e   :  { %2708 = vrot.lane.b32.xlu0 %v2706_v36, %s4295_s6 }
0x1810   :  { %v2709_v33 = vpop.permute.xlu0 %2708 }
0x1811   :  { %v2717_v34 = vsel %vm4550_vm4, %v2709_v33, 0.0  ;;  %v2711_v9 = vsel %vm57_vm13, %v2709_v33, 0.0  ;;  %v2729_v2 = vsel %vm4559_vm6, %v2709_v33, 0.0  ;;  %v2723_v38 = vsel %vm4555_vm12, %v2709_v33, 0.0 }
0x1812   :  { %v2718_v37 = vsel %vm399_vm2, %v2717_v34, 0.0  ;;  %v2712_v6 = vsel %vm399_vm2, %v2711_v9, 0.0  ;;  %v2730_v39 = vsel %vm399_vm2, %v2729_v2, 0.0  ;;  %v2724_v40 = vsel %vm399_vm2, %v2723_v38, 0.0  ;;  %v4138_v9 = vld [vmem:[#allocation5 + $0x524] ss:$36 sps:$4 sm:$0xff]  }
0x1813   :  { %2719 = vadd.xlane.f32.xlu0 %v2718_v37  ;;  %2713 = vadd.xlane.f32.xlu1 %v2712_v6  ;;  %v2735_v7 = vsel %vm4575_vm0, %v2709_v33, 0.0  ;;  %v4137_v33 = vld [vmem:[#allocation5 + $0x4dc] ss:$36 sps:$4 sm:$0xff]   ;;  %v4140_v37 = vld [vmem:[#allocation5 + $0x5b4] ss:$36 sps:$4 sm:$0xff]  }
0x1814   :  { %v2736_v41 = vsel %vm399_vm2, %v2735_v7, 0.0  ;;  %2975 = vmatpush1.bf16.msra.mxu0 %v4137_v33  ;;  %v4141_v6 = vld [vmem:[#allocation5 + $0x5fc] ss:$36 sps:$4 sm:$0xff]   ;;  %v4142_v38 = vld [vmem:[#allocation5 + $0x644] ss:$36 sps:$4 sm:$0xff]  }
0x1815   :  { %2976 = vmatprep.subr.bf16.mxu0 %v4294_v0 }
0x1817   :  { %2731 = vadd.xlane.f32.xlu0 %v2730_v39  ;;  %2725 = vadd.xlane.f32.xlu1 %v2724_v40  ;;  %v4143_v39 = vld [vmem:[#allocation5 + $0x68c] ss:$36 sps:$4 sm:$0xff]   ;;  %v2776_v40 = vld [vmem:[#allocation5 + $0x514] sm:$0x11] }
0x1818   :  { %2977 = vmatpush1.bf16.msra.mxu0 %v4138_v9  ;;  %v2777_v7 = vunpack.c.l.bf16 %v2776_v40 }
0x1819   :  { %2978 = vmatprep.subr.bf16.mxu0 %v4294_v0 }
0x181a   :  { %v2782_v42 = vrot.slane %v2777_v7, %v4398_v22 }
0x181b   :  { %2737 = vadd.xlane.f32.xlu1 %v2736_v41  ;;  %v2778_v41 = vunpack.c.h.bf16 %v2776_v40 }
0x181d   :  { %v2786_v43 = vrot.slane %v2778_v41, %v4398_v22 }
0x182c   :  { %2754 = vrot.lane.b32.xlu1 %v2752_v45, %s4299_s1 }
0x1830   :  { %2764 = vrot.lane.b32.xlu1 %v2762_v48, %s4299_s1 }
0x18a0   :  { %v2720_v49 = vpop.xlane.xlu0 %2719  ;;  %v2714_v50 = vpop.xlane.xlu1 %2713 }
0x18a1   :  { %v2715_v54 = vmul.f32 0.09090909, %v2714_v50  ;;  %v2721_v55 = vmul.f32 0.09090909, %v2720_v49 }
0x18a3   :  { %v2716_v58 = vsel %vm57_vm13, %v2715_v54, 0.0 }
0x18a4   :  { %v2732_v60 = vpop.xlane.xlu0 %2731  ;;  %v2726_v61 = vpop.xlane.xlu1 %2725  ;;  %v2722_v63 = vsel %vm4550_vm4, %v2721_v55, %v2716_v58 }
0x18a5   :  { %v2727_v62 = vmul.f32 0.09090909, %v2726_v61  ;;  %v2733_v13 = vmul.f32 0.09090909, %v2732_v60 }
0x18a7   :  { %v2728_v16 = vsel %vm4555_vm12, %v2727_v62, %v2722_v63 }
0x18a8   :  { %v2738_v21 = vpop.xlane.xlu1 %2737  ;;  %v2734_v31 = vsel %vm4559_vm6, %v2733_v13, %v2728_v16 }
0x18a9   :  { %v2739_v28 = vmul.f32 0.09090909, %v2738_v21 }
0x18ab   :  { %v2740_v4 = vsel %vm4575_vm0, %v2739_v28, %v2734_v31 }
0x18ac   :  { %v2741_v29 = vadd.f32 1e-05, %v2740_v4  ;;  %v2755_v51 = vpop.permute.xlu1 %2754 }
0x18ae   :  { %4165 = vrsqrt.f32 %v2741_v29 }
0x18b0   :  { %v2765_v26 = vpop.permute.xlu1 %2764 }
0x18b8   :  { %v4166_v14 = vpop.eup %4165 }
0x18b9   :  { %2744 = vrot.lane.b32.xlu0 %v4166_v14, %s4299_s1 }
0x192b   :  { %v2745_v1 = vpop.permute.xlu0 %2744 }
0x192c   :  { %v2747_v25 = vmul.f32 %v2745_v1, %v4878_v30  ;;  %v4139_v30 = vld [vmem:[#allocation5 + $0x56c] ss:$36 sps:$4 sm:$0xff]  }
0x192d   :  { %2979 = vmatpush1.bf16.msra.mxu0 %v4139_v30 }
0x192e   :  { %v2757_v35 = vmul.f32 %v2755_v51, %v2747_v25  ;;  %2980 = vmatprep.subr.bf16.mxu0 %v4294_v0 }
0x1930   :  { %v2767_v36 = vadd.f32 %v2765_v26, %v2757_v35 }
0x1931   :  { %2981 = vmatpush1.bf16.msra.mxu0 %v4140_v37 }
0x1932   :  { %v2775_v34 = vpack.c.bf16 %v2767_v36, %v2767_v36  ;;  %2982 = vmatprep.subr.bf16.mxu0 %v4294_v0 }
0x1934   :  { %2788 = vrot.lane.b32.xlu0 %v2775_v34, %s4295_s6 }
0x1935   :  { %2983 = vmatpush1.bf16.msra.mxu0 %v4141_v6 }
0x1936   :  { %2984 = vmatprep.subr.bf16.mxu0 %v4294_v0 }
0x1939   :  { %2985 = vmatpush1.bf16.msra.mxu0 %v4142_v38 }
0x193a   :  { %2986 = vmatprep.subr.bf16.mxu0 %v4294_v0  ;;  %v2899_v0 = vld [vmem:[#allocation5 + $0x444] sm:$0x1] }
0x193b   :  { %v2900_v61 = vunpack.c.l.bf16 %v2899_v0 }
0x193d   :  { %2987 = vmatpush1.bf16.msra.mxu0 %v4143_v39  ;;  %v2904_v62 = vrot.slane %v2900_v61, %v4398_v22 }
0x19a6   :  { %v2789_v2 = vpop.permute.xlu0 %2788 }
0x19a7   :  { %3651 = vmatmul.mubr.msk.bf16.vlgmr.msra.gmra.mrb[48].mxu1 %vm399_vm2, %v2789_v2 }
0x19a8   :  { %3919 = vmatprep.mubr.msk.bf16.mxu1 %vm4298_vm3, %v4297_v53 }
0x1a7a   :  { %v2868_v45 = vpop.f32.mrb[48].mxu1 }
0x1a7b   :  { %v2869_v46 = vadd.f32 %v2868_v45, %v2782_v42  ;;  %v2870_v32 = vpop.f32.mrb[49].mxu1 }
0x1a7c   :  { %v2871_v48 = vadd.f32 %v2870_v32, %v2786_v43  ;;  %v2872_v49 = vpop.f32.mrb[50].mxu1 }
0x1a7d   :  { %v2875_v50 = vmax.f32 %v2869_v46, 0.0  ;;  %v2873_v54 = vpop.f32.mrb[51].mxu1  ;;  %v3013_v49 = vld [vmem:[#allocation5 + $0x51c] sm:$0x1] }
0x1a7e   :  { %v2876_v55 = vmax.f32 %v2871_v48, 0.0 }
0x1a7f   :  { %v2897_v60 = vpack.c.bf16 %v2875_v50, %v2875_v50  ;;  %v3096_v50 = vunpack.c.l.bf16 %v3013_v49  ;;  %v3169_v49 = vld [vmem:[#allocation5 + $0x564] sm:$0x1] }
0x1a80   :  { %v2898_v58 = vpack.c.bf16 %v2876_v55, %v2876_v55  ;;  %v3014_v55 = vld [vmem:[#allocation5 + $0x52c] sm:$0x1] }
0x1a81   :  { %v3100_v54 = vrot.slane %v3096_v50, %v4398_v22  ;;  %v3170_v50 = vunpack.c.l.bf16 %v3169_v49 }
0x1a82   :  { %3662 = vmatprep.mubr.msk.bf16.mxu0 %vm5089_vm5, %v2898_v58  ;;  %v3106_v58 = vunpack.c.l.bf16 %v3014_v55 }
0x1a83   :  { %3001 = vmatmul.mubr.bf16.vlgmr.msra.gmra.mrb[56].mxu0 %v2897_v60 }
0x1a84   :  { %v3110_v60 = vrot.slane %v3106_v58, %v4398_v22 }
0x1b56   :  { %v3002_v63 = vpop.f32.mrb[56].mxu0 }
0x1b57   :  { %v3003_v13 = vadd.f32 %v3002_v63, %v2904_v62  ;;  %v3004_v16 = vpop.f32.mrb[57].mxu0 }
0x1b58   :  { %v3005_v21 = vpop.f32.mrb[58].mxu0 }
0x1b59   :  { %v3006_v28 = vpop.f32.mrb[59].mxu0  ;;  %3009 = vrot.lane.b32.xlu1 %v3003_v13, %s4299_s1 }
0x1bcb   :  { %v3010_v31 = vpop.permute.xlu1 %3009 }
0x1bcc   :  { %v3012_v4 = vadd.f32 %v3010_v31, %v2767_v36 }
0x1bce   :  { %3016 = vrot.lane.b32.xlu0 %v3012_v4, %s4295_s6 }
0x1c40   :  { %v3017_v29 = vpop.permute.xlu0 %3016 }
0x1c41   :  { %v3025_v44 = vsel %vm4550_vm4, %v3017_v29, 0.0  ;;  %v3019_v8 = vsel %vm57_vm13, %v3017_v29, 0.0  ;;  %v3031_v12 = vsel %vm4555_vm12, %v3017_v29, 0.0  ;;  %v3037_v14 = vsel %vm4559_vm6, %v3017_v29, 0.0 }
0x1c42   :  { %v3026_v10 = vsel %vm399_vm2, %v3025_v44, 0.0  ;;  %v3020_v11 = vsel %vm399_vm2, %v3019_v8, 0.0  ;;  %v3032_v18 = vsel %vm399_vm2, %v3031_v12, 0.0  ;;  %v3038_v15 = vsel %vm399_vm2, %v3037_v14, 0.0 }
0x1c43   :  { %3027 = vadd.xlane.f32.xlu0 %v3026_v10  ;;  %3021 = vadd.xlane.f32.xlu1 %v3020_v11  ;;  %v3043_v47 = vsel %vm4575_vm0, %v3017_v29, 0.0 }
0x1c44   :  { %v3044_v19 = vsel %vm399_vm2, %v3043_v47, 0.0 }
0x1c47   :  { %3033 = vadd.xlane.f32.xlu0 %v3032_v18  ;;  %3039 = vadd.xlane.f32.xlu1 %v3038_v15 }
0x1c4b   :  { %3045 = vadd.xlane.f32.xlu0 %v3044_v19  ;;  %v4993_v19 = vld [vmem:[#allocation2] sm:$0xff] }
0x1cd0   :  { %v3028_v52 = vpop.xlane.xlu0 %3027  ;;  %v3022_v20 = vpop.xlane.xlu1 %3021 }
0x1cd1   :  { %v3023_v51 = vmul.f32 0.09090909, %v3022_v20  ;;  %v3029_v23 = vmul.f32 0.09090909, %v3028_v52  ;;  %v3117_v20 = vld [vmem:[#allocation5 + $0x530] sm:$0x1] }
0x1cd3   :  { %v3024_v24 = vsel %vm57_vm13, %v3023_v51, 0.0  ;;  %v3141_v51 = vunpack.c.l.bf16 %v3117_v20 }
0x1cd4   :  { %v3034_v1 = vpop.xlane.xlu0 %3033  ;;  %v3040_v25 = vpop.xlane.xlu1 %3039  ;;  %v3030_v27 = vsel %vm4550_vm4, %v3029_v23, %v3024_v24 }
0x1cd5   :  { %v3035_v26 = vmul.f32 0.09090909, %v3034_v1  ;;  %v3041_v35 = vmul.f32 0.09090909, %v3040_v25  ;;  %v3145_v23 = vrot.slane %v3141_v51, %v4398_v22 }
0x1cd7   :  { %v3036_v36 = vsel %vm4555_vm12, %v3035_v26, %v3030_v27 }
0x1cd8   :  { %v3046_v33 = vpop.xlane.xlu0 %3045  ;;  %v3042_v9 = vsel %vm4559_vm6, %v3041_v35, %v3036_v36  ;;  %v3118_v36 = vld [vmem:[#allocation5 + $0x55c] sm:$0x1] }
0x1cd9   :  { %v3047_v34 = vmul.f32 0.09090909, %v3046_v33  ;;  %v3151_v33 = vunpack.c.l.bf16 %v3118_v36 }
0x1cdb   :  { %v3048_v30 = vsel %vm4575_vm0, %v3047_v34, %v3042_v9  ;;  %v3155_v34 = vrot.slane %v3151_v33, %v4398_v22  ;;  %v4144_v9 = vld [vmem:[#allocation5 + $0x560] ss:$36 sps:$4 sm:$0xff]  }
0x1cdc   :  { %3050 = vrot.lane.b32.xlu1 %v3048_v30, %s4299_s1  ;;  %3912 = vmatpush3.bf16.msra.mxu1 %v4144_v9  ;;  %v4145_v30 = vld [vmem:[#allocation5 + $0x5a8] ss:$36 sps:$4 sm:$0xff]  }
0x1cdd   :  { %3913 = vmatprep.subr.bf16.mxu1 %v4297_v53 }
0x1ce0   :  { %3914 = vmatpush3.bf16.msra.mxu1 %v4145_v30 }
0x1ce1   :  { %3915 = vmatprep.subr.bf16.mxu1 %v4297_v53 }
0x1d4e   :  { %v3051_v37 = vpop.permute.xlu1 %3050 }
0x1d4f   :  { %v3053_v6 = vsub.f32 %v3012_v4, %v3051_v37  ;;  %v4146_v37 = vld [vmem:[#allocation5 + $0x5f0] ss:$36 sps:$4 sm:$0xff]  }
0x1d50   :  { %3916 = vmatpush3.bf16.msra.mxu1 %v4146_v37 }
0x1d51   :  { %v3054_v2 = vmul.f32 %v3053_v6, %v3053_v6  ;;  %3917 = vmatprep.subr.bf16.mxu1 %v4297_v53 }
0x1d53   :  { %3056 = vrot.lane.b32.xlu0 %v3054_v2, %s4295_s6 }
0x1dc5   :  { %v3057_v38 = vpop.permute.xlu0 %3056 }
0x1dc6   :  { %v3065_v39 = vsel %vm4550_vm4, %v3057_v38, 0.0  ;;  %v3059_v40 = vsel %vm57_vm13, %v3057_v38, 0.0  ;;  %v3077_v42 = vsel %vm4559_vm6, %v3057_v38, 0.0  ;;  %v3071_v43 = vsel %vm4555_vm12, %v3057_v38, 0.0 }
0x1dc7   :  { %v3066_v7 = vsel %vm399_vm2, %v3065_v39, 0.0  ;;  %v3060_v41 = vsel %vm399_vm2, %v3059_v40, 0.0  ;;  %v3078_v45 = vsel %vm399_vm2, %v3077_v42, 0.0  ;;  %v3072_v46 = vsel %vm399_vm2, %v3071_v43, 0.0 }
0x1dc8   :  { %3067 = vadd.xlane.f32.xlu0 %v3066_v7  ;;  %3061 = vadd.xlane.f32.xlu1 %v3060_v41  ;;  %v3083_v32 = vsel %vm4575_vm0, %v3057_v38, 0.0 }
0x1dc9   :  { %v3084_v48 = vsel %vm399_vm2, %v3083_v32, 0.0 }
0x1dcc   :  { %3079 = vadd.xlane.f32.xlu0 %v3078_v45  ;;  %3073 = vadd.xlane.f32.xlu1 %v3072_v46 }
0x1dd0   :  { %3085 = vadd.xlane.f32.xlu1 %v3084_v48 }
0x1de1   :  { %3102 = vrot.lane.b32.xlu1 %v3100_v54, %s4299_s1  ;;  %v3174_v54 = vrot.slane %v3170_v50, %v4398_v22 }
0x1de5   :  { %3112 = vrot.lane.b32.xlu1 %v3110_v60, %s4299_s1 }
0x1e55   :  { %v3068_v0 = vpop.xlane.xlu0 %3067  ;;  %v3062_v61 = vpop.xlane.xlu1 %3061 }
0x1e56   :  { %v3063_v62 = vmul.f32 0.09090909, %v3062_v61  ;;  %v3069_v63 = vmul.f32 0.09090909, %v3068_v0 }
0x1e58   :  { %v3064_v13 = vsel %vm57_vm13, %v3063_v62, 0.0 }
0x1e59   :  { %v3080_v16 = vpop.xlane.xlu0 %3079  ;;  %v3074_v21 = vpop.xlane.xlu1 %3073  ;;  %v3070_v31 = vsel %vm4550_vm4, %v3069_v63, %v3064_v13  ;;  %vm3255_vm4 = vcmask 162816  }
0x1e5a   :  { %v3075_v28 = vmul.f32 0.09090909, %v3074_v21  ;;  %v3081_v4 = vmul.f32 0.09090909, %v3080_v16 }
0x1e5c   :  { %v3076_v29 = vsel %vm4555_vm12, %v3075_v28, %v3070_v31  ;;  %vm3368_vm12 = vcmask 97280  }
0x1e5d   :  { %v3086_v44 = vpop.xlane.xlu1 %3085  ;;  %v3082_v10 = vsel %vm4559_vm6, %v3081_v4, %v3076_v29  ;;  %vm3259_vm6 = vcmask 318464  }
0x1e5e   :  { %v3087_v8 = vmul.f32 0.09090909, %v3086_v44 }
0x1e60   :  { %v3088_v11 = vsel %vm4575_vm0, %v3087_v8, %v3082_v10 }
0x1e61   :  { %v3089_v5 = vadd.f32 1e-05, %v3088_v11  ;;  %v3103_v14 = vpop.permute.xlu1 %3102 }
0x1e63   :  { %4167 = vrsqrt.f32 %v3089_v5  ;;  %v4148_v5 = vld [vmem:[#allocation5 + $0x5a4] ss:$36 sps:$4 sm:$0xff]  }
0x1e65   :  { %v3113_v15 = vpop.permute.xlu1 %3112 }
0x1e6d   :  { %v4168_v12 = vpop.eup %4167 }
0x1e6e   :  { %3092 = vrot.lane.b32.xlu0 %v4168_v12, %s4299_s1  ;;  %v4149_v12 = vld [vmem:[#allocation5 + $0x5ec] ss:$36 sps:$4 sm:$0xff]  }
0x1ee0   :  { %v3093_v56 = vpop.permute.xlu0 %3092 }
0x1ee1   :  { %v3095_v18 = vmul.f32 %v3093_v56, %v3053_v6  ;;  %v4147_v6 = vld [vmem:[#allocation5 + $0x638] ss:$0 sps:$4 sm:$0xff]  }
0x1ee2   :  { %v3203_v2 = vand.u32 %v4147_v6, %v4355_v17 }
0x1ee3   :  { %v3105_v47 = vmul.f32 %v3103_v14, %v3095_v18  ;;  %v4150_v14 = vld [vmem:[#allocation5 + $0x634] ss:$0 sps:$4 sm:$0xff]  }
0x1ee4   :  { %3918 = vmatpush3.bf16.msra.mxu1 %v3203_v2  ;;  %v3317_v56 = vand.u32 %v4150_v14, %v4355_v17 }
0x1ee5   :  { %v3115_v57 = vadd.f32 %v3113_v15, %v3105_v47  ;;  %3923 = vmatprep.subr.bf16.mxu1 %v4297_v53 }
0x1ee7   :  { %v3116_v52 = vadd.f32 %v4993_v19, %v3115_v57  ;;  %v3257_v57 = vld [vmem:[#allocation5 + $0x574] sm:$0x1] }
0x1ee9   :  { %3120 = vrot.lane.b32.xlu0 %v3116_v52, %s4295_s6 }
0x1f5b   :  { %v3121_v59 = vpop.permute.xlu0 %3120 }
0x1f5c   :  { %v3123_v3 = vsel %vm399_vm2, %v3121_v59, 0.0  ;;  %v3274_v59 = vunpack.c.l.bf16 %v3257_v57 }
0x1f5d   :  { %3124 = vadd.xlane.f32.xlu1 %v3123_v3 }
0x1f5e   :  { %v3278_v20 = vrot.slane %v3274_v59, %v4398_v22 }
0x1f6e   :  { %3147 = vrot.lane.b32.xlu1 %v3145_v23, %s4299_s1 }
0x1fea   :  { %v3125_v24 = vpop.xlane.xlu1 %3124 }
0x1feb   :  { %v3127_v1 = vmul.f32 0.018181818, %v3125_v24 }
0x1fed   :  { %v3128_v25 = vsub.f32 %v3116_v52, %v3127_v1  ;;  %v3258_v52 = vld [vmem:[#allocation5 + $0x578] sm:$0x1] }
0x1fee   :  { %v3148_v41 = vpop.permute.xlu1 %3147  ;;  %v3280_v3 = vunpack.c.l.bf16 %v3258_v52 }
0x1fef   :  { %v3129_v26 = vmul.f32 %v3128_v25, %v3128_v25 }
0x1ff0   :  { %v3284_v23 = vrot.slane %v3280_v3, %v4398_v22 }
0x1ff1   :  { %3131 = vrot.lane.b32.xlu0 %v3129_v26, %s4295_s6 }
0x2063   :  { %v3132_v27 = vpop.permute.xlu0 %3131 }
0x2064   :  { %v3134_v35 = vsel %vm399_vm2, %v3132_v27, 0.0 }
0x2065   :  { %3135 = vadd.xlane.f32.xlu0 %v3134_v35 }
0x207b   :  { %3157 = vrot.lane.b32.xlu0 %v3155_v34, %s4299_s1 }
0x20f2   :  { %v3136_v38 = vpop.xlane.xlu0 %3135 }
0x20f3   :  { %v3137_v39 = vmul.f32 0.018181818, %v3136_v38 }
0x20f5   :  { %v3138_v40 = vadd.f32 1e-05, %v3137_v39 }
0x20f6   :  { %v3158_v43 = vpop.permute.xlu0 %3157 }
0x20f7   :  { %4169 = vrsqrt.f32 %v3138_v40 }
0x2101   :  { %v4170_v7 = vpop.eup %4169 }
0x2102   :  { %v3140_v42 = vmul.f32 %v4170_v7, %v3128_v25 }
0x2104   :  { %v3150_v45 = vmul.f32 %v3148_v41, %v3140_v42 }
0x2106   :  { %v3160_v46 = vadd.f32 %v3158_v43, %v3150_v45 }
0x2108   :  { %v3168_v32 = vpack.c.bf16 %v3160_v46, %v3160_v46 }
0x210a   :  { %3176 = vrot.lane.b32.xlu1 %v3168_v32, %s4295_s6  ;;  %v4151_v32 = vld [vmem:[#allocation5 + $0x5f4] ss:$36 sps:$4 sm:$0xff]  }
0x210e   :  { %3252 = vrot.lane.b32.xlu1 %v4993_v19, %s4300_s7 }
0x217c   :  { %v3177_v48 = vpop.permute.xlu1 %3176 }
0x217d   :  { %3920 = vmatmul.mubr.msk.bf16.vlgmr.msra.gmra.mrb[52].mxu1 %vm399_vm2, %v3177_v48  ;;  %v4152_v48 = vld [vmem:[#allocation5 + $0x63c] ss:$0 sps:$4 sm:$0x11]  }
0x217e   :  { %3929 = vmatprep.mubr.msk.bf16.mxu1 %vm4298_vm3, %v4297_v53  ;;  %3924 = vmatpush3.bf16.msra.mxu1 %v4148_v5 }
0x217f   :  { %3925 = vmatprep.subr.bf16.mxu1 %v4297_v53 }
0x2180   :  { %v3253_v16 = vpop.permute.xlu1 %3252 }
0x2182   :  { %3926 = vmatpush3.bf16.msra.mxu1 %v4149_v12 }
0x2183   :  { %3927 = vmatprep.subr.bf16.mxu1 %v4297_v53 }
0x2186   :  { %3928 = vmatpush3.bf16.msra.mxu1 %v3317_v56 }
0x2187   :  { %3933 = vmatprep.subr.bf16.mxu1 %v4297_v53 }
0x2250   :  { %v3239_v55 = vpop.f32.mrb[52].mxu1 }
0x2251   :  { %v3240_v58 = vadd.f32 %v3239_v55, %v3174_v54  ;;  %v3921_v60 = vpop.f32.mrb[53].mxu1 }
0x2252   :  { %v3242_v0 = vpop.f32.mrb[54].mxu1  ;;  %v3371_v60 = vld [vmem:[#allocation5 + $0x5c0] sm:$0x1] }
0x2253   :  { %v3246_v61 = vmin.f32 %v3240_v58, 0.0  ;;  %v3922_v62 = vpop.f32.mrb[55].mxu1  ;;  %vm3245_vm2 = vcmp.gt.f32.partialorder %v3240_v58, 0.0 }
0x2255   :  { %v3247_v63 = vmul.f32 1.442695, %v3246_v61  ;;  %v3393_v61 = vunpack.c.l.bf16 %v3371_v60 }
0x2257   :  { %4171 = vpow2.f32 %v3247_v63 }
0x2261   :  { %v4172_v13 = vpop.eup %4171 }
0x2262   :  { %v3668_v21 = vadd.f32 -1.0, %v4172_v13 }
0x2264   :  { %v3250_v28 = vsel %vm3245_vm2, %v3240_v58, %v3668_v21  ;;  %v3370_v58 = vld [vmem:[#allocation5 + $0x5bc] sm:$0x1] }
0x2265   :  { %v3256_v31 = vsel %vm3255_vm4, %v3250_v28, %v3253_v16  ;;  %v3387_v0 = vunpack.c.l.bf16 %v3370_v58  ;;  %v3397_v16 = vrot.slane %v3393_v61, %v4398_v22 }
0x2266   :  { %v3260_v4 = vsel %vm3259_vm6, %v3256_v31, 0.0 }
0x2267   :  { %3261 = vadd.xlane.f32.xlu0 %v3260_v4  ;;  %v3391_v62 = vrot.slane %v3387_v0, %v4398_v22 }
0x227d   :  { %3365 = vrot.lane.b32.xlu0 %v4993_v19, %s4301_s8  ;;  %v3292_v19 = vld [vmem:[#allocation5 + $0x5ac] sm:$0x1] }
0x227e   :  { %v3293_v26 = vunpack.c.l.bf16 %v3292_v19 }
0x2280   :  { %v3297_v27 = vrot.slane %v3293_v26, %v4398_v22 }
0x22f4   :  { %v3262_v29 = vpop.xlane.xlu0 %3261 }
0x22f5   :  { %v3264_v44 = vmul.f32 0.025641026, %v3262_v29 }
0x22f7   :  { %v3265_v8 = vsub.f32 %v3256_v31, %v3264_v44  ;;  %v3403_v31 = vld [vmem:[#allocation5 + $0x600] sm:$0x1] }
0x22f8   :  { %v3366_v38 = vpop.permute.xlu0 %3365  ;;  %v3404_v4 = vunpack.c.l.bf16 %v3403_v31 }
0x22f9   :  { %v3266_v10 = vmul.f32 %v3265_v8, %v3265_v8 }
0x22fa   :  { %v3408_v29 = vrot.slane %v3404_v4, %v4398_v22 }
0x22fb   :  { %v3267_v11 = vsel %vm3259_vm6, %v3266_v10, 0.0 }
0x22fc   :  { %3268 = vadd.xlane.f32.xlu1 %v3267_v11 }
0x2389   :  { %v3269_v18 = vpop.xlane.xlu1 %3268 }
0x238a   :  { %v3270_v15 = vmul.f32 0.025641026, %v3269_v18 }
0x238c   :  { %v3271_v47 = vadd.f32 1e-05, %v3270_v15 }
0x238e   :  { %4173 = vrsqrt.f32 %v3271_v47 }
0x2398   :  { %v4174_v51 = vpop.eup %4173 }
0x2399   :  { %v3273_v17 = vmul.f32 %v4174_v51, %v3265_v8 }
0x239b   :  { %v3279_v24 = vmul.f32 %v3278_v20, %v3273_v17 }
0x239d   :  { %v3285_v1 = vadd.f32 %v3284_v23, %v3279_v24 }
0x239f   :  { %v3291_v25 = vpack.c.bf16 %v3285_v1, %v3285_v1 }
0x23a1   :  { %3930 = vmatmul.mubr.msk.bf16.vlgmr.msra.gmra.mrb[56].mxu1 %vm3259_vm6, %v3291_v25 }
0x23a2   :  { %3937 = vmatprep.mubr.msk.bf16.mxu1 %vm4298_vm3, %v4297_v53  ;;  %3934 = vmatpush3.bf16.msra.mxu1 %v4151_v32  ;;  %vm5090_vm3 = vcmask 1040384  }
0x23a3   :  { %3935 = vmatprep.subr.bf16.mxu1 %v4297_v53  ;;  %v3422_v49 = vsel %vm5090_vm3, %v4152_v48, 0 }
0x23a6   :  { %3936 = vmatpush3.bf16.msra.mxu1 %v3422_v49 }
0x2474   :  { %v3353_v35 = vpop.f32.mrb[56].mxu1 }
0x2475   :  { %v3354_v36 = vadd.f32 %v3353_v35, %v3297_v27  ;;  %v3931_v33 = vpop.f32.mrb[57].mxu1 }
0x2476   :  { %v3356_v34 = vpop.f32.mrb[58].mxu1 }
0x2477   :  { %v3360_v9 = vmin.f32 %v3354_v36, 0.0  ;;  %v3932_v30 = vpop.f32.mrb[59].mxu1  ;;  %vm3359_vm13 = vcmp.gt.f32.partialorder %v3354_v36, 0.0 }
0x2479   :  { %v3361_v37 = vmul.f32 1.442695, %v3360_v9 }
0x247b   :  { %4175 = vpow2.f32 %v3361_v37 }
0x2485   :  { %v4176_v6 = vpop.eup %4175 }
0x2486   :  { %v3673_v2 = vadd.f32 -1.0, %v4176_v6 }
0x2488   :  { %v3364_v39 = vsel %vm3359_vm13, %v3354_v36, %v3673_v2 }
0x2489   :  { %v3369_v40 = vsel %vm3368_vm12, %v3364_v39, %v3366_v38 }
0x248a   :  { %v3373_v7 = vsel %vm3372_vm9, %v3369_v40, 0.0 }
0x248b   :  { %3374 = vadd.xlane.f32.xlu1 %v3373_v7 }
0x2518   :  { %v3375_v41 = vpop.xlane.xlu1 %3374 }
0x2519   :  { %v3377_v42 = vmul.f32 0.055555556, %v3375_v41 }
0x251b   :  { %v3378_v43 = vsub.f32 %v3369_v40, %v3377_v42 }
0x251d   :  { %v3379_v45 = vmul.f32 %v3378_v43, %v3378_v43 }
0x251f   :  { %v3380_v46 = vsel %vm3372_vm9, %v3379_v45, 0.0 }
0x2520   :  { %3381 = vadd.xlane.f32.xlu1 %v3380_v46 }
0x25ad   :  { %v3382_v50 = vpop.xlane.xlu1 %3381 }
0x25ae   :  { %v3383_v54 = vmul.f32 0.055555556, %v3382_v50 }
0x25b0   :  { %v3384_v55 = vadd.f32 1e-05, %v3383_v54 }
0x25b2   :  { %4177 = vrsqrt.f32 %v3384_v55 }
0x25bc   :  { %v4178_v63 = vpop.eup %4177 }
0x25bd   :  { %v3386_v13 = vmul.f32 %v4178_v63, %v3378_v43 }
0x25bf   :  { %v3392_v21 = vmul.f32 %v3391_v62, %v3386_v13 }
0x25c1   :  { %v3398_v28 = vadd.f32 %v3397_v16, %v3392_v21 }
0x25c3   :  { %v3402_v53 = vpack.c.bf16 %v3398_v28, %v3398_v28 }
0x25c5   :  { %3938 = vmatmul.mubr.msk.bf16.vlgmr.msra.gmra.mrb[60].mxu1 %vm3372_vm9, %v3402_v53 }
0x2698   :  { %v3458_v44 = vpop.f32.mrb[60].mxu1 }
0x2699   :  { %v3459_v8 = vadd.f32 %v3458_v44, %v3408_v29  ;;  %v3939_v10 = vpop.f32.mrb[61].mxu1 }
0x269a   :  { %v3461_v11 = vpop.f32.mrb[62].mxu1 }
0x269b   :  { %3464 = vst [vmem:[#allocation7] sm:$0xff] %v3459_v8  ;;  %v3940_v5 = vpop.f32.mrb[63].mxu1 }
0x269c   :  { %4273 = shalt.err (!%p4270_p6)
}
0x269d   :  { %s4274_s14 = scalar_lea.hbm %s5050_s2, 128 }
0x269e   :  { %p4275_p7 = scmp.ne.s32.totalorder %s5050_s2, %s4274_s14  ;;  %p4278_p8 = scmp.lt.u32.totalorder %s4274_s14, %s5050_s2 }
0x26a0   :  { %p4280_p9 = pnand %p4278_p8, %p4275_p7 }
0x26a2   :  { %4283 = shalt.err (!%p4280_p9)
}
0x26a3   :  { %3474 = dma.vmem_to_hbm [thread:$0]  %s3472_s10, 128, %s5050_s2, [#allocation4]  }
0x26a4   :  { %4288 = dma.done.wait [#allocation4], 128  }
0x26a5   :  { %4289 = vsyncadd [#allocation4], 4294967168 }
0x26a6   :  { %3478 = vsyncpa [#allocation3], 1 }
0x26a7   :  { %3479 = vsyncpa [#allocation6], 1 }
0x26a8   :  { %3480 = vsyncpa [#allocation4], 1 }

</bundles_post_ra>
